<compile_context>
chip_gen: v7x
topology: tpu7x:2x2x1
jax: 0.10.0
libtpu: 0.0.40
codegen_flags: <defaults>
</compile_context>

<pallas_src>
import jax
import jax.numpy as jnp
from jax import lax
from jax.experimental import pallas as pl
from jax.experimental.pallas import tpu as pltpu

# ---- small, self-consistent config (scaled-down version of the torch module) ----
IMG_SIZE = (16, 16)          # torch used (320, 320); scaled down
NUM_CHANNELS = 3
NUM_INPUT_FRAMES = 4
NUM_OUTPUT_FRAMES = 1
CNN_CHANNELS = (32, 64, 128)
LSTM_HIDDEN = 256


# --------------------------------------------------------------------------------
# Fused Conv3x3(pad=1) + ReLU + MaxPool2d(2): one MXU matmul per batch element.
# --------------------------------------------------------------------------------
def _conv3x3_relu_pool_kernel(p_ref, w_ref, b_ref, out_ref):
    # p_ref  : (1, 2*H*Wo, 9*Cin) bf16 im2col patches; rows are (col_parity, row, col),
    #          parity slowest (even output columns first, odd second).
    # w_ref  : (9*Cin, Cout) bf16 -- conv weight flattened in (dy, dx, Cin) order.
    # b_ref  : (1, Wo*Cout) f32   -- bias pre-tiled over the pooled width.
    # out_ref: (1, Ho, Wo*Cout) bf16 -- pooled activations, lane-dense minor dim.
    Ho = out_ref.shape[1]
    WC = out_ref.shape[2]                       # Wo * Cout (multiple of 128 here)
    Cout = w_ref.shape[1]
    Wo = WC // Cout
    Mh = p_ref.shape[1] // 2                    # H * Wo conv positions per parity

    # Single MXU push: M = 2*H*Wo (both parities), K = 9*Cin, N = Cout; f32 accumulate.
    z = jnp.dot(p_ref[0], w_ref[...], preferred_element_type=jnp.float32)
    # 2x2 max-pool, step 1: max over the output-column parity (same (row, col) index
    # in the two M-halves).
    m = jnp.maximum(z[:Mh, :], z[Mh:, :])                       # (H*Wo, Cout)
    # 2x2 max-pool, step 2: max over the two conv rows of each pooled row. The reshape
    # only regroups sublanes (Cout stays minor), so no lane shuffle yet.
    m4 = m.reshape(Ho, 2, Wo, Cout)
    m = jnp.maximum(m4[:, 0], m4[:, 1])                         # (Ho, Wo, Cout)
    # Repack once to the lane-dense store layout, add shared bias, ReLU, bulk store.
    m = m.reshape(Ho, WC)
    out_ref[0] = jnp.maximum(m + b_ref[...], 0.0).astype(out_ref.dtype)


def conv3x3_relu_maxpool2(x, w, bias):
    """x: (B, H, W, Cin) NHWC; w: (3,3,Cin,Cout) HWIO f32; bias: (Cout,) f32.
    Returns (B, H//2, W//2, Cout) bf16."""
    B, H, W, Cin = x.shape
    Cout = w.shape[-1]
    Ho, Wo = H // 2, W // 2
    K = 9 * Cin

    # glue (plain JAX): full im2col with dy AND dx taps pre-concatenated along K,
    # split by output-column parity so the 2x2 pool becomes two cheap maxes in-kernel.
    # ~9x input duplication is negligible at 16x16.
    # TODO(synk): at 320x320 (esp. v5e HBM roofline / v7x 64 MiB VMEM) keep only the dx
    # taps pre-concatenated, row-block the patch BlockSpec (halo of 2 rows), and raise R.
    xp = jnp.pad(x.astype(jnp.bfloat16), ((0, 0), (1, 1), (1, 1), (0, 0)))
    # column views: cols[q][b, r, c, :] == xp[b, r, 2*c + q, :]
    cols = [xp[:, :, q::2, :][:, :, :Wo, :] for q in range(4)]

    def patches(parity):
        taps = [cols[parity + dx][:, dy:dy + H, :, :]
                for dy in range(3) for dx in range(3)]
        return jnp.concatenate(taps, axis=-1)                   # (B, H, Wo, 9*Cin)

    pat = jnp.stack([patches(0), patches(1)], axis=1)           # (B, 2, H, Wo, 9*Cin)
    pat = pat.reshape(B, 2 * H * Wo, K)
    wf = w.reshape(K, Cout).astype(jnp.bfloat16)                # (dy, dx, Cin) -> K
    bl = jnp.broadcast_to(bias.astype(jnp.float32).reshape(1, Cout),
                          (Wo, Cout)).reshape(1, Wo * Cout)

    out = pl.pallas_call(
        _conv3x3_relu_pool_kernel,
        out_shape=jax.ShapeDtypeStruct((B, Ho, Wo * Cout), jnp.bfloat16),
        grid_spec=pltpu.PrefetchScalarGridSpec(
            num_scalar_prefetch=0,
            grid=(B,),
            in_specs=[
                pl.BlockSpec((1, 2 * H * Wo, K), lambda b: (b, 0, 0)),
                pl.BlockSpec((K, Cout), lambda b: (0, 0)),
                pl.BlockSpec((1, Wo * Cout), lambda b: (0, 0)),
            ],
            out_specs=pl.BlockSpec((1, Ho, Wo * Cout), lambda b: (b, 0, 0)),
        ),
        compiler_params=pltpu.CompilerParams(
            dimension_semantics=("parallel",),
            vmem_limit_bytes=48 * 1024 * 1024),
    )(pat, wf, bl)
    return out.reshape(B, Ho, Wo, Cout)


# --------------------------------------------------------------------------------
# Fused: LSTM layer-0 input projection + 2-layer LSTM recurrence + final Linear.
# Everything stays VMEM-resident (weights ~2 MB bf16 at this scale): one launch,
# no HBM round-trips for z0 / h_last.
# --------------------------------------------------------------------------------
def _lstm2_fc_kernel(x_ref, wi0_ref, wh0_ref, wi1_ref, wh1_ref,
                     b0_ref, b1_ref, fcw_ref, fcb_ref, y_ref):
    # x_ref: (T, B, In) bf16 time-major; wi0: (In,4H); wh0/wi1/wh1: (H,4H) bf16;
    # b0/b1: (1,4H) f32 (== torch b_ih + b_hh); fcw: (H, Nout) bf16; fcb: (1, Nout) f32;
    # y_ref: (B, Nout) f32.
    T = x_ref.shape[0]
    B = x_ref.shape[1]
    Hd = wh0_ref.shape[0]

    def sigmoid(v):                       # stable, EUP tanh based: 0.5*(tanh(v/2)+1)
        return 0.5 * jnp.tanh(0.5 * v) + 0.5

    def cell(z, c):                       # z: (B, 4H); torch gate order i, f, g, o
        i = sigmoid(z[:, 0 * Hd:1 * Hd])
        f = sigmoid(z[:, 1 * Hd:2 * Hd])
        g = jnp.tanh(z[:, 2 * Hd:3 * Hd])
        o = sigmoid(z[:, 3 * Hd:4 * Hd])
        c_new = f * c + i * g
        return o * jnp.tanh(c_new), c_new

    b0 = b0_ref[...]
    b1 = b1_ref[...]
    zeros = jnp.zeros((B, Hd), jnp.float32)

    def step(t, carry):
        h0, c0, h1, c1 = carry
        x_t = x_ref[t]                                           # (B, In) bf16
        z0 = (jnp.dot(x_t, wi0_ref[...], preferred_element_type=jnp.float32)
              + jnp.dot(h0.astype(jnp.bfloat16), wh0_ref[...],
                        preferred_element_type=jnp.float32) + b0)
        h0, c0 = cell(z0, c0)
        # Layer 1: two dots instead of concat([h0, h1]) -> no per-step lane shuffle.
        z1 = (jnp.dot(h0.astype(jnp.bfloat16), wi1_ref[...],
                      preferred_element_type=jnp.float32)
              + jnp.dot(h1.astype(jnp.bfloat16), wh1_ref[...],
                        preferred_element_type=jnp.float32) + b1)
        h1, c1 = cell(z1, c1)
        return h0, c0, h1, c1

    _, _, h1, _ = lax.fori_loop(0, T, step, (zeros, zeros, zeros, zeros), unroll=True)
    # Fused FC epilogue: h1 (= h_n[-1]) is already VMEM-resident.
    y_ref[...] = (jnp.dot(h1.astype(jnp.bfloat16), fcw_ref[...],
                          preferred_element_type=jnp.float32) + fcb_ref[...])


def lstm2_fc(x_seq, wi0, wh0, wi1, wh1, b0, b1, fc_w, fc_b):
    """x_seq: (T, B, In); returns fc(h_n[-1]) as (B, Nout) f32."""
    # TODO(synk): at the real 51200-wide LSTM input, hoist x@Wi0 back out into a
    # K-tiled matmul (Wi0 no longer fits VMEM) and N-tile the FC so v7x's second
    # TensorCore is used for the non-recurrent matmuls.
    T, B, _ = x_seq.shape
    Nout = fc_w.shape[1]
    args = (x_seq.astype(jnp.bfloat16),
            wi0.astype(jnp.bfloat16), wh0.astype(jnp.bfloat16),
            wi1.astype(jnp.bfloat16), wh1.astype(jnp.bfloat16),
            b0.astype(jnp.float32), b1.astype(jnp.float32),
            fc_w.astype(jnp.bfloat16), fc_b.astype(jnp.float32))
    return pl.pallas_call(
        _lstm2_fc_kernel,
        out_shape=jax.ShapeDtypeStruct((B, Nout), jnp.float32),
        in_specs=[pl.BlockSpec(memory_space=pltpu.MemorySpace.VMEM)] * len(args),
        out_specs=pl.BlockSpec(memory_space=pltpu.MemorySpace.VMEM),
    )(*args)


# --------------------------------------------------------------------------------
# Parameters (deterministic synthetic init) and full forward pass.
# --------------------------------------------------------------------------------
def init_params(key):
    ks = jax.random.split(key, 8)

    def dense(k, shape, fan_in):
        return jax.random.normal(k, shape, jnp.float32) / jnp.sqrt(float(fan_in))

    cin0 = NUM_INPUT_FRAMES * NUM_CHANNELS
    chans = (cin0,) + CNN_CHANNELS
    convs = []
    for i in range(3):
        # NOTE: HWIO layout; torch OIHW weights must be transposed before loading here.
        w = dense(ks[i], (3, 3, chans[i], chans[i + 1]), 9 * chans[i])
        b = jnp.zeros((chans[i + 1],), jnp.float32)
        convs.append((w, b))

    hf, wf = IMG_SIZE[0] // 8, IMG_SIZE[1] // 8
    assert (CNN_CHANNELS[-1] * hf * wf) % NUM_INPUT_FRAMES == 0   # flatten-to-frames split
    lstm_in = (CNN_CHANNELS[-1] * hf * wf) // NUM_INPUT_FRAMES    # analogue of 51200
    Hd = LSTM_HIDDEN
    fc_out = NUM_CHANNELS * IMG_SIZE[0] * IMG_SIZE[1] * NUM_OUTPUT_FRAMES
    return {
        "convs": convs,
        "wi0": dense(ks[3], (lstm_in, 4 * Hd), lstm_in),
        "wh0": dense(ks[4], (Hd, 4 * Hd), Hd),
        # single bias per layer == torch's (b_ih + b_hh); pass the SUM if loading torch
        # weights (identical under the zero init used here).
        "b0": jnp.zeros((1, 4 * Hd), jnp.float32),
        "wi1": dense(ks[5], (Hd, 4 * Hd), Hd),
        "wh1": dense(ks[6], (Hd, 4 * Hd), Hd),
        "b1": jnp.zeros((1, 4 * Hd), jnp.float32),
        "fc_w": dense(ks[7], (Hd, fc_out), Hd),
        "fc_b": jnp.zeros((1, fc_out), jnp.float32),
    }


def prednet_forward(x, params):
    """x: (B, F, C, H, W) float32 — same layout/semantics as the PyTorch module."""
    B, F, C, H, W = x.shape

    x = x.reshape(B, F * C, H, W)                 # torch: reshape to (B, F*C, H, W)
    x = jnp.transpose(x, (0, 2, 3, 1))            # NCHW -> NHWC for the TPU kernels
    for (w, b) in params["convs"]:
        x = conv3x3_relu_maxpool2(x, w, b)        # fused Conv+ReLU+MaxPool kernel (bf16)
    x = jnp.transpose(x, (0, 3, 1, 2))            # back to NCHW so flatten matches torch
    feat = x.reshape(B, F, -1)                    # torch: x.view(B, num_input_frames, -1)

    xt = jnp.transpose(feat, (1, 0, 2))           # time-major (F, B, In)
    y = lstm2_fc(xt, params["wi0"], params["wh0"], params["wi1"], params["wh1"],
                 params["b0"], params["b1"], params["fc_w"], params["fc_b"])

    return y.reshape(B, NUM_OUTPUT_FRAMES, C, H, W)
    # TODO(synk): the torch forward's debug print() calls are intentionally omitted.


if __name__ == "__main__":
    key = jax.random.PRNGKey(0)
    k_x, k_p = jax.random.split(key)
    B = 2
    H, W = IMG_SIZE
    x = jax.random.normal(k_x, (B, NUM_INPUT_FRAMES, NUM_CHANNELS, H, W), jnp.float32)
    params = init_params(k_p)

    out = jax.jit(prednet_forward)(x, params)
    out = jax.block_until_ready(out)

    assert out.shape == (B, NUM_OUTPUT_FRAMES, NUM_CHANNELS, H, W), out.shape
    assert bool(jnp.all(jnp.isfinite(out)))
    print("KERNEL_OK")
</pallas_src>

<mosaic_0001>
module attributes {stable_mosaic.version = 11 : i64} {
  func.func @_conv3x3_relu_pool_kernel(%arg0: i32, %arg1: memref<1x256x108xbf16, #tpu.memory_space<vmem>>, %arg2: memref<108x32xbf16, #tpu.memory_space<vmem>>, %arg3: memref<1x256xf32, #tpu.memory_space<vmem>>, %arg4: memref<1x8x256xbf16, #tpu.memory_space<vmem>>) attributes {dimension_semantics = [#tpu.dimension_semantics<parallel>], iteration_bounds = array<i64: 2>, scalar_prefetch = 0 : i64, scratch_operands = 0 : i64, tpu.core_type = #tpu.core_type<tc>, window_params = [{transform_indices = @transform_0, window_bounds = array<i64: 1, 256, 108>}, {pipeline_mode = #tpu.pipeline_mode<synchronous>, transform_indices = @transform_1, window_bounds = array<i64: 108, 32>}, {pipeline_mode = #tpu.pipeline_mode<synchronous>, transform_indices = @transform_2, window_bounds = array<i64: 1, 256>}, {transform_indices = @transform_3, window_bounds = array<i64: 1, 8, 256>}]} {
    %c0 = arith.constant 0 : index
    %c0_0 = arith.constant 0 : index
    %c0_1 = arith.constant 0 : index
    %0 = vector.load %arg1[%c0, %c0_0, %c0_1] : memref<1x256x108xbf16, #tpu.memory_space<vmem>>, vector<1x256x108xbf16>
    %1 = vector.shape_cast %0 : vector<1x256x108xbf16> to vector<256x108xbf16>
    %c0_2 = arith.constant 0 : index
    %c0_3 = arith.constant 0 : index
    %2 = vector.load %arg2[%c0_2, %c0_3] : memref<108x32xbf16, #tpu.memory_space<vmem>>, vector<108x32xbf16>
    %cst = arith.constant dense<0.000000e+00> : vector<256x32xf32>
    %3 = tpu.matmul %1, %2, %cst {dimension_numbers = #tpu.dot_dimension_numbers<[1], [0], [0], [1], [0, 0, 1, 1], [], []>} : vector<256x108xbf16>, vector<108x32xbf16>, vector<256x32xf32> -> vector<256x32xf32>
    %4 = vector.extract_strided_slice %3 {offsets = [0, 0], sizes = [128, 32], strides = [1, 1]} : vector<256x32xf32> to vector<128x32xf32>
    %5 = vector.extract_strided_slice %3 {offsets = [128, 0], sizes = [128, 32], strides = [1, 1]} : vector<256x32xf32> to vector<128x32xf32>
    %6 = arith.maximumf %4, %5 : vector<128x32xf32>
    %7 = vector.shape_cast %6 : vector<128x32xf32> to vector<8x2x8x32xf32>
    %8 = vector.extract_strided_slice %7 {offsets = [0, 0, 0, 0], sizes = [8, 1, 8, 32], strides = [1, 1, 1, 1]} : vector<8x2x8x32xf32> to vector<8x1x8x32xf32>
    %9 = vector.shape_cast %8 : vector<8x1x8x32xf32> to vector<8x8x32xf32>
    %10 = vector.extract_strided_slice %7 {offsets = [0, 1, 0, 0], sizes = [8, 1, 8, 32], strides = [1, 1, 1, 1]} : vector<8x2x8x32xf32> to vector<8x1x8x32xf32>
    %11 = vector.shape_cast %10 : vector<8x1x8x32xf32> to vector<8x8x32xf32>
    %12 = arith.maximumf %9, %11 : vector<8x8x32xf32>
    %13 = vector.shape_cast %12 : vector<8x8x32xf32> to vector<8x256xf32>
    %c0_4 = arith.constant 0 : index
    %c0_5 = arith.constant 0 : index
    %14 = vector.load %arg3[%c0_4, %c0_5] : memref<1x256xf32, #tpu.memory_space<vmem>>, vector<1x256xf32>
    %15 = vector.broadcast %14 : vector<1x256xf32> to vector<8x256xf32>
    %16 = arith.addf %13, %15 : vector<8x256xf32>
    %cst_6 = arith.constant 0.000000e+00 : f32
    %17 = vector.broadcast %cst_6 : f32 to vector<8x256xf32>
    %18 = arith.maximumf %16, %17 : vector<8x256xf32>
    %19 = arith.truncf %18 : vector<8x256xf32> to vector<8x256xbf16>
    %c0_7 = arith.constant 0 : index
    %c0_8 = arith.constant 0 : index
    %c0_9 = arith.constant 0 : index
    %20 = vector.load %arg4[%c0_7, %c0_8, %c0_9] : memref<1x8x256xbf16, #tpu.memory_space<vmem>>, vector<1x8x256xbf16>
    %21 = vector.shape_cast %20 : vector<1x8x256xbf16> to vector<8x256xbf16>
    %22 = vector.shape_cast %19 : vector<8x256xbf16> to vector<1x8x256xbf16>
    tpu.vector_store %arg4[%c0_7, %c0_8, %c0_9], %22 {strides = array<i32>} : memref<1x8x256xbf16, #tpu.memory_space<vmem>>, vector<1x8x256xbf16>,
    return
  }
  func.func @transform_0(%arg0: i32) -> (i32, i32, i32) {
    %c0_i32 = arith.constant 0 : i32
    %c0_i32_0 = arith.constant 0 : i32
    %c0_i32_1 = arith.constant 0 : i32
    return %arg0, %c0_i32, %c0_i32_0 : i32, i32, i32
  }
  func.func @transform_1(%arg0: i32) -> (i32, i32) {
    %c0_i32 = arith.constant 0 : i32
    %c0_i32_0 = arith.constant 0 : i32
    %c0_i32_1 = arith.constant 0 : i32
    return %c0_i32, %c0_i32_0 : i32, i32
  }
  func.func @transform_2(%arg0: i32) -> (i32, i32) {
    %c0_i32 = arith.constant 0 : i32
    %c0_i32_0 = arith.constant 0 : i32
    %c0_i32_1 = arith.constant 0 : i32
    return %c0_i32, %c0_i32_0 : i32, i32
  }
  func.func @transform_3(%arg0: i32) -> (i32, i32, i32) {
    %c0_i32 = arith.constant 0 : i32
    %c0_i32_0 = arith.constant 0 : i32
    %c0_i32_1 = arith.constant 0 : i32
    return %arg0, %c0_i32, %c0_i32_0 : i32, i32, i32
  }
}

module attributes {stable_mosaic.version = 11 : i64} {
  func.func @_conv3x3_relu_pool_kernel(%arg0: i32, %arg1: memref<1x64x288xbf16, #tpu.memory_space<vmem>>, %arg2: memref<288x64xbf16, #tpu.memory_space<vmem>>, %arg3: memref<1x256xf32, #tpu.memory_space<vmem>>, %arg4: memref<1x4x256xbf16, #tpu.memory_space<vmem>>) attributes {dimension_semantics = [#tpu.dimension_semantics<parallel>], iteration_bounds = array<i64: 2>, scalar_prefetch = 0 : i64, scratch_operands = 0 : i64, tpu.core_type = #tpu.core_type<tc>, window_params = [{transform_indices = @transform_0, window_bounds = array<i64: 1, 64, 288>}, {pipeline_mode = #tpu.pipeline_mode<synchronous>, transform_indices = @transform_1, window_bounds = array<i64: 288, 64>}, {pipeline_mode = #tpu.pipeline_mode<synchronous>, transform_indices = @transform_2, window_bounds = array<i64: 1, 256>}, {transform_indices = @transform_3, window_bounds = array<i64: 1, 4, 256>}]} {
    %c0 = arith.constant 0 : index
    %c0_0 = arith.constant 0 : index
    %c0_1 = arith.constant 0 : index
    %0 = vector.load %arg1[%c0, %c0_0, %c0_1] : memref<1x64x288xbf16, #tpu.memory_space<vmem>>, vector<1x64x288xbf16>
    %1 = vector.shape_cast %0 : vector<1x64x288xbf16> to vector<64x288xbf16>
    %c0_2 = arith.constant 0 : index
    %c0_3 = arith.constant 0 : index
    %2 = vector.load %arg2[%c0_2, %c0_3] : memref<288x64xbf16, #tpu.memory_space<vmem>>, vector<288x64xbf16>
    %cst = arith.constant dense<0.000000e+00> : vector<64x64xf32>
    %3 = tpu.matmul %1, %2, %cst {dimension_numbers = #tpu.dot_dimension_numbers<[1], [0], [0], [1], [0, 0, 1, 1], [], []>} : vector<64x288xbf16>, vector<288x64xbf16>, vector<64x64xf32> -> vector<64x64xf32>
    %4 = vector.extract_strided_slice %3 {offsets = [0, 0], sizes = [32, 64], strides = [1, 1]} : vector<64x64xf32> to vector<32x64xf32>
    %5 = vector.extract_strided_slice %3 {offsets = [32, 0], sizes = [32, 64], strides = [1, 1]} : vector<64x64xf32> to vector<32x64xf32>
    %6 = arith.maximumf %4, %5 : vector<32x64xf32>
    %7 = vector.shape_cast %6 : vector<32x64xf32> to vector<4x2x4x64xf32>
    %8 = vector.extract_strided_slice %7 {offsets = [0, 0, 0, 0], sizes = [4, 1, 4, 64], strides = [1, 1, 1, 1]} : vector<4x2x4x64xf32> to vector<4x1x4x64xf32>
    %9 = vector.shape_cast %8 : vector<4x1x4x64xf32> to vector<4x4x64xf32>
    %10 = vector.extract_strided_slice %7 {offsets = [0, 1, 0, 0], sizes = [4, 1, 4, 64], strides = [1, 1, 1, 1]} : vector<4x2x4x64xf32> to vector<4x1x4x64xf32>
    %11 = vector.shape_cast %10 : vector<4x1x4x64xf32> to vector<4x4x64xf32>
    %12 = arith.maximumf %9, %11 : vector<4x4x64xf32>
    %13 = vector.shape_cast %12 : vector<4x4x64xf32> to vector<4x256xf32>
    %c0_4 = arith.constant 0 : index
    %c0_5 = arith.constant 0 : index
    %14 = vector.load %arg3[%c0_4, %c0_5] : memref<1x256xf32, #tpu.memory_space<vmem>>, vector<1x256xf32>
    %15 = vector.broadcast %14 : vector<1x256xf32> to vector<4x256xf32>
    %16 = arith.addf %13, %15 : vector<4x256xf32>
    %cst_6 = arith.constant 0.000000e+00 : f32
    %17 = vector.broadcast %cst_6 : f32 to vector<4x256xf32>
    %18 = arith.maximumf %16, %17 : vector<4x256xf32>
    %19 = arith.truncf %18 : vector<4x256xf32> to vector<4x256xbf16>
    %c0_7 = arith.constant 0 : index
    %c0_8 = arith.constant 0 : index
    %c0_9 = arith.constant 0 : index
    %20 = vector.load %arg4[%c0_7, %c0_8, %c0_9] : memref<1x4x256xbf16, #tpu.memory_space<vmem>>, vector<1x4x256xbf16>
    %21 = vector.shape_cast %20 : vector<1x4x256xbf16> to vector<4x256xbf16>
    %22 = vector.shape_cast %19 : vector<4x256xbf16> to vector<1x4x256xbf16>
    tpu.vector_store %arg4[%c0_7, %c0_8, %c0_9], %22 {strides = array<i32>} : memref<1x4x256xbf16, #tpu.memory_space<vmem>>, vector<1x4x256xbf16>,
    return
  }
  func.func @transform_0(%arg0: i32) -> (i32, i32, i32) {
    %c0_i32 = arith.constant 0 : i32
    %c0_i32_0 = arith.constant 0 : i32
    %c0_i32_1 = arith.constant 0 : i32
    return %arg0, %c0_i32, %c0_i32_0 : i32, i32, i32
  }
  func.func @transform_1(%arg0: i32) -> (i32, i32) {
    %c0_i32 = arith.constant 0 : i32
    %c0_i32_0 = arith.constant 0 : i32
    %c0_i32_1 = arith.constant 0 : i32
    return %c0_i32, %c0_i32_0 : i32, i32
  }
  func.func @transform_2(%arg0: i32) -> (i32, i32) {
    %c0_i32 = arith.constant 0 : i32
    %c0_i32_0 = arith.constant 0 : i32
    %c0_i32_1 = arith.constant 0 : i32
    return %c0_i32, %c0_i32_0 : i32, i32
  }
  func.func @transform_3(%arg0: i32) -> (i32, i32, i32) {
    %c0_i32 = arith.constant 0 : i32
    %c0_i32_0 = arith.constant 0 : i32
    %c0_i32_1 = arith.constant 0 : i32
    return %arg0, %c0_i32, %c0_i32_0 : i32, i32, i32
  }
}

module attributes {stable_mosaic.version = 11 : i64} {
  func.func @_conv3x3_relu_pool_kernel(%arg0: i32, %arg1: memref<1x16x576xbf16, #tpu.memory_space<vmem>>, %arg2: memref<576x128xbf16, #tpu.memory_space<vmem>>, %arg3: memref<1x256xf32, #tpu.memory_space<vmem>>, %arg4: memref<1x2x256xbf16, #tpu.memory_space<vmem>>) attributes {dimension_semantics = [#tpu.dimension_semantics<parallel>], iteration_bounds = array<i64: 2>, scalar_prefetch = 0 : i64, scratch_operands = 0 : i64, tpu.core_type = #tpu.core_type<tc>, window_params = [{transform_indices = @transform_0, window_bounds = array<i64: 1, 16, 576>}, {pipeline_mode = #tpu.pipeline_mode<synchronous>, transform_indices = @transform_1, window_bounds = array<i64: 576, 128>}, {pipeline_mode = #tpu.pipeline_mode<synchronous>, transform_indices = @transform_2, window_bounds = array<i64: 1, 256>}, {transform_indices = @transform_3, window_bounds = array<i64: 1, 2, 256>}]} {
    %c0 = arith.constant 0 : index
    %c0_0 = arith.constant 0 : index
    %c0_1 = arith.constant 0 : index
    %0 = vector.load %arg1[%c0, %c0_0, %c0_1] : memref<1x16x576xbf16, #tpu.memory_space<vmem>>, vector<1x16x576xbf16>
    %1 = vector.shape_cast %0 : vector<1x16x576xbf16> to vector<16x576xbf16>
    %c0_2 = arith.constant 0 : index
    %c0_3 = arith.constant 0 : index
    %2 = vector.load %arg2[%c0_2, %c0_3] : memref<576x128xbf16, #tpu.memory_space<vmem>>, vector<576x128xbf16>
    %cst = arith.constant dense<0.000000e+00> : vector<16x128xf32>
    %3 = tpu.matmul %1, %2, %cst {dimension_numbers = #tpu.dot_dimension_numbers<[1], [0], [0], [1], [0, 0, 1, 1], [], []>} : vector<16x576xbf16>, vector<576x128xbf16>, vector<16x128xf32> -> vector<16x128xf32>
    %4 = vector.extract_strided_slice %3 {offsets = [0, 0], sizes = [8, 128], strides = [1, 1]} : vector<16x128xf32> to vector<8x128xf32>
    %5 = vector.extract_strided_slice %3 {offsets = [8, 0], sizes = [8, 128], strides = [1, 1]} : vector<16x128xf32> to vector<8x128xf32>
    %6 = arith.maximumf %4, %5 : vector<8x128xf32>
    %7 = vector.shape_cast %6 : vector<8x128xf32> to vector<2x2x2x128xf32>
    %8 = vector.extract_strided_slice %7 {offsets = [0, 0, 0, 0], sizes = [2, 1, 2, 128], strides = [1, 1, 1, 1]} : vector<2x2x2x128xf32> to vector<2x1x2x128xf32>
    %9 = vector.shape_cast %8 : vector<2x1x2x128xf32> to vector<2x2x128xf32>
    %10 = vector.extract_strided_slice %7 {offsets = [0, 1, 0, 0], sizes = [2, 1, 2, 128], strides = [1, 1, 1, 1]} : vector<2x2x2x128xf32> to vector<2x1x2x128xf32>
    %11 = vector.shape_cast %10 : vector<2x1x2x128xf32> to vector<2x2x128xf32>
    %12 = arith.maximumf %9, %11 : vector<2x2x128xf32>
    %13 = vector.shape_cast %12 : vector<2x2x128xf32> to vector<2x256xf32>
    %c0_4 = arith.constant 0 : index
    %c0_5 = arith.constant 0 : index
    %14 = vector.load %arg3[%c0_4, %c0_5] : memref<1x256xf32, #tpu.memory_space<vmem>>, vector<1x256xf32>
    %15 = vector.broadcast %14 : vector<1x256xf32> to vector<2x256xf32>
    %16 = arith.addf %13, %15 : vector<2x256xf32>
    %cst_6 = arith.constant 0.000000e+00 : f32
    %17 = vector.broadcast %cst_6 : f32 to vector<2x256xf32>
    %18 = arith.maximumf %16, %17 : vector<2x256xf32>
    %19 = arith.truncf %18 : vector<2x256xf32> to vector<2x256xbf16>
    %c0_7 = arith.constant 0 : index
    %c0_8 = arith.constant 0 : index
    %c0_9 = arith.constant 0 : index
    %20 = vector.load %arg4[%c0_7, %c0_8, %c0_9] : memref<1x2x256xbf16, #tpu.memory_space<vmem>>, vector<1x2x256xbf16>
    %21 = vector.shape_cast %20 : vector<1x2x256xbf16> to vector<2x256xbf16>
    %22 = vector.shape_cast %19 : vector<2x256xbf16> to vector<1x2x256xbf16>
    tpu.vector_store %arg4[%c0_7, %c0_8, %c0_9], %22 {strides = array<i32>} : memref<1x2x256xbf16, #tpu.memory_space<vmem>>, vector<1x2x256xbf16>,
    return
  }
  func.func @transform_0(%arg0: i32) -> (i32, i32, i32) {
    %c0_i32 = arith.constant 0 : i32
    %c0_i32_0 = arith.constant 0 : i32
    %c0_i32_1 = arith.constant 0 : i32
    return %arg0, %c0_i32, %c0_i32_0 : i32, i32, i32
  }
  func.func @transform_1(%arg0: i32) -> (i32, i32) {
    %c0_i32 = arith.constant 0 : i32
    %c0_i32_0 = arith.constant 0 : i32
    %c0_i32_1 = arith.constant 0 : i32
    return %c0_i32, %c0_i32_0 : i32, i32
  }
  func.func @transform_2(%arg0: i32) -> (i32, i32) {
    %c0_i32 = arith.constant 0 : i32
    %c0_i32_0 = arith.constant 0 : i32
    %c0_i32_1 = arith.constant 0 : i32
    return %c0_i32, %c0_i32_0 : i32, i32
  }
  func.func @transform_3(%arg0: i32) -> (i32, i32, i32) {
    %c0_i32 = arith.constant 0 : i32
    %c0_i32_0 = arith.constant 0 : i32
    %c0_i32_1 = arith.constant 0 : i32
    return %arg0, %c0_i32, %c0_i32_0 : i32, i32, i32
  }
}

module attributes {stable_mosaic.version = 11 : i64} {
  func.func @_lstm2_fc_kernel(%arg0: memref<4x2x128xbf16, #tpu.memory_space<vmem>>, %arg1: memref<128x1024xbf16, #tpu.memory_space<vmem>>, %arg2: memref<256x1024xbf16, #tpu.memory_space<vmem>>, %arg3: memref<256x1024xbf16, #tpu.memory_space<vmem>>, %arg4: memref<256x1024xbf16, #tpu.memory_space<vmem>>, %arg5: memref<1x1024xf32, #tpu.memory_space<vmem>>, %arg6: memref<1x1024xf32, #tpu.memory_space<vmem>>, %arg7: memref<256x768xbf16, #tpu.memory_space<vmem>>, %arg8: memref<1x768xf32, #tpu.memory_space<vmem>>, %arg9: memref<2x768xf32, #tpu.memory_space<vmem>>) attributes {dimension_semantics = [], scalar_prefetch = 0 : i64, scratch_operands = 0 : i64, tpu.core_type = #tpu.core_type<tc>} {
    %c0 = arith.constant 0 : index
    %c0_0 = arith.constant 0 : index
    %0 = vector.load %arg5[%c0, %c0_0] : memref<1x1024xf32, #tpu.memory_space<vmem>>, vector<1x1024xf32>
    %c0_1 = arith.constant 0 : index
    %c0_2 = arith.constant 0 : index
    %1 = vector.load %arg6[%c0_1, %c0_2] : memref<1x1024xf32, #tpu.memory_space<vmem>>, vector<1x1024xf32>
    %cst = arith.constant 0.000000e+00 : f32
    %2 = vector.broadcast %cst : f32 to vector<2x256xf32>
    %c0_i32 = arith.constant 0 : i32
    %3 = arith.index_cast %c0_i32 : i32 to index
    %c0_3 = arith.constant 0 : index
    %c0_4 = arith.constant 0 : index
    %4 = vector.load %arg0[%3, %c0_3, %c0_4] : memref<4x2x128xbf16, #tpu.memory_space<vmem>>, vector<1x2x128xbf16>
    %5 = vector.shape_cast %4 : vector<1x2x128xbf16> to vector<2x128xbf16>
    %c0_5 = arith.constant 0 : index
    %c0_6 = arith.constant 0 : index
    %6 = vector.load %arg1[%c0_5, %c0_6] : memref<128x1024xbf16, #tpu.memory_space<vmem>>, vector<128x1024xbf16>
    %cst_7 = arith.constant dense<0.000000e+00> : vector<2x1024xf32>
    %7 = tpu.matmul %5, %6, %cst_7 {dimension_numbers = #tpu.dot_dimension_numbers<[1], [0], [0], [1], [0, 0, 1, 1], [], []>} : vector<2x128xbf16>, vector<128x1024xbf16>, vector<2x1024xf32> -> vector<2x1024xf32>
    %8 = arith.truncf %2 : vector<2x256xf32> to vector<2x256xbf16>
    %c0_8 = arith.constant 0 : index
    %c0_9 = arith.constant 0 : index
    %9 = vector.load %arg2[%c0_8, %c0_9] : memref<256x1024xbf16, #tpu.memory_space<vmem>>, vector<256x1024xbf16>
    %cst_10 = arith.constant dense<0.000000e+00> : vector<2x1024xf32>
    %10 = tpu.matmul %8, %9, %cst_10 {dimension_numbers = #tpu.dot_dimension_numbers<[1], [0], [0], [1], [0, 0, 1, 1], [], []>} : vector<2x256xbf16>, vector<256x1024xbf16>, vector<2x1024xf32> -> vector<2x1024xf32>
    %11 = arith.addf %7, %10 : vector<2x1024xf32>
    %12 = vector.broadcast %0 : vector<1x1024xf32> to vector<2x1024xf32>
    %13 = arith.addf %11, %12 : vector<2x1024xf32>
    %14 = vector.extract_strided_slice %13 {offsets = [0, 0], sizes = [2, 256], strides = [1, 1]} : vector<2x1024xf32> to vector<2x256xf32>
    %cst_11 = arith.constant 5.000000e-01 : f32
    %15 = vector.broadcast %cst_11 : f32 to vector<2x256xf32>
    %16 = arith.mulf %15, %14 : vector<2x256xf32>
    %17 = math.tanh %16 : vector<2x256xf32>
    %cst_12 = arith.constant 5.000000e-01 : f32
    %18 = vector.broadcast %cst_12 : f32 to vector<2x256xf32>
    %19 = arith.mulf %18, %17 : vector<2x256xf32>
    %cst_13 = arith.constant 5.000000e-01 : f32
    %20 = vector.broadcast %cst_13 : f32 to vector<2x256xf32>
    %21 = arith.addf %19, %20 : vector<2x256xf32>
    %22 = vector.extract_strided_slice %13 {offsets = [0, 256], sizes = [2, 256], strides = [1, 1]} : vector<2x1024xf32> to vector<2x256xf32>
    %cst_14 = arith.constant 5.000000e-01 : f32
    %23 = vector.broadcast %cst_14 : f32 to vector<2x256xf32>
    %24 = arith.mulf %23, %22 : vector<2x256xf32>
    %25 = math.tanh %24 : vector<2x256xf32>
    %cst_15 = arith.constant 5.000000e-01 : f32
    %26 = vector.broadcast %cst_15 : f32 to vector<2x256xf32>
    %27 = arith.mulf %26, %25 : vector<2x256xf32>
    %cst_16 = arith.constant 5.000000e-01 : f32
    %28 = vector.broadcast %cst_16 : f32 to vector<2x256xf32>
    %29 = arith.addf %27, %28 : vector<2x256xf32>
    %30 = vector.extract_strided_slice %13 {offsets = [0, 512], sizes = [2, 256], strides = [1, 1]} : vector<2x1024xf32> to vector<2x256xf32>
    %31 = math.tanh %30 : vector<2x256xf32>
    %32 = vector.extract_strided_slice %13 {offsets = [0, 768], sizes = [2, 256], strides = [1, 1]} : vector<2x1024xf32> to vector<2x256xf32>
    %cst_17 = arith.constant 5.000000e-01 : f32
    %33 = vector.broadcast %cst_17 : f32 to vector<2x256xf32>
    %34 = arith.mulf %33, %32 : vector<2x256xf32>
    %35 = math.tanh %34 : vector<2x256xf32>
    %cst_18 = arith.constant 5.000000e-01 : f32
    %36 = vector.broadcast %cst_18 : f32 to vector<2x256xf32>
    %37 = arith.mulf %36, %35 : vector<2x256xf32>
    %cst_19 = arith.constant 5.000000e-01 : f32
    %38 = vector.broadcast %cst_19 : f32 to vector<2x256xf32>
    %39 = arith.addf %37, %38 : vector<2x256xf32>
    %40 = arith.mulf %29, %2 : vector<2x256xf32>
    %41 = arith.mulf %21, %31 : vector<2x256xf32>
    %42 = arith.addf %40, %41 : vector<2x256xf32>
    %43 = math.tanh %42 : vector<2x256xf32>
    %44 = arith.mulf %39, %43 : vector<2x256xf32>
    %45 = arith.truncf %44 : vector<2x256xf32> to vector<2x256xbf16>
    %c0_20 = arith.constant 0 : index
    %c0_21 = arith.constant 0 : index
    %46 = vector.load %arg3[%c0_20, %c0_21] : memref<256x1024xbf16, #tpu.memory_space<vmem>>, vector<256x1024xbf16>
    %cst_22 = arith.constant dense<0.000000e+00> : vector<2x1024xf32>
    %47 = tpu.matmul %45, %46, %cst_22 {dimension_numbers = #tpu.dot_dimension_numbers<[1], [0], [0], [1], [0, 0, 1, 1], [], []>} : vector<2x256xbf16>, vector<256x1024xbf16>, vector<2x1024xf32> -> vector<2x1024xf32>
    %48 = arith.truncf %2 : vector<2x256xf32> to vector<2x256xbf16>
    %c0_23 = arith.constant 0 : index
    %c0_24 = arith.constant 0 : index
    %49 = vector.load %arg4[%c0_23, %c0_24] : memref<256x1024xbf16, #tpu.memory_space<vmem>>, vector<256x1024xbf16>
    %cst_25 = arith.constant dense<0.000000e+00> : vector<2x1024xf32>
    %50 = tpu.matmul %48, %49, %cst_25 {dimension_numbers = #tpu.dot_dimension_numbers<[1], [0], [0], [1], [0, 0, 1, 1], [], []>} : vector<2x256xbf16>, vector<256x1024xbf16>, vector<2x1024xf32> -> vector<2x1024xf32>
    %51 = arith.addf %47, %50 : vector<2x1024xf32>
    %52 = vector.broadcast %1 : vector<1x1024xf32> to vector<2x1024xf32>
    %53 = arith.addf %51, %52 : vector<2x1024xf32>
    %54 = vector.extract_strided_slice %53 {offsets = [0, 0], sizes = [2, 256], strides = [1, 1]} : vector<2x1024xf32> to vector<2x256xf32>
    %cst_26 = arith.constant 5.000000e-01 : f32
    %55 = vector.broadcast %cst_26 : f32 to vector<2x256xf32>
    %56 = arith.mulf %55, %54 : vector<2x256xf32>
    %57 = math.tanh %56 : vector<2x256xf32>
    %cst_27 = arith.constant 5.000000e-01 : f32
    %58 = vector.broadcast %cst_27 : f32 to vector<2x256xf32>
    %59 = arith.mulf %58, %57 : vector<2x256xf32>
    %cst_28 = arith.constant 5.000000e-01 : f32
    %60 = vector.broadcast %cst_28 : f32 to vector<2x256xf32>
    %61 = arith.addf %59, %60 : vector<2x256xf32>
    %62 = vector.extract_strided_slice %53 {offsets = [0, 256], sizes = [2, 256], strides = [1, 1]} : vector<2x1024xf32> to vector<2x256xf32>
    %cst_29 = arith.constant 5.000000e-01 : f32
    %63 = vector.broadcast %cst_29 : f32 to vector<2x256xf32>
    %64 = arith.mulf %63, %62 : vector<2x256xf32>
    %65 = math.tanh %64 : vector<2x256xf32>
    %cst_30 = arith.constant 5.000000e-01 : f32
    %66 = vector.broadcast %cst_30 : f32 to vector<2x256xf32>
    %67 = arith.mulf %66, %65 : vector<2x256xf32>
    %cst_31 = arith.constant 5.000000e-01 : f32
    %68 = vector.broadcast %cst_31 : f32 to vector<2x256xf32>
    %69 = arith.addf %67, %68 : vector<2x256xf32>
    %70 = vector.extract_strided_slice %53 {offsets = [0, 512], sizes = [2, 256], strides = [1, 1]} : vector<2x1024xf32> to vector<2x256xf32>
    %71 = math.tanh %70 : vector<2x256xf32>
    %72 = vector.extract_strided_slice %53 {offsets = [0, 768], sizes = [2, 256], strides = [1, 1]} : vector<2x1024xf32> to vector<2x256xf32>
    %cst_32 = arith.constant 5.000000e-01 : f32
    %73 = vector.broadcast %cst_32 : f32 to vector<2x256xf32>
    %74 = arith.mulf %73, %72 : vector<2x256xf32>
    %75 = math.tanh %74 : vector<2x256xf32>
    %cst_33 = arith.constant 5.000000e-01 : f32
    %76 = vector.broadcast %cst_33 : f32 to vector<2x256xf32>
    %77 = arith.mulf %76, %75 : vector<2x256xf32>
    %cst_34 = arith.constant 5.000000e-01 : f32
    %78 = vector.broadcast %cst_34 : f32 to vector<2x256xf32>
    %79 = arith.addf %77, %78 : vector<2x256xf32>
    %80 = arith.mulf %69, %2 : vector<2x256xf32>
    %81 = arith.mulf %61, %71 : vector<2x256xf32>
    %82 = arith.addf %80, %81 : vector<2x256xf32>
    %83 = math.tanh %82 : vector<2x256xf32>
    %84 = arith.mulf %79, %83 : vector<2x256xf32>
    %c1_i32 = arith.constant 1 : i32
    %85 = arith.index_cast %c1_i32 : i32 to index
    %c0_35 = arith.constant 0 : index
    %c0_36 = arith.constant 0 : index
    %86 = vector.load %arg0[%85, %c0_35, %c0_36] : memref<4x2x128xbf16, #tpu.memory_space<vmem>>, vector<1x2x128xbf16>
    %87 = vector.shape_cast %86 : vector<1x2x128xbf16> to vector<2x128xbf16>
    %c0_37 = arith.constant 0 : index
    %c0_38 = arith.constant 0 : index
    %88 = vector.load %arg1[%c0_37, %c0_38] : memref<128x1024xbf16, #tpu.memory_space<vmem>>, vector<128x1024xbf16>
    %cst_39 = arith.constant dense<0.000000e+00> : vector<2x1024xf32>
    %89 = tpu.matmul %87, %88, %cst_39 {dimension_numbers = #tpu.dot_dimension_numbers<[1], [0], [0], [1], [0, 0, 1, 1], [], []>} : vector<2x128xbf16>, vector<128x1024xbf16>, vector<2x1024xf32> -> vector<2x1024xf32>
    %90 = arith.truncf %44 : vector<2x256xf32> to vector<2x256xbf16>
    %c0_40 = arith.constant 0 : index
    %c0_41 = arith.constant 0 : index
    %91 = vector.load %arg2[%c0_40, %c0_41] : memref<256x1024xbf16, #tpu.memory_space<vmem>>, vector<256x1024xbf16>
    %cst_42 = arith.constant dense<0.000000e+00> : vector<2x1024xf32>
    %92 = tpu.matmul %90, %91, %cst_42 {dimension_numbers = #tpu.dot_dimension_numbers<[1], [0], [0], [1], [0, 0, 1, 1], [], []>} : vector<2x256xbf16>, vector<256x1024xbf16>, vector<2x1024xf32> -> vector<2x1024xf32>
    %93 = arith.addf %89, %92 : vector<2x1024xf32>
    %94 = vector.broadcast %0 : vector<1x1024xf32> to vector<2x1024xf32>
    %95 = arith.addf %93, %94 : vector<2x1024xf32>
    %96 = vector.extract_strided_slice %95 {offsets = [0, 0], sizes = [2, 256], strides = [1, 1]} : vector<2x1024xf32> to vector<2x256xf32>
    %cst_43 = arith.constant 5.000000e-01 : f32
    %97 = vector.broadcast %cst_43 : f32 to vector<2x256xf32>
    %98 = arith.mulf %97, %96 : vector<2x256xf32>
    %99 = math.tanh %98 : vector<2x256xf32>
    %cst_44 = arith.constant 5.000000e-01 : f32
    %100 = vector.broadcast %cst_44 : f32 to vector<2x256xf32>
    %101 = arith.mulf %100, %99 : vector<2x256xf32>
    %cst_45 = arith.constant 5.000000e-01 : f32
    %102 = vector.broadcast %cst_45 : f32 to vector<2x256xf32>
    %103 = arith.addf %101, %102 : vector<2x256xf32>
    %104 = vector.extract_strided_slice %95 {offsets = [0, 256], sizes = [2, 256], strides = [1, 1]} : vector<2x1024xf32> to vector<2x256xf32>
    %cst_46 = arith.constant 5.000000e-01 : f32
    %105 = vector.broadcast %cst_46 : f32 to vector<2x256xf32>
    %106 = arith.mulf %105, %104 : vector<2x256xf32>
    %107 = math.tanh %106 : vector<2x256xf32>
    %cst_47 = arith.constant 5.000000e-01 : f32
    %108 = vector.broadcast %cst_47 : f32 to vector<2x256xf32>
    %109 = arith.mulf %108, %107 : vector<2x256xf32>
    %cst_48 = arith.constant 5.000000e-01 : f32
    %110 = vector.broadcast %cst_48 : f32 to vector<2x256xf32>
    %111 = arith.addf %109, %110 : vector<2x256xf32>
    %112 = vector.extract_strided_slice %95 {offsets = [0, 512], sizes = [2, 256], strides = [1, 1]} : vector<2x1024xf32> to vector<2x256xf32>
    %113 = math.tanh %112 : vector<2x256xf32>
    %114 = vector.extract_strided_slice %95 {offsets = [0, 768], sizes = [2, 256], strides = [1, 1]} : vector<2x1024xf32> to vector<2x256xf32>
    %cst_49 = arith.constant 5.000000e-01 : f32
    %115 = vector.broadcast %cst_49 : f32 to vector<2x256xf32>
    %116 = arith.mulf %115, %114 : vector<2x256xf32>
    %117 = math.tanh %116 : vector<2x256xf32>
    %cst_50 = arith.constant 5.000000e-01 : f32
    %118 = vector.broadcast %cst_50 : f32 to vector<2x256xf32>
    %119 = arith.mulf %118, %117 : vector<2x256xf32>
    %cst_51 = arith.constant 5.000000e-01 : f32
    %120 = vector.broadcast %cst_51 : f32 to vector<2x256xf32>
    %121 = arith.addf %119, %120 : vector<2x256xf32>
    %122 = arith.mulf %111, %42 : vector<2x256xf32>
    %123 = arith.mulf %103, %113 : vector<2x256xf32>
    %124 = arith.addf %122, %123 : vector<2x256xf32>
    %125 = math.tanh %124 : vector<2x256xf32>
    %126 = arith.mulf %121, %125 : vector<2x256xf32>
    %127 = arith.truncf %126 : vector<2x256xf32> to vector<2x256xbf16>
    %c0_52 = arith.constant 0 : index
    %c0_53 = arith.constant 0 : index
    %128 = vector.load %arg3[%c0_52, %c0_53] : memref<256x1024xbf16, #tpu.memory_space<vmem>>, vector<256x1024xbf16>
    %cst_54 = arith.constant dense<0.000000e+00> : vector<2x1024xf32>
    %129 = tpu.matmul %127, %128, %cst_54 {dimension_numbers = #tpu.dot_dimension_numbers<[1], [0], [0], [1], [0, 0, 1, 1], [], []>} : vector<2x256xbf16>, vector<256x1024xbf16>, vector<2x1024xf32> -> vector<2x1024xf32>
    %130 = arith.truncf %84 : vector<2x256xf32> to vector<2x256xbf16>
    %c0_55 = arith.constant 0 : index
    %c0_56 = arith.constant 0 : index
    %131 = vector.load %arg4[%c0_55, %c0_56] : memref<256x1024xbf16, #tpu.memory_space<vmem>>, vector<256x1024xbf16>
    %cst_57 = arith.constant dense<0.000000e+00> : vector<2x1024xf32>
    %132 = tpu.matmul %130, %131, %cst_57 {dimension_numbers = #tpu.dot_dimension_numbers<[1], [0], [0], [1], [0, 0, 1, 1], [], []>} : vector<2x256xbf16>, vector<256x1024xbf16>, vector<2x1024xf32> -> vector<2x1024xf32>
    %133 = arith.addf %129, %132 : vector<2x1024xf32>
    %134 = vector.broadcast %1 : vector<1x1024xf32> to vector<2x1024xf32>
    %135 = arith.addf %133, %134 : vector<2x1024xf32>
    %136 = vector.extract_strided_slice %135 {offsets = [0, 0], sizes = [2, 256], strides = [1, 1]} : vector<2x1024xf32> to vector<2x256xf32>
    %cst_58 = arith.constant 5.000000e-01 : f32
    %137 = vector.broadcast %cst_58 : f32 to vector<2x256xf32>
    %138 = arith.mulf %137, %136 : vector<2x256xf32>
    %139 = math.tanh %138 : vector<2x256xf32>
    %cst_59 = arith.constant 5.000000e-01 : f32
    %140 = vector.broadcast %cst_59 : f32 to vector<2x256xf32>
    %141 = arith.mulf %140, %139 : vector<2x256xf32>
    %cst_60 = arith.constant 5.000000e-01 : f32
    %142 = vector.broadcast %cst_60 : f32 to vector<2x256xf32>
    %143 = arith.addf %141, %142 : vector<2x256xf32>
    %144 = vector.extract_strided_slice %135 {offsets = [0, 256], sizes = [2, 256], strides = [1, 1]} : vector<2x1024xf32> to vector<2x256xf32>
    %cst_61 = arith.constant 5.000000e-01 : f32
    %145 = vector.broadcast %cst_61 : f32 to vector<2x256xf32>
    %146 = arith.mulf %145, %144 : vector<2x256xf32>
    %147 = math.tanh %146 : vector<2x256xf32>
    %cst_62 = arith.constant 5.000000e-01 : f32
    %148 = vector.broadcast %cst_62 : f32 to vector<2x256xf32>
    %149 = arith.mulf %148, %147 : vector<2x256xf32>
    %cst_63 = arith.constant 5.000000e-01 : f32
    %150 = vector.broadcast %cst_63 : f32 to vector<2x256xf32>
    %151 = arith.addf %149, %150 : vector<2x256xf32>
    %152 = vector.extract_strided_slice %135 {offsets = [0, 512], sizes = [2, 256], strides = [1, 1]} : vector<2x1024xf32> to vector<2x256xf32>
    %153 = math.tanh %152 : vector<2x256xf32>
    %154 = vector.extract_strided_slice %135 {offsets = [0, 768], sizes = [2, 256], strides = [1, 1]} : vector<2x1024xf32> to vector<2x256xf32>
    %cst_64 = arith.constant 5.000000e-01 : f32
    %155 = vector.broadcast %cst_64 : f32 to vector<2x256xf32>
    %156 = arith.mulf %155, %154 : vector<2x256xf32>
    %157 = math.tanh %156 : vector<2x256xf32>
    %cst_65 = arith.constant 5.000000e-01 : f32
    %158 = vector.broadcast %cst_65 : f32 to vector<2x256xf32>
    %159 = arith.mulf %158, %157 : vector<2x256xf32>
    %cst_66 = arith.constant 5.000000e-01 : f32
    %160 = vector.broadcast %cst_66 : f32 to vector<2x256xf32>
    %161 = arith.addf %159, %160 : vector<2x256xf32>
    %162 = arith.mulf %151, %82 : vector<2x256xf32>
    %163 = arith.mulf %143, %153 : vector<2x256xf32>
    %164 = arith.addf %162, %163 : vector<2x256xf32>
    %165 = math.tanh %164 : vector<2x256xf32>
    %166 = arith.mulf %161, %165 : vector<2x256xf32>
    %c2_i32 = arith.constant 2 : i32
    %167 = arith.index_cast %c2_i32 : i32 to index
    %c0_67 = arith.constant 0 : index
    %c0_68 = arith.constant 0 : index
    %168 = vector.load %arg0[%167, %c0_67, %c0_68] : memref<4x2x128xbf16, #tpu.memory_space<vmem>>, vector<1x2x128xbf16>
    %169 = vector.shape_cast %168 : vector<1x2x128xbf16> to vector<2x128xbf16>
    %c0_69 = arith.constant 0 : index
    %c0_70 = arith.constant 0 : index
    %170 = vector.load %arg1[%c0_69, %c0_70] : memref<128x1024xbf16, #tpu.memory_space<vmem>>, vector<128x1024xbf16>
    %cst_71 = arith.constant dense<0.000000e+00> : vector<2x1024xf32>
    %171 = tpu.matmul %169, %170, %cst_71 {dimension_numbers = #tpu.dot_dimension_numbers<[1], [0], [0], [1], [0, 0, 1, 1], [], []>} : vector<2x128xbf16>, vector<128x1024xbf16>, vector<2x1024xf32> -> vector<2x1024xf32>
    %172 = arith.truncf %126 : vector<2x256xf32> to vector<2x256xbf16>
    %c0_72 = arith.constant 0 : index
    %c0_73 = arith.constant 0 : index
    %173 = vector.load %arg2[%c0_72, %c0_73] : memref<256x1024xbf16, #tpu.memory_space<vmem>>, vector<256x1024xbf16>
    %cst_74 = arith.constant dense<0.000000e+00> : vector<2x1024xf32>
    %174 = tpu.matmul %172, %173, %cst_74 {dimension_numbers = #tpu.dot_dimension_numbers<[1], [0], [0], [1], [0, 0, 1, 1], [], []>} : vector<2x256xbf16>, vector<256x1024xbf16>, vector<2x1024xf32> -> vector<2x1024xf32>
    %175 = arith.addf %171, %174 : vector<2x1024xf32>
    %176 = vector.broadcast %0 : vector<1x1024xf32> to vector<2x1024xf32>
    %177 = arith.addf %175, %176 : vector<2x1024xf32>
    %178 = vector.extract_strided_slice %177 {offsets = [0, 0], sizes = [2, 256], strides = [1, 1]} : vector<2x1024xf32> to vector<2x256xf32>
    %cst_75 = arith.constant 5.000000e-01 : f32
    %179 = vector.broadcast %cst_75 : f32 to vector<2x256xf32>
    %180 = arith.mulf %179, %178 : vector<2x256xf32>
    %181 = math.tanh %180 : vector<2x256xf32>
    %cst_76 = arith.constant 5.000000e-01 : f32
    %182 = vector.broadcast %cst_76 : f32 to vector<2x256xf32>
    %183 = arith.mulf %182, %181 : vector<2x256xf32>
    %cst_77 = arith.constant 5.000000e-01 : f32
    %184 = vector.broadcast %cst_77 : f32 to vector<2x256xf32>
    %185 = arith.addf %183, %184 : vector<2x256xf32>
    %186 = vector.extract_strided_slice %177 {offsets = [0, 256], sizes = [2, 256], strides = [1, 1]} : vector<2x1024xf32> to vector<2x256xf32>
    %cst_78 = arith.constant 5.000000e-01 : f32
    %187 = vector.broadcast %cst_78 : f32 to vector<2x256xf32>
    %188 = arith.mulf %187, %186 : vector<2x256xf32>
    %189 = math.tanh %188 : vector<2x256xf32>
    %cst_79 = arith.constant 5.000000e-01 : f32
    %190 = vector.broadcast %cst_79 : f32 to vector<2x256xf32>
    %191 = arith.mulf %190, %189 : vector<2x256xf32>
    %cst_80 = arith.constant 5.000000e-01 : f32
    %192 = vector.broadcast %cst_80 : f32 to vector<2x256xf32>
    %193 = arith.addf %191, %192 : vector<2x256xf32>
    %194 = vector.extract_strided_slice %177 {offsets = [0, 512], sizes = [2, 256], strides = [1, 1]} : vector<2x1024xf32> to vector<2x256xf32>
    %195 = math.tanh %194 : vector<2x256xf32>
    %196 = vector.extract_strided_slice %177 {offsets = [0, 768], sizes = [2, 256], strides = [1, 1]} : vector<2x1024xf32> to vector<2x256xf32>
    %cst_81 = arith.constant 5.000000e-01 : f32
    %197 = vector.broadcast %cst_81 : f32 to vector<2x256xf32>
    %198 = arith.mulf %197, %196 : vector<2x256xf32>
    %199 = math.tanh %198 : vector<2x256xf32>
    %cst_82 = arith.constant 5.000000e-01 : f32
    %200 = vector.broadcast %cst_82 : f32 to vector<2x256xf32>
    %201 = arith.mulf %200, %199 : vector<2x256xf32>
    %cst_83 = arith.constant 5.000000e-01 : f32
    %202 = vector.broadcast %cst_83 : f32 to vector<2x256xf32>
    %203 = arith.addf %201, %202 : vector<2x256xf32>
    %204 = arith.mulf %193, %124 : vector<2x256xf32>
    %205 = arith.mulf %185, %195 : vector<2x256xf32>
    %206 = arith.addf %204, %205 : vector<2x256xf32>
    %207 = math.tanh %206 : vector<2x256xf32>
    %208 = arith.mulf %203, %207 : vector<2x256xf32>
    %209 = arith.truncf %208 : vector<2x256xf32> to vector<2x256xbf16>
    %c0_84 = arith.constant 0 : index
    %c0_85 = arith.constant 0 : index
    %210 = vector.load %arg3[%c0_84, %c0_85] : memref<256x1024xbf16, #tpu.memory_space<vmem>>, vector<256x1024xbf16>
    %cst_86 = arith.constant dense<0.000000e+00> : vector<2x1024xf32>
    %211 = tpu.matmul %209, %210, %cst_86 {dimension_numbers = #tpu.dot_dimension_numbers<[1], [0], [0], [1], [0, 0, 1, 1], [], []>} : vector<2x256xbf16>, vector<256x1024xbf16>, vector<2x1024xf32> -> vector<2x1024xf32>
    %212 = arith.truncf %166 : vector<2x256xf32> to vector<2x256xbf16>
    %c0_87 = arith.constant 0 : index
    %c0_88 = arith.constant 0 : index
    %213 = vector.load %arg4[%c0_87, %c0_88] : memref<256x1024xbf16, #tpu.memory_space<vmem>>, vector<256x1024xbf16>
    %cst_89 = arith.constant dense<0.000000e+00> : vector<2x1024xf32>
    %214 = tpu.matmul %212, %213, %cst_89 {dimension_numbers = #tpu.dot_dimension_numbers<[1], [0], [0], [1], [0, 0, 1, 1], [], []>} : vector<2x256xbf16>, vector<256x1024xbf16>, vector<2x1024xf32> -> vector<2x1024xf32>
    %215 = arith.addf %211, %214 : vector<2x1024xf32>
    %216 = vector.broadcast %1 : vector<1x1024xf32> to vector<2x1024xf32>
    %217 = arith.addf %215, %216 : vector<2x1024xf32>
    %218 = vector.extract_strided_slice %217 {offsets = [0, 0], sizes = [2, 256], strides = [1, 1]} : vector<2x1024xf32> to vector<2x256xf32>
    %cst_90 = arith.constant 5.000000e-01 : f32
    %219 = vector.broadcast %cst_90 : f32 to vector<2x256xf32>
    %220 = arith.mulf %219, %218 : vector<2x256xf32>
    %221 = math.tanh %220 : vector<2x256xf32>
    %cst_91 = arith.constant 5.000000e-01 : f32
    %222 = vector.broadcast %cst_91 : f32 to vector<2x256xf32>
    %223 = arith.mulf %222, %221 : vector<2x256xf32>
    %cst_92 = arith.constant 5.000000e-01 : f32
    %224 = vector.broadcast %cst_92 : f32 to vector<2x256xf32>
    %225 = arith.addf %223, %224 : vector<2x256xf32>
    %226 = vector.extract_strided_slice %217 {offsets = [0, 256], sizes = [2, 256], strides = [1, 1]} : vector<2x1024xf32> to vector<2x256xf32>
    %cst_93 = arith.constant 5.000000e-01 : f32
    %227 = vector.broadcast %cst_93 : f32 to vector<2x256xf32>
    %228 = arith.mulf %227, %226 : vector<2x256xf32>
    %229 = math.tanh %228 : vector<2x256xf32>
    %cst_94 = arith.constant 5.000000e-01 : f32
    %230 = vector.broadcast %cst_94 : f32 to vector<2x256xf32>
    %231 = arith.mulf %230, %229 : vector<2x256xf32>
    %cst_95 = arith.constant 5.000000e-01 : f32
    %232 = vector.broadcast %cst_95 : f32 to vector<2x256xf32>
    %233 = arith.addf %231, %232 : vector<2x256xf32>
    %234 = vector.extract_strided_slice %217 {offsets = [0, 512], sizes = [2, 256], strides = [1, 1]} : vector<2x1024xf32> to vector<2x256xf32>
    %235 = math.tanh %234 : vector<2x256xf32>
    %236 = vector.extract_strided_slice %217 {offsets = [0, 768], sizes = [2, 256], strides = [1, 1]} : vector<2x1024xf32> to vector<2x256xf32>
    %cst_96 = arith.constant 5.000000e-01 : f32
    %237 = vector.broadcast %cst_96 : f32 to vector<2x256xf32>
    %238 = arith.mulf %237, %236 : vector<2x256xf32>
    %239 = math.tanh %238 : vector<2x256xf32>
    %cst_97 = arith.constant 5.000000e-01 : f32
    %240 = vector.broadcast %cst_97 : f32 to vector<2x256xf32>
    %241 = arith.mulf %240, %239 : vector<2x256xf32>
    %cst_98 = arith.constant 5.000000e-01 : f32
    %242 = vector.broadcast %cst_98 : f32 to vector<2x256xf32>
    %243 = arith.addf %241, %242 : vector<2x256xf32>
    %244 = arith.mulf %233, %164 : vector<2x256xf32>
    %245 = arith.mulf %225, %235 : vector<2x256xf32>
    %246 = arith.addf %244, %245 : vector<2x256xf32>
    %247 = math.tanh %246 : vector<2x256xf32>
    %248 = arith.mulf %243, %247 : vector<2x256xf32>
    %c3_i32 = arith.constant 3 : i32
    %249 = arith.index_cast %c3_i32 : i32 to index
    %c0_99 = arith.constant 0 : index
    %c0_100 = arith.constant 0 : index
    %250 = vector.load %arg0[%249, %c0_99, %c0_100] : memref<4x2x128xbf16, #tpu.memory_space<vmem>>, vector<1x2x128xbf16>
    %251 = vector.shape_cast %250 : vector<1x2x128xbf16> to vector<2x128xbf16>
    %c0_101 = arith.constant 0 : index
    %c0_102 = arith.constant 0 : index
    %252 = vector.load %arg1[%c0_101, %c0_102] : memref<128x1024xbf16, #tpu.memory_space<vmem>>, vector<128x1024xbf16>
    %cst_103 = arith.constant dense<0.000000e+00> : vector<2x1024xf32>
    %253 = tpu.matmul %251, %252, %cst_103 {dimension_numbers = #tpu.dot_dimension_numbers<[1], [0], [0], [1], [0, 0, 1, 1], [], []>} : vector<2x128xbf16>, vector<128x1024xbf16>, vector<2x1024xf32> -> vector<2x1024xf32>
    %254 = arith.truncf %208 : vector<2x256xf32> to vector<2x256xbf16>
    %c0_104 = arith.constant 0 : index
    %c0_105 = arith.constant 0 : index
    %255 = vector.load %arg2[%c0_104, %c0_105] : memref<256x1024xbf16, #tpu.memory_space<vmem>>, vector<256x1024xbf16>
    %cst_106 = arith.constant dense<0.000000e+00> : vector<2x1024xf32>
    %256 = tpu.matmul %254, %255, %cst_106 {dimension_numbers = #tpu.dot_dimension_numbers<[1], [0], [0], [1], [0, 0, 1, 1], [], []>} : vector<2x256xbf16>, vector<256x1024xbf16>, vector<2x1024xf32> -> vector<2x1024xf32>
    %257 = arith.addf %253, %256 : vector<2x1024xf32>
    %258 = vector.broadcast %0 : vector<1x1024xf32> to vector<2x1024xf32>
    %259 = arith.addf %257, %258 : vector<2x1024xf32>
    %260 = vector.extract_strided_slice %259 {offsets = [0, 0], sizes = [2, 256], strides = [1, 1]} : vector<2x1024xf32> to vector<2x256xf32>
    %cst_107 = arith.constant 5.000000e-01 : f32
    %261 = vector.broadcast %cst_107 : f32 to vector<2x256xf32>
    %262 = arith.mulf %261, %260 : vector<2x256xf32>
    %263 = math.tanh %262 : vector<2x256xf32>
    %cst_108 = arith.constant 5.000000e-01 : f32
    %264 = vector.broadcast %cst_108 : f32 to vector<2x256xf32>
    %265 = arith.mulf %264, %263 : vector<2x256xf32>
    %cst_109 = arith.constant 5.000000e-01 : f32
    %266 = vector.broadcast %cst_109 : f32 to vector<2x256xf32>
    %267 = arith.addf %265, %266 : vector<2x256xf32>
    %268 = vector.extract_strided_slice %259 {offsets = [0, 256], sizes = [2, 256], strides = [1, 1]} : vector<2x1024xf32> to vector<2x256xf32>
    %cst_110 = arith.constant 5.000000e-01 : f32
    %269 = vector.broadcast %cst_110 : f32 to vector<2x256xf32>
    %270 = arith.mulf %269, %268 : vector<2x256xf32>
    %271 = math.tanh %270 : vector<2x256xf32>
    %cst_111 = arith.constant 5.000000e-01 : f32
    %272 = vector.broadcast %cst_111 : f32 to vector<2x256xf32>
    %273 = arith.mulf %272, %271 : vector<2x256xf32>
    %cst_112 = arith.constant 5.000000e-01 : f32
    %274 = vector.broadcast %cst_112 : f32 to vector<2x256xf32>
    %275 = arith.addf %273, %274 : vector<2x256xf32>
    %276 = vector.extract_strided_slice %259 {offsets = [0, 512], sizes = [2, 256], strides = [1, 1]} : vector<2x1024xf32> to vector<2x256xf32>
    %277 = math.tanh %276 : vector<2x256xf32>
    %278 = vector.extract_strided_slice %259 {offsets = [0, 768], sizes = [2, 256], strides = [1, 1]} : vector<2x1024xf32> to vector<2x256xf32>
    %cst_113 = arith.constant 5.000000e-01 : f32
    %279 = vector.broadcast %cst_113 : f32 to vector<2x256xf32>
    %280 = arith.mulf %279, %278 : vector<2x256xf32>
    %281 = math.tanh %280 : vector<2x256xf32>
    %cst_114 = arith.constant 5.000000e-01 : f32
    %282 = vector.broadcast %cst_114 : f32 to vector<2x256xf32>
    %283 = arith.mulf %282, %281 : vector<2x256xf32>
    %cst_115 = arith.constant 5.000000e-01 : f32
    %284 = vector.broadcast %cst_115 : f32 to vector<2x256xf32>
    %285 = arith.addf %283, %284 : vector<2x256xf32>
    %286 = arith.mulf %275, %206 : vector<2x256xf32>
    %287 = arith.mulf %267, %277 : vector<2x256xf32>
    %288 = arith.addf %286, %287 : vector<2x256xf32>
    %289 = math.tanh %288 : vector<2x256xf32>
    %290 = arith.mulf %285, %289 : vector<2x256xf32>
    %291 = arith.truncf %290 : vector<2x256xf32> to vector<2x256xbf16>
    %c0_116 = arith.constant 0 : index
    %c0_117 = arith.constant 0 : index
    %292 = vector.load %arg3[%c0_116, %c0_117] : memref<256x1024xbf16, #tpu.memory_space<vmem>>, vector<256x1024xbf16>
    %cst_118 = arith.constant dense<0.000000e+00> : vector<2x1024xf32>
    %293 = tpu.matmul %291, %292, %cst_118 {dimension_numbers = #tpu.dot_dimension_numbers<[1], [0], [0], [1], [0, 0, 1, 1], [], []>} : vector<2x256xbf16>, vector<256x1024xbf16>, vector<2x1024xf32> -> vector<2x1024xf32>
    %294 = arith.truncf %248 : vector<2x256xf32> to vector<2x256xbf16>
    %c0_119 = arith.constant 0 : index
    %c0_120 = arith.constant 0 : index
    %295 = vector.load %arg4[%c0_119, %c0_120] : memref<256x1024xbf16, #tpu.memory_space<vmem>>, vector<256x1024xbf16>
    %cst_121 = arith.constant dense<0.000000e+00> : vector<2x1024xf32>
    %296 = tpu.matmul %294, %295, %cst_121 {dimension_numbers = #tpu.dot_dimension_numbers<[1], [0], [0], [1], [0, 0, 1, 1], [], []>} : vector<2x256xbf16>, vector<256x1024xbf16>, vector<2x1024xf32> -> vector<2x1024xf32>
    %297 = arith.addf %293, %296 : vector<2x1024xf32>
    %298 = vector.broadcast %1 : vector<1x1024xf32> to vector<2x1024xf32>
    %299 = arith.addf %297, %298 : vector<2x1024xf32>
    %300 = vector.extract_strided_slice %299 {offsets = [0, 0], sizes = [2, 256], strides = [1, 1]} : vector<2x1024xf32> to vector<2x256xf32>
    %cst_122 = arith.constant 5.000000e-01 : f32
    %301 = vector.broadcast %cst_122 : f32 to vector<2x256xf32>
    %302 = arith.mulf %301, %300 : vector<2x256xf32>
    %303 = math.tanh %302 : vector<2x256xf32>
    %cst_123 = arith.constant 5.000000e-01 : f32
    %304 = vector.broadcast %cst_123 : f32 to vector<2x256xf32>
    %305 = arith.mulf %304, %303 : vector<2x256xf32>
    %cst_124 = arith.constant 5.000000e-01 : f32
    %306 = vector.broadcast %cst_124 : f32 to vector<2x256xf32>
    %307 = arith.addf %305, %306 : vector<2x256xf32>
    %308 = vector.extract_strided_slice %299 {offsets = [0, 256], sizes = [2, 256], strides = [1, 1]} : vector<2x1024xf32> to vector<2x256xf32>
    %cst_125 = arith.constant 5.000000e-01 : f32
    %309 = vector.broadcast %cst_125 : f32 to vector<2x256xf32>
    %310 = arith.mulf %309, %308 : vector<2x256xf32>
    %311 = math.tanh %310 : vector<2x256xf32>
    %cst_126 = arith.constant 5.000000e-01 : f32
    %312 = vector.broadcast %cst_126 : f32 to vector<2x256xf32>
    %313 = arith.mulf %312, %311 : vector<2x256xf32>
    %cst_127 = arith.constant 5.000000e-01 : f32
    %314 = vector.broadcast %cst_127 : f32 to vector<2x256xf32>
    %315 = arith.addf %313, %314 : vector<2x256xf32>
    %316 = vector.extract_strided_slice %299 {offsets = [0, 512], sizes = [2, 256], strides = [1, 1]} : vector<2x1024xf32> to vector<2x256xf32>
    %317 = math.tanh %316 : vector<2x256xf32>
    %318 = vector.extract_strided_slice %299 {offsets = [0, 768], sizes = [2, 256], strides = [1, 1]} : vector<2x1024xf32> to vector<2x256xf32>
    %cst_128 = arith.constant 5.000000e-01 : f32
    %319 = vector.broadcast %cst_128 : f32 to vector<2x256xf32>
    %320 = arith.mulf %319, %318 : vector<2x256xf32>
    %321 = math.tanh %320 : vector<2x256xf32>
    %cst_129 = arith.constant 5.000000e-01 : f32
    %322 = vector.broadcast %cst_129 : f32 to vector<2x256xf32>
    %323 = arith.mulf %322, %321 : vector<2x256xf32>
    %cst_130 = arith.constant 5.000000e-01 : f32
    %324 = vector.broadcast %cst_130 : f32 to vector<2x256xf32>
    %325 = arith.addf %323, %324 : vector<2x256xf32>
    %326 = arith.mulf %315, %246 : vector<2x256xf32>
    %327 = arith.mulf %307, %317 : vector<2x256xf32>
    %328 = arith.addf %326, %327 : vector<2x256xf32>
    %329 = math.tanh %328 : vector<2x256xf32>
    %330 = arith.mulf %325, %329 : vector<2x256xf32>
    %c4_i32 = arith.constant 4 : i32
    %331 = arith.truncf %330 : vector<2x256xf32> to vector<2x256xbf16>
    %c0_131 = arith.constant 0 : index
    %c0_132 = arith.constant 0 : index
    %332 = vector.load %arg7[%c0_131, %c0_132] : memref<256x768xbf16, #tpu.memory_space<vmem>>, vector<256x768xbf16>
    %cst_133 = arith.constant dense<0.000000e+00> : vector<2x768xf32>
    %333 = tpu.matmul %331, %332, %cst_133 {dimension_numbers = #tpu.dot_dimension_numbers<[1], [0], [0], [1], [0, 0, 1, 1], [], []>} : vector<2x256xbf16>, vector<256x768xbf16>, vector<2x768xf32> -> vector<2x768xf32>
    %c0_134 = arith.constant 0 : index
    %c0_135 = arith.constant 0 : index
    %334 = vector.load %arg8[%c0_134, %c0_135] : memref<1x768xf32, #tpu.memory_space<vmem>>, vector<1x768xf32>
    %335 = vector.broadcast %334 : vector<1x768xf32> to vector<2x768xf32>
    %336 = arith.addf %333, %335 : vector<2x768xf32>
    %c0_136 = arith.constant 0 : index
    %c0_137 = arith.constant 0 : index
    %337 = vector.load %arg9[%c0_136, %c0_137] : memref<2x768xf32, #tpu.memory_space<vmem>>, vector<2x768xf32>
    tpu.vector_store %arg9[%c0_136, %c0_137], %336 {strides = array<i32>} : memref<2x768xf32, #tpu.memory_space<vmem>>, vector<2x768xf32>,
    return
  }
}

</mosaic_0001>

<bundles_post_ra>
// kernel: prednet_forward.4
= control target key start
LH: loop header
LB: loop body
LE: loop exit
PB: predicated region body
PF: predicated region fallthrough
CT: control target
= control target key end

     0   :  { %s1034_s12 = smov 0   ;;  %s1119_s0 = inlined_call_operand.vmem [shape: bf16[2,256,108], index: 0, kind: input, shape index: {}]   ;;  %s1120_s1 = inlined_call_operand.vmem [shape: bf16[108,32], index: 1, kind: input, shape index: {}]   ;;  %s1121_s2 = inlined_call_operand.vmem [shape: f32[1,256], index: 2, kind: input, shape index: {}]   ;;  %s1122_s3 = inlined_call_operand.vmem [shape: bf16[2,8,256], index: 3, kind: output, shape index: {}]  }
   0x1 LB: > { %s826_s13 = sadd.s32 4294967295, %s1007_s12   ;;  %p830_p0 = scmp.ge.s32.totalorder %s1007_s12, 1  ;;  %s1007_s12 = sphi %s1034_s12, %s13_s12  }
   0x2   : > { %p137_p1 = scmp.lt.s32.totalorder %s1007_s12, 3 }
   0x4   : > { %p138_p2 = pnand %p830_p0, %p137_p1 }
   0x5   : > { %v978_v0 = vld [vmem:[%s1120_s1] sm:$0xff] (!%p138_p2)   ;;  %v979_v1 = vld [vmem:[%s1120_s1 + $0x8] sm:$0xff] (!%p138_p2)   ;;  %p161_p3 = scmp.lt.s32.totalorder (!%p138_p2), %s826_s13, 1  ;;  %v980_v2 = vld [vmem:[%s1120_s1 + $0x10] sm:$0xff] (!%p138_p2)   ;;  %vm339_vm0 = vcmask (!%p138_p2), 883712   ;;  %vm388_vm1 = vcmask (!%p138_p2), 1045504   ;;  %v582_v39 = vlaneseq (!%p138_p2) }
   0x6   : > { %141 = sbr.rel (%p138_p2) target bundleno = 418 (0x1a2), region = 32  ;;  %903 = vmatprep.subr.bf16.mxu0 (!%p138_p2), %v978_v0  ;;  %949 = vmatprep.subr.bf16.mxu1 (!%p138_p2), %v978_v0  ;;  %v981_v3 = vld [vmem:[%s1120_s1 + $0x18] sm:$0xff] (!%p138_p2)   ;;  %v982_v6 = vld [vmem:[%s1120_s1 + $0x20] sm:$0xff] (!%p138_p2)   ;;  %v983_v7 = vld [vmem:[%s1120_s1 + $0x28] sm:$0xff] (!%p138_p2)   ;;  %v1009_v37 = vmov (!%p138_p2), 1983009808  }
   0x7   : > { %904 = vmatpush3.bf16.msra.mxu0 (!%p138_p2), %v978_v0  ;;  %956 = vmatpush3.bf16.msra.mxu1 (!%p138_p2), %v978_v0  ;;  %v984_v8 = vld [vmem:[%s1120_s1 + $0x30] sm:$0x3f] (!%p138_p2)   ;;  %v580_v38 = vunpack.c.l.s4 (!%p138_p2), %v1009_v37  ;;  %v1103_v47 = vshrl.u32 (!%p138_p2), %v582_v39, 7  ;;  %s1011_s5 = smov (!%p138_p2), 64   ;;  %s1012_s6 = smov (!%p138_p2), 32   ;;  %vm737_vm2 = vcmask (!%p138_p2), 261120  }
   0x8   : > { %905 = vmatprep.subr.bf16.mxu0 (!%p138_p2), %v979_v1  ;;  %950 = vmatprep.subr.bf16.mxu1 (!%p138_p2), %v979_v1  ;;  %v390_v9 = vsel (!%p138_p2), %vm388_vm1, %v984_v8, 0  ;;  %s1013_s7 = smov (!%p138_p2), 96   ;;  %vm739_vm3 = vcmask (!%p138_p2), 523264   ;;  %vm741_vm4 = vcmask (!%p138_p2), 785408  }
   0x9   : > { %v581_v46 = vunpack.c.0.s8 (!%p138_p2), %v580_v38 }
   0xb   : > { %906 = vmatpush3.bf16.msra.mxu0 (!%p138_p2), %v979_v1  ;;  %957 = vmatpush3.bf16.msra.mxu1 (!%p138_p2), %v979_v1  ;;  %v584_v56 = vsub.s32 (!%p138_p2), %v581_v46, %v1103_v47 }
   0xc   : > { %907 = vmatprep.subr.bf16.mxu0 (!%p138_p2), %v980_v2  ;;  %951 = vmatprep.subr.bf16.mxu1 (!%p138_p2), %v980_v2 }
   0xd   : > { %s1124_s13 = smov (!%p161_p3, %s826_s13), 1 }
   0xe   : > { %s877_s20 = sshll.u32 %s1124_s13, 7  ;;  %s878_s10 = sshll.u32 %s1124_s13, 3 }
   0xf   : > { %s1060_s25 = scalar_lea.vmem %s1119_s0, %s877_s20  ;;  %908 = vmatpush3.bf16.msra.mxu0 %v980_v2  ;;  %958 = vmatpush3.bf16.msra.mxu1 %v980_v2  ;;  %s170_s15 = scalar_lea.vmem %s1122_s3, %s878_s10 }
  0x10   : > { %v985_v4 = vld [vmem:[%s1060_s25] sm:$0xff]   ;;  %909 = vmatprep.subr.bf16.mxu0 %v981_v3  ;;  %952 = vmatprep.subr.bf16.mxu1 %v981_v3  ;;  %v987_v10 = vld [vmem:[%s1060_s25 + $0x8] sm:$0xff]   ;;  %v989_v12 = vld [vmem:[%s1060_s25 + $0x10] sm:$0xff]  }
  0x11   : > { %v986_v5 = vld [vmem:[%s1060_s25 + $0x40] sm:$0xff]   ;;  %917 = vmatprep.mubr.msk.bf16.mxu0 %vm339_vm0, %v985_v4  ;;  %v988_v11 = vld [vmem:[%s1060_s25 + $0x48] sm:$0xff]   ;;  %v990_v13 = vld [vmem:[%s1060_s25 + $0x50] sm:$0xff]  }
  0x12   : > { %933 = vmatprep.mubr.msk.bf16.mxu1 %vm339_vm0, %v986_v5  ;;  %v991_v14 = vld [vmem:[%s1060_s25 + $0x18] sm:$0xff]   ;;  %v993_v16 = vld [vmem:[%s1060_s25 + $0x20] sm:$0xff]   ;;  %v995_v18 = vld [vmem:[%s1060_s25 + $0x28] sm:$0xff]  }
  0x13   : > { %910 = vmatpush3.bf16.msra.mxu0 %v981_v3  ;;  %959 = vmatpush3.bf16.msra.mxu1 %v981_v3  ;;  %v992_v15 = vld [vmem:[%s1060_s25 + $0x58] sm:$0xff]   ;;  %v994_v17 = vld [vmem:[%s1060_s25 + $0x60] sm:$0xff]   ;;  %v996_v19 = vld [vmem:[%s1060_s25 + $0x68] sm:$0xff]  }
  0x14   : > { %911 = vmatprep.subr.bf16.mxu0 %v982_v6  ;;  %953 = vmatprep.subr.bf16.mxu1 %v982_v6  ;;  %v997_v20 = vld [vmem:[%s1060_s25 + $0x30] sm:$0xff]   ;;  %v999_v22 = vld [vmem:[%s1060_s25 + $0x38] sm:$0xff]  }
  0x15   : > { %v998_v21 = vld [vmem:[%s1060_s25 + $0x70] sm:$0xff]   ;;  %v1000_v23 = vld [vmem:[%s1060_s25 + $0x78] sm:$0xff]  }
  0x17   : > { %912 = vmatpush3.bf16.msra.mxu0 %v982_v6  ;;  %960 = vmatpush3.bf16.msra.mxu1 %v982_v6 }
  0x18   : > { %913 = vmatprep.subr.bf16.mxu0 %v983_v7  ;;  %954 = vmatprep.subr.bf16.mxu1 %v983_v7 }
  0x1b   : > { %914 = vmatpush3.bf16.msra.mxu0 %v983_v7  ;;  %961 = vmatpush3.bf16.msra.mxu1 %v983_v7 }
  0x1c   : > { %963 = vmatprep.subr.msk.bf16.mxu0 %vm388_vm1, %v984_v8  ;;  %964 = vmatprep.subr.msk.bf16.mxu1 %vm388_vm1, %v984_v8 }
  0x1f   : > { %916 = vmatpush3.bf16.msra.mxu0 %v390_v9  ;;  %962 = vmatpush3.bf16.msra.mxu1 %v390_v9 }
  0x22   : > { %918 = vmatmul.mubr.msk.bf16.vlgmr.msra.gmra.mrb[0].mxu0 %vm339_vm0, %v987_v10  ;;  %934 = vmatmul.mubr.msk.bf16.vlgmr.msra.gmra.mrb[0].mxu1 %vm339_vm0, %v988_v11 }
  0x23   : > { %921 = vmatprep.mubr.msk.bf16.mxu0 %vm339_vm0, %v989_v12  ;;  %937 = vmatprep.mubr.msk.bf16.mxu1 %vm339_vm0, %v990_v13 }
  0x2a   : > { %922 = vmatmul.mubr.msk.bf16.gmra.mrb[4].mxu0 %vm339_vm0, %v991_v14  ;;  %938 = vmatmul.mubr.msk.bf16.gmra.mrb[4].mxu1 %vm339_vm0, %v992_v15 }
  0x2b   : > { %925 = vmatprep.mubr.msk.bf16.mxu0 %vm339_vm0, %v993_v16  ;;  %941 = vmatprep.mubr.msk.bf16.mxu1 %vm339_vm0, %v994_v17 }
  0x32   : > { %926 = vmatmul.mubr.msk.bf16.gmra.mrb[8].mxu0 %vm339_vm0, %v995_v18  ;;  %942 = vmatmul.mubr.msk.bf16.gmra.mrb[8].mxu1 %vm339_vm0, %v996_v19 }
  0x33   : > { %929 = vmatprep.mubr.msk.bf16.mxu0 %vm339_vm0, %v997_v20  ;;  %945 = vmatprep.mubr.msk.bf16.mxu1 %vm339_vm0, %v998_v21 }
  0x3a   : > { %930 = vmatmul.mubr.msk.bf16.gmra.mrb[12].mxu0 %vm339_vm0, %v999_v22  ;;  %946 = vmatmul.mubr.msk.bf16.gmra.mrb[12].mxu1 %vm339_vm0, %v1000_v23 }
  0xf5   : > { %v919_v24 = vpop.f32.mrb[0].mxu0  ;;  %v935_v25 = vpop.f32.mrb[0].mxu1 }
  0xf6   : > { %v555_v26 = vmax.f32 %v919_v24, %v935_v25  ;;  %v426_v27 = vpop.f32.mrb[1].mxu0  ;;  %v490_v28 = vpop.f32.mrb[1].mxu1  ;;  %v1010_v25 = vmov 1934713408  }
  0xf7   : > { %v553_v29 = vmax.f32 %v426_v27, %v490_v28  ;;  %v920_v30 = vpop.f32.mrb[2].mxu0  ;;  %v936_v31 = vpop.f32.mrb[2].mxu1 }
  0xf8   : > { %v556_v32 = vmax.f32 %v920_v30, %v936_v31  ;;  %v429_v33 = vpop.f32.mrb[3].mxu0  ;;  %v493_v34 = vpop.f32.mrb[3].mxu1 }
  0xf9   : > { %v554_v35 = vmax.f32 %v429_v33, %v493_v34 }
  0xfa   : > { %v570_v36 = vmax.f32 %v555_v26, %v556_v32  ;;  %v644_v26 = vunpack.c.l.s4 %v1010_v25 }
  0xfb   : > { %v569_v40 = vmax.f32 %v553_v29, %v554_v35 }
  0xfc   : > { %v645_v35 = vunpack.c.0.s8 %v644_v26 }
  0xfd   : > { %v923_v41 = vpop.f32.mrb[4].mxu0  ;;  %v939_v42 = vpop.f32.mrb[4].mxu1 }
  0xfe   : > { %v559_v43 = vmax.f32 %v923_v41, %v939_v42  ;;  %v442_v44 = vpop.f32.mrb[5].mxu0  ;;  %v506_v45 = vpop.f32.mrb[5].mxu1 }
  0xff   : > { %v557_v48 = vmax.f32 %v442_v44, %v506_v45  ;;  %v924_v49 = vpop.f32.mrb[6].mxu0  ;;  %v940_v50 = vpop.f32.mrb[6].mxu1 }
 0x100   : > { %v560_v51 = vmax.f32 %v924_v49, %v940_v50  ;;  %v445_v52 = vpop.f32.mrb[7].mxu0  ;;  %v509_v53 = vpop.f32.mrb[7].mxu1 }
 0x101   : > { %v558_v54 = vmax.f32 %v445_v52, %v509_v53 }
 0x102   : > { %v572_v55 = vmax.f32 %v559_v43, %v560_v51  ;;  %v648_v43 = vsub.s32 %v645_v35, %v1103_v47 }
 0x103   : > { %v571_v57 = vmax.f32 %v557_v48, %v558_v54 }
 0x104   : > { %v593_v58 = vcombine.low %v570_v36, %v572_v55  ;;  %v594_v59 = vcombine.high %v570_v36, %v572_v55 }
 0x105   : > { %v577_v60 = vcombine.low %v569_v40, %v571_v57  ;;  %v578_v61 = vcombine.high %v569_v40, %v571_v57  ;;  %v927_v62 = vpop.f32.mrb[8].mxu0  ;;  %v943_v63 = vpop.f32.mrb[8].mxu1 }
 0x106   : > { %v601_v0 = vrot.slane %v593_v58, %v584_v56  ;;  %v608_v1 = vrot.slane %v594_v59, %v584_v56  ;;  %v563_v2 = vmax.f32 %v927_v62, %v943_v63  ;;  %v458_v3 = vpop.f32.mrb[9].mxu0  ;;  %v522_v4 = vpop.f32.mrb[9].mxu1 }
 0x107   : > { %v585_v5 = vrot.slane %v577_v60, %v584_v56  ;;  %v592_v6 = vrot.slane %v578_v61, %v584_v56  ;;  %v561_v7 = vmax.f32 %v458_v3, %v522_v4  ;;  %v928_v8 = vpop.f32.mrb[10].mxu0  ;;  %v944_v9 = vpop.f32.mrb[10].mxu1 }
 0x108   : > { %v564_v10 = vmax.f32 %v928_v8, %v944_v9  ;;  %v461_v11 = vpop.f32.mrb[11].mxu0  ;;  %v525_v12 = vpop.f32.mrb[11].mxu1 }
 0x109   : > { %v562_v13 = vmax.f32 %v461_v11, %v525_v12  ;;  %v642_v14 = vcombine.high %v585_v5, %v601_v0  ;;  %v641_v15 = vcombine.low %v585_v5, %v601_v0  ;;  %v658_v16 = vcombine.high %v592_v6, %v608_v1 }
 0x10a   : > { %v574_v17 = vmax.f32 %v563_v2, %v564_v10  ;;  %v657_v18 = vcombine.low %v592_v6, %v608_v1  ;;  %v754_v5 = vsub.s32 1, %v1103_v47  ;;  %v750_v6 = vsub.s32 0, %v1103_v47 }
 0x10b   : > { %v573_v19 = vmax.f32 %v561_v7, %v562_v13  ;;  %v656_v51 = vrot.slane %v642_v14, %v648_v43  ;;  %v649_v52 = vrot.slane %v641_v15, %v648_v43  ;;  %v672_v53 = vrot.slane %v658_v16, %v648_v43  ;;  %v746_v7 = vld [vmem:[%s1121_s2] sm:$0x3] }
 0x10c   : > { %v665_v59 = vrot.slane %v657_v18, %v648_v43  ;;  %v755_v12 = vrot.slane %v746_v7, %v754_v5  ;;  %v751_v13 = vrot.slane %v746_v7, %v750_v6 }
 0x10d   : > { %v931_v20 = vpop.f32.mrb[12].mxu0  ;;  %v947_v21 = vpop.f32.mrb[12].mxu1 }
 0x10e   : > { %v567_v22 = vmax.f32 %v931_v20, %v947_v21  ;;  %v474_v23 = vpop.f32.mrb[13].mxu0  ;;  %v538_v24 = vpop.f32.mrb[13].mxu1 }
 0x10f   : > { %v565_v27 = vmax.f32 %v474_v23, %v538_v24  ;;  %v932_v28 = vpop.f32.mrb[14].mxu0  ;;  %v948_v29 = vpop.f32.mrb[14].mxu1 }
 0x110   : > { %v568_v30 = vmax.f32 %v932_v28, %v948_v29  ;;  %v477_v31 = vpop.f32.mrb[15].mxu0  ;;  %v541_v32 = vpop.f32.mrb[15].mxu1 }
 0x111   : > { %v566_v33 = vmax.f32 %v477_v31, %v541_v32 }
 0x112   : > { %v576_v34 = vmax.f32 %v567_v22, %v568_v30 }
 0x113   : > { %v575_v36 = vmax.f32 %v565_v27, %v566_v33 }
 0x114   : > { %v625_v37 = vcombine.low %v574_v17, %v576_v34  ;;  %v626_v38 = vcombine.high %v574_v17, %v576_v34 }
 0x115   : > { %v609_v39 = vcombine.low %v573_v19, %v575_v36  ;;  %v610_v40 = vcombine.high %v573_v19, %v575_v36 }
 0x116   : > { %v633_v41 = vrot.slane %v625_v37, %v584_v56  ;;  %v640_v42 = vrot.slane %v626_v38, %v584_v56 }
 0x117   : > { %v617_v44 = vrot.slane %v609_v39, %v584_v56  ;;  %v624_v45 = vrot.slane %v610_v40, %v584_v56 }
 0x119   : > { %v674_v46 = vcombine.high %v617_v44, %v633_v41  ;;  %v673_v48 = vcombine.low %v617_v44, %v633_v41  ;;  %v690_v49 = vcombine.high %v624_v45, %v640_v42  ;;  %v689_v50 = vcombine.low %v624_v45, %v640_v42 }
 0x11b   : > { %v688_v54 = vrot.slane %v674_v46, %v648_v43  ;;  %v681_v55 = vrot.slane %v673_v48, %v648_v43  ;;  %v704_v57 = vrot.slane %v690_v49, %v648_v43  ;;  %v697_v58 = vrot.slane %v689_v50, %v648_v43 }
 0x11d   : > { %v707_v60 = vcombine.low %v656_v51, %v688_v54  ;;  %v706_v61 = vcombine.high %v649_v52, %v681_v55  ;;  %v705_v62 = vcombine.low %v649_v52, %v681_v55  ;;  %v711_v63 = vcombine.low %v672_v53, %v704_v57 }
 0x11e   : > { %v710_v0 = vcombine.high %v665_v59, %v697_v58  ;;  %v712_v1 = vcombine.high %v672_v53, %v704_v57  ;;  %v708_v2 = vcombine.high %v656_v51, %v688_v54  ;;  %v709_v56 = vcombine.low %v665_v59, %v697_v58 }
 0x11f   : > { %718 = vrot.lane.b32.xlu1 %v707_v60, %s1011_s5  ;;  %714 = vrot.lane.b32.xlu0 %v706_v61, %s1012_s6 }
 0x123   : > { %730 = vrot.lane.b32.xlu1 %v711_v63, %s1011_s5  ;;  %726 = vrot.lane.b32.xlu0 %v710_v0, %s1012_s6 }
 0x127   : > { %734 = vrot.lane.b32.xlu1 %v712_v1, %s1013_s7  ;;  %722 = vrot.lane.b32.xlu0 %v708_v2, %s1013_s7 }
 0x191   : > { %v719_v3 = vpop.permute.xlu1 %718  ;;  %v715_v4 = vpop.permute.xlu0 %714 }
 0x192   : > { %v738_v10 = vsel %vm737_vm2, %v705_v62, %v715_v4 }
 0x193   : > { %v740_v17 = vsel %vm739_vm3, %v738_v10, %v719_v3 }
 0x195   : > { %v731_v8 = vpop.permute.xlu1 %730  ;;  %v727_v9 = vpop.permute.xlu0 %726 }
 0x196   : > { %v743_v11 = vsel %vm737_vm2, %v709_v56, %v727_v9 }
 0x197   : > { %v744_v15 = vsel %vm739_vm3, %v743_v11, %v731_v8 }
 0x199   : > { %v735_v14 = vpop.permute.xlu1 %734  ;;  %v723_v16 = vpop.permute.xlu0 %722 }
 0x19a   : > { %v745_v18 = vsel %vm741_vm4, %v744_v15, %v735_v14  ;;  %v742_v19 = vsel %vm741_vm4, %v740_v17, %v723_v16 }
 0x19b   : > { %v759_v47 = vadd.f32 %v755_v12, %v745_v18  ;;  %v758_v20 = vadd.f32 %v751_v13, %v742_v19 }
 0x19d   : > { %v761_v21 = vmax.f32 %v759_v47, 0.0  ;;  %v760_v22 = vmax.f32 %v758_v20, 0.0 }
 0x19f   : > { %v879_v23 = vpack.c.bf16 %v761_v21, %v760_v22 }
 0x1a1   : > { %770 = vst [vmem:[%s170_s15] sm:$0xff] %v879_v23 }
 0x1a2 PF: > { %s13_s12 = sadd.s32 1, %s1007_s12  }
 0x1a3   : > { %p10_p4 = scmp.ge.s32.totalorder %s13_s12, 4  }
 0x1a5   :  { %12 = sbr.rel (!%p10_p4) target bundleno = 1 (0x1), region = 62 }

// kernel: prednet_forward.5
= control target key start
LH: loop header
LB: loop body
LE: loop exit
PB: predicated region body
PF: predicated region fallthrough
CT: control target
= control target key end

     0   :  { %s885_s12 = smov 0   ;;  %s981_s0 = inlined_call_operand.vmem [shape: bf16[2,64,288], index: 0, kind: input, shape index: {}]   ;;  %s982_s1 = inlined_call_operand.vmem [shape: bf16[288,64], index: 1, kind: input, shape index: {}]   ;;  %s983_s2 = inlined_call_operand.vmem [shape: f32[1,256], index: 2, kind: input, shape index: {}]   ;;  %s984_s3 = inlined_call_operand.vmem [shape: bf16[2,4,256], index: 3, kind: output, shape index: {}]  }
   0x1 LB: > { %s685_s13 = sadd.s32 4294967295, %s859_s12   ;;  %p689_p0 = scmp.ge.s32.totalorder %s859_s12, 1  ;;  %s859_s12 = sphi %s885_s12, %s13_s12  }
   0x2   : > { %p137_p1 = scmp.lt.s32.totalorder %s859_s12, 3 }
   0x4   : > { %p138_p2 = pnand %p689_p0, %p137_p1 }
   0x5   : > { %v819_v0 = vld [vmem:[%s982_s1 + $0x40] sm:$0xff] (!%p138_p2)   ;;  %v821_v2 = vld [vmem:[%s982_s1 + $0x48] sm:$0xff] (!%p138_p2)   ;;  %p161_p3 = scmp.lt.s32.totalorder (!%p138_p2), %s685_s13, 1  ;;  %v823_v4 = vld [vmem:[%s982_s1 + $0x50] sm:$0xff] (!%p138_p2)   ;;  %vm392_vm0 = vcmask (!%p138_p2), 261120   ;;  %s864_s29 = smov (!%p138_p2), 64  }
   0x6   : > { %141 = sbr.rel (%p138_p2) target bundleno = 416 (0x1a0), region = 32  ;;  %v820_v1 = vld [vmem:[%s982_s1] sm:$0xff] (!%p138_p2)   ;;  %732 = vmatprep.subr.bf16.mxu0 (!%p138_p2), %v819_v0  ;;  %790 = vmatprep.subr.bf16.mxu1 (!%p138_p2), %v819_v0  ;;  %v822_v3 = vld [vmem:[%s982_s1 + $0x8] sm:$0xff] (!%p138_p2)   ;;  %v824_v5 = vld [vmem:[%s982_s1 + $0x10] sm:$0xff] (!%p138_p2)   ;;  %vm597_vm1 = vcmask (!%p138_p2), 523264  }
   0x7   : > { %733 = vmatpush3.bf16.msra.mxu0 (!%p138_p2), %v820_v1  ;;  %798 = vmatpush3.bf16.msra.mxu1 (!%p138_p2), %v820_v1  ;;  %v825_v6 = vld [vmem:[%s982_s1 + $0x58] sm:$0xff] (!%p138_p2)   ;;  %v827_v8 = vld [vmem:[%s982_s1 + $0x60] sm:$0xff] (!%p138_p2)   ;;  %v829_v10 = vld [vmem:[%s982_s1 + $0x68] sm:$0xff] (!%p138_p2)  }
   0x8   : > { %734 = vmatprep.subr.bf16.mxu0 (!%p138_p2), %v821_v2  ;;  %791 = vmatprep.subr.bf16.mxu1 (!%p138_p2), %v821_v2  ;;  %v826_v7 = vld [vmem:[%s982_s1 + $0x18] sm:$0xff] (!%p138_p2)   ;;  %v828_v9 = vld [vmem:[%s982_s1 + $0x20] sm:$0xff] (!%p138_p2)   ;;  %v830_v13 = vld [vmem:[%s982_s1 + $0x28] sm:$0xff] (!%p138_p2)  }
   0x9   : > { %v831_v14 = vld [vmem:[%s982_s1 + $0x70] sm:$0xff] (!%p138_p2)   ;;  %v833_v16 = vld [vmem:[%s982_s1 + $0x78] sm:$0xff] (!%p138_p2)   ;;  %v841_v18 = vld [vmem:[%s982_s1 + $0x80] sm:$0xff] (!%p138_p2)  }
   0xa   : > { %v832_v15 = vld [vmem:[%s982_s1 + $0x30] sm:$0xff] (!%p138_p2)   ;;  %v834_v17 = vld [vmem:[%s982_s1 + $0x38] sm:$0xff] (!%p138_p2)   ;;  %v842_v22 = vld [vmem:[%s982_s1 + $0x88] sm:$0xff] (!%p138_p2)  }
   0xb   : > { %735 = vmatpush3.bf16.msra.mxu0 (!%p138_p2), %v822_v3  ;;  %799 = vmatpush3.bf16.msra.mxu1 (!%p138_p2), %v822_v3 }
   0xc   : > { %736 = vmatprep.subr.bf16.mxu0 (!%p138_p2), %v823_v4  ;;  %792 = vmatprep.subr.bf16.mxu1 (!%p138_p2), %v823_v4  ;;  %v861_v4 = vmov (!%p138_p2), 1983009808  }
   0xd   : > { %s986_s13 = smov (!%p161_p3, %s685_s13), 1 }
   0xe   : > { %s806_s28 = smul.u32 96, %s986_s13  ;;  %s731_s5 = sshll.u32 %s986_s13, 2 }
   0xf   : > { %737 = vmatpush3.bf16.msra.mxu0 %v824_v5  ;;  %800 = vmatpush3.bf16.msra.mxu1 %v824_v5  ;;  %v557_v5 = vunpack.c.l.s4 %v861_v4 }
  0x10   : > { %738 = vmatprep.subr.bf16.mxu0 %v825_v6  ;;  %793 = vmatprep.subr.bf16.mxu1 %v825_v6  ;;  %s926_s8 = scalar_lea.vmem %s981_s0, %s806_s28  ;;  %v559_v6 = vlaneseq }
  0x11   : > { %v837_v11 = vld [vmem:[%s926_s8 + $0x4] ss:$12 sps:$4 sm:$0xff]   ;;  %v840_v12 = vld [vmem:[%s926_s8 + $0x4c] ss:$12 sps:$4 sm:$0xff]   ;;  %v838_v20 = vld [vmem:[%s926_s8 + $0x48] ss:$12 sps:$4 sm:$0xff]  }
  0x12   : > { %437 = vmatprep.mubr.bf16.mxu0 %v837_v11  ;;  %461 = vmatprep.mubr.bf16.mxu1 %v840_v12  ;;  %v835_v19 = vld [vmem:[%s926_s8] ss:$12 sps:$4 sm:$0xff]   ;;  %v843_v21 = vld [vmem:[%s926_s8 + $0x1c] ss:$12 sps:$4 sm:$0xff]   ;;  %v846_v24 = vld [vmem:[%s926_s8 + $0x18] ss:$12 sps:$4 sm:$0xff]  }
  0x13   : > { %739 = vmatpush3.bf16.msra.mxu0 %v826_v7  ;;  %801 = vmatpush3.bf16.msra.mxu1 %v826_v7  ;;  %v845_v23 = vld [vmem:[%s926_s8 + $0x8] ss:$12 sps:$4 sm:$0xff]   ;;  %v847_v25 = vld [vmem:[%s926_s8 + $0x20] ss:$12 sps:$4 sm:$0xff]   ;;  %v850_v27 = vld [vmem:[%s926_s8 + $0x38] ss:$12 sps:$4 sm:$0xff]  }
  0x14   : > { %740 = vmatprep.subr.bf16.mxu0 %v827_v8  ;;  %794 = vmatprep.subr.bf16.mxu1 %v827_v8  ;;  %v848_v26 = vld [vmem:[%s926_s8 + $0x34] ss:$12 sps:$4 sm:$0xff]   ;;  %v851_v28 = vld [vmem:[%s926_s8 + $0x30] ss:$12 sps:$4 sm:$0xff]  }
  0x15   : > { %v852_v29 = vld [vmem:[%s926_s8 + $0x50] ss:$12 sps:$4 sm:$0xff]   ;;  %s170_s8 = scalar_lea.vmem %s984_s3, %s731_s5 }
  0x17   : > { %741 = vmatpush3.bf16.msra.mxu0 %v828_v9  ;;  %802 = vmatpush3.bf16.msra.mxu1 %v828_v9 }
  0x18   : > { %742 = vmatprep.subr.bf16.mxu0 %v829_v10  ;;  %795 = vmatprep.subr.bf16.mxu1 %v829_v10 }
  0x1b   : > { %743 = vmatpush3.bf16.msra.mxu0 %v830_v13  ;;  %803 = vmatpush3.bf16.msra.mxu1 %v830_v13  ;;  %v558_v13 = vunpack.c.0.s8 %v557_v5 }
  0x1c   : > { %744 = vmatprep.subr.bf16.mxu0 %v831_v14  ;;  %796 = vmatprep.subr.bf16.mxu1 %v831_v14  ;;  %v560_v14 = vshrl.u32 %v559_v6, 7 }
  0x1f   : > { %745 = vmatpush3.bf16.msra.mxu0 %v832_v15  ;;  %804 = vmatpush3.bf16.msra.mxu1 %v832_v15 }
  0x20   : > { %746 = vmatprep.subr.bf16.mxu0 %v833_v16  ;;  %797 = vmatprep.subr.bf16.mxu1 %v833_v16 }
  0x23   : > { %747 = vmatpush3.bf16.msra.mxu0 %v834_v17  ;;  %805 = vmatpush3.bf16.msra.mxu1 %v834_v17 }
  0x24   : > { %778 = vmatprep.subr.bf16.mxu1 %v841_v18 }
  0x26   : > { %438 = vmatmul.mubr.bf16.vlgmr.msra.gmra.mrb[0].mxu0 %v835_v19  ;;  %462 = vmatmul.mubr.bf16.vlgmr.msra.gmra.mrb[0].mxu1 %v838_v20 }
  0x27   : > { %779 = vmatpush3.bf16.msra.mxu1 %v841_v18  ;;  %445 = vmatprep.mubr.bf16.mxu0 %v843_v21  ;;  %v862_v18 = vmov 1934713408  }
  0x28   : > { %780 = vmatprep.subr.bf16.mxu1 %v842_v22  ;;  %782 = vmatprep.mubr.msk.bf16.mxu1 %vm392_vm0, %v845_v23  ;;  %v574_v19 = vunpack.c.l.s4 %v862_v18  ;;  %v561_v23 = vsub.s32 %v558_v13, %v560_v14 }
  0x2b   : > { %781 = vmatpush3.bf16.msra.mxu1 %v842_v22 }
  0x2e   : > { %446 = vmatmul.mubr.bf16.gmra.mrb[4].mxu0 %v846_v24  ;;  %783 = vmatmul.mubr.msk.bf16.vlgmr.msra.gmra.mrb[4].mxu1 %vm392_vm0, %v847_v25 }
  0x2f   : > { %453 = vmatprep.mubr.bf16.mxu0 %v848_v26  ;;  %786 = vmatprep.mubr.msk.bf16.mxu1 %vm392_vm0, %v850_v27  ;;  %v575_v27 = vunpack.c.0.s8 %v574_v19 }
  0x36   : > { %454 = vmatmul.mubr.bf16.gmra.mrb[8].mxu0 %v851_v28  ;;  %787 = vmatmul.mubr.msk.bf16.gmra.mrb[8].mxu1 %vm392_vm0, %v852_v29 }
  0xf9   : > { %v748_v30 = vpop.f32.mrb[0].mxu0  ;;  %v766_v31 = vpop.f32.mrb[0].mxu1 }
  0xfa   : > { %v749_v32 = vpop.f32.mrb[1].mxu0  ;;  %v767_v33 = vpop.f32.mrb[1].mxu1 }
  0xfb   : > { %v750_v34 = vadd.f32 %v749_v32, %v748_v30  ;;  %v768_v35 = vadd.f32 %v767_v33, %v766_v31  ;;  %v751_v36 = vpop.f32.mrb[2].mxu0  ;;  %v769_v37 = vpop.f32.mrb[2].mxu1  ;;  %v578_v31 = vsub.s32 %v575_v27, %v560_v14 }
  0xfc   : > { %v752_v38 = vpop.f32.mrb[3].mxu0  ;;  %v770_v39 = vpop.f32.mrb[3].mxu1 }
  0xfd   : > { %v753_v40 = vadd.f32 %v752_v38, %v751_v36  ;;  %v771_v41 = vadd.f32 %v770_v39, %v769_v37  ;;  %v863_v36 = vmov 0.0   ;;  %v604_v39 = vsub.s32 0, %v560_v14 }
 0x101   : > { %v754_v42 = vpop.f32.mrb[4].mxu0  ;;  %v784_v43 = vpop.f32.mrb[4].mxu1 }
 0x102   : > { %v755_v44 = vpop.f32.mrb[5].mxu0  ;;  %v504_v45 = vpop.f32.mrb[5].mxu1 }
 0x103   : > { %v756_v46 = vadd.f32 %v755_v44, %v754_v42  ;;  %v505_v47 = vadd.f32 %v750_v34, %v504_v45  ;;  %v757_v48 = vpop.f32.mrb[6].mxu0  ;;  %v785_v49 = vpop.f32.mrb[6].mxu1 }
 0x104   : > { %v758_v50 = vpop.f32.mrb[7].mxu0  ;;  %v507_v51 = vpop.f32.mrb[7].mxu1 }
 0x105   : > { %v513_v52 = vadd.f32 %v784_v43, %v756_v46  ;;  %v759_v53 = vadd.f32 %v758_v50, %v757_v48  ;;  %v508_v54 = vadd.f32 %v753_v40, %v507_v51  ;;  %v600_v40 = vld [vmem:[%s983_s2] sm:$0x3] }
 0x106   : > { %v605_v42 = vrot.slane %v600_v40, %v604_v39 }
 0x107   : > { %v516_v55 = vadd.f32 %v785_v49, %v759_v53 }
 0x109   : > { %v760_v56 = vpop.f32.mrb[8].mxu0  ;;  %v788_v57 = vpop.f32.mrb[8].mxu1 }
 0x10a   : > { %v529_v58 = vadd.f32 %v788_v57, %v768_v35  ;;  %v761_v59 = vpop.f32.mrb[9].mxu0  ;;  %v520_v60 = vpop.f32.mrb[9].mxu1 }
 0x10b   : > { %v762_v61 = vadd.f32 %v761_v59, %v760_v56  ;;  %v763_v62 = vpop.f32.mrb[10].mxu0  ;;  %v789_v63 = vpop.f32.mrb[10].mxu1 }
 0x10c   : > { %v537_v0 = vmax.f32 %v513_v52, %v529_v58  ;;  %v532_v1 = vadd.f32 %v789_v63, %v771_v41  ;;  %v764_v2 = vpop.f32.mrb[11].mxu0  ;;  %v523_v3 = vpop.f32.mrb[11].mxu1  ;;  %v608_v41 = vsub.s32 1, %v560_v14 }
 0x10d   : > { %v521_v7 = vadd.f32 %v762_v61, %v520_v60  ;;  %v765_v8 = vadd.f32 %v764_v2, %v763_v62 }
 0x10e   : > { %v538_v9 = vmax.f32 %v516_v55, %v532_v1  ;;  %v545_v10 = vcombine.high %v537_v0, %v537_v0  ;;  %v609_v45 = vrot.slane %v600_v40, %v608_v41 }
 0x10f   : > { %v535_v11 = vmax.f32 %v505_v47, %v521_v7  ;;  %v524_v12 = vadd.f32 %v765_v8, %v523_v3 }
 0x110   : > { %v546_v16 = vcombine.high %v538_v9, %v538_v9  ;;  %v553_v20 = vmax.f32 %v537_v0, %v545_v10 }
 0x111   : > { %v543_v15 = vcombine.high %v535_v11, %v535_v11  ;;  %v536_v17 = vmax.f32 %v508_v54, %v524_v12 }
 0x112   : > { %v554_v25 = vmax.f32 %v538_v9, %v546_v16 }
 0x113   : > { %v551_v21 = vmax.f32 %v535_v11, %v543_v15  ;;  %v544_v22 = vcombine.high %v536_v17, %v536_v17 }
 0x115   : > { %v555_v24 = vcombine.low %v551_v21, %v553_v20  ;;  %v552_v26 = vmax.f32 %v536_v17, %v544_v22 }
 0x117   : > { %v563_v28 = vcombine.low %v552_v26, %v554_v25  ;;  %v562_v29 = vrot.slane %v555_v24, %v561_v23 }
 0x119   : > { %v570_v30 = vrot.slane %v563_v28, %v561_v23 }
 0x11b   : > { %v571_v32 = vcombine.low %v562_v29, %v570_v30  ;;  %v572_v33 = vcombine.high %v562_v29, %v570_v30 }
 0x11d   : > { %v579_v34 = vrot.slane %v571_v32, %v578_v31  ;;  %v586_v35 = vrot.slane %v572_v33, %v578_v31 }
 0x11f   : > { %v587_v37 = vcombine.high %v579_v34, %v863_v36  ;;  %v588_v38 = vcombine.high %v586_v35, %v863_v36 }
 0x121   : > { %590 = vrot.lane.b32.xlu0 %v587_v37, %s864_s29 }
 0x125   : > { %594 = vrot.lane.b32.xlu0 %v588_v38, %s864_s29 }
 0x193   : > { %v591_v43 = vpop.permute.xlu0 %590 }
 0x194   : > { %v598_v44 = vsel %vm597_vm1, %v579_v34, %v591_v43 }
 0x195   : > { %v612_v46 = vadd.f32 %v605_v42, %v598_v44 }
 0x197   : > { %v595_v47 = vpop.permute.xlu0 %594  ;;  %v614_v50 = vmax.f32 %v612_v46, 0.0 }
 0x198   : > { %v599_v48 = vsel %vm597_vm1, %v586_v35, %v595_v47 }
 0x199   : > { %v613_v49 = vadd.f32 %v609_v45, %v599_v48 }
 0x19b   : > { %v615_v51 = vmax.f32 %v613_v49, 0.0 }
 0x19d   : > { %v727_v52 = vpack.c.bf16 %v615_v51, %v614_v50 }
 0x19f   : > { %728 = vst.sshfl [vmem:[%s170_s8] sm:$0x33 pattern:$0x76325410] %v727_v52 }
 0x1a0 PF: > { %s13_s12 = sadd.s32 1, %s859_s12  }
 0x1a1   : > { %p10_p4 = scmp.ge.s32.totalorder %s13_s12, 4  }
 0x1a3   :  { %12 = sbr.rel (!%p10_p4) target bundleno = 1 (0x1), region = 62 }

// kernel: prednet_forward.6
= control target key start
LH: loop header
LB: loop body
LE: loop exit
PB: predicated region body
PF: predicated region fallthrough
CT: control target
= control target key end

     0   :  { %s944_s12 = smov 0   ;;  %s1086_s0 = inlined_call_operand.vmem [shape: bf16[2,16,576], index: 0, kind: input, shape index: {}]   ;;  %s1087_s1 = inlined_call_operand.vmem [shape: bf16[576,128], index: 1, kind: input, shape index: {}]   ;;  %s1088_s2 = inlined_call_operand.vmem [shape: f32[1,256], index: 2, kind: input, shape index: {}]   ;;  %s1089_s3 = inlined_call_operand.vmem [shape: bf16[2,2,256], index: 3, kind: output, shape index: {}]  }
   0x1 LB: > { %s740_s13 = sadd.s32 4294967295, %s917_s12   ;;  %p744_p0 = scmp.ge.s32.totalorder %s917_s12, 1  ;;  %s917_s12 = sphi %s944_s12, %s13_s12  }
   0x2   : > { %p137_p1 = scmp.lt.s32.totalorder %s917_s12, 3 }
   0x4   : > { %p138_p2 = pnand %p744_p0, %p137_p1 }
   0x5   : > { %v868_v0 = vld [vmem:[%s1087_s1 + $0x40] sm:$0xff] (!%p138_p2)   ;;  %v872_v4 = vld [vmem:[%s1087_s1 + $0x48] sm:$0xff] (!%p138_p2)   ;;  %v876_v8 = vld [vmem:[%s1087_s1 + $0x50] sm:$0xff] (!%p138_p2)   ;;  %p160_p3 = scmp.lt.s32.totalorder (!%p138_p2), %s740_s13, 1  ;;  %v919_v34 = vmov (!%p138_p2), 0.0   ;;  %vm920_vm0 = vmmov (!%p138_p2), 0   ;;  %v622_v58 = vlaneseq (!%p138_p2) }
   0x6   : > { %141 = sbr.rel (%p138_p2) target bundleno = 296 (0x128), region = 32  ;;  %v869_v1 = vld [vmem:[%s1087_s1 + $0xc0] sm:$0xff] (!%p138_p2)   ;;  %793 = vmatprep.subr.bf16.mxu0 (!%p138_p2), %v868_v0  ;;  %v873_v5 = vld [vmem:[%s1087_s1 + $0xc8] sm:$0xff] (!%p138_p2)   ;;  %v877_v9 = vld [vmem:[%s1087_s1 + $0xd0] sm:$0xff] (!%p138_p2)   ;;  %vm489_vm1 = vcmask (!%p138_p2), 523264  }
   0x7   : > { %v870_v2 = vld [vmem:[%s1087_s1] sm:$0xff] (!%p138_p2)   ;;  %815 = vmatprep.subr.bf16.mxu1 (!%p138_p2), %v869_v1  ;;  %v874_v6 = vld [vmem:[%s1087_s1 + $0x8] sm:$0xff] (!%p138_p2)   ;;  %v878_v10 = vld [vmem:[%s1087_s1 + $0x10] sm:$0xff] (!%p138_p2)   ;;  %v921_v56 = vmov (!%p138_p2), 1983009808   ;;  %v623_v60 = vshrl.u32 (!%p138_p2), %v622_v58, 7 }
   0x8   : > { %v871_v3 = vld [vmem:[%s1087_s1 + $0x80] sm:$0xff] (!%p138_p2)   ;;  %794 = vmatpush3.bf16.msra.mxu0 (!%p138_p2), %v870_v2  ;;  %v875_v7 = vld [vmem:[%s1087_s1 + $0x88] sm:$0xff] (!%p138_p2)   ;;  %v879_v11 = vld [vmem:[%s1087_s1 + $0x90] sm:$0xff] (!%p138_p2)   ;;  %v620_v57 = vunpack.c.l.s4 (!%p138_p2), %v921_v56 }
   0x9   : > { %816 = vmatpush3.bf16.msra.mxu1 (!%p138_p2), %v871_v3  ;;  %795 = vmatprep.subr.bf16.mxu0 (!%p138_p2), %v872_v4  ;;  %v880_v12 = vld [vmem:[%s1087_s1 + $0x58] sm:$0xff] (!%p138_p2)   ;;  %v884_v16 = vld [vmem:[%s1087_s1 + $0x60] sm:$0xff] (!%p138_p2)   ;;  %v888_v20 = vld [vmem:[%s1087_s1 + $0x68] sm:$0xff] (!%p138_p2)  }
   0xa   : > { %817 = vmatprep.subr.bf16.mxu1 (!%p138_p2), %v873_v5  ;;  %v881_v13 = vld [vmem:[%s1087_s1 + $0xd8] sm:$0xff] (!%p138_p2)   ;;  %v885_v17 = vld [vmem:[%s1087_s1 + $0xe0] sm:$0xff] (!%p138_p2)   ;;  %v889_v21 = vld [vmem:[%s1087_s1 + $0xe8] sm:$0xff] (!%p138_p2)   ;;  %v621_v59 = vunpack.c.0.s8 (!%p138_p2), %v620_v57  ;;  %v922_v5 = vmov (!%p138_p2), 1934713408  }
   0xb   : > { %v882_v14 = vld [vmem:[%s1087_s1 + $0x18] sm:$0xff] (!%p138_p2)   ;;  %v886_v18 = vld [vmem:[%s1087_s1 + $0x20] sm:$0xff] (!%p138_p2)   ;;  %v890_v22 = vld [vmem:[%s1087_s1 + $0x28] sm:$0xff] (!%p138_p2)  }
   0xc   : > { %796 = vmatpush3.bf16.msra.mxu0 (!%p138_p2), %v874_v6  ;;  %v883_v15 = vld [vmem:[%s1087_s1 + $0x98] sm:$0xff] (!%p138_p2)   ;;  %v887_v19 = vld [vmem:[%s1087_s1 + $0xa0] sm:$0xff] (!%p138_p2)   ;;  %v891_v23 = vld [vmem:[%s1087_s1 + $0xa8] sm:$0xff] (!%p138_p2)   ;;  %v624_v2 = vsub.s32 (!%p138_p2), %v621_v59, %v623_v60  ;;  %v643_v6 = vunpack.c.l.s4 (!%p138_p2), %v922_v5 }
   0xd   : > { %818 = vmatpush3.bf16.msra.mxu1 %v875_v7  ;;  %797 = vmatprep.subr.bf16.mxu0 %v876_v8  ;;  %s1091_s13 = smov (!%p160_p3, %s740_s13), 1  ;;  %v892_v24 = vld [vmem:[%s1087_s1 + $0x70] sm:$0xff]   ;;  %v896_v28 = vld [vmem:[%s1087_s1 + $0x78] sm:$0xff]   ;;  %v906_v37 = vld [vmem:[%s1087_s1 + $0x100] sm:$0xff]  }
   0xe   : > { %819 = vmatprep.subr.bf16.mxu1 %v877_v9  ;;  %v893_v25 = vld [vmem:[%s1087_s1 + $0xf0] sm:$0xff]   ;;  %s854_s16 = smul.u32 40, %s1091_s13  ;;  %v897_v29 = vld [vmem:[%s1087_s1 + $0xf8] sm:$0xff]   ;;  %v907_v38 = vld [vmem:[%s1087_s1 + $0x108] sm:$0xff]   ;;  %s746_s17 = sshll.u32 %s1091_s13, 1 }
   0xf   : > { %v894_v26 = vld [vmem:[%s1087_s1 + $0x30] sm:$0xff]   ;;  %v898_v30 = vld [vmem:[%s1087_s1 + $0x38] sm:$0xff]   ;;  %s168_s20 = scalar_lea.vmem %s1089_s3, %s746_s17 }
  0x10   : > { %798 = vmatpush3.bf16.msra.mxu0 %v878_v10  ;;  %v895_v27 = vld [vmem:[%s1087_s1 + $0xb0] sm:$0xff]   ;;  %s164_s27 = scalar_lea.vmem %s1086_s0, %s854_s16  ;;  %v899_v31 = vld [vmem:[%s1087_s1 + $0xb8] sm:$0xff]  }
  0x11   : > { %820 = vmatpush3.bf16.msra.mxu1 %v879_v11  ;;  %799 = vmatprep.subr.bf16.mxu0 %v880_v12  ;;  %v900_v32 = vld [vmem:[%s164_s27] ss:$20 sps:$4 sm:$0xff]   ;;  %v902_v33 = vld [vmem:[%s164_s27 + $0x4] ss:$20 sps:$4 sm:$0xff]   ;;  %v903_v35 = vld [vmem:[%s164_s27 + $0x8] ss:$20 sps:$4 sm:$0xff]   ;;  %v644_v11 = vunpack.c.0.s8 %v643_v6 }
  0x12   : > { %821 = vmatprep.subr.bf16.mxu1 %v881_v13  ;;  %v905_v36 = vld [vmem:[%s164_s27 + $0xc] ss:$20 sps:$4 sm:$0xff]   ;;  %525 = vmatprep.mubr.bf16.mxu0 %v902_v33  ;;  %v908_v39 = vld [vmem:[%s1087_s1 + $0x110] sm:$0xff]   ;;  %v909_v40 = vld [vmem:[%s1087_s1 + $0x118] sm:$0xff]   ;;  %v654_v13 = vsub.s32 0, %v623_v60 }
  0x13   : > { %566 = vmatprep.mubr.bf16.mxu1 %v905_v36  ;;  %v910_v41 = vld [vmem:[%s164_s27 + $0x10] ss:$20 sps:$4 sm:$0xff]  }
  0x14   : > { %800 = vmatpush3.bf16.msra.mxu0 %v882_v14  ;;  %v650_v14 = vld [vmem:[%s1088_s2] sm:$0x3] }
  0x15   : > { %822 = vmatpush3.bf16.msra.mxu1 %v883_v15  ;;  %801 = vmatprep.subr.bf16.mxu0 %v884_v16 }
  0x16   : > { %823 = vmatprep.subr.bf16.mxu1 %v885_v17  ;;  %v647_v17 = vsub.s32 %v644_v11, %v623_v60 }
  0x18   : > { %802 = vmatpush3.bf16.msra.mxu0 %v886_v18  ;;  %v658_v18 = vsub.s32 1, %v623_v60 }
  0x19   : > { %824 = vmatpush3.bf16.msra.mxu1 %v887_v19  ;;  %803 = vmatprep.subr.bf16.mxu0 %v888_v20  ;;  %v655_v20 = vrot.slane %v650_v14, %v654_v13 }
  0x1a   : > { %825 = vmatprep.subr.bf16.mxu1 %v889_v21  ;;  %v923_v21 = vmov 1966171168  }
  0x1c   : > { %804 = vmatpush3.bf16.msra.mxu0 %v890_v22  ;;  %v672_v22 = vunpack.c.l.s4 %v923_v21 }
  0x1d   : > { %826 = vmatpush3.bf16.msra.mxu1 %v891_v23  ;;  %805 = vmatprep.subr.bf16.mxu0 %v892_v24  ;;  %v659_v24 = vrot.slane %v650_v14, %v658_v18 }
  0x1e   : > { %827 = vmatprep.subr.bf16.mxu1 %v893_v25 }
  0x20   : > { %806 = vmatpush3.bf16.msra.mxu0 %v894_v26 }
  0x21   : > { %828 = vmatpush3.bf16.msra.mxu1 %v895_v27  ;;  %807 = vmatprep.subr.bf16.mxu0 %v896_v28  ;;  %v673_v27 = vunpack.c.0.s8 %v672_v22 }
  0x22   : > { %829 = vmatprep.subr.bf16.mxu1 %v897_v29 }
  0x24   : > { %808 = vmatpush3.bf16.msra.mxu0 %v898_v30 }
  0x25   : > { %830 = vmatpush3.bf16.msra.mxu1 %v899_v31  ;;  %842 = vmatprep.subr.bf16.mxu0 %v919_v34  ;;  %v676_v31 = vsub.s32 %v673_v27, %v623_v60 }
  0x27   : > { %526 = vmatmul.mubr.bf16.vlgmr.msra.gmra.mrb[0].mxu0 %v900_v32 }
  0x28   : > { %567 = vmatmul.mubr.bf16.vlgmr.msra.gmra.mrb[0].mxu1 %v903_v35  ;;  %843 = vmatpush3.bf16.msra.mxu0 %v906_v37 }
  0x29   : > { %844 = vmatprep.subr.bf16.mxu0 %v919_v34  ;;  %850 = vmatprep.mubr.msk.bf16.mxu0 %vm920_vm0, %v919_v34 }
  0x2c   : > { %845 = vmatpush3.bf16.msra.mxu0 %v907_v38 }
  0x2d   : > { %846 = vmatprep.subr.bf16.mxu0 %v919_v34 }
  0x30   : > { %847 = vmatpush3.bf16.msra.mxu0 %v908_v39 }
  0x31   : > { %848 = vmatprep.subr.bf16.mxu0 %v919_v34 }
  0x34   : > { %849 = vmatpush3.bf16.msra.mxu0 %v909_v40 }
  0x37   : > { %851 = vmatmul.mubr.msk.bf16.vlgmr.msra.gmra.mrb[4].mxu0 %vm489_vm1, %v910_v41 }
  0xfa   : > { %v809_v42 = vpop.f32.mrb[0].mxu0 }
  0xfb   : > { %v831_v43 = vpop.f32.mrb[0].mxu1  ;;  %v810_v44 = vpop.f32.mrb[1].mxu0 }
  0xfc   : > { %v811_v45 = vadd.f32 %v810_v44, %v809_v42  ;;  %v832_v46 = vpop.f32.mrb[1].mxu1  ;;  %v812_v47 = vpop.f32.mrb[2].mxu0 }
  0xfd   : > { %v833_v48 = vadd.f32 %v832_v46, %v831_v43  ;;  %v834_v49 = vpop.f32.mrb[2].mxu1  ;;  %v813_v50 = vpop.f32.mrb[3].mxu0 }
  0xfe   : > { %v814_v51 = vadd.f32 %v813_v50, %v812_v47  ;;  %v835_v52 = vpop.f32.mrb[3].mxu1 }
  0xff   : > { %v836_v53 = vadd.f32 %v835_v52, %v834_v49  ;;  %v569_v54 = vadd.f32 %v833_v48, %v811_v45 }
 0x101   : > { %v572_v55 = vadd.f32 %v836_v53, %v814_v51 }
 0x10a   : > { %v609_v61 = vpop.f32.mrb[4].mxu0 }
 0x10b   : > { %v610_v62 = vadd.f32 %v609_v61, %v569_v54  ;;  %v852_v63 = vpop.f32.mrb[5].mxu0 }
 0x10c   : > { %v612_v0 = vpop.f32.mrb[6].mxu0 }
 0x10d   : > { %v613_v1 = vadd.f32 %v612_v0, %v572_v55  ;;  %v853_v3 = vpop.f32.mrb[7].mxu0 }
 0x10f   : > { %v616_v4 = vmax.f32 %v610_v62, %v613_v1 }
 0x111   : > { %v618_v7 = vcombine.high %v616_v4, %v616_v4  ;;  %v625_v8 = vrot.slane %v616_v4, %v624_v2 }
 0x113   : > { %v632_v9 = vrot.slane %v618_v7, %v624_v2  ;;  %v633_v10 = vcombine.high %v625_v8, %v625_v8 }
 0x115   : > { %v634_v12 = vcombine.high %v632_v9, %v632_v9  ;;  %v639_v15 = vmax.f32 %v625_v8, %v633_v10 }
 0x117   : > { %v640_v16 = vmax.f32 %v632_v9, %v634_v12 }
 0x119   : > { %v641_v19 = vcombine.low %v639_v15, %v640_v16 }
 0x11b   : > { %v648_v23 = vrot.slane %v641_v19, %v647_v17 }
 0x11d   : > { %v649_v25 = vcombine.high %v648_v23, %v919_v34  ;;  %v662_v26 = vadd.f32 %v655_v20, %v648_v23 }
 0x11f   : > { %v663_v28 = vadd.f32 %v659_v24, %v649_v25  ;;  %v664_v29 = vmax.f32 %v662_v26, 0.0 }
 0x121   : > { %v665_v30 = vmax.f32 %v663_v28, 0.0 }
 0x123   : > { %v789_v32 = vpack.c.bf16 %v665_v30, %v664_v29 }
 0x125   : > { %v677_v33 = vrot.slane %v789_v32, %v676_v31 }
 0x127   : > { %790 = vst.sshfl [vmem:[%s168_s20] sm:$0x5 pattern:$0x73625140] %v677_v33 }
 0x128 PF: > { %s13_s12 = sadd.s32 1, %s917_s12  }
 0x129   : > { %p10_p4 = scmp.ge.s32.totalorder %s13_s12, 4  }
 0x12b   :  { %12 = sbr.rel (!%p10_p4) target bundleno = 1 (0x1), region = 62 }

// kernel: prednet_forward.7
= control target key start
LH: loop header
LB: loop body
LE: loop exit
PB: predicated region body
PF: predicated region fallthrough
CT: control target
= control target key end

     0   :  { %v12405_v3 = vmov 0   ;;  %s12395_s2 = inlined_call_operand.vmem [shape: bf16[256,1024], index: 2, kind: input, shape index: {}]   ;;  %s12396_s1 = inlined_call_operand.vmem [shape: bf16[128,1024], index: 1, kind: input, shape index: {}]   ;;  %s12397_s4 = inlined_call_operand.vmem [shape: bf16[256,1024], index: 4, kind: input, shape index: {}]   ;;  %s12398_s0 = inlined_call_operand.vmem [shape: bf16[4,2,128], index: 0, kind: input, shape index: {}]   ;;  %s12399_s3 = inlined_call_operand.vmem [shape: bf16[256,1024], index: 3, kind: input, shape index: {}]   ;;  %s12400_s5 = inlined_call_operand.vmem [shape: f32[1,1024], index: 5, kind: input, shape index: {}]   ;;  %s12401_s6 = inlined_call_operand.vmem [shape: f32[1,1024], index: 6, kind: input, shape index: {}]   ;;  %s12402_s7 = inlined_call_operand.vmem [shape: bf16[256,768], index: 7, kind: input, shape index: {}]   ;;  %s12403_s8 = inlined_call_operand.vmem [shape: f32[1,768], index: 8, kind: input, shape index: {}]   ;;  %s12404_s9 = inlined_call_operand.vmem [shape: f32[2,768], index: 9, kind: output, shape index: {}]  }
   0x1   :  { %v101_v0 = vld [vmem:[%s12395_s2 + $0x8] sm:$0xff]  ;;  %941 = vmatprep.mubr.bf16.mxu1 %v12405_v3  ;;  %900 = vmatprep.mubr.bf16.mxu0 %v12405_v3  ;;  %v100_v7 = vld [vmem:[%s12395_s2] sm:$0xff] }
   0x2   :  { %v105_v1 = vld [vmem:[%s12395_s2 + $0x28] sm:$0xff]  ;;  %v104_v8 = vld [vmem:[%s12395_s2 + $0x20] sm:$0xff] }
   0x3   :  { %v109_v2 = vld [vmem:[%s12395_s2 + $0x48] sm:$0xff]  ;;  %v7491_v4 = vcombine.high %v101_v0, %v105_v1  ;;  %v7493_v5 = vcombine.low %v101_v0, %v105_v1  ;;  %v7506_v10 = vcombine.high %v100_v7, %v104_v8  ;;  %v7508_v11 = vcombine.low %v100_v7, %v104_v8  ;;  %v108_v14 = vld [vmem:[%s12395_s2 + $0x40] sm:$0xff] }
   0x4   :  { %v113_v6 = vld [vmem:[%s12395_s2 + $0x68] sm:$0xff]  ;;  %v112_v15 = vld [vmem:[%s12395_s2 + $0x60] sm:$0xff] }
   0x5   :  { %v7504_v9 = vcombine.high %v109_v2, %v113_v6  ;;  %v117_v12 = vld [vmem:[%s12395_s2 + $0x88] sm:$0xff]  ;;  %909 = vmatprep.subr.bf16.mxu1 %v7491_v4  ;;  %v7524_v16 = vcombine.low %v109_v2, %v113_v6  ;;  %868 = vmatprep.subr.bf16.mxu0 %v7506_v10  ;;  %v7527_v17 = vcombine.high %v108_v14, %v112_v15  ;;  %v116_v18 = vld [vmem:[%s12395_s2 + $0x80] sm:$0xff] }
   0x6   :  { %v121_v13 = vld [vmem:[%s12395_s2 + $0xa8] sm:$0xff]  ;;  %910 = vmatpush1.bf16.msra.mxu1 %v7493_v5  ;;  %v120_v19 = vld [vmem:[%s12395_s2 + $0xa0] sm:$0xff]  ;;  %869 = vmatpush1.bf16.msra.mxu0 %v7508_v11  ;;  %v7539_v21 = vcombine.low %v108_v14, %v112_v15 }
   0x7   :  { %911 = vmatprep.subr.bf16.mxu1 %v7504_v9  ;;  %v7537_v20 = vcombine.high %v117_v12, %v121_v13  ;;  %870 = vmatprep.subr.bf16.mxu0 %v7527_v17  ;;  %v125_v22 = vld [vmem:[%s12395_s2 + $0xc8] sm:$0xff]  ;;  %v7548_v24 = vcombine.high %v116_v18, %v120_v19  ;;  %v124_v25 = vld [vmem:[%s12395_s2 + $0xc0] sm:$0xff]  ;;  %v7557_v27 = vcombine.low %v117_v12, %v121_v13 }
   0x8   :  { %v129_v23 = vld [vmem:[%s12395_s2 + $0xe8] sm:$0xff]  ;;  %v128_v26 = vld [vmem:[%s12395_s2 + $0xe0] sm:$0xff]  ;;  %v7563_v29 = vcombine.low %v116_v18, %v120_v19 }
   0x9   :  { %13314 = vst [vmem:[#allocation2_spill] sm:$0xff] %v7537_v20  ;;  %13315 = vst [vmem:[#allocation3_spill] sm:$0xff] %v7548_v24  ;;  %v7561_v28 = vcombine.high %v125_v22, %v129_v23  ;;  %v133_v30 = vld [vmem:[%s12395_s2 + $0x108] sm:$0xff]  ;;  %v7572_v32 = vcombine.high %v124_v25, %v128_v26  ;;  %v132_v33 = vld [vmem:[%s12395_s2 + $0x100] sm:$0xff]  ;;  %v7581_v35 = vcombine.low %v125_v22, %v129_v23 }
   0xa   :  { %912 = vmatpush1.bf16.msra.mxu1 %v7524_v16  ;;  %13316 = vst [vmem:[#allocation4_spill] sm:$0xff] %v7557_v27  ;;  %871 = vmatpush1.bf16.msra.mxu0 %v7539_v21  ;;  %13318 = vst [vmem:[#allocation6_spill] sm:$0xff] %v7563_v29  ;;  %v137_v31 = vld [vmem:[%s12395_s2 + $0x128] sm:$0xff]  ;;  %v136_v34 = vld [vmem:[%s12395_s2 + $0x120] sm:$0xff]  ;;  %v7587_v37 = vcombine.low %v124_v25, %v128_v26 }
   0xb   :  { %913 = vmatprep.subr.bf16.mxu1 %v7537_v20  ;;  %13317 = vst [vmem:[#allocation5_spill] sm:$0xff] %v7561_v28  ;;  %872 = vmatprep.subr.bf16.mxu0 %v7548_v24  ;;  %13319 = vst [vmem:[#allocation7_spill] sm:$0xff] %v7572_v32  ;;  %v7585_v36 = vcombine.high %v133_v30, %v137_v31  ;;  %v141_v38 = vld [vmem:[%s12395_s2 + $0x148] sm:$0xff]  ;;  %v7596_v40 = vcombine.high %v132_v33, %v136_v34  ;;  %v140_v41 = vld [vmem:[%s12395_s2 + $0x140] sm:$0xff] }
   0xc   :  { %13320 = vst [vmem:[#allocation8_spill] sm:$0xff] %v7581_v35  ;;  %13322 = vst [vmem:[#allocation10_spill] sm:$0xff] %v7587_v37  ;;  %v145_v39 = vld [vmem:[%s12395_s2 + $0x168] sm:$0xff]  ;;  %v144_v42 = vld [vmem:[%s12395_s2 + $0x160] sm:$0xff]  ;;  %v7605_v43 = vcombine.low %v133_v30, %v137_v31  ;;  %v7611_v45 = vcombine.low %v132_v33, %v136_v34 }
   0xd   :  { %13321 = vst [vmem:[#allocation9_spill] sm:$0xff] %v7585_v36  ;;  %13323 = vst [vmem:[#allocation11_spill] sm:$0xff] %v7596_v40  ;;  %v7609_v44 = vcombine.high %v141_v38, %v145_v39  ;;  %v149_v46 = vld [vmem:[%s12395_s2 + $0x188] sm:$0xff]  ;;  %v7620_v48 = vcombine.high %v140_v41, %v144_v42  ;;  %v148_v49 = vld [vmem:[%s12395_s2 + $0x180] sm:$0xff]  ;;  %v7629_v51 = vcombine.low %v141_v38, %v145_v39 }
   0xe   :  { %914 = vmatpush1.bf16.msra.mxu1 %v7557_v27  ;;  %873 = vmatpush1.bf16.msra.mxu0 %v7563_v29  ;;  %13324 = vst [vmem:[#allocation12_spill] sm:$0xff] %v7605_v43  ;;  %13326 = vst [vmem:[#allocation14_spill] sm:$0xff] %v7611_v45  ;;  %v153_v47 = vld [vmem:[%s12395_s2 + $0x1a8] sm:$0xff]  ;;  %v152_v50 = vld [vmem:[%s12395_s2 + $0x1a0] sm:$0xff]  ;;  %v7635_v53 = vcombine.low %v140_v41, %v144_v42 }
   0xf   :  { %915 = vmatprep.subr.bf16.mxu1 %v7561_v28  ;;  %874 = vmatprep.subr.bf16.mxu0 %v7572_v32  ;;  %13325 = vst [vmem:[#allocation13_spill] sm:$0xff] %v7609_v44  ;;  %13327 = vst [vmem:[#allocation15_spill] sm:$0xff] %v7620_v48  ;;  %v7633_v52 = vcombine.high %v149_v46, %v153_v47  ;;  %v157_v54 = vld [vmem:[%s12395_s2 + $0x1c8] sm:$0xff]  ;;  %v7644_v56 = vcombine.high %v148_v49, %v152_v50  ;;  %v156_v57 = vld [vmem:[%s12395_s2 + $0x1c0] sm:$0xff] }
  0x10   :  { %13328 = vst [vmem:[#allocation16_spill] sm:$0xff] %v7629_v51  ;;  %13330 = vst [vmem:[#allocation18_spill] sm:$0xff] %v7635_v53  ;;  %v161_v55 = vld [vmem:[%s12395_s2 + $0x1e8] sm:$0xff]  ;;  %v160_v58 = vld [vmem:[%s12395_s2 + $0x1e0] sm:$0xff]  ;;  %v7653_v59 = vcombine.low %v149_v46, %v153_v47  ;;  %v7659_v61 = vcombine.low %v148_v49, %v152_v50 }
  0x11   :  { %13329 = vst [vmem:[#allocation17_spill] sm:$0xff] %v7633_v52  ;;  %13331 = vst [vmem:[#allocation19_spill] sm:$0xff] %v7644_v56  ;;  %v7657_v60 = vcombine.high %v157_v54, %v161_v55  ;;  %v165_v62 = vld [vmem:[%s12395_s2 + $0x208] sm:$0xff]  ;;  %v7668_v0 = vcombine.high %v156_v57, %v160_v58  ;;  %v164_v1 = vld [vmem:[%s12395_s2 + $0x200] sm:$0xff]  ;;  %v7677_v6 = vcombine.low %v157_v54, %v161_v55 }
  0x12   :  { %916 = vmatpush1.bf16.msra.mxu1 %v7581_v35  ;;  %875 = vmatpush1.bf16.msra.mxu0 %v7587_v37  ;;  %13332 = vst [vmem:[#allocation20_spill] sm:$0xff] %v7653_v59  ;;  %13334 = vst [vmem:[#allocation22_spill] sm:$0xff] %v7659_v61  ;;  %v169_v63 = vld [vmem:[%s12395_s2 + $0x228] sm:$0xff]  ;;  %v168_v2 = vld [vmem:[%s12395_s2 + $0x220] sm:$0xff]  ;;  %v7683_v8 = vcombine.low %v156_v57, %v160_v58 }
  0x13   :  { %917 = vmatprep.subr.bf16.mxu1 %v7585_v36  ;;  %876 = vmatprep.subr.bf16.mxu0 %v7596_v40  ;;  %13333 = vst [vmem:[#allocation21_spill] sm:$0xff] %v7657_v60  ;;  %13335 = vst [vmem:[#allocation23_spill] sm:$0xff] %v7668_v0  ;;  %v7681_v7 = vcombine.high %v165_v62, %v169_v63  ;;  %v173_v12 = vld [vmem:[%s12395_s2 + $0x248] sm:$0xff]  ;;  %v7692_v14 = vcombine.high %v164_v1, %v168_v2  ;;  %v172_v15 = vld [vmem:[%s12395_s2 + $0x240] sm:$0xff] }
  0x14   :  { %13336 = vst [vmem:[#allocation24_spill] sm:$0xff] %v7677_v6  ;;  %13338 = vst [vmem:[#allocation26_spill] sm:$0xff] %v7683_v8  ;;  %v177_v13 = vld [vmem:[%s12395_s2 + $0x268] sm:$0xff]  ;;  %v176_v18 = vld [vmem:[%s12395_s2 + $0x260] sm:$0xff]  ;;  %v7701_v19 = vcombine.low %v165_v62, %v169_v63  ;;  %v7707_v23 = vcombine.low %v164_v1, %v168_v2 }
  0x15   :  { %13337 = vst [vmem:[#allocation25_spill] sm:$0xff] %v7681_v7  ;;  %13339 = vst [vmem:[#allocation27_spill] sm:$0xff] %v7692_v14  ;;  %v7705_v22 = vcombine.high %v173_v12, %v177_v13  ;;  %v181_v25 = vld [vmem:[%s12395_s2 + $0x288] sm:$0xff]  ;;  %v7716_v30 = vcombine.high %v172_v15, %v176_v18  ;;  %v180_v31 = vld [vmem:[%s12395_s2 + $0x280] sm:$0xff]  ;;  %v7725_v34 = vcombine.low %v173_v12, %v177_v13 }
  0x16   :  { %918 = vmatpush1.bf16.msra.mxu1 %v7605_v43  ;;  %877 = vmatpush1.bf16.msra.mxu0 %v7611_v45  ;;  %13340 = vst [vmem:[#allocation28_spill] sm:$0xff] %v7701_v19  ;;  %13342 = vst [vmem:[#allocation30_spill] sm:$0xff] %v7707_v23  ;;  %v185_v26 = vld [vmem:[%s12395_s2 + $0x2a8] sm:$0xff]  ;;  %v184_v33 = vld [vmem:[%s12395_s2 + $0x2a0] sm:$0xff]  ;;  %v7731_v39 = vcombine.low %v172_v15, %v176_v18 }
  0x17   :  { %919 = vmatprep.subr.bf16.mxu1 %v7609_v44  ;;  %878 = vmatprep.subr.bf16.mxu0 %v7620_v48  ;;  %13341 = vst [vmem:[#allocation29_spill] sm:$0xff] %v7705_v22  ;;  %13343 = vst [vmem:[#allocation31_spill] sm:$0xff] %v7716_v30  ;;  %v7729_v38 = vcombine.high %v181_v25, %v185_v26  ;;  %v189_v41 = vld [vmem:[%s12395_s2 + $0x2c8] sm:$0xff]  ;;  %v7740_v46 = vcombine.high %v180_v31, %v184_v33  ;;  %v188_v47 = vld [vmem:[%s12395_s2 + $0x2c0] sm:$0xff] }
  0x18   :  { %13344 = vst [vmem:[#allocation32_spill] sm:$0xff] %v7725_v34  ;;  %13346 = vst [vmem:[#allocation34_spill] sm:$0xff] %v7731_v39  ;;  %v193_v42 = vld [vmem:[%s12395_s2 + $0x2e8] sm:$0xff]  ;;  %v192_v49 = vld [vmem:[%s12395_s2 + $0x2e0] sm:$0xff]  ;;  %v7749_v50 = vcombine.low %v181_v25, %v185_v26  ;;  %v7755_v55 = vcombine.low %v180_v31, %v184_v33 }
  0x19   :  { %13345 = vst [vmem:[#allocation33_spill] sm:$0xff] %v7729_v38  ;;  %13347 = vst [vmem:[#allocation35_spill] sm:$0xff] %v7740_v46  ;;  %v7753_v54 = vcombine.high %v189_v41, %v193_v42  ;;  %v197_v57 = vld [vmem:[%s12395_s2 + $0x308] sm:$0xff]  ;;  %v7764_v62 = vcombine.high %v188_v47, %v192_v49  ;;  %v196_v63 = vld [vmem:[%s12395_s2 + $0x300] sm:$0xff]  ;;  %v7773_v2 = vcombine.low %v189_v41, %v193_v42 }
  0x1a   :  { %920 = vmatpush1.bf16.msra.mxu1 %v7629_v51  ;;  %879 = vmatpush1.bf16.msra.mxu0 %v7635_v53  ;;  %13348 = vst [vmem:[#allocation36_spill] sm:$0xff] %v7749_v50  ;;  %13350 = vst [vmem:[#allocation38_spill] sm:$0xff] %v7755_v55  ;;  %v201_v58 = vld [vmem:[%s12395_s2 + $0x328] sm:$0xff]  ;;  %v200_v1 = vld [vmem:[%s12395_s2 + $0x320] sm:$0xff]  ;;  %v7779_v13 = vcombine.low %v188_v47, %v192_v49 }
  0x1b   :  { %921 = vmatprep.subr.bf16.mxu1 %v7633_v52  ;;  %880 = vmatprep.subr.bf16.mxu0 %v7644_v56  ;;  %13349 = vst [vmem:[#allocation37_spill] sm:$0xff] %v7753_v54  ;;  %13351 = vst [vmem:[#allocation39_spill] sm:$0xff] %v7764_v62  ;;  %v7777_v12 = vcombine.high %v197_v57, %v201_v58  ;;  %v205_v15 = vld [vmem:[%s12395_s2 + $0x348] sm:$0xff]  ;;  %v7788_v25 = vcombine.high %v196_v63, %v200_v1  ;;  %v204_v26 = vld [vmem:[%s12395_s2 + $0x340] sm:$0xff] }
  0x1c   :  { %13352 = vst [vmem:[#allocation40_spill] sm:$0xff] %v7773_v2  ;;  %13354 = vst [vmem:[#allocation42_spill] sm:$0xff] %v7779_v13  ;;  %v209_v18 = vld [vmem:[%s12395_s2 + $0x368] sm:$0xff]  ;;  %v208_v31 = vld [vmem:[%s12395_s2 + $0x360] sm:$0xff]  ;;  %v7797_v33 = vcombine.low %v197_v57, %v201_v58  ;;  %v7803_v42 = vcombine.low %v196_v63, %v200_v1 }
  0x1d   :  { %13353 = vst [vmem:[#allocation41_spill] sm:$0xff] %v7777_v12  ;;  %13355 = vst [vmem:[#allocation43_spill] sm:$0xff] %v7788_v25  ;;  %v7801_v41 = vcombine.high %v205_v15, %v209_v18  ;;  %v213_v47 = vld [vmem:[%s12395_s2 + $0x388] sm:$0xff]  ;;  %v7812_v57 = vcombine.high %v204_v26, %v208_v31  ;;  %v212_v58 = vld [vmem:[%s12395_s2 + $0x380] sm:$0xff]  ;;  %v7821_v1 = vcombine.low %v205_v15, %v209_v18 }
  0x1e   :  { %922 = vmatpush1.bf16.msra.mxu1 %v7653_v59  ;;  %881 = vmatpush1.bf16.msra.mxu0 %v7659_v61  ;;  %13356 = vst [vmem:[#allocation44_spill] sm:$0xff] %v7797_v33  ;;  %13358 = vst [vmem:[#allocation46_spill] sm:$0xff] %v7803_v42  ;;  %v217_v49 = vld [vmem:[%s12395_s2 + $0x3a8] sm:$0xff]  ;;  %v216_v63 = vld [vmem:[%s12395_s2 + $0x3a0] sm:$0xff] }
  0x1f   :  { %923 = vmatprep.subr.bf16.mxu1 %v7657_v60  ;;  %882 = vmatprep.subr.bf16.mxu0 %v7668_v0  ;;  %13357 = vst [vmem:[#allocation45_spill] sm:$0xff] %v7801_v41  ;;  %13359 = vst [vmem:[#allocation47_spill] sm:$0xff] %v7812_v57  ;;  %v7825_v3 = vcombine.high %v213_v47, %v217_v49  ;;  %v7836_v15 = vcombine.high %v212_v58, %v216_v63  ;;  %v220_v18 = vld [vmem:[%s12395_s2 + $0x3c0] sm:$0xff] }
  0x20   :  { %13360 = vst [vmem:[#allocation48_spill] sm:$0xff] %v7821_v1 }
  0x21   :  { %13361 = vst [vmem:[#allocation49_spill] sm:$0xff] %v7825_v3  ;;  %13363 = vst [vmem:[#allocation51_spill] sm:$0xff] %v7836_v15 }
  0x22   :  { %924 = vmatpush1.bf16.msra.mxu1 %v7677_v6  ;;  %883 = vmatpush1.bf16.msra.mxu0 %v7683_v8 }
  0x23   :  { %925 = vmatprep.subr.bf16.mxu1 %v7681_v7  ;;  %884 = vmatprep.subr.bf16.mxu0 %v7692_v14 }
  0x26   :  { %926 = vmatpush1.bf16.msra.mxu1 %v7701_v19  ;;  %885 = vmatpush1.bf16.msra.mxu0 %v7707_v23 }
  0x27   :  { %927 = vmatprep.subr.bf16.mxu1 %v7705_v22  ;;  %886 = vmatprep.subr.bf16.mxu0 %v7716_v30 }
  0x2a   :  { %928 = vmatpush1.bf16.msra.mxu1 %v7725_v34  ;;  %887 = vmatpush1.bf16.msra.mxu0 %v7731_v39  ;;  %v1719_v34 = vld [vmem:[%s12399_s3 + $0x3a0] sm:$0xff] }
  0x2b   :  { %929 = vmatprep.subr.bf16.mxu1 %v7729_v38  ;;  %888 = vmatprep.subr.bf16.mxu0 %v7740_v46  ;;  %v1715_v46 = vld [vmem:[%s12399_s3 + $0x380] sm:$0xff] }
  0x2e   :  { %930 = vmatpush1.bf16.msra.mxu1 %v7749_v50  ;;  %889 = vmatpush1.bf16.msra.mxu0 %v7755_v55 }
  0x2f   :  { %931 = vmatprep.subr.bf16.mxu1 %v7753_v54  ;;  %890 = vmatprep.subr.bf16.mxu0 %v7764_v62  ;;  %v1767_v54 = vld [vmem:[%s12397_s4 + $0x120] sm:$0xff] }
  0x32   :  { %932 = vmatpush1.bf16.msra.mxu1 %v7773_v2  ;;  %891 = vmatpush1.bf16.msra.mxu0 %v7779_v13  ;;  %v127_v2 = vld [vmem:[%s12395_s2 + $0xd8] sm:$0xff]  ;;  %v1755_v13 = vld [vmem:[%s12397_s4 + $0xc0] sm:$0xff] }
  0x33   :  { %933 = vmatprep.subr.bf16.mxu1 %v7777_v12  ;;  %892 = vmatprep.subr.bf16.mxu0 %v7788_v25  ;;  %v7827_v12 = vcombine.low %v204_v26, %v208_v31  ;;  %v221_v25 = vld [vmem:[%s12395_s2 + $0x3c8] sm:$0xff]  ;;  %v224_v26 = vld [vmem:[%s12395_s2 + $0x3e0] sm:$0xff]  ;;  %v7845_v31 = vcombine.low %v213_v47, %v217_v49  ;;  %v102_v49 = vld [vmem:[%s12395_s2 + $0x10] sm:$0xff] }
  0x34   :  { %v7860_v47 = vcombine.high %v220_v18, %v224_v26 }
  0x35   :  { %13362 = vst [vmem:[#allocation50_spill] sm:$0xff] %v7827_v12  ;;  %13364 = vst [vmem:[#allocation52_spill] sm:$0xff] %v7845_v31 }
  0x36   :  { %934 = vmatpush1.bf16.msra.mxu1 %v7797_v33  ;;  %893 = vmatpush1.bf16.msra.mxu0 %v7803_v42  ;;  %v225_v33 = vld [vmem:[%s12395_s2 + $0x3e8] sm:$0xff]  ;;  %v103_v42 = vld [vmem:[%s12395_s2 + $0x18] sm:$0xff]  ;;  %13367 = vst [vmem:[#allocation55_spill] sm:$0xff] %v7860_v47 }
  0x37   :  { %935 = vmatprep.subr.bf16.mxu1 %v7801_v41  ;;  %894 = vmatprep.subr.bf16.mxu0 %v7812_v57  ;;  %v7849_v41 = vcombine.high %v221_v25, %v225_v33  ;;  %v7851_v57 = vcombine.low %v212_v58, %v216_v63  ;;  %v106_v58 = vld [vmem:[%s12395_s2 + $0x30] sm:$0xff]  ;;  %v7869_v63 = vcombine.low %v221_v25, %v225_v33 }
  0x38   :  { %v7884_v25 = vcombine.high %v102_v49, %v106_v58  ;;  %v110_v33 = vld [vmem:[%s12395_s2 + $0x50] sm:$0xff] }
  0x39   :  { %13365 = vst [vmem:[#allocation53_spill] sm:$0xff] %v7849_v41  ;;  %13366 = vst [vmem:[#allocation54_spill] sm:$0xff] %v7851_v57 }
  0x3a   :  { %936 = vmatpush1.bf16.msra.mxu1 %v7821_v1  ;;  %895 = vmatpush1.bf16.msra.mxu0 %v7827_v12  ;;  %v107_v1 = vld [vmem:[%s12395_s2 + $0x38] sm:$0xff]  ;;  %13368 = vst [vmem:[#allocation56_spill] sm:$0xff] %v7869_v63  ;;  %13371 = vst [vmem:[#allocation59_spill] sm:$0xff] %v7884_v25 }
  0x3b   :  { %937 = vmatprep.subr.bf16.mxu1 %v7825_v3  ;;  %896 = vmatprep.subr.bf16.mxu0 %v7836_v15  ;;  %v7873_v3 = vcombine.high %v103_v42, %v107_v1  ;;  %v7875_v15 = vcombine.low %v220_v18, %v224_v26  ;;  %v111_v12 = vld [vmem:[%s12395_s2 + $0x58] sm:$0xff]  ;;  %v114_v18 = vld [vmem:[%s12395_s2 + $0x70] sm:$0xff]  ;;  %v7893_v26 = vcombine.low %v103_v42, %v107_v1  ;;  %v13376_v1 = vmov 0  }
  0x3c   :  { %v7908_v42 = vcombine.high %v110_v33, %v114_v18 }
  0x3d   :  { %13369 = vst [vmem:[#allocation57_spill] sm:$0xff] %v7873_v3  ;;  %13370 = vst [vmem:[#allocation58_spill] sm:$0xff] %v7875_v15 }
  0x3e   :  { %938 = vmatpush1.bf16.msra.mxu1 %v7845_v31  ;;  %897 = vmatpush1.bf16.msra.mxu0 %v7851_v57  ;;  %v115_v31 = vld [vmem:[%s12395_s2 + $0x78] sm:$0xff]  ;;  %13372 = vst [vmem:[#allocation60_spill] sm:$0xff] %v7893_v26  ;;  %13375 = vst [vmem:[#allocation63_spill] sm:$0xff] %v7908_v42 }
  0x3f   :  { %939 = vmatprep.subr.bf16.mxu1 %v7849_v41  ;;  %898 = vmatprep.subr.bf16.mxu0 %v7860_v47  ;;  %v7897_v41 = vcombine.high %v111_v12, %v115_v31  ;;  %v7899_v47 = vcombine.low %v102_v49, %v106_v58  ;;  %v119_v57 = vld [vmem:[%s12395_s2 + $0x98] sm:$0xff]  ;;  %v122_v49 = vld [vmem:[%s12395_s2 + $0xb0] sm:$0xff]  ;;  %v7918_v58 = vcombine.low %v111_v12, %v115_v31 }
  0x40   :  { %v131_v12 = vld [vmem:[%s12395_s2 + $0xf8] sm:$0xff] }
  0x41   :  { %13373 = vst [vmem:[#allocation61_spill] sm:$0xff] %v7897_v41  ;;  %13374 = vst [vmem:[#allocation62_spill] sm:$0xff] %v7899_v47 }
  0x42   :  { %940 = vmatpush1.bf16.msra.mxu1 %v7869_v63  ;;  %899 = vmatpush1.bf16.msra.mxu0 %v7875_v15  ;;  %v123_v63 = vld [vmem:[%s12395_s2 + $0xb8] sm:$0xff]  ;;  %13377 = vst [vmem:[#allocation64_spill] sm:$0xff] %v7918_v58  ;;  %v7925_v15 = vcombine.low %v110_v33, %v114_v18  ;;  %v130_v33 = vld [vmem:[%s12395_s2 + $0xf0] sm:$0xff] }
  0x43   :  { %991 = vmatprep.subr.bf16.mxu1 %v7873_v3  ;;  %950 = vmatprep.subr.bf16.mxu0 %v7884_v25  ;;  %v118_v3 = vld [vmem:[%s12395_s2 + $0x90] sm:$0xff]  ;;  %v7923_v25 = vcombine.high %v119_v57, %v123_v63  ;;  %v7945_v18 = vcombine.low %v119_v57, %v123_v63 }
  0x44   :  { %13379 = vst [vmem:[#allocation66_spill] sm:$0xff] %v7925_v15  ;;  %v7934_v31 = vcombine.high %v118_v3, %v122_v49  ;;  %v134_v63 = vld [vmem:[%s12395_s2 + $0x110] sm:$0xff] }
  0x45   :  { %942 = vmatmul.mubr.bf16.vlgmr.msra.gmra.mrb[0].mxu1 %v13376_v1  ;;  %901 = vmatmul.mubr.bf16.vlgmr.msra.gmra.mrb[0].mxu0 %v13376_v1  ;;  %13378 = vst [vmem:[#allocation65_spill] sm:$0xff] %v7923_v25  ;;  %13381 = vst [vmem:[#allocation68_spill] sm:$0xff] %v7945_v18 }
  0x46   :  { %992 = vmatpush1.bf16.msra.mxu1 %v7893_v26  ;;  %951 = vmatpush1.bf16.msra.mxu0 %v7899_v47  ;;  %13380 = vst [vmem:[#allocation67_spill] sm:$0xff] %v7934_v31  ;;  %v7951_v26 = vcombine.low %v118_v3, %v122_v49  ;;  %v135_v47 = vld [vmem:[%s12395_s2 + $0x118] sm:$0xff]  ;;  %v138_v3 = vld [vmem:[%s12395_s2 + $0x130] sm:$0xff]  ;;  %v7969_v49 = vcombine.low %v127_v2, %v131_v12 }
  0x47   :  { %993 = vmatprep.subr.bf16.mxu1 %v7897_v41  ;;  %952 = vmatprep.subr.bf16.mxu0 %v7908_v42  ;;  %v126_v41 = vld [vmem:[%s12395_s2 + $0xd0] sm:$0xff]  ;;  %v7949_v42 = vcombine.high %v127_v2, %v131_v12  ;;  %v7984_v2 = vcombine.high %v134_v63, %v138_v3 }
  0x48   :  { %1023 = vmatprep.mubr.bf16.mxu1 %v13376_v1  ;;  %982 = vmatprep.mubr.bf16.mxu0 %v13376_v1  ;;  %13383 = vst [vmem:[#allocation70_spill] sm:$0xff] %v7951_v26  ;;  %v7960_v57 = vcombine.high %v126_v41, %v130_v33  ;;  %13385 = vst [vmem:[#allocation72_spill] sm:$0xff] %v7969_v49  ;;  %v142_v12 = vld [vmem:[%s12395_s2 + $0x150] sm:$0xff] }
  0x49   :  { %13382 = vst [vmem:[#allocation69_spill] sm:$0xff] %v7949_v42  ;;  %13388 = vst [vmem:[#allocation75_spill] sm:$0xff] %v7984_v2 }
  0x4a   :  { %994 = vmatpush1.bf16.msra.mxu1 %v7918_v58  ;;  %953 = vmatpush1.bf16.msra.mxu0 %v7925_v15  ;;  %v139_v58 = vld [vmem:[%s12395_s2 + $0x138] sm:$0xff]  ;;  %13384 = vst [vmem:[#allocation71_spill] sm:$0xff] %v7960_v57 }
  0x4b   :  { %995 = vmatprep.subr.bf16.mxu1 %v7923_v25  ;;  %954 = vmatprep.subr.bf16.mxu0 %v7934_v31  ;;  %v7973_v25 = vcombine.high %v135_v47, %v139_v58  ;;  %v7975_v31 = vcombine.low %v126_v41, %v130_v33  ;;  %v143_v15 = vld [vmem:[%s12395_s2 + $0x158] sm:$0xff]  ;;  %v146_v41 = vld [vmem:[%s12395_s2 + $0x170] sm:$0xff]  ;;  %v7993_v33 = vcombine.low %v135_v47, %v139_v58 }
  0x4c   :  { %v8008_v47 = vcombine.high %v142_v12, %v146_v41  ;;  %v150_v58 = vld [vmem:[%s12395_s2 + $0x190] sm:$0xff] }
  0x4d   :  { %13386 = vst [vmem:[#allocation73_spill] sm:$0xff] %v7973_v25  ;;  %13387 = vst [vmem:[#allocation74_spill] sm:$0xff] %v7975_v31 }
  0x4e   :  { %996 = vmatpush1.bf16.msra.mxu1 %v7945_v18  ;;  %955 = vmatpush1.bf16.msra.mxu0 %v7951_v26  ;;  %v147_v18 = vld [vmem:[%s12395_s2 + $0x178] sm:$0xff]  ;;  %13389 = vst [vmem:[#allocation76_spill] sm:$0xff] %v7993_v33  ;;  %13392 = vst [vmem:[#allocation79_spill] sm:$0xff] %v8008_v47 }
  0x4f   :  { %997 = vmatprep.subr.bf16.mxu1 %v7949_v42  ;;  %956 = vmatprep.subr.bf16.mxu0 %v7960_v57  ;;  %v7997_v42 = vcombine.high %v143_v15, %v147_v18  ;;  %v7999_v57 = vcombine.low %v134_v63, %v138_v3  ;;  %v151_v26 = vld [vmem:[%s12395_s2 + $0x198] sm:$0xff]  ;;  %v154_v63 = vld [vmem:[%s12395_s2 + $0x1b0] sm:$0xff]  ;;  %v8017_v3 = vcombine.low %v143_v15, %v147_v18 }
  0x50   :  { %v8032_v15 = vcombine.high %v150_v58, %v154_v63  ;;  %v158_v18 = vld [vmem:[%s12395_s2 + $0x1d0] sm:$0xff] }
  0x51   :  { %13390 = vst [vmem:[#allocation77_spill] sm:$0xff] %v7997_v42  ;;  %13391 = vst [vmem:[#allocation78_spill] sm:$0xff] %v7999_v57 }
  0x52   :  { %998 = vmatpush1.bf16.msra.mxu1 %v7969_v49  ;;  %957 = vmatpush1.bf16.msra.mxu0 %v7975_v31  ;;  %v155_v49 = vld [vmem:[%s12395_s2 + $0x1b8] sm:$0xff]  ;;  %13393 = vst [vmem:[#allocation80_spill] sm:$0xff] %v8017_v3  ;;  %13396 = vst [vmem:[#allocation83_spill] sm:$0xff] %v8032_v15 }
  0x53   :  { %999 = vmatprep.subr.bf16.mxu1 %v7973_v25  ;;  %958 = vmatprep.subr.bf16.mxu0 %v7984_v2  ;;  %v8021_v25 = vcombine.high %v151_v26, %v155_v49  ;;  %v8023_v2 = vcombine.low %v142_v12, %v146_v41  ;;  %v159_v31 = vld [vmem:[%s12395_s2 + $0x1d8] sm:$0xff]  ;;  %v162_v12 = vld [vmem:[%s12395_s2 + $0x1f0] sm:$0xff]  ;;  %v8041_v41 = vcombine.low %v151_v26, %v155_v49 }
  0x54   :  { %v8056_v26 = vcombine.high %v158_v18, %v162_v12  ;;  %v166_v49 = vld [vmem:[%s12395_s2 + $0x210] sm:$0xff] }
  0x55   :  { %13394 = vst [vmem:[#allocation81_spill] sm:$0xff] %v8021_v25  ;;  %13395 = vst [vmem:[#allocation82_spill] sm:$0xff] %v8023_v2 }
  0x56   :  { %1000 = vmatpush1.bf16.msra.mxu1 %v7993_v33  ;;  %959 = vmatpush1.bf16.msra.mxu0 %v7999_v57  ;;  %v163_v33 = vld [vmem:[%s12395_s2 + $0x1f8] sm:$0xff]  ;;  %13397 = vst [vmem:[#allocation84_spill] sm:$0xff] %v8041_v41  ;;  %13400 = vst [vmem:[#allocation87_spill] sm:$0xff] %v8056_v26 }
  0x57   :  { %1001 = vmatprep.subr.bf16.mxu1 %v7997_v42  ;;  %960 = vmatprep.subr.bf16.mxu0 %v8008_v47  ;;  %v8045_v42 = vcombine.high %v159_v31, %v163_v33  ;;  %v8047_v47 = vcombine.low %v150_v58, %v154_v63  ;;  %v167_v57 = vld [vmem:[%s12395_s2 + $0x218] sm:$0xff]  ;;  %v170_v58 = vld [vmem:[%s12395_s2 + $0x230] sm:$0xff]  ;;  %v8065_v63 = vcombine.low %v159_v31, %v163_v33 }
  0x58   :  { %v8080_v31 = vcombine.high %v166_v49, %v170_v58  ;;  %v174_v33 = vld [vmem:[%s12395_s2 + $0x250] sm:$0xff] }
  0x59   :  { %13398 = vst [vmem:[#allocation85_spill] sm:$0xff] %v8045_v42  ;;  %13399 = vst [vmem:[#allocation86_spill] sm:$0xff] %v8047_v47 }
  0x5a   :  { %1002 = vmatpush1.bf16.msra.mxu1 %v8017_v3  ;;  %961 = vmatpush1.bf16.msra.mxu0 %v8023_v2  ;;  %v171_v3 = vld [vmem:[%s12395_s2 + $0x238] sm:$0xff]  ;;  %13401 = vst [vmem:[#allocation88_spill] sm:$0xff] %v8065_v63  ;;  %13404 = vst [vmem:[#allocation91_spill] sm:$0xff] %v8080_v31 }
  0x5b   :  { %1003 = vmatprep.subr.bf16.mxu1 %v8021_v25  ;;  %962 = vmatprep.subr.bf16.mxu0 %v8032_v15  ;;  %v8069_v25 = vcombine.high %v167_v57, %v171_v3  ;;  %v8071_v15 = vcombine.low %v158_v18, %v162_v12  ;;  %v175_v2 = vld [vmem:[%s12395_s2 + $0x258] sm:$0xff]  ;;  %v178_v18 = vld [vmem:[%s12395_s2 + $0x270] sm:$0xff]  ;;  %v8089_v12 = vcombine.low %v167_v57, %v171_v3 }
  0x5c   :  { %v8104_v57 = vcombine.high %v174_v33, %v178_v18  ;;  %v182_v3 = vld [vmem:[%s12395_s2 + $0x290] sm:$0xff] }
  0x5d   :  { %13402 = vst [vmem:[#allocation89_spill] sm:$0xff] %v8069_v25  ;;  %13403 = vst [vmem:[#allocation90_spill] sm:$0xff] %v8071_v15 }
  0x5e   :  { %1004 = vmatpush1.bf16.msra.mxu1 %v8041_v41  ;;  %963 = vmatpush1.bf16.msra.mxu0 %v8047_v47  ;;  %v179_v41 = vld [vmem:[%s12395_s2 + $0x278] sm:$0xff]  ;;  %13405 = vst [vmem:[#allocation92_spill] sm:$0xff] %v8089_v12  ;;  %13408 = vst [vmem:[#allocation95_spill] sm:$0xff] %v8104_v57 }
  0x5f   :  { %1005 = vmatprep.subr.bf16.mxu1 %v8045_v42  ;;  %964 = vmatprep.subr.bf16.mxu0 %v8056_v26  ;;  %v8093_v42 = vcombine.high %v175_v2, %v179_v41  ;;  %v8095_v26 = vcombine.low %v166_v49, %v170_v58  ;;  %v183_v47 = vld [vmem:[%s12395_s2 + $0x298] sm:$0xff]  ;;  %v186_v49 = vld [vmem:[%s12395_s2 + $0x2b0] sm:$0xff]  ;;  %v8113_v58 = vcombine.low %v175_v2, %v179_v41 }
  0x60   :  { %v8128_v2 = vcombine.high %v182_v3, %v186_v49  ;;  %v190_v41 = vld [vmem:[%s12395_s2 + $0x2d0] sm:$0xff] }
  0x61   :  { %13406 = vst [vmem:[#allocation93_spill] sm:$0xff] %v8093_v42  ;;  %13407 = vst [vmem:[#allocation94_spill] sm:$0xff] %v8095_v26 }
  0x62   :  { %1006 = vmatpush1.bf16.msra.mxu1 %v8065_v63  ;;  %965 = vmatpush1.bf16.msra.mxu0 %v8071_v15  ;;  %v187_v63 = vld [vmem:[%s12395_s2 + $0x2b8] sm:$0xff]  ;;  %13409 = vst [vmem:[#allocation96_spill] sm:$0xff] %v8113_v58  ;;  %13412 = vst [vmem:[#allocation99_spill] sm:$0xff] %v8128_v2 }
  0x63   :  { %1007 = vmatprep.subr.bf16.mxu1 %v8069_v25  ;;  %966 = vmatprep.subr.bf16.mxu0 %v8080_v31  ;;  %v8117_v25 = vcombine.high %v183_v47, %v187_v63  ;;  %v8119_v31 = vcombine.low %v174_v33, %v178_v18  ;;  %v191_v15 = vld [vmem:[%s12395_s2 + $0x2d8] sm:$0xff]  ;;  %v194_v33 = vld [vmem:[%s12395_s2 + $0x2f0] sm:$0xff]  ;;  %v8137_v18 = vcombine.low %v183_v47, %v187_v63 }
  0x64   :  { %v8152_v47 = vcombine.high %v190_v41, %v194_v33  ;;  %v198_v63 = vld [vmem:[%s12395_s2 + $0x310] sm:$0xff] }
  0x65   :  { %13410 = vst [vmem:[#allocation97_spill] sm:$0xff] %v8117_v25  ;;  %13411 = vst [vmem:[#allocation98_spill] sm:$0xff] %v8119_v31 }
  0x66   :  { %1008 = vmatpush1.bf16.msra.mxu1 %v8089_v12  ;;  %967 = vmatpush1.bf16.msra.mxu0 %v8095_v26  ;;  %v195_v12 = vld [vmem:[%s12395_s2 + $0x2f8] sm:$0xff]  ;;  %13413 = vst [vmem:[#allocation100_spill] sm:$0xff] %v8137_v18  ;;  %13416 = vst [vmem:[#allocation103_spill] sm:$0xff] %v8152_v47 }
  0x67   :  { %1009 = vmatprep.subr.bf16.mxu1 %v8093_v42  ;;  %968 = vmatprep.subr.bf16.mxu0 %v8104_v57  ;;  %v8141_v42 = vcombine.high %v191_v15, %v195_v12  ;;  %v8143_v57 = vcombine.low %v182_v3, %v186_v49  ;;  %v199_v26 = vld [vmem:[%s12395_s2 + $0x318] sm:$0xff]  ;;  %v202_v3 = vld [vmem:[%s12395_s2 + $0x330] sm:$0xff]  ;;  %v8161_v49 = vcombine.low %v191_v15, %v195_v12 }
  0x68   :  { %v8176_v15 = vcombine.high %v198_v63, %v202_v3  ;;  %v206_v12 = vld [vmem:[%s12395_s2 + $0x350] sm:$0xff] }
  0x69   :  { %13414 = vst [vmem:[#allocation101_spill] sm:$0xff] %v8141_v42  ;;  %13415 = vst [vmem:[#allocation102_spill] sm:$0xff] %v8143_v57 }
  0x6a   :  { %1010 = vmatpush1.bf16.msra.mxu1 %v8113_v58  ;;  %969 = vmatpush1.bf16.msra.mxu0 %v8119_v31  ;;  %v203_v58 = vld [vmem:[%s12395_s2 + $0x338] sm:$0xff]  ;;  %13417 = vst [vmem:[#allocation104_spill] sm:$0xff] %v8161_v49  ;;  %13420 = vst [vmem:[#allocation107_spill] sm:$0xff] %v8176_v15 }
  0x6b   :  { %1011 = vmatprep.subr.bf16.mxu1 %v8117_v25  ;;  %970 = vmatprep.subr.bf16.mxu0 %v8128_v2  ;;  %v8165_v25 = vcombine.high %v199_v26, %v203_v58  ;;  %v8167_v2 = vcombine.low %v190_v41, %v194_v33  ;;  %v207_v31 = vld [vmem:[%s12395_s2 + $0x358] sm:$0xff]  ;;  %v210_v41 = vld [vmem:[%s12395_s2 + $0x370] sm:$0xff]  ;;  %v8185_v33 = vcombine.low %v199_v26, %v203_v58 }
  0x6c   :  { %v8200_v26 = vcombine.high %v206_v12, %v210_v41  ;;  %v214_v58 = vld [vmem:[%s12395_s2 + $0x390] sm:$0xff] }
  0x6d   :  { %13418 = vst [vmem:[#allocation105_spill] sm:$0xff] %v8165_v25  ;;  %13419 = vst [vmem:[#allocation106_spill] sm:$0xff] %v8167_v2 }
  0x6e   :  { %1012 = vmatpush1.bf16.msra.mxu1 %v8137_v18  ;;  %971 = vmatpush1.bf16.msra.mxu0 %v8143_v57  ;;  %v211_v18 = vld [vmem:[%s12395_s2 + $0x378] sm:$0xff]  ;;  %13421 = vst [vmem:[#allocation108_spill] sm:$0xff] %v8185_v33  ;;  %13424 = vst [vmem:[#allocation111_spill] sm:$0xff] %v8200_v26 }
  0x6f   :  { %1013 = vmatprep.subr.bf16.mxu1 %v8141_v42  ;;  %972 = vmatprep.subr.bf16.mxu0 %v8152_v47  ;;  %v8189_v42 = vcombine.high %v207_v31, %v211_v18  ;;  %v8191_v47 = vcombine.low %v198_v63, %v202_v3  ;;  %v215_v57 = vld [vmem:[%s12395_s2 + $0x398] sm:$0xff]  ;;  %v218_v63 = vld [vmem:[%s12395_s2 + $0x3b0] sm:$0xff]  ;;  %v8209_v3 = vcombine.low %v207_v31, %v211_v18 }
  0x70   :  { %v8224_v31 = vcombine.high %v214_v58, %v218_v63  ;;  %v222_v18 = vld [vmem:[%s12395_s2 + $0x3d0] sm:$0xff] }
  0x71   :  { %13422 = vst [vmem:[#allocation109_spill] sm:$0xff] %v8189_v42  ;;  %13423 = vst [vmem:[#allocation110_spill] sm:$0xff] %v8191_v47 }
  0x72   :  { %1014 = vmatpush1.bf16.msra.mxu1 %v8161_v49  ;;  %973 = vmatpush1.bf16.msra.mxu0 %v8167_v2  ;;  %v219_v49 = vld [vmem:[%s12395_s2 + $0x3b8] sm:$0xff]  ;;  %13425 = vst [vmem:[#allocation112_spill] sm:$0xff] %v8209_v3  ;;  %13428 = vst [vmem:[#allocation115_spill] sm:$0xff] %v8224_v31 }
  0x73   :  { %1015 = vmatprep.subr.bf16.mxu1 %v8165_v25  ;;  %974 = vmatprep.subr.bf16.mxu0 %v8176_v15  ;;  %v8213_v25 = vcombine.high %v215_v57, %v219_v49  ;;  %v8215_v15 = vcombine.low %v206_v12, %v210_v41  ;;  %v223_v2 = vld [vmem:[%s12395_s2 + $0x3d8] sm:$0xff]  ;;  %v226_v12 = vld [vmem:[%s12395_s2 + $0x3f0] sm:$0xff]  ;;  %v8233_v41 = vcombine.low %v215_v57, %v219_v49 }
  0x74   :  { %v8248_v57 = vcombine.high %v222_v18, %v226_v12  ;;  %v38_v49 = vld [vmem:[%s12396_s1 + $0x10] sm:$0xff] }
  0x75   :  { %13426 = vst [vmem:[#allocation113_spill] sm:$0xff] %v8213_v25  ;;  %13427 = vst [vmem:[#allocation114_spill] sm:$0xff] %v8215_v15 }
  0x76   :  { %1016 = vmatpush1.bf16.msra.mxu1 %v8185_v33  ;;  %975 = vmatpush1.bf16.msra.mxu0 %v8191_v47  ;;  %v227_v33 = vld [vmem:[%s12395_s2 + $0x3f8] sm:$0xff]  ;;  %13429 = vst [vmem:[#allocation116_spill] sm:$0xff] %v8233_v41  ;;  %v36_v47 = vld [vmem:[%s12396_s1] sm:$0xff]  ;;  %13432 = vst [vmem:[#allocation119_spill] sm:$0xff] %v8248_v57 }
  0x77   :  { %1017 = vmatprep.subr.bf16.mxu1 %v8189_v42  ;;  %976 = vmatprep.subr.bf16.mxu0 %v8200_v26  ;;  %v8237_v42 = vcombine.high %v223_v2, %v227_v33  ;;  %v8239_v26 = vcombine.low %v214_v58, %v218_v63  ;;  %v42_v58 = vld [vmem:[%s12396_s1 + $0x30] sm:$0xff]  ;;  %v8257_v63 = vcombine.low %v223_v2, %v227_v33 }
  0x78   :  { %v8272_v2 = vcombine.high %v38_v49, %v42_v58  ;;  %v46_v33 = vld [vmem:[%s12396_s1 + $0x50] sm:$0xff] }
  0x79   :  { %13430 = vst [vmem:[#allocation117_spill] sm:$0xff] %v8237_v42  ;;  %13431 = vst [vmem:[#allocation118_spill] sm:$0xff] %v8239_v26 }
  0x7a   :  { %1018 = vmatpush1.bf16.msra.mxu1 %v8209_v3  ;;  %977 = vmatpush1.bf16.msra.mxu0 %v8215_v15  ;;  %v40_v3 = vld [vmem:[%s12396_s1 + $0x20] sm:$0xff]  ;;  %13433 = vst [vmem:[#allocation120_spill] sm:$0xff] %v8257_v63  ;;  %13436 = vst [vmem:[#allocation123_spill] sm:$0xff] %v8272_v2 }
  0x7b   :  { %1019 = vmatprep.subr.bf16.mxu1 %v8213_v25  ;;  %978 = vmatprep.subr.bf16.mxu0 %v8224_v31  ;;  %v8261_v25 = vcombine.high %v36_v47, %v40_v3  ;;  %v8263_v31 = vcombine.low %v222_v18, %v226_v12  ;;  %v44_v15 = vld [vmem:[%s12396_s1 + $0x40] sm:$0xff]  ;;  %v50_v18 = vld [vmem:[%s12396_s1 + $0x70] sm:$0xff]  ;;  %v8281_v12 = vcombine.low %v36_v47, %v40_v3 }
  0x7c   :  { %v8296_v47 = vcombine.high %v46_v33, %v50_v18  ;;  %v54_v3 = vld [vmem:[%s12396_s1 + $0x90] sm:$0xff] }
  0x7d   :  { %13434 = vst [vmem:[#allocation121_spill] sm:$0xff] %v8261_v25  ;;  %13435 = vst [vmem:[#allocation122_spill] sm:$0xff] %v8263_v31 }
  0x7e   :  { %1020 = vmatpush1.bf16.msra.mxu1 %v8233_v41  ;;  %979 = vmatpush1.bf16.msra.mxu0 %v8239_v26  ;;  %v48_v41 = vld [vmem:[%s12396_s1 + $0x60] sm:$0xff]  ;;  %13437 = vst [vmem:[#allocation124_spill] sm:$0xff] %v8281_v12  ;;  %13440 = vst [vmem:[#allocation127_spill] sm:$0xff] %v8296_v47 }
  0x7f   :  { %1021 = vmatprep.subr.bf16.mxu1 %v8237_v42  ;;  %980 = vmatprep.subr.bf16.mxu0 %v8248_v57  ;;  %v8285_v42 = vcombine.high %v44_v15, %v48_v41  ;;  %v8287_v57 = vcombine.low %v38_v49, %v42_v58  ;;  %v52_v26 = vld [vmem:[%s12396_s1 + $0x80] sm:$0xff]  ;;  %v58_v49 = vld [vmem:[%s12396_s1 + $0xb0] sm:$0xff]  ;;  %v8306_v58 = vcombine.low %v44_v15, %v48_v41 }
  0x80   :  { %v64_v15 = vld [vmem:[%s12396_s1 + $0xe0] sm:$0xff]  ;;  %v8322_v41 = vcombine.high %v54_v3, %v58_v49 }
  0x81   :  { %13438 = vst [vmem:[#allocation125_spill] sm:$0xff] %v8285_v42  ;;  %13439 = vst [vmem:[#allocation126_spill] sm:$0xff] %v8287_v57 }
  0x82   :  { %1022 = vmatpush1.bf16.msra.mxu1 %v8257_v63  ;;  %981 = vmatpush1.bf16.msra.mxu0 %v8263_v31  ;;  %v56_v63 = vld [vmem:[%s12396_s1 + $0xa0] sm:$0xff]  ;;  %13441 = vst [vmem:[#allocation128_spill] sm:$0xff] %v8306_v58  ;;  %13444 = vst [vmem:[#allocation131_spill] sm:$0xff] %v8322_v41 }
  0x83   :  { %1352 = vmatprep.subr.bf16.mxu1 %v8261_v25  ;;  %1434 = vmatprep.subr.bf16.mxu0 %v8272_v2  ;;  %v8311_v2 = vcombine.high %v52_v26, %v56_v63  ;;  %v8313_v25 = vcombine.low %v46_v33, %v50_v18  ;;  %v60_v31 = vld [vmem:[%s12396_s1 + $0xc0] sm:$0xff]  ;;  %v66_v33 = vld [vmem:[%s12396_s1 + $0xf0] sm:$0xff]  ;;  %v8333_v18 = vcombine.low %v52_v26, %v56_v63 }
  0x84   :  { %v70_v63 = vld [vmem:[%s12396_s1 + $0x110] sm:$0xff] }
  0x85   :  { %1024 = vmatmul.mubr.bf16.vlgmr.msra.gmra.mrb[4].mxu1 %v13376_v1  ;;  %983 = vmatmul.mubr.bf16.vlgmr.msra.gmra.mrb[4].mxu0 %v13376_v1  ;;  %13442 = vst [vmem:[#allocation129_spill] sm:$0xff] %v8311_v2  ;;  %13443 = vst [vmem:[#allocation130_spill] sm:$0xff] %v8313_v25 }
  0x86   :  { %1353 = vmatpush1.bf16.msra.mxu1 %v8281_v12  ;;  %1435 = vmatpush1.bf16.msra.mxu0 %v8287_v57  ;;  %v62_v57 = vld [vmem:[%s12396_s1 + $0xd0] sm:$0xff]  ;;  %13445 = vst [vmem:[#allocation132_spill] sm:$0xff] %v8333_v18  ;;  %v68_v12 = vld [vmem:[%s12396_s1 + $0x100] sm:$0xff] }
  0x87   :  { %1354 = vmatprep.subr.bf16.mxu1 %v8285_v42  ;;  %1436 = vmatprep.subr.bf16.mxu0 %v8296_v47  ;;  %v8337_v47 = vcombine.high %v60_v31, %v64_v15  ;;  %v8339_v42 = vcombine.low %v54_v3, %v58_v49  ;;  %v8348_v26 = vcombine.high %v62_v57, %v66_v33  ;;  %v74_v3 = vld [vmem:[%s12396_s1 + $0x130] sm:$0xff] }
  0x88   :  { %1384 = vmatprep.mubr.bf16.mxu1 %v13376_v1  ;;  %1466 = vmatprep.mubr.bf16.mxu0 %v13376_v1  ;;  %v8357_v49 = vcombine.low %v60_v31, %v64_v15  ;;  %v8372_v31 = vcombine.high %v70_v63, %v74_v3  ;;  %v78_v15 = vld [vmem:[%s12396_s1 + $0x150] sm:$0xff] }
  0x89   :  { %13446 = vst [vmem:[#allocation133_spill] sm:$0xff] %v8337_v47  ;;  %13447 = vst [vmem:[#allocation134_spill] sm:$0xff] %v8339_v42 }
  0x8a   :  { %1355 = vmatpush1.bf16.msra.mxu1 %v8306_v58  ;;  %1437 = vmatpush1.bf16.msra.mxu0 %v8313_v25  ;;  %v72_v58 = vld [vmem:[%s12396_s1 + $0x120] sm:$0xff]  ;;  %13448 = vst [vmem:[#allocation135_spill] sm:$0xff] %v8348_v26  ;;  %13449 = vst [vmem:[#allocation136_spill] sm:$0xff] %v8357_v49  ;;  %v8363_v25 = vcombine.low %v62_v57, %v66_v33  ;;  %v82_v57 = vld [vmem:[%s12396_s1 + $0x170] sm:$0xff] }
  0x8b   :  { %1356 = vmatprep.subr.bf16.mxu1 %v8311_v2  ;;  %1438 = vmatprep.subr.bf16.mxu0 %v8322_v41  ;;  %v8361_v41 = vcombine.high %v68_v12, %v72_v58  ;;  %v76_v2 = vld [vmem:[%s12396_s1 + $0x140] sm:$0xff]  ;;  %13452 = vst [vmem:[#allocation139_spill] sm:$0xff] %v8372_v31  ;;  %v8381_v33 = vcombine.low %v68_v12, %v72_v58  ;;  %v86_v58 = vld [vmem:[%s12396_s1 + $0x190] sm:$0xff] }
  0x8c   :  { %13451 = vst [vmem:[#allocation138_spill] sm:$0xff] %v8363_v25  ;;  %v8396_v12 = vcombine.high %v78_v15, %v82_v57 }
  0x8d   :  { %13450 = vst [vmem:[#allocation137_spill] sm:$0xff] %v8361_v41  ;;  %13453 = vst [vmem:[#allocation140_spill] sm:$0xff] %v8381_v33 }
  0x8e   :  { %1357 = vmatpush1.bf16.msra.mxu1 %v8333_v18  ;;  %1439 = vmatpush1.bf16.msra.mxu0 %v8339_v42  ;;  %v80_v18 = vld [vmem:[%s12396_s1 + $0x160] sm:$0xff]  ;;  %v8387_v42 = vcombine.low %v70_v63, %v74_v3  ;;  %13456 = vst [vmem:[#allocation143_spill] sm:$0xff] %v8396_v12  ;;  %v90_v63 = vld [vmem:[%s12396_s1 + $0x1b0] sm:$0xff] }
  0x8f   :  { %1358 = vmatprep.subr.bf16.mxu1 %v8337_v47  ;;  %1440 = vmatprep.subr.bf16.mxu0 %v8348_v26  ;;  %v8385_v26 = vcombine.high %v76_v2, %v80_v18  ;;  %v84_v47 = vld [vmem:[%s12396_s1 + $0x180] sm:$0xff]  ;;  %v8405_v3 = vcombine.low %v76_v2, %v80_v18  ;;  %v8420_v2 = vcombine.high %v86_v58, %v90_v63  ;;  %v94_v18 = vld [vmem:[%s12396_s1 + $0x1d0] sm:$0xff] }
  0x90   :  { %13455 = vst [vmem:[#allocation142_spill] sm:$0xff] %v8387_v42 }
  0x91   :  { %13454 = vst [vmem:[#allocation141_spill] sm:$0xff] %v8385_v26  ;;  %13457 = vst [vmem:[#allocation144_spill] sm:$0xff] %v8405_v3 }
  0x92   :  { %1359 = vmatpush1.bf16.msra.mxu1 %v8357_v49  ;;  %1441 = vmatpush1.bf16.msra.mxu0 %v8363_v25  ;;  %v88_v49 = vld [vmem:[%s12396_s1 + $0x1a0] sm:$0xff]  ;;  %v8411_v25 = vcombine.low %v78_v15, %v82_v57  ;;  %13460 = vst [vmem:[#allocation147_spill] sm:$0xff] %v8420_v2  ;;  %v98_v15 = vld [vmem:[%s12396_s1 + $0x1f0] sm:$0xff] }
  0x93   :  { %1360 = vmatprep.subr.bf16.mxu1 %v8361_v41  ;;  %1442 = vmatprep.subr.bf16.mxu0 %v8372_v31  ;;  %v8409_v31 = vcombine.high %v84_v47, %v88_v49  ;;  %v92_v41 = vld [vmem:[%s12396_s1 + $0x1c0] sm:$0xff]  ;;  %v8429_v57 = vcombine.low %v84_v47, %v88_v49  ;;  %v8444_v47 = vcombine.high %v94_v18, %v98_v15 }
  0x94   :  { %13459 = vst [vmem:[#allocation146_spill] sm:$0xff] %v8411_v25  ;;  %v1731_v49 = vld [vmem:[%s12397_s4] sm:$0xff] }
  0x95   :  { %13458 = vst [vmem:[#allocation145_spill] sm:$0xff] %v8409_v31  ;;  %13461 = vst [vmem:[#allocation148_spill] sm:$0xff] %v8429_v57 }
  0x96   :  { %1361 = vmatpush1.bf16.msra.mxu1 %v8381_v33  ;;  %1443 = vmatpush1.bf16.msra.mxu0 %v8387_v42  ;;  %v96_v33 = vld [vmem:[%s12396_s1 + $0x1e0] sm:$0xff]  ;;  %v8435_v42 = vcombine.low %v86_v58, %v90_v63  ;;  %13464 = vst [vmem:[#allocation151_spill] sm:$0xff] %v8444_v47 }
  0x97   :  { %1362 = vmatprep.subr.bf16.mxu1 %v8385_v26  ;;  %1444 = vmatprep.subr.bf16.mxu0 %v8396_v12  ;;  %v8433_v12 = vcombine.high %v92_v41, %v96_v33  ;;  %v37_v26 = vld [vmem:[%s12396_s1 + $0x8] sm:$0xff]  ;;  %v1735_v58 = vld [vmem:[%s12397_s4 + $0x20] sm:$0xff]  ;;  %v8453_v63 = vcombine.low %v92_v41, %v96_v33 }
  0x98   :  { %13463 = vst [vmem:[#allocation150_spill] sm:$0xff] %v8435_v42  ;;  %v8468_v41 = vcombine.high %v1731_v49, %v1735_v58  ;;  %v8474_v33 = vld [vmem:[%s12398_s0] sm:$0x1] }
  0x99   :  { %13462 = vst [vmem:[#allocation149_spill] sm:$0xff] %v8433_v12  ;;  %13465 = vst [vmem:[#allocation152_spill] sm:$0xff] %v8453_v63 }
  0x9a   :  { %1363 = vmatpush1.bf16.msra.mxu1 %v8405_v3  ;;  %1445 = vmatpush1.bf16.msra.mxu0 %v8411_v25  ;;  %v41_v3 = vld [vmem:[%s12396_s1 + $0x28] sm:$0xff]  ;;  %v8459_v25 = vcombine.low %v94_v18, %v98_v15  ;;  %13468 = vst [vmem:[#allocation155_spill] sm:$0xff] %v8468_v41  ;;  %v1739_v15 = vld [vmem:[%s12397_s4 + $0x40] sm:$0xff] }
  0x9b   :  { %1364 = vmatprep.subr.bf16.mxu1 %v8409_v31  ;;  %1446 = vmatprep.subr.bf16.mxu0 %v8420_v2  ;;  %v8457_v2 = vcombine.high %v37_v26, %v41_v3  ;;  %v45_v31 = vld [vmem:[%s12396_s1 + $0x48] sm:$0xff]  ;;  %v8476_v18 = vcombine.low %v37_v26, %v41_v3  ;;  %v8495_v3 = vcombine.low %v1731_v49, %v1735_v58 }
  0x9c   :  { %13467 = vst [vmem:[#allocation154_spill] sm:$0xff] %v8459_v25  ;;  %v57_v26 = vld [vmem:[%s12396_s1 + $0xa8] sm:$0xff] }
  0x9d   :  { %13466 = vst [vmem:[#allocation153_spill] sm:$0xff] %v8457_v2  ;;  %13469 = vst [vmem:[#allocation156_spill] sm:$0xff] %v8476_v18 }
  0x9e   :  { %1365 = vmatpush1.bf16.msra.mxu1 %v8429_v57  ;;  %1447 = vmatpush1.bf16.msra.mxu0 %v8435_v42  ;;  %v49_v57 = vld [vmem:[%s12396_s1 + $0x68] sm:$0xff]  ;;  %13471 = vst [vmem:[#allocation158_spill] sm:$0xff] %v8495_v3 }
  0x9f   :  { %1366 = vmatprep.subr.bf16.mxu1 %v8433_v12  ;;  %1448 = vmatprep.subr.bf16.mxu0 %v8444_v47  ;;  %v1743_v47 = vld [vmem:[%s12397_s4 + $0x60] sm:$0xff]  ;;  %v8486_v42 = vcombine.high %v45_v31, %v49_v57 }
  0xa0   :  { %v8498_v12 = vcombine.high %v1739_v15, %v1743_v47  ;;  %v8521_v58 = vcombine.low %v1739_v15, %v1743_v47  ;;  %v69_v15 = vld [vmem:[%s12396_s1 + $0x108] sm:$0xff] }
  0xa1   :  { %13470 = vst [vmem:[#allocation157_spill] sm:$0xff] %v8486_v42 }
  0xa2   :  { %1367 = vmatpush1.bf16.msra.mxu1 %v8453_v63  ;;  %1449 = vmatpush1.bf16.msra.mxu0 %v8459_v25  ;;  %v53_v63 = vld [vmem:[%s12396_s1 + $0x88] sm:$0xff]  ;;  %13472 = vst [vmem:[#allocation159_spill] sm:$0xff] %v8498_v12  ;;  %v8501_v25 = vcombine.low %v45_v31, %v49_v57  ;;  %13475 = vst [vmem:[#allocation162_spill] sm:$0xff] %v8521_v58 }
  0xa3   :  { %1393 = vmatprep.subr.bf16.mxu1 %v8457_v2  ;;  %2499 = vmatprep.subr.bf16.mxu0 %v8468_v41  ;;  %v1747_v2 = vld [vmem:[%s12397_s4 + $0x80] sm:$0xff]  ;;  %v8511_v49 = vcombine.high %v53_v63, %v57_v26  ;;  %v61_v31 = vld [vmem:[%s12396_s1 + $0xc8] sm:$0xff] }
  0xa4   :  { %13473 = vst [vmem:[#allocation160_spill] sm:$0xff] %v8501_v25  ;;  %v1751_v41 = vld [vmem:[%s12397_s4 + $0xa0] sm:$0xff]  ;;  %v65_v57 = vld [vmem:[%s12396_s1 + $0xe8] sm:$0xff] }
  0xa5   :  { %1385 = vmatmul.mubr.bf16.vlgmr.msra.gmra.mrb[8].mxu1 %v8474_v33  ;;  %1467 = vmatmul.mubr.bf16.vlgmr.msra.gmra.mrb[8].mxu0 %v8474_v33  ;;  %13474 = vst [vmem:[#allocation161_spill] sm:$0xff] %v8511_v49  ;;  %v8537_v47 = vcombine.high %v61_v31, %v65_v57 }
  0xa6   :  { %1394 = vmatpush1.bf16.msra.mxu1 %v8476_v18  ;;  %1425 = vmatprep.mubr.bf16.mxu1 %v13376_v1  ;;  %v8528_v18 = vcombine.low %v53_v63, %v57_v26  ;;  %v73_v63 = vld [vmem:[%s12396_s1 + $0x128] sm:$0xff]  ;;  %v8546_v26 = vcombine.low %v1747_v2, %v1751_v41 }
  0xa7   :  { %1395 = vmatprep.subr.bf16.mxu1 %v8486_v42  ;;  %2500 = vmatpush1.bf16.msra.mxu0 %v8495_v3  ;;  %v8525_v42 = vcombine.high %v1747_v2, %v1751_v41  ;;  %v1759_v3 = vld [vmem:[%s12397_s4 + $0xe0] sm:$0xff]  ;;  %13478 = vst [vmem:[#allocation165_spill] sm:$0xff] %v8537_v47  ;;  %v8561_v2 = vcombine.high %v69_v15, %v73_v63  ;;  %v77_v41 = vld [vmem:[%s12396_s1 + $0x148] sm:$0xff] }
  0xa8   :  { %2531 = vmatprep.mubr.bf16.mxu0 %v13376_v1  ;;  %2501 = vmatprep.subr.bf16.mxu0 %v8498_v12  ;;  %13477 = vst [vmem:[#allocation164_spill] sm:$0xff] %v8528_v18  ;;  %13479 = vst [vmem:[#allocation166_spill] sm:$0xff] %v8546_v26  ;;  %v8549_v12 = vcombine.high %v1755_v13, %v1759_v3 }
  0xa9   :  { %13476 = vst [vmem:[#allocation163_spill] sm:$0xff] %v8525_v42  ;;  %13482 = vst [vmem:[#allocation169_spill] sm:$0xff] %v8561_v2 }
  0xaa   :  { %1396 = vmatpush1.bf16.msra.mxu1 %v8501_v25  ;;  %13480 = vst [vmem:[#allocation167_spill] sm:$0xff] %v8549_v12  ;;  %v1763_v25 = vld [vmem:[%s12397_s4 + $0x100] sm:$0xff] }
  0xab   :  { %1397 = vmatprep.subr.bf16.mxu1 %v8511_v49  ;;  %2502 = vmatpush1.bf16.msra.mxu0 %v8521_v58  ;;  %v8552_v49 = vcombine.low %v61_v31, %v65_v57  ;;  %v81_v31 = vld [vmem:[%s12396_s1 + $0x168] sm:$0xff]  ;;  %v8570_v57 = vcombine.low %v1755_v13, %v1759_v3  ;;  %v8576_v58 = vcombine.low %v69_v15, %v73_v63 }
  0xac   :  { %2503 = vmatprep.subr.bf16.mxu0 %v8525_v42  ;;  %v8573_v42 = vcombine.high %v1763_v25, %v1767_v54  ;;  %v8585_v13 = vcombine.high %v77_v41, %v81_v31  ;;  %v85_v3 = vld [vmem:[%s12396_s1 + $0x188] sm:$0xff]  ;;  %v8594_v63 = vcombine.low %v1763_v25, %v1767_v54 }
  0xad   :  { %13481 = vst [vmem:[#allocation168_spill] sm:$0xff] %v8552_v49  ;;  %13483 = vst [vmem:[#allocation170_spill] sm:$0xff] %v8570_v57  ;;  %v89_v15 = vld [vmem:[%s12396_s1 + $0x1a8] sm:$0xff] }
  0xae   :  { %1398 = vmatpush1.bf16.msra.mxu1 %v8528_v18  ;;  %13484 = vst [vmem:[#allocation171_spill] sm:$0xff] %v8573_v42  ;;  %13485 = vst [vmem:[#allocation172_spill] sm:$0xff] %v8576_v58  ;;  %v1775_v18 = vld [vmem:[%s12397_s4 + $0x160] sm:$0xff]  ;;  %v8609_v54 = vcombine.high %v85_v3, %v89_v15  ;;  %v93_v25 = vld [vmem:[%s12396_s1 + $0x1c8] sm:$0xff] }
  0xaf   :  { %1399 = vmatprep.subr.bf16.mxu1 %v8537_v47  ;;  %2504 = vmatpush1.bf16.msra.mxu0 %v8546_v26  ;;  %v1771_v47 = vld [vmem:[%s12397_s4 + $0x140] sm:$0xff]  ;;  %13486 = vst [vmem:[#allocation173_spill] sm:$0xff] %v8585_v13  ;;  %13487 = vst [vmem:[#allocation174_spill] sm:$0xff] %v8594_v63  ;;  %v8600_v26 = vcombine.low %v77_v41, %v81_v31  ;;  %v97_v41 = vld [vmem:[%s12396_s1 + $0x1e8] sm:$0xff] }
  0xb0   :  { %2505 = vmatprep.subr.bf16.mxu0 %v8549_v12  ;;  %v8597_v12 = vcombine.high %v1771_v47, %v1775_v18  ;;  %13490 = vst [vmem:[#allocation177_spill] sm:$0xff] %v8609_v54  ;;  %v8618_v31 = vcombine.low %v1771_v47, %v1775_v18  ;;  %v8633_v18 = vcombine.high %v93_v25, %v97_v41  ;;  %v39_v47 = vld [vmem:[%s12396_s1 + $0x18] sm:$0xff] }
  0xb1   :  { %13489 = vst [vmem:[#allocation176_spill] sm:$0xff] %v8600_v26 }
  0xb2   :  { %1400 = vmatpush1.bf16.msra.mxu1 %v8552_v49  ;;  %13488 = vst [vmem:[#allocation175_spill] sm:$0xff] %v8597_v12  ;;  %v1783_v49 = vld [vmem:[%s12397_s4 + $0x1a0] sm:$0xff]  ;;  %13491 = vst [vmem:[#allocation178_spill] sm:$0xff] %v8618_v31 }
  0xb3   :  { %1401 = vmatprep.subr.bf16.mxu1 %v8561_v2  ;;  %2506 = vmatpush1.bf16.msra.mxu0 %v8570_v57  ;;  %v1779_v2 = vld [vmem:[%s12397_s4 + $0x180] sm:$0xff]  ;;  %v8624_v57 = vcombine.low %v85_v3, %v89_v15  ;;  %13494 = vst [vmem:[#allocation181_spill] sm:$0xff] %v8633_v18  ;;  %v43_v3 = vld [vmem:[%s12396_s1 + $0x38] sm:$0xff] }
  0xb4   :  { %2507 = vmatprep.subr.bf16.mxu0 %v8573_v42  ;;  %v8621_v42 = vcombine.high %v1779_v2, %v1783_v49  ;;  %v8642_v15 = vcombine.low %v1779_v2, %v1783_v49  ;;  %v8657_v49 = vcombine.high %v39_v47, %v43_v3  ;;  %v47_v2 = vld [vmem:[%s12396_s1 + $0x58] sm:$0xff] }
  0xb5   :  { %13493 = vst [vmem:[#allocation180_spill] sm:$0xff] %v8624_v57 }
  0xb6   :  { %1402 = vmatpush1.bf16.msra.mxu1 %v8576_v58  ;;  %13492 = vst [vmem:[#allocation179_spill] sm:$0xff] %v8621_v42  ;;  %v1791_v58 = vld [vmem:[%s12397_s4 + $0x1e0] sm:$0xff]  ;;  %13495 = vst [vmem:[#allocation182_spill] sm:$0xff] %v8642_v15 }
  0xb7   :  { %1403 = vmatprep.subr.bf16.mxu1 %v8585_v13  ;;  %2508 = vmatpush1.bf16.msra.mxu0 %v8594_v63  ;;  %v1787_v13 = vld [vmem:[%s12397_s4 + $0x1c0] sm:$0xff]  ;;  %v8648_v63 = vcombine.low %v93_v25, %v97_v41  ;;  %13498 = vst [vmem:[#allocation185_spill] sm:$0xff] %v8657_v49  ;;  %v51_v25 = vld [vmem:[%s12396_s1 + $0x78] sm:$0xff] }
  0xb8   :  { %2509 = vmatprep.subr.bf16.mxu0 %v8597_v12  ;;  %v8645_v12 = vcombine.high %v1787_v13, %v1791_v58  ;;  %v8666_v41 = vcombine.low %v1787_v13, %v1791_v58  ;;  %v8681_v58 = vcombine.high %v47_v2, %v51_v25  ;;  %v55_v13 = vld [vmem:[%s12396_s1 + $0x98] sm:$0xff] }
  0xb9   :  { %13497 = vst [vmem:[#allocation184_spill] sm:$0xff] %v8648_v63 }
  0xba   :  { %1404 = vmatpush1.bf16.msra.mxu1 %v8600_v26  ;;  %13496 = vst [vmem:[#allocation183_spill] sm:$0xff] %v8645_v12  ;;  %v1799_v26 = vld [vmem:[%s12397_s4 + $0x220] sm:$0xff]  ;;  %13499 = vst [vmem:[#allocation186_spill] sm:$0xff] %v8666_v41 }
  0xbb   :  { %1405 = vmatprep.subr.bf16.mxu1 %v8609_v54  ;;  %2510 = vmatpush1.bf16.msra.mxu0 %v8618_v31  ;;  %v1795_v54 = vld [vmem:[%s12397_s4 + $0x200] sm:$0xff]  ;;  %v8672_v31 = vcombine.low %v39_v47, %v43_v3  ;;  %13502 = vst [vmem:[#allocation189_spill] sm:$0xff] %v8681_v58  ;;  %v59_v47 = vld [vmem:[%s12396_s1 + $0xb8] sm:$0xff] }
  0xbc   :  { %2511 = vmatprep.subr.bf16.mxu0 %v8621_v42  ;;  %v8669_v42 = vcombine.high %v1795_v54, %v1799_v26  ;;  %v8690_v3 = vcombine.low %v1795_v54, %v1799_v26  ;;  %v1815_v26 = vld [vmem:[%s12397_s4 + $0x2a0] sm:$0xff]  ;;  %v8707_v54 = vcombine.high %v55_v13, %v59_v47 }
  0xbd   :  { %13501 = vst [vmem:[#allocation188_spill] sm:$0xff] %v8672_v31 }
  0xbe   :  { %1406 = vmatpush1.bf16.msra.mxu1 %v8624_v57  ;;  %13500 = vst [vmem:[#allocation187_spill] sm:$0xff] %v8669_v42  ;;  %v1807_v57 = vld [vmem:[%s12397_s4 + $0x260] sm:$0xff]  ;;  %13503 = vst [vmem:[#allocation190_spill] sm:$0xff] %v8690_v3 }
  0xbf   :  { %1407 = vmatprep.subr.bf16.mxu1 %v8633_v18  ;;  %2512 = vmatpush1.bf16.msra.mxu0 %v8642_v15  ;;  %v1803_v18 = vld [vmem:[%s12397_s4 + $0x240] sm:$0xff]  ;;  %v8697_v15 = vcombine.low %v47_v2, %v51_v25  ;;  %13506 = vst [vmem:[#allocation193_spill] sm:$0xff] %v8707_v54  ;;  %v67_v2 = vld [vmem:[%s12396_s1 + $0xf8] sm:$0xff] }
  0xc0   :  { %2513 = vmatprep.subr.bf16.mxu0 %v8645_v12  ;;  %v8694_v12 = vcombine.high %v1803_v18, %v1807_v57  ;;  %v8716_v25 = vcombine.low %v1803_v18, %v1807_v57  ;;  %v71_v18 = vld [vmem:[%s12396_s1 + $0x118] sm:$0xff] }
  0xc1   :  { %13505 = vst [vmem:[#allocation192_spill] sm:$0xff] %v8697_v15 }
  0xc2   :  { %1408 = vmatpush1.bf16.msra.mxu1 %v8648_v63  ;;  %13504 = vst [vmem:[#allocation191_spill] sm:$0xff] %v8694_v12  ;;  %13507 = vst [vmem:[#allocation194_spill] sm:$0xff] %v8716_v25  ;;  %v1823_v63 = vld [vmem:[%s12397_s4 + $0x2e0] sm:$0xff] }
  0xc3   :  { %1475 = vmatprep.subr.bf16.mxu1 %v8657_v49  ;;  %2514 = vmatpush1.bf16.msra.mxu0 %v8666_v41  ;;  %v1811_v49 = vld [vmem:[%s12397_s4 + $0x280] sm:$0xff] }
  0xc4   :  { %2515 = vmatprep.subr.bf16.mxu0 %v8669_v42  ;;  %v63_v42 = vld [vmem:[%s12396_s1 + $0xd8] sm:$0xff]  ;;  %v8719_v41 = vcombine.high %v1811_v49, %v1815_v26 }
  0xc5   :  { %1426 = vmatmul.mubr.bf16.vlgmr.msra.gmra.mrb[12].mxu1 %v8474_v33  ;;  %v8731_v57 = vcombine.high %v63_v42, %v67_v2 }
  0xc6   :  { %1476 = vmatpush1.bf16.msra.mxu1 %v8672_v31  ;;  %1507 = vmatprep.mubr.bf16.mxu1 %v13376_v1  ;;  %13508 = vst [vmem:[#allocation195_spill] sm:$0xff] %v8719_v41  ;;  %v1819_v31 = vld [vmem:[%s12397_s4 + $0x2c0] sm:$0xff] }
  0xc7   :  { %1477 = vmatprep.subr.bf16.mxu1 %v8681_v58  ;;  %2516 = vmatpush1.bf16.msra.mxu0 %v8690_v3  ;;  %v8722_v58 = vcombine.low %v55_v13, %v59_v47  ;;  %13510 = vst [vmem:[#allocation197_spill] sm:$0xff] %v8731_v57  ;;  %v75_v13 = vld [vmem:[%s12396_s1 + $0x138] sm:$0xff]  ;;  %v8740_v47 = vcombine.low %v1811_v49, %v1815_v26 }
  0xc8   :  { %2517 = vmatprep.subr.bf16.mxu0 %v8694_v12  ;;  %v8743_v12 = vcombine.high %v1819_v31, %v1823_v63  ;;  %v8746_v3 = vcombine.low %v63_v42, %v67_v2  ;;  %v8755_v49 = vcombine.high %v71_v18, %v75_v13  ;;  %v79_v26 = vld [vmem:[%s12396_s1 + $0x158] sm:$0xff]  ;;  %v8764_v2 = vcombine.low %v1819_v31, %v1823_v63 }
  0xc9   :  { %13509 = vst [vmem:[#allocation196_spill] sm:$0xff] %v8722_v58  ;;  %13511 = vst [vmem:[#allocation198_spill] sm:$0xff] %v8740_v47  ;;  %v83_v42 = vld [vmem:[%s12396_s1 + $0x178] sm:$0xff] }
  0xca   :  { %1478 = vmatpush1.bf16.msra.mxu1 %v8697_v15  ;;  %13512 = vst [vmem:[#allocation199_spill] sm:$0xff] %v8743_v12  ;;  %13513 = vst [vmem:[#allocation200_spill] sm:$0xff] %v8746_v3  ;;  %v1831_v15 = vld [vmem:[%s12397_s4 + $0x320] sm:$0xff]  ;;  %v8779_v63 = vcombine.high %v79_v26, %v83_v42  ;;  %v87_v31 = vld [vmem:[%s12396_s1 + $0x198] sm:$0xff] }
  0xcb   :  { %1479 = vmatprep.subr.bf16.mxu1 %v8707_v54  ;;  %2518 = vmatpush1.bf16.msra.mxu0 %v8716_v25  ;;  %v1827_v54 = vld [vmem:[%s12397_s4 + $0x300] sm:$0xff]  ;;  %13514 = vst [vmem:[#allocation201_spill] sm:$0xff] %v8755_v49  ;;  %13515 = vst [vmem:[#allocation202_spill] sm:$0xff] %v8764_v2  ;;  %v8770_v25 = vcombine.low %v71_v18, %v75_v13  ;;  %v91_v18 = vld [vmem:[%s12396_s1 + $0x1b8] sm:$0xff] }
  0xcc   :  { %2519 = vmatprep.subr.bf16.mxu0 %v8719_v41  ;;  %v8767_v41 = vcombine.high %v1827_v54, %v1831_v15  ;;  %13518 = vst [vmem:[#allocation205_spill] sm:$0xff] %v8779_v63  ;;  %v8788_v13 = vcombine.low %v1827_v54, %v1831_v15  ;;  %v8803_v15 = vcombine.high %v87_v31, %v91_v18  ;;  %v95_v54 = vld [vmem:[%s12396_s1 + $0x1d8] sm:$0xff] }
  0xcd   :  { %13517 = vst [vmem:[#allocation204_spill] sm:$0xff] %v8770_v25 }
  0xce   :  { %1480 = vmatpush1.bf16.msra.mxu1 %v8722_v58  ;;  %13516 = vst [vmem:[#allocation203_spill] sm:$0xff] %v8767_v41  ;;  %v1839_v58 = vld [vmem:[%s12397_s4 + $0x360] sm:$0xff]  ;;  %13519 = vst [vmem:[#allocation206_spill] sm:$0xff] %v8788_v13 }
  0xcf   :  { %1481 = vmatprep.subr.bf16.mxu1 %v8731_v57  ;;  %2520 = vmatpush1.bf16.msra.mxu0 %v8740_v47  ;;  %v1835_v57 = vld [vmem:[%s12397_s4 + $0x340] sm:$0xff]  ;;  %v8794_v47 = vcombine.low %v79_v26, %v83_v42  ;;  %13522 = vst [vmem:[#allocation209_spill] sm:$0xff] %v8803_v15  ;;  %v99_v26 = vld [vmem:[%s12396_s1 + $0x1f8] sm:$0xff] }
  0xd0   :  { %2521 = vmatprep.subr.bf16.mxu0 %v8743_v12  ;;  %v8791_v12 = vcombine.high %v1835_v57, %v1839_v58  ;;  %v8812_v42 = vcombine.low %v1835_v57, %v1839_v58  ;;  %v8827_v58 = vcombine.high %v95_v54, %v99_v26  ;;  %v1732_v57 = vld [vmem:[%s12397_s4 + $0x8] sm:$0xff] }
  0xd1   :  { %13521 = vst [vmem:[#allocation208_spill] sm:$0xff] %v8794_v47 }
  0xd2   :  { %1482 = vmatpush1.bf16.msra.mxu1 %v8746_v3  ;;  %13520 = vst [vmem:[#allocation207_spill] sm:$0xff] %v8791_v12  ;;  %v1847_v3 = vld [vmem:[%s12397_s4 + $0x3a0] sm:$0xff]  ;;  %13523 = vst [vmem:[#allocation210_spill] sm:$0xff] %v8812_v42 }
  0xd3   :  { %1483 = vmatprep.subr.bf16.mxu1 %v8755_v49  ;;  %2522 = vmatpush1.bf16.msra.mxu0 %v8764_v2  ;;  %v1843_v49 = vld [vmem:[%s12397_s4 + $0x380] sm:$0xff]  ;;  %v8818_v2 = vcombine.low %v87_v31, %v91_v18  ;;  %13526 = vst [vmem:[#allocation213_spill] sm:$0xff] %v8827_v58  ;;  %v1736_v31 = vld [vmem:[%s12397_s4 + $0x28] sm:$0xff] }
  0xd4   :  { %2523 = vmatprep.subr.bf16.mxu0 %v8767_v41  ;;  %v8815_v41 = vcombine.high %v1843_v49, %v1847_v3  ;;  %v8836_v18 = vcombine.low %v1843_v49, %v1847_v3  ;;  %v8851_v3 = vcombine.high %v1732_v57, %v1736_v31  ;;  %v1740_v49 = vld [vmem:[%s12397_s4 + $0x48] sm:$0xff] }
  0xd5   :  { %13525 = vst [vmem:[#allocation212_spill] sm:$0xff] %v8818_v2 }
  0xd6   :  { %1484 = vmatpush1.bf16.msra.mxu1 %v8770_v25  ;;  %13524 = vst [vmem:[#allocation211_spill] sm:$0xff] %v8815_v41  ;;  %v1855_v25 = vld [vmem:[%s12397_s4 + $0x3e0] sm:$0xff]  ;;  %13527 = vst [vmem:[#allocation214_spill] sm:$0xff] %v8836_v18 }
  0xd7   :  { %1485 = vmatprep.subr.bf16.mxu1 %v8779_v63  ;;  %2524 = vmatpush1.bf16.msra.mxu0 %v8788_v13  ;;  %v1851_v63 = vld [vmem:[%s12397_s4 + $0x3c0] sm:$0xff]  ;;  %v8842_v13 = vcombine.low %v95_v54, %v99_v26  ;;  %13530 = vst [vmem:[#allocation217_spill] sm:$0xff] %v8851_v3  ;;  %v1744_v54 = vld [vmem:[%s12397_s4 + $0x68] sm:$0xff] }
  0xd8   :  { %2525 = vmatprep.subr.bf16.mxu0 %v8791_v12  ;;  %v8839_v12 = vcombine.high %v1851_v63, %v1855_v25  ;;  %v8860_v26 = vcombine.low %v1851_v63, %v1855_v25  ;;  %v8875_v25 = vcombine.high %v1740_v49, %v1744_v54  ;;  %v1748_v63 = vld [vmem:[%s12397_s4 + $0x88] sm:$0xff] }
  0xd9   :  { %13529 = vst [vmem:[#allocation216_spill] sm:$0xff] %v8842_v13 }
  0xda   :  { %1486 = vmatpush1.bf16.msra.mxu1 %v8794_v47  ;;  %13528 = vst [vmem:[#allocation215_spill] sm:$0xff] %v8839_v12  ;;  %v1737_v47 = vld [vmem:[%s12397_s4 + $0x30] sm:$0xff]  ;;  %13531 = vst [vmem:[#allocation218_spill] sm:$0xff] %v8860_v26 }
  0xdb   :  { %1487 = vmatprep.subr.bf16.mxu1 %v8803_v15  ;;  %2526 = vmatpush1.bf16.msra.mxu0 %v8812_v42  ;;  %v1733_v15 = vld [vmem:[%s12397_s4 + $0x10] sm:$0xff]  ;;  %v8866_v42 = vcombine.low %v1732_v57, %v1736_v31  ;;  %13534 = vst [vmem:[#allocation221_spill] sm:$0xff] %v8875_v25  ;;  %v1752_v57 = vld [vmem:[%s12397_s4 + $0xa8] sm:$0xff] }
  0xdc   :  { %2527 = vmatprep.subr.bf16.mxu0 %v8815_v41  ;;  %v8863_v41 = vcombine.high %v1733_v15, %v1737_v47  ;;  %v8884_v31 = vcombine.low %v1733_v15, %v1737_v47  ;;  %v1753_v47 = vld [vmem:[%s12397_s4 + $0xb0] sm:$0xff]  ;;  %v1756_v15 = vld [vmem:[%s12397_s4 + $0xc8] sm:$0xff] }
  0xdd   :  { %13533 = vst [vmem:[#allocation220_spill] sm:$0xff] %v8866_v42 }
  0xde   :  { %1488 = vmatpush1.bf16.msra.mxu1 %v8818_v2  ;;  %13532 = vst [vmem:[#allocation219_spill] sm:$0xff] %v8863_v41  ;;  %v1745_v2 = vld [vmem:[%s12397_s4 + $0x70] sm:$0xff]  ;;  %13535 = vst [vmem:[#allocation222_spill] sm:$0xff] %v8884_v31 }
  0xdf   :  { %1489 = vmatprep.subr.bf16.mxu1 %v8827_v58  ;;  %2528 = vmatpush1.bf16.msra.mxu0 %v8836_v18  ;;  %v1741_v58 = vld [vmem:[%s12397_s4 + $0x50] sm:$0xff]  ;;  %v8891_v18 = vcombine.low %v1740_v49, %v1744_v54  ;;  %v1760_v49 = vld [vmem:[%s12397_s4 + $0xe8] sm:$0xff] }
  0xe0   :  { %2529 = vmatprep.subr.bf16.mxu0 %v8839_v12  ;;  %v8888_v12 = vcombine.high %v1741_v58, %v1745_v2  ;;  %v8911_v54 = vcombine.low %v1741_v58, %v1745_v2  ;;  %v8927_v2 = vcombine.high %v1756_v15, %v1760_v49  ;;  %v1764_v58 = vld [vmem:[%s12397_s4 + $0x108] sm:$0xff] }
  0xe1   :  { %13537 = vst [vmem:[#allocation224_spill] sm:$0xff] %v8891_v18 }
  0xe2   :  { %1490 = vmatpush1.bf16.msra.mxu1 %v8842_v13  ;;  %13536 = vst [vmem:[#allocation223_spill] sm:$0xff] %v8888_v12  ;;  %13539 = vst [vmem:[#allocation226_spill] sm:$0xff] %v8911_v54 }
  0xe3   :  { %2540 = vmatprep.subr.bf16.mxu1 %v8851_v3  ;;  %2530 = vmatpush1.bf16.msra.mxu0 %v8860_v26  ;;  %v1749_v3 = vld [vmem:[%s12397_s4 + $0x90] sm:$0xff]  ;;  %v8918_v26 = vcombine.low %v1748_v63, %v1752_v57  ;;  %13542 = vst [vmem:[#allocation229_spill] sm:$0xff] %v8927_v2 }
  0xe4   :  { %2581 = vmatprep.subr.bf16.mxu0 %v8863_v41  ;;  %v8915_v41 = vcombine.high %v1749_v3, %v1753_v47 }
  0xe5   :  { %1508 = vmatmul.mubr.bf16.vlgmr.msra.gmra.mrb[16].mxu1 %v8474_v33  ;;  %v8901_v33 = vcombine.high %v1748_v63, %v1752_v57  ;;  %13541 = vst [vmem:[#allocation228_spill] sm:$0xff] %v8918_v26  ;;  %v1768_v63 = vld [vmem:[%s12397_s4 + $0x128] sm:$0xff]  ;;  %v8936_v57 = vcombine.low %v1749_v3, %v1753_v47 }
  0xe6   :  { %2541 = vmatpush1.bf16.msra.mxu1 %v8866_v42  ;;  %2572 = vmatprep.mubr.bf16.mxu1 %v13376_v1  ;;  %13540 = vst [vmem:[#allocation227_spill] sm:$0xff] %v8915_v41  ;;  %v1769_v42 = vld [vmem:[%s12397_s4 + $0x130] sm:$0xff]  ;;  %v8951_v3 = vcombine.high %v1764_v58, %v1768_v63  ;;  %v1772_v47 = vld [vmem:[%s12397_s4 + $0x148] sm:$0xff] }
  0xe7   :  { %2542 = vmatprep.subr.bf16.mxu1 %v8875_v25  ;;  %13538 = vst [vmem:[#allocation225_spill] sm:$0xff] %v8901_v33  ;;  %2532 = vmatmul.mubr.bf16.vlgmr.msra.gmra.mrb[12].mxu0 %v13376_v1  ;;  %v1757_v25 = vld [vmem:[%s12397_s4 + $0xd0] sm:$0xff]  ;;  %13543 = vst [vmem:[#allocation230_spill] sm:$0xff] %v8936_v57 }
  0xe8   :  { %2582 = vmatpush1.bf16.msra.mxu0 %v8884_v31  ;;  %2613 = vmatprep.mubr.bf16.mxu0 %v13376_v1  ;;  %v1761_v31 = vld [vmem:[%s12397_s4 + $0xf0] sm:$0xff]  ;;  %13546 = vst [vmem:[#allocation233_spill] sm:$0xff] %v8951_v3 }
  0xe9   :  { %2583 = vmatprep.subr.bf16.mxu0 %v8888_v12  ;;  %v8939_v12 = vcombine.high %v1757_v25, %v1761_v31 }
  0xea   :  { %2543 = vmatpush1.bf16.msra.mxu1 %v8891_v18  ;;  %v1765_v18 = vld [vmem:[%s12397_s4 + $0x110] sm:$0xff] }
  0xeb   :  { %2544 = vmatprep.subr.bf16.mxu1 %v8901_v33  ;;  %13544 = vst [vmem:[#allocation231_spill] sm:$0xff] %v8939_v12  ;;  %v8942_v33 = vcombine.low %v1756_v15, %v1760_v49  ;;  %v1776_v15 = vld [vmem:[%s12397_s4 + $0x168] sm:$0xff]  ;;  %v8960_v49 = vcombine.low %v1757_v25, %v1761_v31 }
  0xec   :  { %2584 = vmatpush1.bf16.msra.mxu0 %v8911_v54  ;;  %v8966_v54 = vcombine.low %v1764_v58, %v1768_v63  ;;  %v8975_v25 = vcombine.high %v1772_v47, %v1776_v15  ;;  %v1780_v31 = vld [vmem:[%s12397_s4 + $0x188] sm:$0xff]  ;;  %v8984_v63 = vcombine.low %v1765_v18, %v1769_v42 }
  0xed   :  { %2585 = vmatprep.subr.bf16.mxu0 %v8915_v41  ;;  %13545 = vst [vmem:[#allocation232_spill] sm:$0xff] %v8942_v33  ;;  %13547 = vst [vmem:[#allocation234_spill] sm:$0xff] %v8960_v49  ;;  %v8963_v41 = vcombine.high %v1765_v18, %v1769_v42  ;;  %v1784_v58 = vld [vmem:[%s12397_s4 + $0x1a8] sm:$0xff] }
  0xee   :  { %2545 = vmatpush1.bf16.msra.mxu1 %v8918_v26  ;;  %13549 = vst [vmem:[#allocation236_spill] sm:$0xff] %v8966_v54  ;;  %v1777_v26 = vld [vmem:[%s12397_s4 + $0x170] sm:$0xff]  ;;  %13550 = vst [vmem:[#allocation237_spill] sm:$0xff] %v8975_v25  ;;  %v8999_v42 = vcombine.high %v1780_v31, %v1784_v58  ;;  %v1788_v18 = vld [vmem:[%s12397_s4 + $0x1c8] sm:$0xff] }
  0xef   :  { %2546 = vmatprep.subr.bf16.mxu1 %v8927_v2  ;;  %13548 = vst [vmem:[#allocation235_spill] sm:$0xff] %v8963_v41  ;;  %v1773_v2 = vld [vmem:[%s12397_s4 + $0x150] sm:$0xff]  ;;  %13551 = vst [vmem:[#allocation238_spill] sm:$0xff] %v8984_v63 }
  0xf0   :  { %2586 = vmatpush1.bf16.msra.mxu0 %v8936_v57  ;;  %v8990_v57 = vcombine.low %v1772_v47, %v1776_v15  ;;  %13554 = vst [vmem:[#allocation241_spill] sm:$0xff] %v8999_v42  ;;  %v1792_v47 = vld [vmem:[%s12397_s4 + $0x1e8] sm:$0xff]  ;;  %v9008_v15 = vcombine.low %v1773_v2, %v1777_v26 }
  0xf1   :  { %2587 = vmatprep.subr.bf16.mxu0 %v8939_v12  ;;  %v8987_v12 = vcombine.high %v1773_v2, %v1777_v26  ;;  %v9023_v26 = vcombine.high %v1788_v18, %v1792_v47  ;;  %v1796_v2 = vld [vmem:[%s12397_s4 + $0x208] sm:$0xff] }
  0xf2   :  { %2547 = vmatpush1.bf16.msra.mxu1 %v8942_v33  ;;  %13553 = vst [vmem:[#allocation240_spill] sm:$0xff] %v8990_v57  ;;  %v1785_v33 = vld [vmem:[%s12397_s4 + $0x1b0] sm:$0xff]  ;;  %13555 = vst [vmem:[#allocation242_spill] sm:$0xff] %v9008_v15 }
  0xf3   :  { %2548 = vmatprep.subr.bf16.mxu1 %v8951_v3  ;;  %13552 = vst [vmem:[#allocation239_spill] sm:$0xff] %v8987_v12  ;;  %v1781_v3 = vld [vmem:[%s12397_s4 + $0x190] sm:$0xff]  ;;  %13558 = vst [vmem:[#allocation245_spill] sm:$0xff] %v9023_v26 }
  0xf4   :  { %2588 = vmatpush1.bf16.msra.mxu0 %v8960_v49  ;;  %v9014_v49 = vcombine.low %v1780_v31, %v1784_v58  ;;  %v1800_v31 = vld [vmem:[%s12397_s4 + $0x228] sm:$0xff]  ;;  %v9032_v58 = vcombine.low %v1781_v3, %v1785_v33 }
  0xf5   :  { %2589 = vmatprep.subr.bf16.mxu0 %v8963_v41  ;;  %v9011_v41 = vcombine.high %v1781_v3, %v1785_v33  ;;  %v9047_v33 = vcombine.high %v1796_v2, %v1800_v31  ;;  %v1804_v3 = vld [vmem:[%s12397_s4 + $0x248] sm:$0xff] }
  0xf6   :  { %2549 = vmatpush1.bf16.msra.mxu1 %v8966_v54  ;;  %13557 = vst [vmem:[#allocation244_spill] sm:$0xff] %v9014_v49  ;;  %v1793_v54 = vld [vmem:[%s12397_s4 + $0x1f0] sm:$0xff]  ;;  %13559 = vst [vmem:[#allocation246_spill] sm:$0xff] %v9032_v58 }
  0xf7   :  { %2550 = vmatprep.subr.bf16.mxu1 %v8975_v25  ;;  %13556 = vst [vmem:[#allocation243_spill] sm:$0xff] %v9011_v41  ;;  %v1789_v25 = vld [vmem:[%s12397_s4 + $0x1d0] sm:$0xff]  ;;  %13562 = vst [vmem:[#allocation249_spill] sm:$0xff] %v9047_v33 }
  0xf8   :  { %2590 = vmatpush1.bf16.msra.mxu0 %v8984_v63  ;;  %v9038_v63 = vcombine.low %v1788_v18, %v1792_v47  ;;  %v1808_v18 = vld [vmem:[%s12397_s4 + $0x268] sm:$0xff]  ;;  %v9056_v47 = vcombine.low %v1789_v25, %v1793_v54 }
  0xf9   :  { %2591 = vmatprep.subr.bf16.mxu0 %v8987_v12  ;;  %v9035_v12 = vcombine.high %v1789_v25, %v1793_v54  ;;  %v9071_v54 = vcombine.high %v1804_v3, %v1808_v18  ;;  %v1812_v25 = vld [vmem:[%s12397_s4 + $0x288] sm:$0xff] }
  0xfa   :  { %2551 = vmatpush1.bf16.msra.mxu1 %v8990_v57  ;;  %13561 = vst [vmem:[#allocation248_spill] sm:$0xff] %v9038_v63  ;;  %v1801_v57 = vld [vmem:[%s12397_s4 + $0x230] sm:$0xff]  ;;  %13563 = vst [vmem:[#allocation250_spill] sm:$0xff] %v9056_v47 }
  0xfb   :  { %2552 = vmatprep.subr.bf16.mxu1 %v8999_v42  ;;  %13560 = vst [vmem:[#allocation247_spill] sm:$0xff] %v9035_v12  ;;  %v1797_v42 = vld [vmem:[%s12397_s4 + $0x210] sm:$0xff]  ;;  %13566 = vst [vmem:[#allocation253_spill] sm:$0xff] %v9071_v54 }
  0xfc   :  { %2592 = vmatpush1.bf16.msra.mxu0 %v9008_v15  ;;  %v9062_v15 = vcombine.low %v1796_v2, %v1800_v31  ;;  %v1816_v2 = vld [vmem:[%s12397_s4 + $0x2a8] sm:$0xff]  ;;  %v9080_v31 = vcombine.low %v1797_v42, %v1801_v57 }
  0xfd   :  { %2593 = vmatprep.subr.bf16.mxu0 %v9011_v41  ;;  %v9059_v41 = vcombine.high %v1797_v42, %v1801_v57  ;;  %v9095_v57 = vcombine.high %v1812_v25, %v1816_v2  ;;  %v1820_v42 = vld [vmem:[%s12397_s4 + $0x2c8] sm:$0xff] }
  0xfe   :  { %2553 = vmatpush1.bf16.msra.mxu1 %v9014_v49  ;;  %13565 = vst [vmem:[#allocation252_spill] sm:$0xff] %v9062_v15  ;;  %v1809_v49 = vld [vmem:[%s12397_s4 + $0x270] sm:$0xff]  ;;  %13567 = vst [vmem:[#allocation254_spill] sm:$0xff] %v9080_v31 }
  0xff   :  { %2554 = vmatprep.subr.bf16.mxu1 %v9023_v26  ;;  %13564 = vst [vmem:[#allocation251_spill] sm:$0xff] %v9059_v41  ;;  %v1805_v26 = vld [vmem:[%s12397_s4 + $0x250] sm:$0xff]  ;;  %13570 = vst [vmem:[#allocation257_spill] sm:$0xff] %v9095_v57 }
 0x100   :  { %2594 = vmatpush1.bf16.msra.mxu0 %v9032_v58  ;;  %v9086_v58 = vcombine.low %v1804_v3, %v1808_v18  ;;  %v1824_v3 = vld [vmem:[%s12397_s4 + $0x2e8] sm:$0xff]  ;;  %v9104_v18 = vcombine.low %v1805_v26, %v1809_v49 }
 0x101   :  { %2595 = vmatprep.subr.bf16.mxu0 %v9035_v12  ;;  %v9083_v12 = vcombine.high %v1805_v26, %v1809_v49  ;;  %v9119_v49 = vcombine.high %v1820_v42, %v1824_v3  ;;  %v1828_v26 = vld [vmem:[%s12397_s4 + $0x308] sm:$0xff] }
 0x102   :  { %2555 = vmatpush1.bf16.msra.mxu1 %v9038_v63  ;;  %13569 = vst [vmem:[#allocation256_spill] sm:$0xff] %v9086_v58  ;;  %v1817_v63 = vld [vmem:[%s12397_s4 + $0x2b0] sm:$0xff]  ;;  %13571 = vst [vmem:[#allocation258_spill] sm:$0xff] %v9104_v18 }
 0x103   :  { %2556 = vmatprep.subr.bf16.mxu1 %v9047_v33  ;;  %13568 = vst [vmem:[#allocation255_spill] sm:$0xff] %v9083_v12  ;;  %v1813_v33 = vld [vmem:[%s12397_s4 + $0x290] sm:$0xff]  ;;  %13574 = vst [vmem:[#allocation261_spill] sm:$0xff] %v9119_v49 }
 0x104   :  { %2596 = vmatpush1.bf16.msra.mxu0 %v9056_v47  ;;  %v9110_v47 = vcombine.low %v1812_v25, %v1816_v2  ;;  %v1832_v25 = vld [vmem:[%s12397_s4 + $0x328] sm:$0xff]  ;;  %v9128_v2 = vcombine.low %v1813_v33, %v1817_v63 }
 0x105   :  { %2597 = vmatprep.subr.bf16.mxu0 %v9059_v41  ;;  %v9107_v41 = vcombine.high %v1813_v33, %v1817_v63  ;;  %v9143_v63 = vcombine.high %v1828_v26, %v1832_v25  ;;  %v1836_v33 = vld [vmem:[%s12397_s4 + $0x348] sm:$0xff] }
 0x106   :  { %2557 = vmatpush1.bf16.msra.mxu1 %v9062_v15  ;;  %13573 = vst [vmem:[#allocation260_spill] sm:$0xff] %v9110_v47  ;;  %v1825_v15 = vld [vmem:[%s12397_s4 + $0x2f0] sm:$0xff]  ;;  %13575 = vst [vmem:[#allocation262_spill] sm:$0xff] %v9128_v2 }
 0x107   :  { %2558 = vmatprep.subr.bf16.mxu1 %v9071_v54  ;;  %13572 = vst [vmem:[#allocation259_spill] sm:$0xff] %v9107_v41  ;;  %v1821_v54 = vld [vmem:[%s12397_s4 + $0x2d0] sm:$0xff]  ;;  %13578 = vst [vmem:[#allocation265_spill] sm:$0xff] %v9143_v63 }
 0x108   :  { %2598 = vmatpush1.bf16.msra.mxu0 %v9080_v31  ;;  %v9134_v31 = vcombine.low %v1820_v42, %v1824_v3  ;;  %v1840_v42 = vld [vmem:[%s12397_s4 + $0x368] sm:$0xff]  ;;  %v9152_v3 = vcombine.low %v1821_v54, %v1825_v15 }
 0x109   :  { %2599 = vmatprep.subr.bf16.mxu0 %v9083_v12  ;;  %v9131_v12 = vcombine.high %v1821_v54, %v1825_v15  ;;  %v9167_v15 = vcombine.high %v1836_v33, %v1840_v42  ;;  %v1844_v54 = vld [vmem:[%s12397_s4 + $0x388] sm:$0xff] }
 0x10a   :  { %2559 = vmatpush1.bf16.msra.mxu1 %v9086_v58  ;;  %13577 = vst [vmem:[#allocation264_spill] sm:$0xff] %v9134_v31  ;;  %v1833_v58 = vld [vmem:[%s12397_s4 + $0x330] sm:$0xff]  ;;  %13579 = vst [vmem:[#allocation266_spill] sm:$0xff] %v9152_v3 }
 0x10b   :  { %2560 = vmatprep.subr.bf16.mxu1 %v9095_v57  ;;  %13576 = vst [vmem:[#allocation263_spill] sm:$0xff] %v9131_v12  ;;  %v1829_v57 = vld [vmem:[%s12397_s4 + $0x310] sm:$0xff]  ;;  %13582 = vst [vmem:[#allocation269_spill] sm:$0xff] %v9167_v15 }
 0x10c   :  { %2600 = vmatpush1.bf16.msra.mxu0 %v9104_v18  ;;  %v9158_v18 = vcombine.low %v1828_v26, %v1832_v25  ;;  %v1848_v26 = vld [vmem:[%s12397_s4 + $0x3a8] sm:$0xff]  ;;  %v9176_v25 = vcombine.low %v1829_v57, %v1833_v58 }
 0x10d   :  { %2601 = vmatprep.subr.bf16.mxu0 %v9107_v41  ;;  %v9155_v41 = vcombine.high %v1829_v57, %v1833_v58  ;;  %v9191_v58 = vcombine.high %v1844_v54, %v1848_v26  ;;  %v9212_v62 = vcombine.low %v1844_v54, %v1848_v26  ;;  %v1734_v54 = vld [vmem:[%s12397_s4 + $0x18] sm:$0xff] }
 0x10e   :  { %2561 = vmatpush1.bf16.msra.mxu1 %v9110_v47  ;;  %13581 = vst [vmem:[#allocation268_spill] sm:$0xff] %v9158_v18  ;;  %v1841_v47 = vld [vmem:[%s12397_s4 + $0x370] sm:$0xff]  ;;  %13583 = vst [vmem:[#allocation270_spill] sm:$0xff] %v9176_v25  ;;  %v1738_v26 = vld [vmem:[%s12397_s4 + $0x38] sm:$0xff] }
 0x10f   :  { %2562 = vmatprep.subr.bf16.mxu1 %v9119_v49  ;;  %13580 = vst [vmem:[#allocation267_spill] sm:$0xff] %v9155_v41  ;;  %v1837_v49 = vld [vmem:[%s12397_s4 + $0x350] sm:$0xff]  ;;  %13586 = vst [vmem:[#allocation273_spill] sm:$0xff] %v9191_v58 }
 0x110   :  { %2602 = vmatpush1.bf16.msra.mxu0 %v9128_v2  ;;  %v9182_v2 = vcombine.low %v1836_v33, %v1840_v42  ;;  %v1856_v33 = vld [vmem:[%s12397_s4 + $0x3e8] sm:$0xff]  ;;  %v9202_v42 = vcombine.low %v1837_v49, %v1841_v47  ;;  %13589 = vst [vmem:[#allocation276_spill] sm:$0xff] %v9212_v62 }
 0x111   :  { %2603 = vmatprep.subr.bf16.mxu0 %v9131_v12  ;;  %v9179_v12 = vcombine.high %v1837_v49, %v1841_v47  ;;  %v1853_v47 = vld [vmem:[%s12397_s4 + $0x3d0] sm:$0xff] }
 0x112   :  { %2563 = vmatpush1.bf16.msra.mxu1 %v9134_v31  ;;  %13585 = vst [vmem:[#allocation272_spill] sm:$0xff] %v9182_v2  ;;  %v1849_v31 = vld [vmem:[%s12397_s4 + $0x3b0] sm:$0xff]  ;;  %13587 = vst [vmem:[#allocation274_spill] sm:$0xff] %v9202_v42 }
 0x113   :  { %2564 = vmatprep.subr.bf16.mxu1 %v9143_v63  ;;  %13584 = vst [vmem:[#allocation271_spill] sm:$0xff] %v9179_v12  ;;  %v1845_v63 = vld [vmem:[%s12397_s4 + $0x390] sm:$0xff] }
 0x114   :  { %2604 = vmatpush1.bf16.msra.mxu0 %v9152_v3  ;;  %v1857_v49 = vld [vmem:[%s12397_s4 + $0x3f0] sm:$0xff] }
 0x115   :  { %2605 = vmatprep.subr.bf16.mxu0 %v9155_v41  ;;  %v1852_v41 = vld [vmem:[%s12397_s4 + $0x3c8] sm:$0xff] }
 0x116   :  { %2565 = vmatpush1.bf16.msra.mxu1 %v9158_v18  ;;  %v9223_v55 = vcombine.high %v1852_v41, %v1856_v33 }
 0x117   :  { %2566 = vmatprep.subr.bf16.mxu1 %v9167_v15  ;;  %v9209_v15 = vcombine.high %v1845_v63, %v1849_v31 }
 0x118   :  { %v9193_v57 = vpop.f32.mrb[0].mxu1  ;;  %2606 = vmatpush1.bf16.msra.mxu0 %v9176_v25  ;;  %v9206_v18 = vpop.f32.mrb[0].mxu0  ;;  %13590 = vst [vmem:[#allocation277_spill] sm:$0xff] %v9223_v55 }
 0x119   :  { %v9204_v3 = vpop.f32.mrb[1].mxu1  ;;  %2607 = vmatprep.subr.bf16.mxu0 %v9179_v12  ;;  %13588 = vst [vmem:[#allocation275_spill] sm:$0xff] %v9209_v15  ;;  %v9214_v50 = vpop.f32.mrb[1].mxu0 }
 0x11a   :  { %v947_v13 = vpop.f32.mrb[2].mxu1  ;;  %2567 = vmatpush1.bf16.msra.mxu1 %v9182_v2  ;;  %v906_v12 = vpop.f32.mrb[2].mxu0  ;;  %v9232_v2 = vcombine.low %v1845_v63, %v1849_v31  ;;  %v9247_v31 = vcombine.high %v1734_v54, %v1738_v26  ;;  %v1742_v63 = vld [vmem:[%s12397_s4 + $0x58] sm:$0xff] }
 0x11b   :  { %v948_v25 = vpop.f32.mrb[3].mxu1  ;;  %2568 = vmatprep.subr.bf16.mxu1 %v9191_v58  ;;  %v907_v13 = vpop.f32.mrb[3].mxu0  ;;  %v9238_v12 = vcombine.low %v1852_v41, %v1856_v33  ;;  %v1607_v58 = vld [vmem:[%s12399_s3 + $0x20] sm:$0xff]  ;;  %v1746_v41 = vld [vmem:[%s12397_s4 + $0x78] sm:$0xff]  ;;  %v9256_v33 = vcombine.low %v1853_v47, %v1857_v49 }
 0x11c   :  { %2608 = vmatpush1.bf16.msra.mxu0 %v9202_v42  ;;  %13591 = vst [vmem:[#allocation278_spill] sm:$0xff] %v9232_v2  ;;  %v9235_v25 = vcombine.high %v1853_v47, %v1857_v49  ;;  %v1603_v13 = vld [vmem:[%s12399_s3] sm:$0xff]  ;;  %13594 = vst [vmem:[#allocation281_spill] sm:$0xff] %v9247_v31  ;;  %v9262_v42 = vcombine.low %v1734_v54, %v1738_v26  ;;  %v9271_v47 = vcombine.high %v1742_v63, %v1746_v41  ;;  %v1750_v49 = vld [vmem:[%s12397_s4 + $0x98] sm:$0xff] }
 0x11d   :  { %2609 = vmatprep.subr.bf16.mxu0 %v9209_v15  ;;  %13593 = vst [vmem:[#allocation280_spill] sm:$0xff] %v9238_v12  ;;  %13595 = vst [vmem:[#allocation282_spill] sm:$0xff] %v9256_v33  ;;  %v9259_v15 = vcombine.high %v1603_v13, %v1607_v58  ;;  %v1754_v54 = vld [vmem:[%s12397_s4 + $0xb8] sm:$0xff]  ;;  %v9280_v26 = vcombine.low %v1603_v13, %v1607_v58  ;;  %v1623_v58 = vld [vmem:[%s12399_s3 + $0xa0] sm:$0xff] }
 0x11e   :  { %13592 = vst [vmem:[#allocation279_spill] sm:$0xff] %v9235_v25  ;;  %2569 = vmatpush1.bf16.msra.mxu1 %v9212_v62  ;;  %13597 = vst [vmem:[#allocation284_spill] sm:$0xff] %v9262_v42  ;;  %v1615_v62 = vld [vmem:[%s12399_s3 + $0x60] sm:$0xff]  ;;  %v9297_v13 = vcombine.high %v1750_v49, %v1754_v54 }
 0x11f   :  { %2570 = vmatprep.subr.bf16.mxu1 %v9223_v55  ;;  %13596 = vst [vmem:[#allocation283_spill] sm:$0xff] %v9259_v15  ;;  %v1611_v55 = vld [vmem:[%s12399_s3 + $0x40] sm:$0xff]  ;;  %13598 = vst [vmem:[#allocation285_spill] sm:$0xff] %v9271_v47 }
 0x120   :  { %2610 = vmatpush1.bf16.msra.mxu0 %v9232_v2  ;;  %13599 = vst [vmem:[#allocation286_spill] sm:$0xff] %v9280_v26  ;;  %v9287_v2 = vcombine.low %v1742_v63, %v1746_v41  ;;  %13602 = vst [vmem:[#allocation289_spill] sm:$0xff] %v9297_v13  ;;  %v1758_v63 = vld [vmem:[%s12397_s4 + $0xd8] sm:$0xff] }
 0x121   :  { %2611 = vmatprep.subr.bf16.mxu0 %v9235_v25  ;;  %v9284_v25 = vcombine.high %v1611_v55, %v1615_v62  ;;  %v1762_v41 = vld [vmem:[%s12397_s4 + $0xf8] sm:$0xff] }
 0x122   :  { %2571 = vmatpush1.bf16.msra.mxu1 %v9238_v12  ;;  %13601 = vst [vmem:[#allocation288_spill] sm:$0xff] %v9287_v2  ;;  %v1631_v12 = vld [vmem:[%s12399_s3 + $0xe0] sm:$0xff] }
 0x123   :  { %2622 = vmatprep.subr.bf16.mxu1 %v9247_v31  ;;  %13600 = vst [vmem:[#allocation287_spill] sm:$0xff] %v9284_v25  ;;  %v1619_v31 = vld [vmem:[%s12399_s3 + $0x80] sm:$0xff] }
 0x124   :  { %2612 = vmatpush1.bf16.msra.mxu0 %v9256_v33  ;;  %v9310_v33 = vcombine.high %v1619_v31, %v1623_v58 }
 0x125   :  { %2573 = vmatmul.mubr.bf16.vlgmr.msra.gmra.mrb[20].mxu1 %v13376_v1  ;;  %3303 = vmatprep.subr.bf16.mxu0 %v9259_v15  ;;  %v9307_v15 = vcombine.low %v1611_v55, %v1615_v62  ;;  %v9322_v55 = vcombine.high %v1758_v63, %v1762_v41  ;;  %v1766_v62 = vld [vmem:[%s12397_s4 + $0x118] sm:$0xff] }
 0x126   :  { %2623 = vmatpush1.bf16.msra.mxu1 %v9262_v42  ;;  %2654 = vmatprep.mubr.bf16.mxu1 %v13376_v1  ;;  %13604 = vst [vmem:[#allocation291_spill] sm:$0xff] %v9310_v33  ;;  %v1627_v42 = vld [vmem:[%s12399_s3 + $0xc0] sm:$0xff] }
 0x127   :  { %2624 = vmatprep.subr.bf16.mxu1 %v9271_v47  ;;  %2614 = vmatmul.mubr.bf16.vlgmr.msra.gmra.mrb[16].mxu0 %v13376_v1  ;;  %13603 = vst [vmem:[#allocation290_spill] sm:$0xff] %v9307_v15  ;;  %v9313_v47 = vcombine.low %v1750_v49, %v1754_v54  ;;  %13606 = vst [vmem:[#allocation293_spill] sm:$0xff] %v9322_v55  ;;  %v1770_v49 = vld [vmem:[%s12397_s4 + $0x138] sm:$0xff]  ;;  %v9331_v54 = vcombine.low %v1619_v31, %v1623_v58 }
 0x128   :  { %3304 = vmatpush1.bf16.msra.mxu0 %v9280_v26  ;;  %v9337_v26 = vcombine.low %v1758_v63, %v1762_v41  ;;  %v9346_v31 = vcombine.high %v1766_v62, %v1770_v49  ;;  %v1774_v58 = vld [vmem:[%s12397_s4 + $0x158] sm:$0xff]  ;;  %v9355_v41 = vcombine.low %v1627_v42, %v1631_v12 }
 0x129   :  { %3305 = vmatprep.subr.bf16.mxu0 %v9284_v25  ;;  %13605 = vst [vmem:[#allocation292_spill] sm:$0xff] %v9313_v47  ;;  %13607 = vst [vmem:[#allocation294_spill] sm:$0xff] %v9331_v54  ;;  %v9334_v25 = vcombine.high %v1627_v42, %v1631_v12  ;;  %v1778_v63 = vld [vmem:[%s12397_s4 + $0x178] sm:$0xff] }
 0x12a   :  { %2625 = vmatpush1.bf16.msra.mxu1 %v9287_v2  ;;  %13609 = vst [vmem:[#allocation296_spill] sm:$0xff] %v9337_v26  ;;  %v1639_v2 = vld [vmem:[%s12399_s3 + $0x120] sm:$0xff]  ;;  %13610 = vst [vmem:[#allocation297_spill] sm:$0xff] %v9346_v31  ;;  %v9370_v42 = vcombine.high %v1774_v58, %v1778_v63  ;;  %v1782_v12 = vld [vmem:[%s12397_s4 + $0x198] sm:$0xff] }
 0x12b   :  { %2626 = vmatprep.subr.bf16.mxu1 %v9297_v13  ;;  %13608 = vst [vmem:[#allocation295_spill] sm:$0xff] %v9334_v25  ;;  %v1635_v13 = vld [vmem:[%s12399_s3 + $0x100] sm:$0xff]  ;;  %13611 = vst [vmem:[#allocation298_spill] sm:$0xff] %v9355_v41 }
 0x12c   :  { %3306 = vmatpush1.bf16.msra.mxu0 %v9307_v15  ;;  %v9361_v15 = vcombine.low %v1766_v62, %v1770_v49  ;;  %13614 = vst [vmem:[#allocation301_spill] sm:$0xff] %v9370_v42  ;;  %v1786_v62 = vld [vmem:[%s12397_s4 + $0x1b8] sm:$0xff]  ;;  %v9379_v49 = vcombine.low %v1635_v13, %v1639_v2 }
 0x12d   :  { %3307 = vmatprep.subr.bf16.mxu0 %v9310_v33  ;;  %v9358_v33 = vcombine.high %v1635_v13, %v1639_v2  ;;  %v9394_v2 = vcombine.high %v1782_v12, %v1786_v62  ;;  %v1790_v13 = vld [vmem:[%s12397_s4 + $0x1d8] sm:$0xff] }
 0x12e   :  { %2627 = vmatpush1.bf16.msra.mxu1 %v9313_v47  ;;  %13613 = vst [vmem:[#allocation300_spill] sm:$0xff] %v9361_v15  ;;  %v1647_v47 = vld [vmem:[%s12399_s3 + $0x160] sm:$0xff]  ;;  %13615 = vst [vmem:[#allocation302_spill] sm:$0xff] %v9379_v49 }
 0x12f   :  { %2628 = vmatprep.subr.bf16.mxu1 %v9322_v55  ;;  %13612 = vst [vmem:[#allocation299_spill] sm:$0xff] %v9358_v33  ;;  %v1643_v55 = vld [vmem:[%s12399_s3 + $0x140] sm:$0xff]  ;;  %13618 = vst [vmem:[#allocation305_spill] sm:$0xff] %v9394_v2 }
 0x130   :  { %3308 = vmatpush1.bf16.msra.mxu0 %v9331_v54  ;;  %v9385_v54 = vcombine.low %v1774_v58, %v1778_v63  ;;  %v1794_v58 = vld [vmem:[%s12397_s4 + $0x1f8] sm:$0xff]  ;;  %v9403_v63 = vcombine.low %v1643_v55, %v1647_v47 }
 0x131   :  { %3309 = vmatprep.subr.bf16.mxu0 %v9334_v25  ;;  %v9382_v25 = vcombine.high %v1643_v55, %v1647_v47  ;;  %v9418_v47 = vcombine.high %v1790_v13, %v1794_v58  ;;  %v1798_v55 = vld [vmem:[%s12397_s4 + $0x218] sm:$0xff] }
 0x132   :  { %2629 = vmatpush1.bf16.msra.mxu1 %v9337_v26  ;;  %13617 = vst [vmem:[#allocation304_spill] sm:$0xff] %v9385_v54  ;;  %v1655_v26 = vld [vmem:[%s12399_s3 + $0x1a0] sm:$0xff]  ;;  %13619 = vst [vmem:[#allocation306_spill] sm:$0xff] %v9403_v63 }
 0x133   :  { %2630 = vmatprep.subr.bf16.mxu1 %v9346_v31  ;;  %13616 = vst [vmem:[#allocation303_spill] sm:$0xff] %v9382_v25  ;;  %v1651_v31 = vld [vmem:[%s12399_s3 + $0x180] sm:$0xff]  ;;  %13622 = vst [vmem:[#allocation309_spill] sm:$0xff] %v9418_v47 }
 0x134   :  { %3310 = vmatpush1.bf16.msra.mxu0 %v9355_v41  ;;  %v9409_v41 = vcombine.low %v1782_v12, %v1786_v62  ;;  %v1802_v12 = vld [vmem:[%s12397_s4 + $0x238] sm:$0xff]  ;;  %v9427_v62 = vcombine.low %v1651_v31, %v1655_v26 }
 0x135   :  { %3311 = vmatprep.subr.bf16.mxu0 %v9358_v33  ;;  %v9406_v33 = vcombine.high %v1651_v31, %v1655_v26  ;;  %v9442_v26 = vcombine.high %v1798_v55, %v1802_v12  ;;  %v1806_v31 = vld [vmem:[%s12397_s4 + $0x258] sm:$0xff] }
 0x136   :  { %2631 = vmatpush1.bf16.msra.mxu1 %v9361_v15  ;;  %13621 = vst [vmem:[#allocation308_spill] sm:$0xff] %v9409_v41  ;;  %v1663_v15 = vld [vmem:[%s12399_s3 + $0x1e0] sm:$0xff]  ;;  %13623 = vst [vmem:[#allocation310_spill] sm:$0xff] %v9427_v62 }
 0x137   :  { %2632 = vmatprep.subr.bf16.mxu1 %v9370_v42  ;;  %13620 = vst [vmem:[#allocation307_spill] sm:$0xff] %v9406_v33  ;;  %v1659_v42 = vld [vmem:[%s12399_s3 + $0x1c0] sm:$0xff]  ;;  %13626 = vst [vmem:[#allocation313_spill] sm:$0xff] %v9442_v26 }
 0x138   :  { %3312 = vmatpush1.bf16.msra.mxu0 %v9379_v49  ;;  %v9433_v49 = vcombine.low %v1790_v13, %v1794_v58  ;;  %v1810_v13 = vld [vmem:[%s12397_s4 + $0x278] sm:$0xff]  ;;  %v9451_v58 = vcombine.low %v1659_v42, %v1663_v15 }
 0x139   :  { %3313 = vmatprep.subr.bf16.mxu0 %v9382_v25  ;;  %v9430_v25 = vcombine.high %v1659_v42, %v1663_v15  ;;  %v9466_v15 = vcombine.high %v1806_v31, %v1810_v13  ;;  %v1814_v42 = vld [vmem:[%s12397_s4 + $0x298] sm:$0xff] }
 0x13a   :  { %2633 = vmatpush1.bf16.msra.mxu1 %v9385_v54  ;;  %13625 = vst [vmem:[#allocation312_spill] sm:$0xff] %v9433_v49  ;;  %v1671_v54 = vld [vmem:[%s12399_s3 + $0x220] sm:$0xff]  ;;  %13627 = vst [vmem:[#allocation314_spill] sm:$0xff] %v9451_v58 }
 0x13b   :  { %2634 = vmatprep.subr.bf16.mxu1 %v9394_v2  ;;  %13624 = vst [vmem:[#allocation311_spill] sm:$0xff] %v9430_v25  ;;  %v1667_v2 = vld [vmem:[%s12399_s3 + $0x200] sm:$0xff]  ;;  %13630 = vst [vmem:[#allocation317_spill] sm:$0xff] %v9466_v15 }
 0x13c   :  { %3314 = vmatpush1.bf16.msra.mxu0 %v9403_v63  ;;  %v9457_v63 = vcombine.low %v1798_v55, %v1802_v12  ;;  %v1818_v55 = vld [vmem:[%s12397_s4 + $0x2b8] sm:$0xff]  ;;  %v9475_v12 = vcombine.low %v1667_v2, %v1671_v54 }
 0x13d   :  { %3315 = vmatprep.subr.bf16.mxu0 %v9406_v33  ;;  %v9454_v33 = vcombine.high %v1667_v2, %v1671_v54  ;;  %v9490_v54 = vcombine.high %v1814_v42, %v1818_v55  ;;  %v1822_v2 = vld [vmem:[%s12397_s4 + $0x2d8] sm:$0xff] }
 0x13e   :  { %2635 = vmatpush1.bf16.msra.mxu1 %v9409_v41  ;;  %13629 = vst [vmem:[#allocation316_spill] sm:$0xff] %v9457_v63  ;;  %v1679_v41 = vld [vmem:[%s12399_s3 + $0x260] sm:$0xff]  ;;  %13631 = vst [vmem:[#allocation318_spill] sm:$0xff] %v9475_v12 }
 0x13f   :  { %2636 = vmatprep.subr.bf16.mxu1 %v9418_v47  ;;  %13628 = vst [vmem:[#allocation315_spill] sm:$0xff] %v9454_v33  ;;  %v1675_v47 = vld [vmem:[%s12399_s3 + $0x240] sm:$0xff]  ;;  %13634 = vst [vmem:[#allocation321_spill] sm:$0xff] %v9490_v54 }
 0x140   :  { %3316 = vmatpush1.bf16.msra.mxu0 %v9427_v62  ;;  %v9481_v62 = vcombine.low %v1806_v31, %v1810_v13  ;;  %v1826_v31 = vld [vmem:[%s12397_s4 + $0x2f8] sm:$0xff]  ;;  %v9499_v13 = vcombine.low %v1675_v47, %v1679_v41 }
 0x141   :  { %3317 = vmatprep.subr.bf16.mxu0 %v9430_v25  ;;  %v9478_v25 = vcombine.high %v1675_v47, %v1679_v41  ;;  %v9514_v41 = vcombine.high %v1822_v2, %v1826_v31  ;;  %v1830_v47 = vld [vmem:[%s12397_s4 + $0x318] sm:$0xff] }
 0x142   :  { %2637 = vmatpush1.bf16.msra.mxu1 %v9433_v49  ;;  %13633 = vst [vmem:[#allocation320_spill] sm:$0xff] %v9481_v62  ;;  %v1687_v49 = vld [vmem:[%s12399_s3 + $0x2a0] sm:$0xff]  ;;  %13635 = vst [vmem:[#allocation322_spill] sm:$0xff] %v9499_v13 }
 0x143   :  { %2638 = vmatprep.subr.bf16.mxu1 %v9442_v26  ;;  %13632 = vst [vmem:[#allocation319_spill] sm:$0xff] %v9478_v25  ;;  %v1683_v26 = vld [vmem:[%s12399_s3 + $0x280] sm:$0xff]  ;;  %13638 = vst [vmem:[#allocation325_spill] sm:$0xff] %v9514_v41 }
 0x144   :  { %3318 = vmatpush1.bf16.msra.mxu0 %v9451_v58  ;;  %v9505_v58 = vcombine.low %v1814_v42, %v1818_v55  ;;  %v1834_v42 = vld [vmem:[%s12397_s4 + $0x338] sm:$0xff]  ;;  %v9523_v55 = vcombine.low %v1683_v26, %v1687_v49 }
 0x145   :  { %3319 = vmatprep.subr.bf16.mxu0 %v9454_v33  ;;  %v9502_v33 = vcombine.high %v1683_v26, %v1687_v49  ;;  %v9538_v49 = vcombine.high %v1830_v47, %v1834_v42  ;;  %v1838_v26 = vld [vmem:[%s12397_s4 + $0x358] sm:$0xff] }
 0x146   :  { %2639 = vmatpush1.bf16.msra.mxu1 %v9457_v63  ;;  %13637 = vst [vmem:[#allocation324_spill] sm:$0xff] %v9505_v58  ;;  %v1695_v63 = vld [vmem:[%s12399_s3 + $0x2e0] sm:$0xff]  ;;  %13639 = vst [vmem:[#allocation326_spill] sm:$0xff] %v9523_v55 }
 0x147   :  { %2640 = vmatprep.subr.bf16.mxu1 %v9466_v15  ;;  %13636 = vst [vmem:[#allocation323_spill] sm:$0xff] %v9502_v33  ;;  %v1691_v15 = vld [vmem:[%s12399_s3 + $0x2c0] sm:$0xff]  ;;  %13642 = vst [vmem:[#allocation329_spill] sm:$0xff] %v9538_v49 }
 0x148   :  { %3320 = vmatpush1.bf16.msra.mxu0 %v9475_v12  ;;  %v9529_v12 = vcombine.low %v1822_v2, %v1826_v31  ;;  %v1842_v2 = vld [vmem:[%s12397_s4 + $0x378] sm:$0xff]  ;;  %v9547_v31 = vcombine.low %v1691_v15, %v1695_v63 }
 0x149   :  { %3321 = vmatprep.subr.bf16.mxu0 %v9478_v25  ;;  %v9526_v25 = vcombine.high %v1691_v15, %v1695_v63  ;;  %v1707_v63 = vld [vmem:[%s12399_s3 + $0x340] sm:$0xff]  ;;  %v9570_v38 = vcombine.high %v1838_v26, %v1842_v2 }
 0x14a   :  { %2641 = vmatpush1.bf16.msra.mxu1 %v9481_v62  ;;  %13641 = vst [vmem:[#allocation328_spill] sm:$0xff] %v9529_v12  ;;  %v1703_v62 = vld [vmem:[%s12399_s3 + $0x320] sm:$0xff]  ;;  %13643 = vst [vmem:[#allocation330_spill] sm:$0xff] %v9547_v31 }
 0x14b   :  { %2642 = vmatprep.subr.bf16.mxu1 %v9490_v54  ;;  %13640 = vst [vmem:[#allocation327_spill] sm:$0xff] %v9526_v25  ;;  %v1699_v54 = vld [vmem:[%s12399_s3 + $0x300] sm:$0xff]  ;;  %13647 = vst [vmem:[#allocation334_spill] sm:$0xff] %v9570_v38 }
 0x14c   :  { %3322 = vmatpush1.bf16.msra.mxu0 %v9499_v13  ;;  %v1609_v13 = vld [vmem:[%s12399_s3 + $0x30] sm:$0xff]  ;;  %v1711_v15 = vld [vmem:[%s12399_s3 + $0x360] sm:$0xff] }
 0x14d   :  { %3323 = vmatprep.subr.bf16.mxu0 %v9502_v33  ;;  %v1605_v33 = vld [vmem:[%s12399_s3 + $0x10] sm:$0xff] }
 0x14e   :  { %2643 = vmatpush1.bf16.msra.mxu1 %v9505_v58  ;;  %v9559_v58 = vcombine.low %v1830_v47, %v1834_v42  ;;  %v1850_v47 = vld [vmem:[%s12397_s4 + $0x3b8] sm:$0xff]  ;;  %v9579_v42 = vcombine.low %v1699_v54, %v1703_v62 }
 0x14f   :  { %2644 = vmatprep.subr.bf16.mxu1 %v9514_v41  ;;  %v9556_v41 = vcombine.high %v1699_v54, %v1703_v62 }
 0x150   :  { %3324 = vmatpush1.bf16.msra.mxu0 %v9523_v55  ;;  %13645 = vst [vmem:[#allocation332_spill] sm:$0xff] %v9559_v58  ;;  %v9567_v55 = vcombine.low %v1605_v33, %v1609_v13  ;;  %13648 = vst [vmem:[#allocation335_spill] sm:$0xff] %v9579_v42 }
 0x151   :  { %3325 = vmatprep.subr.bf16.mxu0 %v9526_v25  ;;  %13644 = vst [vmem:[#allocation331_spill] sm:$0xff] %v9556_v41  ;;  %v1846_v25 = vld [vmem:[%s12397_s4 + $0x398] sm:$0xff] }
 0x152   :  { %2645 = vmatpush1.bf16.msra.mxu1 %v9529_v12  ;;  %13646 = vst [vmem:[#allocation333_spill] sm:$0xff] %v9567_v55  ;;  %v9582_v12 = vcombine.high %v1707_v63, %v1711_v15  ;;  %v9594_v62 = vcombine.high %v1846_v25, %v1850_v47  ;;  %v9617_v30 = vcombine.low %v1846_v25, %v1850_v47  ;;  %v1604_v25 = vld [vmem:[%s12399_s3 + $0x8] sm:$0xff] }
 0x153   :  { %2646 = vmatprep.subr.bf16.mxu1 %v9538_v49  ;;  %v9585_v49 = vcombine.low %v1838_v26, %v1842_v2  ;;  %v1858_v26 = vld [vmem:[%s12397_s4 + $0x3f8] sm:$0xff]  ;;  %v9605_v2 = vcombine.low %v1707_v63, %v1711_v15  ;;  %v1723_v63 = vld [vmem:[%s12399_s3 + $0x3c0] sm:$0xff]  ;;  %v1608_v47 = vld [vmem:[%s12399_s3 + $0x28] sm:$0xff] }
 0x154   :  { %3326 = vmatpush1.bf16.msra.mxu0 %v9547_v31  ;;  %13649 = vst [vmem:[#allocation336_spill] sm:$0xff] %v9582_v12  ;;  %13651 = vst [vmem:[#allocation338_spill] sm:$0xff] %v9594_v62  ;;  %v1727_v15 = vld [vmem:[%s12399_s3 + $0x3e0] sm:$0xff] }
 0x155   :  { %3327 = vmatprep.subr.bf16.mxu0 %v9556_v41  ;;  %13650 = vst [vmem:[#allocation337_spill] sm:$0xff] %v9585_v49  ;;  %v1854_v41 = vld [vmem:[%s12397_s4 + $0x3d8] sm:$0xff]  ;;  %13652 = vst [vmem:[#allocation339_spill] sm:$0xff] %v9605_v2 }
 0x156   :  { %2647 = vmatpush1.bf16.msra.mxu1 %v9559_v58  ;;  %13654 = vst [vmem:[#allocation341_spill] sm:$0xff] %v9617_v30 }
 0x157   :  { %2648 = vmatprep.subr.bf16.mxu1 %v9570_v38  ;;  %v9612_v38 = vcombine.high %v1715_v46, %v1719_v34 }
 0x158   :  { %v9596_v54 = vpop.f32.mrb[4].mxu1  ;;  %3328 = vmatpush1.bf16.msra.mxu0 %v9579_v42  ;;  %v9609_v58 = vpop.f32.mrb[4].mxu0 }
 0x159   :  { %v9607_v31 = vpop.f32.mrb[5].mxu1  ;;  %3329 = vmatprep.subr.bf16.mxu0 %v9582_v12  ;;  %13653 = vst [vmem:[#allocation340_spill] sm:$0xff] %v9612_v38  ;;  %v9614_v22 = vpop.f32.mrb[5].mxu0  ;;  %v9626_v12 = vcombine.high %v1854_v41, %v1858_v26 }
 0x15a   :  { %v1029_v39 = vpop.f32.mrb[6].mxu1  ;;  %2649 = vmatpush1.bf16.msra.mxu1 %v9585_v49  ;;  %v988_v19 = vpop.f32.mrb[6].mxu0  ;;  %v9635_v49 = vcombine.low %v1715_v46, %v1719_v34  ;;  %v1616_v34 = vld [vmem:[%s12399_s3 + $0x68] sm:$0xff]  ;;  %v9653_v46 = vcombine.low %v1723_v63, %v1727_v15 }
 0x15b   :  { %v1030_v42 = vpop.f32.mrb[7].mxu1  ;;  %2650 = vmatprep.subr.bf16.mxu1 %v9594_v62  ;;  %13655 = vst [vmem:[#allocation342_spill] sm:$0xff] %v9626_v12  ;;  %v989_v39 = vpop.f32.mrb[7].mxu0  ;;  %v9638_v19 = vcombine.high %v1723_v63, %v1727_v15  ;;  %v1612_v62 = vld [vmem:[%s12399_s3 + $0x48] sm:$0xff] }
 0x15c   :  { %3330 = vmatpush1.bf16.msra.mxu0 %v9605_v2  ;;  %13656 = vst [vmem:[#allocation343_spill] sm:$0xff] %v9635_v49  ;;  %v9641_v42 = vcombine.low %v1854_v41, %v1858_v26  ;;  %v9644_v39 = vcombine.high %v1604_v25, %v1608_v47  ;;  %13660 = vst [vmem:[#allocation347_spill] sm:$0xff] %v9653_v46  ;;  %v9656_v41 = vcombine.high %v1605_v33, %v1609_v13  ;;  %v1620_v2 = vld [vmem:[%s12399_s3 + $0x88] sm:$0xff] }
 0x15d   :  { %3331 = vmatprep.subr.bf16.mxu0 %v9612_v38  ;;  %13657 = vst [vmem:[#allocation344_spill] sm:$0xff] %v9638_v19  ;;  %v9659_v26 = vcombine.low %v1604_v25, %v1608_v47  ;;  %v9662_v38 = vcombine.high %v1612_v62, %v1616_v34  ;;  %v1624_v63 = vld [vmem:[%s12399_s3 + $0xa8] sm:$0xff]  ;;  %v9674_v33 = vcombine.low %v1612_v62, %v1616_v34 }
 0x15e   :  { %2651 = vmatpush1.bf16.msra.mxu1 %v9617_v30  ;;  %13658 = vst [vmem:[#allocation345_spill] sm:$0xff] %v9641_v42  ;;  %13659 = vst [vmem:[#allocation346_spill] sm:$0xff] %v9644_v39  ;;  %v9677_v13 = vcombine.high %v1620_v2, %v1624_v63  ;;  %v1628_v15 = vld [vmem:[%s12399_s3 + $0xc8] sm:$0xff]  ;;  %v9686_v47 = vcombine.low %v1620_v2, %v1624_v63 }
 0x15f   :  { %2652 = vmatprep.subr.bf16.mxu1 %v9626_v12  ;;  %13661 = vst [vmem:[#allocation348_spill] sm:$0xff] %v9656_v41  ;;  %13662 = vst [vmem:[#allocation349_spill] sm:$0xff] %v9659_v26  ;;  %v1632_v25 = vld [vmem:[%s12399_s3 + $0xe8] sm:$0xff] }
 0x160   :  { %3332 = vmatpush1.bf16.msra.mxu0 %v9635_v49  ;;  %13663 = vst [vmem:[#allocation350_spill] sm:$0xff] %v9662_v38  ;;  %13664 = vst [vmem:[#allocation351_spill] sm:$0xff] %v9674_v33  ;;  %v9689_v62 = vcombine.high %v1628_v15, %v1632_v25  ;;  %v1636_v34 = vld [vmem:[%s12399_s3 + $0x108] sm:$0xff] }
 0x161   :  { %3333 = vmatprep.subr.bf16.mxu0 %v9638_v19  ;;  %13665 = vst [vmem:[#allocation352_spill] sm:$0xff] %v9677_v13  ;;  %13666 = vst [vmem:[#allocation353_spill] sm:$0xff] %v9686_v47  ;;  %v9698_v19 = vcombine.low %v1628_v15, %v1632_v25  ;;  %v1644_v63 = vld [vmem:[%s12399_s3 + $0x148] sm:$0xff]  ;;  %v9723_v25 = vld [vmem:[%s12400_s5] sm:$0xff] }
 0x162   :  { %2653 = vmatpush1.bf16.msra.mxu1 %v9641_v42  ;;  %13667 = vst [vmem:[#allocation354_spill] sm:$0xff] %v9689_v62  ;;  %v1660_v12 = vld [vmem:[%s12399_s3 + $0x1c8] sm:$0xff] }
 0x163   :  { %3344 = vmatprep.subr.bf16.mxu1 %v9644_v39  ;;  %13668 = vst [vmem:[#allocation355_spill] sm:$0xff] %v9698_v19 }
 0x164   :  { %3334 = vmatpush1.bf16.msra.mxu0 %v9653_v46  ;;  %v1640_v46 = vld [vmem:[%s12399_s3 + $0x128] sm:$0xff] }
 0x165   :  { %2655 = vmatmul.mubr.bf16.vlgmr.msra.gmra.mrb[24].mxu1 %v13376_v1  ;;  %3385 = vmatprep.subr.bf16.mxu0 %v9656_v41  ;;  %v1517_v41 = vlaneseq  ;;  %v9703_v2 = vcombine.high %v1636_v34, %v1640_v46 }
 0x166   :  { %3345 = vmatpush1.bf16.msra.mxu1 %v9659_v26 }
 0x167   :  { %3346 = vmatprep.subr.bf16.mxu1 %v9662_v38  ;;  %v9700_v49 = vshrl.u32 %v1517_v41, 7  ;;  %13670 = vst [vmem:[#allocation357_spill] sm:$0xff] %v9703_v2 }
 0x169   :  { %13669 = vst [vmem:[#allocation356_spill] sm:$0xff] %v9700_v49  ;;  %v9715_v15 = vsub.s32 0, %v9700_v49 }
 0x16a   :  { %3347 = vmatpush1.bf16.msra.mxu1 %v9674_v33  ;;  %v9712_v33 = vcombine.low %v1636_v34, %v1640_v46  ;;  %v1652_v46 = vld [vmem:[%s12399_s3 + $0x188] sm:$0xff] }
 0x16b   :  { %3348 = vmatprep.subr.bf16.mxu1 %v9677_v13  ;;  %v1648_v13 = vld [vmem:[%s12399_s3 + $0x168] sm:$0xff]  ;;  %13672 = vst [vmem:[#allocation359_spill] sm:$0xff] %v9715_v15  ;;  %v9745_v38 = vrot.slane %v9723_v25, %v9715_v15 }
 0x16c   :  { %13671 = vst [vmem:[#allocation358_spill] sm:$0xff] %v9712_v33  ;;  %v9718_v41 = vcombine.high %v1644_v63, %v1648_v13  ;;  %v1656_v34 = vld [vmem:[%s12399_s3 + $0x1a8] sm:$0xff] }
 0x16d   :  { %13678 = vst [vmem:[#allocation365_spill] sm:$0xff] %v9745_v38  ;;  %v9748_v26 = vcombine.high %v1652_v46, %v1656_v34  ;;  %v9772_v14 = vcombine.low %v1652_v46, %v1656_v34  ;;  %v1672_v46 = vld [vmem:[%s12399_s3 + $0x228] sm:$0xff] }
 0x16e   :  { %3349 = vmatpush1.bf16.msra.mxu1 %v9686_v47  ;;  %13673 = vst [vmem:[#allocation360_spill] sm:$0xff] %v9718_v41  ;;  %v9741_v47 = vcombine.low %v1644_v63, %v1648_v13  ;;  %v1664_v13 = vld [vmem:[%s12399_s3 + $0x1e8] sm:$0xff] }
 0x16f   :  { %3350 = vmatprep.subr.bf16.mxu1 %v9689_v62  ;;  %v9726_v62 = vsub.s32 1, %v9700_v49  ;;  %13679 = vst [vmem:[#allocation366_spill] sm:$0xff] %v9748_v26  ;;  %13683 = vst [vmem:[#allocation370_spill] sm:$0xff] %v9772_v14 }
 0x170   :  { %13677 = vst [vmem:[#allocation364_spill] sm:$0xff] %v9741_v47 }
 0x171   :  { %13674 = vst [vmem:[#allocation361_spill] sm:$0xff] %v9726_v62  ;;  %v9752_v42 = vrot.slane %v9723_v25, %v9726_v62 }
 0x172   :  { %3351 = vmatpush1.bf16.msra.mxu1 %v9698_v19  ;;  %v9738_v19 = vsub.s32 5, %v9700_v49 }
 0x173   :  { %3352 = vmatprep.subr.bf16.mxu1 %v9703_v2  ;;  %v9735_v2 = vsub.s32 4, %v9700_v49  ;;  %13680 = vst [vmem:[#allocation367_spill] sm:$0xff] %v9752_v42 }
 0x174   :  { %13676 = vst [vmem:[#allocation363_spill] sm:$0xff] %v9738_v19  ;;  %v9769_v7 = vrot.slane %v9723_v25, %v9738_v19 }
 0x175   :  { %13675 = vst [vmem:[#allocation362_spill] sm:$0xff] %v9735_v2 }
 0x176   :  { %3353 = vmatpush1.bf16.msra.mxu1 %v9712_v33  ;;  %13682 = vst [vmem:[#allocation369_spill] sm:$0xff] %v9769_v7 }
 0x177   :  { %3354 = vmatprep.subr.bf16.mxu1 %v9718_v41  ;;  %v9763_v41 = vrot.slane %v9723_v25, %v9735_v2 }
 0x178   :  { %v1386_v39 = vpop.f32.mrb[8].mxu1  ;;  %v1468_v30 = vpop.f32.mrb[8].mxu0 }
 0x179   :  { %v1387_v63 = vadd.f32 %v1386_v39, %v9206_v18  ;;  %v1388_v33 = vpop.f32.mrb[9].mxu1  ;;  %13681 = vst [vmem:[#allocation368_spill] sm:$0xff] %v9763_v41  ;;  %v1469_v1 = vadd.f32 %v1468_v30, %v9609_v58  ;;  %v1470_v23 = vpop.f32.mrb[9].mxu0 }
 0x17a   :  { %v1389_v15 = vadd.f32 %v1388_v33, %v9214_v50  ;;  %v1390_v62 = vpop.f32.mrb[10].mxu1  ;;  %3355 = vmatpush1.bf16.msra.mxu1 %v9741_v47  ;;  %v1471_v2 = vadd.f32 %v1470_v23, %v9614_v22  ;;  %v1472_v50 = vpop.f32.mrb[10].mxu0  ;;  %v9777_v33 = vcombine.high %v1660_v12, %v1664_v13 }
 0x17b   :  { %v1557_v18 = vadd.f32 %v9745_v38, %v1387_v63  ;;  %v1391_v39 = vpop.f32.mrb[11].mxu1  ;;  %3356 = vmatprep.subr.bf16.mxu1 %v9748_v26  ;;  %v1473_v58 = vpop.f32.mrb[11].mxu0  ;;  %v1668_v62 = vld [vmem:[%s12399_s3 + $0x208] sm:$0xff]  ;;  %v1561_v63 = vadd.f32 %v9763_v41, %v1469_v1 }
 0x17c   :  { %13684 = vst [vmem:[#allocation371_spill] sm:$0xff] %v9777_v33  ;;  %v1558_v30 = vadd.f32 %v9752_v42, %v1389_v15  ;;  %v1562_v23 = vadd.f32 %v9769_v7, %v1471_v2  ;;  %v9789_v39 = vcombine.low %v1660_v12, %v1664_v13  ;;  %v9792_v15 = vcombine.high %v1668_v62, %v1672_v46  ;;  %v1676_v50 = vld [vmem:[%s12399_s3 + $0x248] sm:$0xff] }
 0x17d   :  { %v1565_v34 = vmul.f32 0.5, %v1557_v18  ;;  %v1680_v1 = vld [vmem:[%s12399_s3 + $0x268] sm:$0xff]  ;;  %v9801_v12 = vcombine.low %v1668_v62, %v1672_v46 }
 0x17e   :  { %v1566_v22 = vmul.f32 0.5, %v1558_v30  ;;  %3357 = vmatpush1.bf16.msra.mxu1 %v9772_v14  ;;  %13685 = vst [vmem:[#allocation372_spill] sm:$0xff] %v9789_v39  ;;  %13686 = vst [vmem:[#allocation373_spill] sm:$0xff] %v9792_v15  ;;  %v9804_v2 = vcombine.high %v1676_v50, %v1680_v1  ;;  %v1684_v13 = vld [vmem:[%s12399_s3 + $0x288] sm:$0xff]  ;;  %v9813_v30 = vcombine.low %v1676_v50, %v1680_v1 }
 0x17f   :  { %7268 = vtanh.f32 %v1565_v34  ;;  %3358 = vmatprep.subr.bf16.mxu1 %v9777_v33  ;;  %13687 = vst [vmem:[#allocation374_spill] sm:$0xff] %v9801_v12  ;;  %v1688_v18 = vld [vmem:[%s12399_s3 + $0x2a8] sm:$0xff] }
 0x180   :  { %7270 = vtanh.f32 %v1566_v22  ;;  %13688 = vst [vmem:[#allocation375_spill] sm:$0xff] %v9804_v2  ;;  %13689 = vst [vmem:[#allocation376_spill] sm:$0xff] %v9813_v30  ;;  %v9816_v58 = vcombine.high %v1684_v13, %v1688_v18  ;;  %v1692_v62 = vld [vmem:[%s12399_s3 + $0x2c8] sm:$0xff] }
 0x181   :  { %7272 = vtanh.f32 %v1561_v63  ;;  %v1696_v46 = vld [vmem:[%s12399_s3 + $0x2e8] sm:$0xff] }
 0x182   :  { %7274 = vtanh.f32 %v1562_v23  ;;  %3359 = vmatpush1.bf16.msra.mxu1 %v9789_v39  ;;  %13690 = vst [vmem:[#allocation377_spill] sm:$0xff] %v9816_v58  ;;  %v9825_v23 = vcombine.low %v1684_v13, %v1688_v18  ;;  %v9828_v7 = vcombine.high %v1692_v62, %v1696_v46  ;;  %v1700_v38 = vld [vmem:[%s12399_s3 + $0x308] sm:$0xff]  ;;  %v9837_v13 = vcombine.low %v1692_v62, %v1696_v46 }
 0x183   :  { %3360 = vmatprep.subr.bf16.mxu1 %v9792_v15  ;;  %v9852_v62 = vsub.s32 2, %v9700_v49  ;;  %v1716_v46 = vld [vmem:[%s12399_s3 + $0x388] sm:$0xff] }
 0x184   :  { %13691 = vst [vmem:[#allocation378_spill] sm:$0xff] %v9825_v23  ;;  %13692 = vst [vmem:[#allocation379_spill] sm:$0xff] %v9828_v7 }
 0x185   :  { %13693 = vst [vmem:[#allocation380_spill] sm:$0xff] %v9837_v13  ;;  %13696 = vst [vmem:[#allocation383_spill] sm:$0xff] %v9852_v62 }
 0x186   :  { %3361 = vmatpush1.bf16.msra.mxu1 %v9801_v12 }
 0x187   :  { %3362 = vmatprep.subr.bf16.mxu1 %v9804_v2 }
 0x189   :  { %v7269_v34 = vpop.eup %7268 }
 0x18a   :  { %v7271_v63 = vpop.eup %7270  ;;  %v1569_v22 = vmul.f32 0.5, %v7269_v34  ;;  %3363 = vmatpush1.bf16.msra.mxu1 %v9813_v30  ;;  %v1704_v34 = vld [vmem:[%s12399_s3 + $0x328] sm:$0xff] }
 0x18b   :  { %v7273_v50 = vpop.eup %7272  ;;  %v1570_v1 = vmul.f32 0.5, %v7271_v63  ;;  %3364 = vmatprep.subr.bf16.mxu1 %v9816_v58  ;;  %v9840_v63 = vcombine.high %v1700_v38, %v1704_v34  ;;  %v1712_v58 = vld [vmem:[%s12399_s3 + $0x368] sm:$0xff] }
 0x18c   :  { %v7275_v41 = vpop.eup %7274  ;;  %v1571_v42 = vadd.f32 0.5, %v1569_v22  ;;  %v1708_v22 = vld [vmem:[%s12399_s3 + $0x348] sm:$0xff] }
 0x18d   :  { %v1572_v2 = vadd.f32 0.5, %v1570_v1  ;;  %13694 = vst [vmem:[#allocation381_spill] sm:$0xff] %v9840_v63  ;;  %v9871_v1 = vrot.slane %v9723_v25, %v9852_v62 }
 0x18e   :  { %v1593_v30 = vmul.f32 %v7273_v50, %v1571_v42  ;;  %3365 = vmatpush1.bf16.msra.mxu1 %v9825_v23  ;;  %v9849_v42 = vcombine.low %v1700_v38, %v1704_v34  ;;  %v1720_v50 = vld [vmem:[%s12399_s3 + $0x3a8] sm:$0xff]  ;;  %v9867_v38 = vcombine.low %v1708_v22, %v1712_v58 }
 0x18f   :  { %v1594_v18 = vmul.f32 %v7275_v41, %v1572_v2  ;;  %3366 = vmatprep.subr.bf16.mxu1 %v9828_v7  ;;  %v9855_v41 = vcombine.high %v1708_v22, %v1712_v58  ;;  %v9858_v2 = vsub.s32 3, %v9700_v49  ;;  %13700 = vst [vmem:[#allocation387_spill] sm:$0xff] %v9871_v1  ;;  %v9874_v34 = vcombine.high %v1716_v46, %v1720_v50  ;;  %v1724_v7 = vld [vmem:[%s12399_s3 + $0x3c8] sm:$0xff] }
 0x190   :  { %13695 = vst [vmem:[#allocation382_spill] sm:$0xff] %v9849_v42  ;;  %13699 = vst [vmem:[#allocation386_spill] sm:$0xff] %v9867_v38  ;;  %v1728_v58 = vld [vmem:[%s12399_s3 + $0x3e8] sm:$0xff]  ;;  %v9889_v12 = vcombine.low %v1716_v46, %v1720_v50 }
 0x191   :  { %13697 = vst [vmem:[#allocation384_spill] sm:$0xff] %v9855_v41  ;;  %13698 = vst [vmem:[#allocation385_spill] sm:$0xff] %v9858_v2  ;;  %v9893_v33 = vcombine.high %v1724_v7, %v1728_v58 }
 0x192   :  { %3367 = vmatpush1.bf16.msra.mxu1 %v9837_v13  ;;  %13701 = vst [vmem:[#allocation388_spill] sm:$0xff] %v9874_v34  ;;  %v9878_v13 = vrot.slane %v9723_v25, %v9858_v2  ;;  %13703 = vst [vmem:[#allocation390_spill] sm:$0xff] %v9889_v12 }
 0x193   :  { %3368 = vmatprep.subr.bf16.mxu1 %v9840_v63  ;;  %13704 = vst [vmem:[#allocation391_spill] sm:$0xff] %v9893_v33 }
 0x194   :  { %13702 = vst [vmem:[#allocation389_spill] sm:$0xff] %v9878_v13 }
 0x196   :  { %3369 = vmatpush1.bf16.msra.mxu1 %v9849_v42 }
 0x197   :  { %3370 = vmatprep.subr.bf16.mxu1 %v9855_v41 }
 0x198   :  { %v1427_v63 = vpop.f32.mrb[12].mxu1 }
 0x199   :  { %v1428_v22 = vadd.f32 %v1427_v63, %v9193_v57  ;;  %v1429_v42 = vpop.f32.mrb[13].mxu1  ;;  %v1606_v57 = vld [vmem:[%s12399_s3 + $0x18] sm:$0xff] }
 0x19a   :  { %v1430_v41 = vadd.f32 %v1429_v42, %v9204_v3  ;;  %v1431_v23 = vpop.f32.mrb[14].mxu1  ;;  %3371 = vmatpush1.bf16.msra.mxu1 %v9867_v38  ;;  %v1610_v3 = vld [vmem:[%s12399_s3 + $0x38] sm:$0xff]  ;;  %v9903_v42 = vcombine.low %v1724_v7, %v1728_v58 }
 0x19b   :  { %v1559_v15 = vadd.f32 %v9871_v1, %v1428_v22  ;;  %v1432_v39 = vpop.f32.mrb[15].mxu1  ;;  %3372 = vmatprep.subr.bf16.mxu1 %v9874_v34 }
 0x19c   :  { %v1560_v14 = vadd.f32 %v9878_v13, %v1430_v41  ;;  %13705 = vst [vmem:[#allocation392_spill] sm:$0xff] %v9903_v42  ;;  %v9906_v39 = vcombine.high %v1606_v57, %v1610_v3 }
 0x19d   :  { %v1573_v23 = vmul.f32 0.5, %v1559_v15 }
 0x19e   :  { %v1574_v63 = vmul.f32 0.5, %v1560_v14  ;;  %3373 = vmatpush1.bf16.msra.mxu1 %v9889_v12  ;;  %13706 = vst [vmem:[#allocation393_spill] sm:$0xff] %v9906_v39 }
 0x19f   :  { %7276 = vtanh.f32 %v1573_v23  ;;  %3374 = vmatprep.subr.bf16.mxu1 %v9893_v33  ;;  %v13122_v23 = vsub.s32 6, %v9700_v49 }
 0x1a0   :  { %7278 = vtanh.f32 %v1574_v63  ;;  %v13127_v63 = vsub.s32 7, %v9700_v49 }
 0x1a2   :  { %3375 = vmatpush1.bf16.msra.mxu1 %v9903_v42 }
 0x1a3   :  { %3426 = vmatprep.subr.bf16.mxu1 %v9906_v39  ;;  %v9919_v39 = vrot.slane %v9723_v25, %v13122_v23 }
 0x1a5   :  { %13709 = vst [vmem:[#allocation396_spill] sm:$0xff] %v9919_v39 }
 0x1a9   :  { %v7277_v41 = vpop.eup %7276 }
 0x1aa   :  { %v7279_v46 = vpop.eup %7278  ;;  %v1577_v50 = vmul.f32 0.5, %v7277_v41  ;;  %v9924_v41 = vrot.slane %v9723_v25, %v13127_v63 }
 0x1ab   :  { %v1578_v22 = vmul.f32 0.5, %v7279_v46 }
 0x1ac   :  { %v1579_v15 = vadd.f32 0.5, %v1577_v50  ;;  %13710 = vst [vmem:[#allocation397_spill] sm:$0xff] %v9924_v41 }
 0x1ad   :  { %v1580_v14 = vadd.f32 0.5, %v1578_v22 }
 0x1ae   :  { %v1591_v13 = vmul.f32 0.0, %v1579_v15 }
 0x1af   :  { %v1592_v1 = vmul.f32 0.0, %v1580_v14 }
 0x1b0   :  { %v9910_v7 = vadd.f32 %v1593_v30, %v1591_v13 }
 0x1b1   :  { %v9912_v58 = vadd.f32 %v1594_v18, %v1592_v1 }
 0x1b2   :  { %13707 = vst [vmem:[#allocation394_spill] sm:$0xff] %v9910_v7 }
 0x1b3   :  { %13708 = vst [vmem:[#allocation395_spill] sm:$0xff] %v9912_v58 }
 0x1b8   :  { %v1509_v42 = vpop.f32.mrb[16].mxu1 }
 0x1b9   :  { %v1510_v30 = vadd.f32 %v1509_v42, %v9596_v54  ;;  %v1511_v13 = vpop.f32.mrb[17].mxu1 }
 0x1ba   :  { %v1512_v18 = vadd.f32 %v1511_v13, %v9607_v31  ;;  %v1513_v1 = vpop.f32.mrb[18].mxu1  ;;  %v9928_v46 = vpop.f32.mrb[12].mxu0 }
 0x1bb   :  { %v1563_v50 = vadd.f32 %v9919_v39, %v1510_v30  ;;  %v1514_v22 = vpop.f32.mrb[19].mxu1  ;;  %v9931_v15 = vpop.f32.mrb[13].mxu0 }
 0x1bc   :  { %v1564_v14 = vadd.f32 %v9924_v41, %v1512_v18  ;;  %v2537_v23 = vpop.f32.mrb[14].mxu0 }
 0x1bd   :  { %v1583_v33 = vmul.f32 0.5, %v1563_v50  ;;  %v2538_v12 = vpop.f32.mrb[15].mxu0  ;;  %v1614_v23 = vld [vmem:[%s12399_s3 + $0x58] sm:$0xff] }
 0x1be   :  { %v1584_v25 = vmul.f32 0.5, %v1564_v14  ;;  %v1613_v12 = vld [vmem:[%s12399_s3 + $0x50] sm:$0xff]  ;;  %v1618_v50 = vld [vmem:[%s12399_s3 + $0x78] sm:$0xff] }
 0x1bf   :  { %7280 = vtanh.f32 %v1583_v33  ;;  %v1617_v33 = vld [vmem:[%s12399_s3 + $0x70] sm:$0xff] }
 0x1c0   :  { %7282 = vtanh.f32 %v1584_v25  ;;  %v9950_v25 = vcombine.low %v1606_v57, %v1610_v3  ;;  %v1622_v57 = vld [vmem:[%s12399_s3 + $0x98] sm:$0xff] }
 0x1c1   :  { %7284 = vtanh.f32 %v9910_v7  ;;  %v1626_v3 = vld [vmem:[%s12399_s3 + $0xb8] sm:$0xff] }
 0x1c2   :  { %7286 = vtanh.f32 %v9912_v58  ;;  %13711 = vst [vmem:[#allocation398_spill] sm:$0xff] %v9950_v25 }
 0x1c9   :  { %v7281_v31 = vpop.eup %7280 }
 0x1ca   :  { %v7283_v54 = vpop.eup %7282  ;;  %v1587_v42 = vmul.f32 0.5, %v7281_v31  ;;  %v1621_v31 = vld [vmem:[%s12399_s3 + $0x90] sm:$0xff] }
 0x1cb   :  { %v1588_v13 = vmul.f32 0.5, %v7283_v54  ;;  %v7285_v1 = vpop.eup %7284  ;;  %v9959_v54 = vcombine.high %v1613_v12, %v1617_v33 }
 0x1cc   :  { %v1589_v30 = vadd.f32 0.5, %v1587_v42  ;;  %v7287_v63 = vpop.eup %7286  ;;  %v9961_v42 = vcombine.high %v1614_v23, %v1618_v50 }
 0x1cd   :  { %v1590_v22 = vadd.f32 0.5, %v1588_v13  ;;  %13712 = vst [vmem:[#allocation399_spill] sm:$0xff] %v9959_v54  ;;  %v1625_v13 = vld [vmem:[%s12399_s3 + $0xb0] sm:$0xff] }
 0x1ce   :  { %v1599_v39 = vmul.f32 %v7285_v1, %v1589_v30  ;;  %13713 = vst [vmem:[#allocation400_spill] sm:$0xff] %v9961_v42  ;;  %v9978_v30 = vcombine.low %v1614_v23, %v1618_v50  ;;  %v9982_v1 = vcombine.high %v1621_v31, %v1625_v13  ;;  %v1634_v23 = vld [vmem:[%s12399_s3 + $0xf8] sm:$0xff]  ;;  %v10002_v50 = vcombine.low %v1621_v31, %v1625_v13 }
 0x1cf   :  { %v1600_v18 = vmul.f32 %v7287_v63, %v1590_v22  ;;  %v9984_v22 = vcombine.high %v1622_v57, %v1626_v3  ;;  %v1638_v31 = vld [vmem:[%s12399_s3 + $0x118] sm:$0xff] }
 0x1d0   :  { %v9952_v63 = vpack.c.bf16 %v1599_v39, %v1599_v39  ;;  %v9976_v39 = vcombine.low %v1613_v12, %v1617_v33  ;;  %13715 = vst [vmem:[#allocation402_spill] sm:$0xff] %v9978_v30  ;;  %13716 = vst [vmem:[#allocation403_spill] sm:$0xff] %v9982_v1  ;;  %v1633_v12 = vld [vmem:[%s12399_s3 + $0xf0] sm:$0xff]  ;;  %v1630_v33 = vld [vmem:[%s12399_s3 + $0xd8] sm:$0xff] }
 0x1d1   :  { %v9948_v14 = vpack.c.bf16 %v1600_v18, %v1600_v18  ;;  %13717 = vst [vmem:[#allocation404_spill] sm:$0xff] %v9984_v22  ;;  %v1629_v18 = vld [vmem:[%s12399_s3 + $0xd0] sm:$0xff]  ;;  %13718 = vst [vmem:[#allocation405_spill] sm:$0xff] %v10002_v50  ;;  %v1642_v13 = vld [vmem:[%s12399_s3 + $0x138] sm:$0xff] }
 0x1d2   :  { %13714 = vst [vmem:[#allocation401_spill] sm:$0xff] %v9976_v39 }
 0x1d3   :  { %3335 = vmatprep.mubr.bf16.mxu0 %v9948_v14  ;;  %3376 = vmatprep.mubr.bf16.mxu1 %v9948_v14 }
 0x1d4   :  { %3336 = vmatmul.mubr.bf16.vlgmr.msra.gmra.mrb[20].mxu0 %v9952_v63  ;;  %3377 = vmatmul.mubr.bf16.vlgmr.msra.gmra.mrb[28].mxu1 %v9952_v63 }
 0x1d5   :  { %3386 = vmatpush1.bf16.msra.mxu0 %v9567_v55  ;;  %3427 = vmatpush1.bf16.msra.mxu1 %v9950_v25  ;;  %v10010_v25 = vcombine.high %v1630_v33, %v1634_v23  ;;  %v1637_v55 = vld [vmem:[%s12399_s3 + $0x110] sm:$0xff] }
 0x1d6   :  { %3417 = vmatprep.mubr.bf16.mxu0 %v9948_v14  ;;  %3458 = vmatprep.mubr.bf16.mxu1 %v9948_v14 }
 0x1d7   :  { %3387 = vmatprep.subr.bf16.mxu0 %v9959_v54  ;;  %3428 = vmatprep.subr.bf16.mxu1 %v9961_v42  ;;  %v10004_v54 = vcombine.low %v1622_v57, %v1626_v3  ;;  %v10008_v42 = vcombine.high %v1629_v18, %v1633_v12  ;;  %13721 = vst [vmem:[#allocation408_spill] sm:$0xff] %v10010_v25 }
 0x1d8   :  { %v10026_v57 = vcombine.low %v1629_v18, %v1633_v12  ;;  %v10028_v3 = vcombine.low %v1630_v33, %v1634_v23  ;;  %v1646_v18 = vld [vmem:[%s12399_s3 + $0x158] sm:$0xff]  ;;  %v10052_v23 = vcombine.low %v1638_v31, %v1642_v13 }
 0x1d9   :  { %3388 = vmatpush1.bf16.msra.mxu0 %v9976_v39  ;;  %3429 = vmatpush1.bf16.msra.mxu1 %v9978_v30  ;;  %13719 = vst [vmem:[#allocation406_spill] sm:$0xff] %v10004_v54  ;;  %13720 = vst [vmem:[#allocation407_spill] sm:$0xff] %v10008_v42  ;;  %v1641_v30 = vld [vmem:[%s12399_s3 + $0x130] sm:$0xff]  ;;  %v1650_v12 = vld [vmem:[%s12399_s3 + $0x178] sm:$0xff] }
 0x1da   :  { %3389 = vmatprep.subr.bf16.mxu0 %v9982_v1  ;;  %3430 = vmatprep.subr.bf16.mxu1 %v9984_v22  ;;  %13722 = vst [vmem:[#allocation409_spill] sm:$0xff] %v10026_v57  ;;  %13723 = vst [vmem:[#allocation410_spill] sm:$0xff] %v10028_v3  ;;  %v10032_v22 = vcombine.high %v1637_v55, %v1641_v30  ;;  %v10034_v1 = vcombine.high %v1638_v31, %v1642_v13  ;;  %v1645_v39 = vld [vmem:[%s12399_s3 + $0x150] sm:$0xff] }
 0x1db   :  { %v10050_v33 = vcombine.low %v1637_v55, %v1641_v30  ;;  %13727 = vst [vmem:[#allocation414_spill] sm:$0xff] %v10052_v23  ;;  %v1654_v55 = vld [vmem:[%s12399_s3 + $0x198] sm:$0xff]  ;;  %v10076_v13 = vcombine.low %v1646_v18, %v1650_v12 }
 0x1dc   :  { %13724 = vst [vmem:[#allocation411_spill] sm:$0xff] %v10032_v22  ;;  %13725 = vst [vmem:[#allocation412_spill] sm:$0xff] %v10034_v1  ;;  %v1658_v30 = vld [vmem:[%s12399_s3 + $0x1b8] sm:$0xff] }
 0x1dd   :  { %3390 = vmatpush1.bf16.msra.mxu0 %v10002_v50  ;;  %3431 = vmatpush1.bf16.msra.mxu1 %v10004_v54  ;;  %v1649_v54 = vld [vmem:[%s12399_s3 + $0x170] sm:$0xff]  ;;  %13726 = vst [vmem:[#allocation413_spill] sm:$0xff] %v10050_v33  ;;  %13731 = vst [vmem:[#allocation418_spill] sm:$0xff] %v10076_v13 }
 0x1de   :  { %3391 = vmatprep.subr.bf16.mxu0 %v10008_v42  ;;  %3432 = vmatprep.subr.bf16.mxu1 %v10010_v25  ;;  %v10056_v25 = vcombine.high %v1645_v39, %v1649_v54  ;;  %v10058_v42 = vcombine.high %v1646_v18, %v1650_v12  ;;  %v1653_v50 = vld [vmem:[%s12399_s3 + $0x190] sm:$0xff]  ;;  %v10074_v31 = vcombine.low %v1645_v39, %v1649_v54  ;;  %v1662_v54 = vld [vmem:[%s12399_s3 + $0x1d8] sm:$0xff] }
 0x1df   :  { %v1666_v39 = vld [vmem:[%s12399_s3 + $0x1f8] sm:$0xff]  ;;  %v10100_v12 = vcombine.low %v1654_v55, %v1658_v30 }
 0x1e0   :  { %13728 = vst [vmem:[#allocation415_spill] sm:$0xff] %v10056_v25  ;;  %13729 = vst [vmem:[#allocation416_spill] sm:$0xff] %v10058_v42 }
 0x1e1   :  { %3392 = vmatpush1.bf16.msra.mxu0 %v10026_v57  ;;  %3433 = vmatpush1.bf16.msra.mxu1 %v10028_v3  ;;  %v1657_v3 = vld [vmem:[%s12399_s3 + $0x1b0] sm:$0xff]  ;;  %13730 = vst [vmem:[#allocation417_spill] sm:$0xff] %v10074_v31  ;;  %13735 = vst [vmem:[#allocation422_spill] sm:$0xff] %v10100_v12 }
 0x1e2   :  { %3393 = vmatprep.subr.bf16.mxu0 %v10032_v22  ;;  %3434 = vmatprep.subr.bf16.mxu1 %v10034_v1  ;;  %v10080_v1 = vcombine.high %v1653_v50, %v1657_v3  ;;  %v10082_v22 = vcombine.high %v1654_v55, %v1658_v30  ;;  %v1661_v57 = vld [vmem:[%s12399_s3 + $0x1d0] sm:$0xff]  ;;  %v10098_v18 = vcombine.low %v1653_v50, %v1657_v3  ;;  %v1670_v50 = vld [vmem:[%s12399_s3 + $0x218] sm:$0xff] }
 0x1e3   :  { %v1674_v3 = vld [vmem:[%s12399_s3 + $0x238] sm:$0xff]  ;;  %v10124_v30 = vcombine.low %v1662_v54, %v1666_v39 }
 0x1e4   :  { %13732 = vst [vmem:[#allocation419_spill] sm:$0xff] %v10080_v1  ;;  %13733 = vst [vmem:[#allocation420_spill] sm:$0xff] %v10082_v22 }
 0x1e5   :  { %3394 = vmatpush1.bf16.msra.mxu0 %v10050_v33  ;;  %3435 = vmatpush1.bf16.msra.mxu1 %v10052_v23  ;;  %v1665_v23 = vld [vmem:[%s12399_s3 + $0x1f0] sm:$0xff]  ;;  %13734 = vst [vmem:[#allocation421_spill] sm:$0xff] %v10098_v18  ;;  %13739 = vst [vmem:[#allocation426_spill] sm:$0xff] %v10124_v30 }
 0x1e6   :  { %3395 = vmatprep.subr.bf16.mxu0 %v10056_v25  ;;  %3436 = vmatprep.subr.bf16.mxu1 %v10058_v42  ;;  %v10104_v42 = vcombine.high %v1661_v57, %v1665_v23  ;;  %v10106_v25 = vcombine.high %v1662_v54, %v1666_v39  ;;  %v1669_v33 = vld [vmem:[%s12399_s3 + $0x210] sm:$0xff]  ;;  %v10122_v55 = vcombine.low %v1661_v57, %v1665_v23  ;;  %v1678_v57 = vld [vmem:[%s12399_s3 + $0x258] sm:$0xff] }
 0x1e7   :  { %v1682_v23 = vld [vmem:[%s12399_s3 + $0x278] sm:$0xff]  ;;  %v10148_v39 = vcombine.low %v1670_v50, %v1674_v3 }
 0x1e8   :  { %13736 = vst [vmem:[#allocation423_spill] sm:$0xff] %v10104_v42  ;;  %13737 = vst [vmem:[#allocation424_spill] sm:$0xff] %v10106_v25 }
 0x1e9   :  { %3396 = vmatpush1.bf16.msra.mxu0 %v10074_v31  ;;  %3437 = vmatpush1.bf16.msra.mxu1 %v10076_v13  ;;  %v1673_v13 = vld [vmem:[%s12399_s3 + $0x230] sm:$0xff]  ;;  %13738 = vst [vmem:[#allocation425_spill] sm:$0xff] %v10122_v55  ;;  %13743 = vst [vmem:[#allocation430_spill] sm:$0xff] %v10148_v39 }
 0x1ea   :  { %3397 = vmatprep.subr.bf16.mxu0 %v10080_v1  ;;  %3438 = vmatprep.subr.bf16.mxu1 %v10082_v22  ;;  %v10128_v22 = vcombine.high %v1669_v33, %v1673_v13  ;;  %v10130_v1 = vcombine.high %v1670_v50, %v1674_v3  ;;  %v1677_v31 = vld [vmem:[%s12399_s3 + $0x250] sm:$0xff]  ;;  %v10146_v54 = vcombine.low %v1669_v33, %v1673_v13  ;;  %v1686_v33 = vld [vmem:[%s12399_s3 + $0x298] sm:$0xff] }
 0x1eb   :  { %v1690_v13 = vld [vmem:[%s12399_s3 + $0x2b8] sm:$0xff]  ;;  %v10172_v3 = vcombine.low %v1678_v57, %v1682_v23 }
 0x1ec   :  { %13740 = vst [vmem:[#allocation427_spill] sm:$0xff] %v10128_v22  ;;  %13741 = vst [vmem:[#allocation428_spill] sm:$0xff] %v10130_v1 }
 0x1ed   :  { %3398 = vmatpush1.bf16.msra.mxu0 %v10098_v18  ;;  %3439 = vmatpush1.bf16.msra.mxu1 %v10100_v12  ;;  %v1681_v12 = vld [vmem:[%s12399_s3 + $0x270] sm:$0xff]  ;;  %13742 = vst [vmem:[#allocation429_spill] sm:$0xff] %v10146_v54  ;;  %13747 = vst [vmem:[#allocation434_spill] sm:$0xff] %v10172_v3 }
 0x1ee   :  { %3399 = vmatprep.subr.bf16.mxu0 %v10104_v42  ;;  %3440 = vmatprep.subr.bf16.mxu1 %v10106_v25  ;;  %v10152_v25 = vcombine.high %v1677_v31, %v1681_v12  ;;  %v10154_v42 = vcombine.high %v1678_v57, %v1682_v23  ;;  %v1685_v18 = vld [vmem:[%s12399_s3 + $0x290] sm:$0xff]  ;;  %v10170_v50 = vcombine.low %v1677_v31, %v1681_v12  ;;  %v1694_v31 = vld [vmem:[%s12399_s3 + $0x2d8] sm:$0xff] }
 0x1ef   :  { %v1698_v12 = vld [vmem:[%s12399_s3 + $0x2f8] sm:$0xff] }
 0x1f0   :  { %13744 = vst [vmem:[#allocation431_spill] sm:$0xff] %v10152_v25  ;;  %13745 = vst [vmem:[#allocation432_spill] sm:$0xff] %v10154_v42  ;;  %v10206_v58 = vcombine.high %v1694_v31, %v1698_v12  ;;  %v10228_v41 = vcombine.low %v1694_v31, %v1698_v12 }
 0x1f1   :  { %3400 = vmatpush1.bf16.msra.mxu0 %v10122_v55  ;;  %3441 = vmatpush1.bf16.msra.mxu1 %v10124_v30  ;;  %v1689_v30 = vld [vmem:[%s12399_s3 + $0x2b0] sm:$0xff]  ;;  %13746 = vst [vmem:[#allocation433_spill] sm:$0xff] %v10170_v50 }
 0x1f2   :  { %3401 = vmatprep.subr.bf16.mxu0 %v10128_v22  ;;  %3442 = vmatprep.subr.bf16.mxu1 %v10130_v1  ;;  %v10176_v1 = vcombine.high %v1685_v18, %v1689_v30  ;;  %v10178_v22 = vcombine.high %v1686_v33, %v1690_v13  ;;  %v1693_v55 = vld [vmem:[%s12399_s3 + $0x2d0] sm:$0xff]  ;;  %v10196_v23 = vcombine.low %v1685_v18, %v1689_v30  ;;  %v1702_v30 = vld [vmem:[%s12399_s3 + $0x318] sm:$0xff] }
 0x1f3   :  { %13753 = vst [vmem:[#allocation440_spill] sm:$0xff] %v10206_v58  ;;  %v1705_v18 = vld [vmem:[%s12399_s3 + $0x330] sm:$0xff]  ;;  %13755 = vst [vmem:[#allocation442_spill] sm:$0xff] %v10228_v41 }
 0x1f4   :  { %13748 = vst [vmem:[#allocation435_spill] sm:$0xff] %v10176_v1  ;;  %13749 = vst [vmem:[#allocation436_spill] sm:$0xff] %v10178_v22 }
 0x1f5   :  { %3402 = vmatpush1.bf16.msra.mxu0 %v10146_v54  ;;  %3443 = vmatpush1.bf16.msra.mxu1 %v10148_v39  ;;  %v1697_v39 = vld [vmem:[%s12399_s3 + $0x2f0] sm:$0xff]  ;;  %13750 = vst [vmem:[#allocation437_spill] sm:$0xff] %v10196_v23 }
 0x1f6   :  { %3403 = vmatprep.subr.bf16.mxu0 %v10152_v25  ;;  %3444 = vmatprep.subr.bf16.mxu1 %v10154_v42  ;;  %v10198_v42 = vcombine.low %v1686_v33, %v1690_v13  ;;  %v10204_v54 = vcombine.high %v1693_v55, %v1697_v39  ;;  %v1706_v33 = vld [vmem:[%s12399_s3 + $0x338] sm:$0xff] }
 0x1f7   :  { %v10234_v26 = vcombine.high %v1702_v30, %v1706_v33  ;;  %v10252_v12 = vcombine.low %v1702_v30, %v1706_v33 }
 0x1f8   :  { %v10192_v57 = vpop.f32.mrb[20].mxu1  ;;  %13751 = vst [vmem:[#allocation438_spill] sm:$0xff] %v10198_v42  ;;  %13752 = vst [vmem:[#allocation439_spill] sm:$0xff] %v10204_v54 }
 0x1f9   :  { %3404 = vmatpush1.bf16.msra.mxu0 %v10170_v50  ;;  %3445 = vmatpush1.bf16.msra.mxu1 %v10172_v3  ;;  %v10200_v25 = vpop.f32.mrb[21].mxu1  ;;  %v1701_v50 = vld [vmem:[%s12399_s3 + $0x310] sm:$0xff]  ;;  %13757 = vst [vmem:[#allocation444_spill] sm:$0xff] %v10234_v26  ;;  %13759 = vst [vmem:[#allocation446_spill] sm:$0xff] %v10252_v12 }
 0x1fa   :  { %3405 = vmatprep.subr.bf16.mxu0 %v10176_v1  ;;  %3446 = vmatprep.subr.bf16.mxu1 %v10178_v22  ;;  %v2578_v7 = vpop.f32.mrb[22].mxu1  ;;  %v10211_v3 = vpop.f32.mrb[16].mxu0  ;;  %v10232_v38 = vcombine.high %v1701_v50, %v1705_v18  ;;  %v10250_v31 = vcombine.low %v1701_v50, %v1705_v18  ;;  %v1718_v50 = vld [vmem:[%s12399_s3 + $0x398] sm:$0xff] }
 0x1fb   :  { %v2579_v13 = vpop.f32.mrb[23].mxu1  ;;  %v10222_v22 = vpop.f32.mrb[17].mxu0  ;;  %v10226_v7 = vcombine.low %v1693_v55, %v1697_v39  ;;  %v1713_v55 = vld [vmem:[%s12399_s3 + $0x370] sm:$0xff]  ;;  %v1714_v39 = vld [vmem:[%s12399_s3 + $0x378] sm:$0xff] }
 0x1fc   :  { %v2619_v1 = vpop.f32.mrb[18].mxu0  ;;  %13756 = vst [vmem:[#allocation443_spill] sm:$0xff] %v10232_v38  ;;  %13758 = vst [vmem:[#allocation445_spill] sm:$0xff] %v10250_v31  ;;  %v1722_v18 = vld [vmem:[%s12399_s3 + $0x3b8] sm:$0xff] }
 0x1fd   :  { %3406 = vmatpush1.bf16.msra.mxu0 %v10196_v23  ;;  %3447 = vmatpush1.bf16.msra.mxu1 %v10198_v42  ;;  %13754 = vst [vmem:[#allocation441_spill] sm:$0xff] %v10226_v7  ;;  %v2620_v34 = vpop.f32.mrb[19].mxu0  ;;  %v1709_v1 = vld [vmem:[%s12399_s3 + $0x350] sm:$0xff] }
 0x1fe   :  { %3407 = vmatprep.subr.bf16.mxu0 %v10204_v54  ;;  %3448 = vmatprep.subr.bf16.mxu1 %v10206_v58  ;;  %v1710_v34 = vld [vmem:[%s12399_s3 + $0x358] sm:$0xff]  ;;  %v10256_v13 = vcombine.high %v1709_v1, %v1713_v55  ;;  %v1717_v54 = vld [vmem:[%s12399_s3 + $0x390] sm:$0xff]  ;;  %v10274_v30 = vcombine.low %v1709_v1, %v1713_v55 }
 0x1ff   :  { %v10258_v58 = vcombine.high %v1710_v34, %v1714_v39  ;;  %v10276_v33 = vcombine.low %v1710_v34, %v1714_v39  ;;  %v1726_v1 = vld [vmem:[%s12399_s3 + $0x3d8] sm:$0xff]  ;;  %v10300_v39 = vcombine.low %v1718_v50, %v1722_v18 }
 0x200   :  { %13760 = vst [vmem:[#allocation447_spill] sm:$0xff] %v10256_v13  ;;  %13762 = vst [vmem:[#allocation449_spill] sm:$0xff] %v10274_v30  ;;  %v1730_v55 = vld [vmem:[%s12399_s3 + $0x3f8] sm:$0xff] }
 0x201   :  { %3408 = vmatpush1.bf16.msra.mxu0 %v10226_v7  ;;  %3449 = vmatpush1.bf16.msra.mxu1 %v10228_v41  ;;  %13761 = vst [vmem:[#allocation448_spill] sm:$0xff] %v10258_v58  ;;  %v1721_v41 = vld [vmem:[%s12399_s3 + $0x3b0] sm:$0xff]  ;;  %13764 = vst [vmem:[#allocation451_spill] sm:$0xff] %v10300_v39 }
 0x202   :  { %3409 = vmatprep.subr.bf16.mxu0 %v10232_v38  ;;  %3450 = vmatprep.subr.bf16.mxu1 %v10234_v26  ;;  %v10280_v26 = vcombine.high %v1717_v54, %v1721_v41  ;;  %v10282_v38 = vcombine.high %v1718_v50, %v1722_v18  ;;  %v1725_v7 = vld [vmem:[%s12399_s3 + $0x3d0] sm:$0xff]  ;;  %v10298_v34 = vcombine.low %v1717_v54, %v1721_v41  ;;  %v13769_v41 = vld [vmem:[#allocation27_spill] sm:$0xff]  ;;  %v13770_v54 = vld [vmem:[#allocation25_spill] sm:$0xff] }
 0x203   :  { %v13773_v50 = vld [vmem:[#allocation31_spill] sm:$0xff]  ;;  %v13774_v18 = vld [vmem:[#allocation29_spill] sm:$0xff] }
 0x204   :  { %13763 = vst [vmem:[#allocation450_spill] sm:$0xff] %v10298_v34 }
 0x205   :  { %3410 = vmatpush1.bf16.msra.mxu0 %v10250_v31  ;;  %3451 = vmatpush1.bf16.msra.mxu1 %v10252_v12  ;;  %v1729_v12 = vld [vmem:[%s12399_s3 + $0x3f0] sm:$0xff] }
 0x206   :  { %3411 = vmatprep.subr.bf16.mxu0 %v10256_v13  ;;  %3452 = vmatprep.subr.bf16.mxu1 %v10258_v58  ;;  %v10304_v58 = vcombine.high %v1725_v7, %v1729_v12  ;;  %v10306_v13 = vcombine.high %v1726_v1, %v1730_v55  ;;  %v10310_v31 = vcombine.low %v1725_v7, %v1729_v12  ;;  %v13771_v7 = vld [vmem:[#allocation30_spill] sm:$0xff]  ;;  %v13772_v12 = vld [vmem:[#allocation28_spill] sm:$0xff] }
 0x208   :  { %13765 = vst [vmem:[#allocation452_spill] sm:$0xff] %v10304_v58  ;;  %13766 = vst [vmem:[#allocation453_spill] sm:$0xff] %v10306_v13 }
 0x209   :  { %3412 = vmatpush1.bf16.msra.mxu0 %v10274_v30  ;;  %3453 = vmatpush1.bf16.msra.mxu1 %v10276_v33  ;;  %13767 = vst [vmem:[#allocation454_spill] sm:$0xff] %v10310_v31  ;;  %v10312_v30 = vcombine.low %v1726_v1, %v1730_v55  ;;  %v13775_v55 = vld [vmem:[#allocation34_spill] sm:$0xff] }
 0x20a   :  { %3413 = vmatprep.subr.bf16.mxu0 %v10280_v26  ;;  %3454 = vmatprep.subr.bf16.mxu1 %v10282_v38 }
 0x20b   :  { %13768 = vst [vmem:[#allocation455_spill] sm:$0xff] %v10312_v30 }
 0x20d   :  { %3414 = vmatpush1.bf16.msra.mxu0 %v10298_v34  ;;  %3455 = vmatpush1.bf16.msra.mxu1 %v10300_v39 }
 0x20e   :  { %3415 = vmatprep.subr.bf16.mxu0 %v10304_v58  ;;  %3456 = vmatprep.subr.bf16.mxu1 %v10306_v13 }
 0x211   :  { %3416 = vmatpush1.bf16.msra.mxu0 %v10310_v31  ;;  %3457 = vmatpush1.bf16.msra.mxu1 %v10312_v30 }
 0x212   :  { %3554 = vmatprep.subr.bf16.mxu0 %v7506_v10  ;;  %3595 = vmatprep.subr.bf16.mxu1 %v7491_v4 }
 0x214   :  { %3418 = vmatmul.mubr.bf16.vlgmr.msra.gmra.mrb[24].mxu0 %v9952_v63  ;;  %3459 = vmatmul.mubr.bf16.vlgmr.msra.gmra.mrb[32].mxu1 %v9952_v63 }
 0x215   :  { %3555 = vmatpush1.bf16.msra.mxu0 %v7508_v11  ;;  %3586 = vmatprep.mubr.bf16.mxu0 %v9948_v14 }
 0x216   :  { %3596 = vmatpush1.bf16.msra.mxu1 %v7493_v5  ;;  %3627 = vmatprep.mubr.bf16.mxu1 %v9948_v14 }
 0x217   :  { %3556 = vmatprep.subr.bf16.mxu0 %v7527_v17  ;;  %3597 = vmatprep.subr.bf16.mxu1 %v7504_v9 }
 0x219   :  { %3557 = vmatpush1.bf16.msra.mxu0 %v7539_v21 }
 0x21a   :  { %3598 = vmatpush1.bf16.msra.mxu1 %v7524_v16  ;;  %3558 = vmatprep.subr.bf16.mxu0 %v7548_v24 }
 0x21b   :  { %3599 = vmatprep.subr.bf16.mxu1 %v7537_v20 }
 0x21d   :  { %3559 = vmatpush1.bf16.msra.mxu0 %v7563_v29 }
 0x21e   :  { %3600 = vmatpush1.bf16.msra.mxu1 %v7557_v27  ;;  %3560 = vmatprep.subr.bf16.mxu0 %v7572_v32 }
 0x21f   :  { %3601 = vmatprep.subr.bf16.mxu1 %v7561_v28 }
 0x221   :  { %3561 = vmatpush1.bf16.msra.mxu0 %v7587_v37 }
 0x222   :  { %3602 = vmatpush1.bf16.msra.mxu1 %v7581_v35  ;;  %3562 = vmatprep.subr.bf16.mxu0 %v7596_v40 }
 0x223   :  { %3603 = vmatprep.subr.bf16.mxu1 %v7585_v36 }
 0x225   :  { %3563 = vmatpush1.bf16.msra.mxu0 %v7611_v45 }
 0x226   :  { %3604 = vmatpush1.bf16.msra.mxu1 %v7605_v43  ;;  %3564 = vmatprep.subr.bf16.mxu0 %v7620_v48 }
 0x227   :  { %3605 = vmatprep.subr.bf16.mxu1 %v7609_v44 }
 0x229   :  { %3565 = vmatpush1.bf16.msra.mxu0 %v7635_v53 }
 0x22a   :  { %3606 = vmatpush1.bf16.msra.mxu1 %v7629_v51  ;;  %3566 = vmatprep.subr.bf16.mxu0 %v7644_v56 }
 0x22b   :  { %3607 = vmatprep.subr.bf16.mxu1 %v7633_v52  ;;  %v13893_v52 = vld [vmem:[#allocation180_spill] sm:$0xff] }
 0x22d   :  { %3567 = vmatpush1.bf16.msra.mxu0 %v7659_v61  ;;  %v13785_v61 = vld [vmem:[#allocation43_spill] sm:$0xff] }
 0x22e   :  { %3608 = vmatpush1.bf16.msra.mxu1 %v7653_v59  ;;  %3568 = vmatprep.subr.bf16.mxu0 %v7668_v0  ;;  %v13779_v0 = vld [vmem:[#allocation38_spill] sm:$0xff] }
 0x22f   :  { %3609 = vmatprep.subr.bf16.mxu1 %v7657_v60  ;;  %v13783_v59 = vld [vmem:[#allocation42_spill] sm:$0xff] }
 0x231   :  { %3569 = vmatpush1.bf16.msra.mxu0 %v7683_v8  ;;  %v13776_v8 = vld [vmem:[#allocation32_spill] sm:$0xff] }
 0x232   :  { %3610 = vmatpush1.bf16.msra.mxu1 %v7677_v6  ;;  %3570 = vmatprep.subr.bf16.mxu0 %v13769_v41  ;;  %v13777_v6 = vld [vmem:[#allocation35_spill] sm:$0xff] }
 0x233   :  { %3611 = vmatprep.subr.bf16.mxu1 %v13770_v54  ;;  %v13778_v54 = vld [vmem:[#allocation33_spill] sm:$0xff] }
 0x235   :  { %3571 = vmatpush1.bf16.msra.mxu0 %v13771_v7 }
 0x236   :  { %3612 = vmatpush1.bf16.msra.mxu1 %v13772_v12  ;;  %3572 = vmatprep.subr.bf16.mxu0 %v13773_v50  ;;  %v13780_v12 = vld [vmem:[#allocation36_spill] sm:$0xff]  ;;  %v13781_v50 = vld [vmem:[#allocation39_spill] sm:$0xff] }
 0x237   :  { %3613 = vmatprep.subr.bf16.mxu1 %v13774_v18  ;;  %v13782_v18 = vld [vmem:[#allocation37_spill] sm:$0xff] }
 0x238   :  { %v10360_v1 = vpop.f32.mrb[24].mxu1 }
 0x239   :  { %3573 = vmatpush1.bf16.msra.mxu0 %v13775_v55  ;;  %v10363_v60 = vpop.f32.mrb[25].mxu1  ;;  %v13784_v55 = vld [vmem:[#allocation40_spill] sm:$0xff] }
 0x23a   :  { %3614 = vmatpush1.bf16.msra.mxu1 %v13776_v8  ;;  %3574 = vmatprep.subr.bf16.mxu0 %v13777_v6  ;;  %v2660_v41 = vpop.f32.mrb[26].mxu1  ;;  %v13786_v8 = vld [vmem:[#allocation41_spill] sm:$0xff]  ;;  %v13889_v6 = vld [vmem:[#allocation176_spill] sm:$0xff] }
 0x23b   :  { %3615 = vmatprep.subr.bf16.mxu1 %v13778_v54  ;;  %v2661_v7 = vpop.f32.mrb[27].mxu1  ;;  %v13787_v41 = vld [vmem:[#allocation46_spill] sm:$0xff]  ;;  %v13788_v54 = vld [vmem:[#allocation44_spill] sm:$0xff] }
 0x23c   :  { %v13789_v7 = vld [vmem:[#allocation47_spill] sm:$0xff] }
 0x23d   :  { %3575 = vmatpush1.bf16.msra.mxu0 %v13779_v0  ;;  %v13790_v0 = vld [vmem:[#allocation45_spill] sm:$0xff] }
 0x23e   :  { %3616 = vmatpush1.bf16.msra.mxu1 %v13780_v12  ;;  %3576 = vmatprep.subr.bf16.mxu0 %v13781_v50  ;;  %v13791_v12 = vld [vmem:[#allocation50_spill] sm:$0xff]  ;;  %v13792_v50 = vld [vmem:[#allocation48_spill] sm:$0xff] }
 0x23f   :  { %3617 = vmatprep.subr.bf16.mxu1 %v13782_v18  ;;  %v13793_v18 = vld [vmem:[#allocation51_spill] sm:$0xff] }
 0x241   :  { %3577 = vmatpush1.bf16.msra.mxu0 %v13783_v59  ;;  %v13794_v59 = vld [vmem:[#allocation49_spill] sm:$0xff] }
 0x242   :  { %3618 = vmatpush1.bf16.msra.mxu1 %v13784_v55  ;;  %3578 = vmatprep.subr.bf16.mxu0 %v13785_v61  ;;  %v13795_v55 = vld [vmem:[#allocation54_spill] sm:$0xff]  ;;  %v13796_v61 = vld [vmem:[#allocation52_spill] sm:$0xff] }
 0x243   :  { %3619 = vmatprep.subr.bf16.mxu1 %v13786_v8  ;;  %v13797_v8 = vld [vmem:[#allocation55_spill] sm:$0xff] }
 0x245   :  { %3579 = vmatpush1.bf16.msra.mxu0 %v13787_v41  ;;  %v13798_v41 = vld [vmem:[#allocation53_spill] sm:$0xff] }
 0x246   :  { %3620 = vmatpush1.bf16.msra.mxu1 %v13788_v54  ;;  %3580 = vmatprep.subr.bf16.mxu0 %v13789_v7  ;;  %v13799_v54 = vld [vmem:[#allocation58_spill] sm:$0xff]  ;;  %v13800_v7 = vld [vmem:[#allocation56_spill] sm:$0xff] }
 0x247   :  { %3621 = vmatprep.subr.bf16.mxu1 %v13790_v0  ;;  %v13801_v0 = vld [vmem:[#allocation59_spill] sm:$0xff] }
 0x249   :  { %3581 = vmatpush1.bf16.msra.mxu0 %v13791_v12  ;;  %v13802_v12 = vld [vmem:[#allocation57_spill] sm:$0xff] }
 0x24a   :  { %3622 = vmatpush1.bf16.msra.mxu1 %v13792_v50  ;;  %3582 = vmatprep.subr.bf16.mxu0 %v13793_v18  ;;  %v13813_v18 = vld [vmem:[#allocation71_spill] sm:$0xff]  ;;  %v13887_v50 = vld [vmem:[#allocation173_spill] sm:$0xff] }
 0x24b   :  { %3623 = vmatprep.subr.bf16.mxu1 %v13794_v59  ;;  %v13803_v59 = vld [vmem:[#allocation62_spill] sm:$0xff] }
 0x24d   :  { %3583 = vmatpush1.bf16.msra.mxu0 %v13795_v55  ;;  %v13811_v55 = vld [vmem:[#allocation70_spill] sm:$0xff] }
 0x24e   :  { %3624 = vmatpush1.bf16.msra.mxu1 %v13796_v61  ;;  %3584 = vmatprep.subr.bf16.mxu0 %v13797_v8  ;;  %v13804_v61 = vld [vmem:[#allocation60_spill] sm:$0xff]  ;;  %v13810_v8 = vld [vmem:[#allocation65_spill] sm:$0xff] }
 0x24f   :  { %3625 = vmatprep.subr.bf16.mxu1 %v13798_v41  ;;  %v13805_v41 = vld [vmem:[#allocation63_spill] sm:$0xff] }
 0x251   :  { %3585 = vmatpush1.bf16.msra.mxu0 %v13799_v54  ;;  %v13806_v54 = vld [vmem:[#allocation61_spill] sm:$0xff] }
 0x252   :  { %3626 = vmatpush1.bf16.msra.mxu1 %v13800_v7  ;;  %3636 = vmatprep.subr.bf16.mxu0 %v13801_v0  ;;  %v13807_v7 = vld [vmem:[#allocation66_spill] sm:$0xff]  ;;  %v13808_v0 = vld [vmem:[#allocation64_spill] sm:$0xff] }
 0x253   :  { %3677 = vmatprep.subr.bf16.mxu1 %v13802_v12  ;;  %v13809_v12 = vld [vmem:[#allocation67_spill] sm:$0xff] }
 0x254   :  { %3587 = vmatmul.mubr.bf16.vlgmr.msra.gmra.mrb[28].mxu0 %v9952_v63 }
 0x255   :  { %3628 = vmatmul.mubr.bf16.vlgmr.msra.gmra.mrb[36].mxu1 %v9952_v63  ;;  %3637 = vmatpush1.bf16.msra.mxu0 %v13803_v59  ;;  %v13812_v59 = vld [vmem:[#allocation68_spill] sm:$0xff] }
 0x256   :  { %3668 = vmatprep.mubr.bf16.mxu0 %v9948_v14  ;;  %3678 = vmatpush1.bf16.msra.mxu1 %v13804_v61  ;;  %v13814_v61 = vld [vmem:[#allocation69_spill] sm:$0xff] }
 0x257   :  { %3709 = vmatprep.mubr.bf16.mxu1 %v9948_v14  ;;  %3638 = vmatprep.subr.bf16.mxu0 %v13805_v41  ;;  %v13815_v14 = vld [vmem:[#allocation74_spill] sm:$0xff]  ;;  %v13816_v41 = vld [vmem:[#allocation72_spill] sm:$0xff] }
 0x258   :  { %3679 = vmatprep.subr.bf16.mxu1 %v13806_v54  ;;  %v13817_v54 = vld [vmem:[#allocation75_spill] sm:$0xff] }
 0x259   :  { %3639 = vmatpush1.bf16.msra.mxu0 %v13807_v7  ;;  %v13818_v7 = vld [vmem:[#allocation73_spill] sm:$0xff] }
 0x25a   :  { %3680 = vmatpush1.bf16.msra.mxu1 %v13808_v0  ;;  %3640 = vmatprep.subr.bf16.mxu0 %v13809_v12  ;;  %v13819_v0 = vld [vmem:[#allocation78_spill] sm:$0xff]  ;;  %v13820_v12 = vld [vmem:[#allocation76_spill] sm:$0xff] }
 0x25b   :  { %3681 = vmatprep.subr.bf16.mxu1 %v13810_v8  ;;  %v13821_v8 = vld [vmem:[#allocation79_spill] sm:$0xff] }
 0x25d   :  { %3641 = vmatpush1.bf16.msra.mxu0 %v13811_v55  ;;  %v13822_v55 = vld [vmem:[#allocation77_spill] sm:$0xff] }
 0x25e   :  { %3682 = vmatpush1.bf16.msra.mxu1 %v13812_v59  ;;  %3642 = vmatprep.subr.bf16.mxu0 %v13813_v18  ;;  %v13823_v59 = vld [vmem:[#allocation82_spill] sm:$0xff]  ;;  %v13824_v18 = vld [vmem:[#allocation80_spill] sm:$0xff] }
 0x25f   :  { %3683 = vmatprep.subr.bf16.mxu1 %v13814_v61  ;;  %v13825_v61 = vld [vmem:[#allocation83_spill] sm:$0xff] }
 0x261   :  { %3643 = vmatpush1.bf16.msra.mxu0 %v13815_v14  ;;  %v13826_v14 = vld [vmem:[#allocation81_spill] sm:$0xff] }
 0x262   :  { %3684 = vmatpush1.bf16.msra.mxu1 %v13816_v41  ;;  %3644 = vmatprep.subr.bf16.mxu0 %v13817_v54  ;;  %v13827_v41 = vld [vmem:[#allocation86_spill] sm:$0xff]  ;;  %v13828_v54 = vld [vmem:[#allocation84_spill] sm:$0xff] }
 0x263   :  { %3685 = vmatprep.subr.bf16.mxu1 %v13818_v7  ;;  %v13829_v7 = vld [vmem:[#allocation87_spill] sm:$0xff] }
 0x265   :  { %3645 = vmatpush1.bf16.msra.mxu0 %v13819_v0  ;;  %v13830_v0 = vld [vmem:[#allocation85_spill] sm:$0xff] }
 0x266   :  { %3686 = vmatpush1.bf16.msra.mxu1 %v13820_v12  ;;  %3646 = vmatprep.subr.bf16.mxu0 %v13821_v8  ;;  %v13831_v12 = vld [vmem:[#allocation90_spill] sm:$0xff]  ;;  %v13832_v8 = vld [vmem:[#allocation88_spill] sm:$0xff] }
 0x267   :  { %3687 = vmatprep.subr.bf16.mxu1 %v13822_v55  ;;  %v13833_v55 = vld [vmem:[#allocation91_spill] sm:$0xff] }
 0x269   :  { %3647 = vmatpush1.bf16.msra.mxu0 %v13823_v59  ;;  %v13834_v59 = vld [vmem:[#allocation89_spill] sm:$0xff] }
 0x26a   :  { %3688 = vmatpush1.bf16.msra.mxu1 %v13824_v18  ;;  %3648 = vmatprep.subr.bf16.mxu0 %v13825_v61  ;;  %v13835_v18 = vld [vmem:[#allocation94_spill] sm:$0xff]  ;;  %v13836_v61 = vld [vmem:[#allocation92_spill] sm:$0xff] }
 0x26b   :  { %3689 = vmatprep.subr.bf16.mxu1 %v13826_v14  ;;  %v13837_v14 = vld [vmem:[#allocation95_spill] sm:$0xff] }
 0x26d   :  { %3649 = vmatpush1.bf16.msra.mxu0 %v13827_v41  ;;  %v13838_v41 = vld [vmem:[#allocation93_spill] sm:$0xff] }
 0x26e   :  { %3690 = vmatpush1.bf16.msra.mxu1 %v13828_v54  ;;  %3650 = vmatprep.subr.bf16.mxu0 %v13829_v7  ;;  %v13839_v54 = vld [vmem:[#allocation98_spill] sm:$0xff]  ;;  %v13840_v7 = vld [vmem:[#allocation96_spill] sm:$0xff] }
 0x26f   :  { %3691 = vmatprep.subr.bf16.mxu1 %v13830_v0  ;;  %v13841_v0 = vld [vmem:[#allocation99_spill] sm:$0xff] }
 0x271   :  { %3651 = vmatpush1.bf16.msra.mxu0 %v13831_v12  ;;  %v13842_v12 = vld [vmem:[#allocation97_spill] sm:$0xff] }
 0x272   :  { %3692 = vmatpush1.bf16.msra.mxu1 %v13832_v8  ;;  %3652 = vmatprep.subr.bf16.mxu0 %v13833_v55  ;;  %v13843_v8 = vld [vmem:[#allocation102_spill] sm:$0xff]  ;;  %v13844_v55 = vld [vmem:[#allocation100_spill] sm:$0xff] }
 0x273   :  { %3693 = vmatprep.subr.bf16.mxu1 %v13834_v59  ;;  %v13845_v59 = vld [vmem:[#allocation103_spill] sm:$0xff] }
 0x275   :  { %3653 = vmatpush1.bf16.msra.mxu0 %v13835_v18  ;;  %v13846_v18 = vld [vmem:[#allocation101_spill] sm:$0xff] }
 0x276   :  { %3694 = vmatpush1.bf16.msra.mxu1 %v13836_v61  ;;  %3654 = vmatprep.subr.bf16.mxu0 %v13837_v14  ;;  %v13847_v61 = vld [vmem:[#allocation106_spill] sm:$0xff]  ;;  %v13848_v14 = vld [vmem:[#allocation104_spill] sm:$0xff] }
 0x277   :  { %3695 = vmatprep.subr.bf16.mxu1 %v13838_v41  ;;  %v13849_v41 = vld [vmem:[#allocation107_spill] sm:$0xff] }
 0x279   :  { %3655 = vmatpush1.bf16.msra.mxu0 %v13839_v54  ;;  %v13850_v54 = vld [vmem:[#allocation105_spill] sm:$0xff] }
 0x27a   :  { %3696 = vmatpush1.bf16.msra.mxu1 %v13840_v7  ;;  %3656 = vmatprep.subr.bf16.mxu0 %v13841_v0  ;;  %v13851_v7 = vld [vmem:[#allocation110_spill] sm:$0xff]  ;;  %v13852_v0 = vld [vmem:[#allocation108_spill] sm:$0xff] }
 0x27b   :  { %3697 = vmatprep.subr.bf16.mxu1 %v13842_v12  ;;  %v13853_v12 = vld [vmem:[#allocation111_spill] sm:$0xff] }
 0x27d   :  { %3657 = vmatpush1.bf16.msra.mxu0 %v13843_v8  ;;  %v13854_v8 = vld [vmem:[#allocation109_spill] sm:$0xff] }
 0x27e   :  { %3698 = vmatpush1.bf16.msra.mxu1 %v13844_v55  ;;  %3658 = vmatprep.subr.bf16.mxu0 %v13845_v59  ;;  %v13855_v55 = vld [vmem:[#allocation114_spill] sm:$0xff]  ;;  %v13856_v59 = vld [vmem:[#allocation112_spill] sm:$0xff] }
 0x27f   :  { %3699 = vmatprep.subr.bf16.mxu1 %v13846_v18  ;;  %v13857_v18 = vld [vmem:[#allocation115_spill] sm:$0xff] }
 0x281   :  { %3659 = vmatpush1.bf16.msra.mxu0 %v13847_v61  ;;  %v13858_v61 = vld [vmem:[#allocation113_spill] sm:$0xff] }
 0x282   :  { %3700 = vmatpush1.bf16.msra.mxu1 %v13848_v14  ;;  %3660 = vmatprep.subr.bf16.mxu0 %v13849_v41  ;;  %v13859_v14 = vld [vmem:[#allocation118_spill] sm:$0xff]  ;;  %v13860_v41 = vld [vmem:[#allocation116_spill] sm:$0xff] }
 0x283   :  { %3701 = vmatprep.subr.bf16.mxu1 %v13850_v54  ;;  %v13861_v54 = vld [vmem:[#allocation119_spill] sm:$0xff] }
 0x285   :  { %3661 = vmatpush1.bf16.msra.mxu0 %v13851_v7  ;;  %v13862_v7 = vld [vmem:[#allocation117_spill] sm:$0xff] }
 0x286   :  { %3702 = vmatpush1.bf16.msra.mxu1 %v13852_v0  ;;  %3662 = vmatprep.subr.bf16.mxu0 %v13853_v12  ;;  %v13863_v0 = vld [vmem:[#allocation122_spill] sm:$0xff]  ;;  %v13864_v12 = vld [vmem:[#allocation120_spill] sm:$0xff] }
 0x287   :  { %3703 = vmatprep.subr.bf16.mxu1 %v13854_v8  ;;  %v13865_v8 = vld [vmem:[#allocation121_spill] sm:$0xff] }
 0x289   :  { %3663 = vmatpush1.bf16.msra.mxu0 %v13855_v55  ;;  %v13866_v55 = vld [vmem:[#allocation153_spill] sm:$0xff] }
 0x28a   :  { %3704 = vmatpush1.bf16.msra.mxu1 %v13856_v59  ;;  %3664 = vmatprep.subr.bf16.mxu0 %v13857_v18  ;;  %v13881_v18 = vld [vmem:[#allocation168_spill] sm:$0xff]  ;;  %v13882_v59 = vld [vmem:[#allocation137_spill] sm:$0xff] }
 0x28b   :  { %3705 = vmatprep.subr.bf16.mxu1 %v13858_v61  ;;  %v13867_v61 = vld [vmem:[#allocation124_spill] sm:$0xff] }
 0x28d   :  { %3665 = vmatpush1.bf16.msra.mxu0 %v13859_v14  ;;  %v13868_v14 = vld [vmem:[#allocation156_spill] sm:$0xff] }
 0x28e   :  { %3706 = vmatpush1.bf16.msra.mxu1 %v13860_v41  ;;  %3666 = vmatprep.subr.bf16.mxu0 %v13861_v54  ;;  %v13869_v41 = vld [vmem:[#allocation125_spill] sm:$0xff] }
 0x28f   :  { %3707 = vmatprep.subr.bf16.mxu1 %v13862_v7  ;;  %v13870_v54 = vld [vmem:[#allocation157_spill] sm:$0xff]  ;;  %v13871_v7 = vmov 0  }
 0x291   :  { %3667 = vmatpush1.bf16.msra.mxu0 %v13863_v0  ;;  %v13875_v0 = vld [vmem:[#allocation161_spill] sm:$0xff] }
 0x292   :  { %3708 = vmatpush1.bf16.msra.mxu1 %v13864_v12  ;;  %3718 = vmatprep.subr.bf16.mxu0 %v13865_v8  ;;  %v13872_v12 = vld [vmem:[#allocation128_spill] sm:$0xff] }
 0x293   :  { %3759 = vmatprep.subr.bf16.mxu1 %v13866_v55  ;;  %v13873_v8 = vld [vmem:[#allocation160_spill] sm:$0xff]  ;;  %v13874_v55 = vld [vmem:[#allocation129_spill] sm:$0xff] }
 0x294   :  { %3669 = vmatmul.mubr.bf16.vlgmr.msra.gmra.mrb[32].mxu0 %v9952_v63 }
 0x295   :  { %3710 = vmatmul.mubr.bf16.vlgmr.msra.gmra.mrb[40].mxu1 %v9952_v63  ;;  %3719 = vmatpush1.bf16.msra.mxu0 %v13867_v61  ;;  %v13876_v63 = vld [vmem:[#allocation132_spill] sm:$0xff] }
 0x296   :  { %3760 = vmatpush1.bf16.msra.mxu1 %v13868_v14  ;;  %3720 = vmatprep.subr.bf16.mxu0 %v13869_v41  ;;  %v13877_v61 = vld [vmem:[#allocation164_spill] sm:$0xff]  ;;  %v13878_v14 = vld [vmem:[#allocation133_spill] sm:$0xff] }
 0x297   :  { %3761 = vmatprep.subr.bf16.mxu1 %v13870_v54  ;;  %3750 = vmatprep.mubr.bf16.mxu0 %v13871_v7  ;;  %v13879_v41 = vld [vmem:[#allocation165_spill] sm:$0xff]  ;;  %v13880_v54 = vld [vmem:[#allocation136_spill] sm:$0xff] }
 0x298   :  { %3791 = vmatprep.mubr.bf16.mxu1 %v13871_v7 }
 0x299   :  { %3721 = vmatpush1.bf16.msra.mxu0 %v13872_v12  ;;  %v13883_v12 = vld [vmem:[#allocation169_spill] sm:$0xff] }
 0x29a   :  { %3762 = vmatpush1.bf16.msra.mxu1 %v13873_v8  ;;  %3722 = vmatprep.subr.bf16.mxu0 %v13874_v55  ;;  %v13884_v8 = vld [vmem:[#allocation140_spill] sm:$0xff] }
 0x29b   :  { %3763 = vmatprep.subr.bf16.mxu1 %v13875_v0  ;;  %v13885_v55 = vld [vmem:[#allocation172_spill] sm:$0xff]  ;;  %v13886_v0 = vld [vmem:[#allocation141_spill] sm:$0xff] }
 0x29d   :  { %3723 = vmatpush1.bf16.msra.mxu0 %v13876_v63 }
 0x29e   :  { %3764 = vmatpush1.bf16.msra.mxu1 %v13877_v61  ;;  %3724 = vmatprep.subr.bf16.mxu0 %v13878_v14 }
 0x29f   :  { %3765 = vmatprep.subr.bf16.mxu1 %v13879_v41 }
 0x2a1   :  { %3725 = vmatpush1.bf16.msra.mxu0 %v13880_v54 }
 0x2a2   :  { %3766 = vmatpush1.bf16.msra.mxu1 %v13881_v18  ;;  %3726 = vmatprep.subr.bf16.mxu0 %v13882_v59 }
 0x2a3   :  { %3767 = vmatprep.subr.bf16.mxu1 %v13883_v12 }
 0x2a5   :  { %3727 = vmatpush1.bf16.msra.mxu0 %v13884_v8 }
 0x2a6   :  { %3768 = vmatpush1.bf16.msra.mxu1 %v13885_v55  ;;  %3728 = vmatprep.subr.bf16.mxu0 %v13886_v0  ;;  %v13888_v55 = vld [vmem:[#allocation144_spill] sm:$0xff] }
 0x2a7   :  { %v3337_v63 = vpop.f32.mrb[20].mxu0  ;;  %v3378_v61 = vpop.f32.mrb[28].mxu1  ;;  %3769 = vmatprep.subr.bf16.mxu1 %v13887_v50 }
 0x2a8   :  { %v10485_v41 = vadd.f32 %v3337_v63, %v9928_v46  ;;  %v10488_v54 = vadd.f32 %v3378_v61, %v10192_v57  ;;  %v3339_v18 = vpop.f32.mrb[21].mxu0  ;;  %v3380_v59 = vpop.f32.mrb[29].mxu1  ;;  %v13890_v63 = vld [vmem:[#allocation145_spill] sm:$0xff]  ;;  %v13892_v57 = vld [vmem:[#allocation148_spill] sm:$0xff] }
 0x2a9   :  { %v10491_v12 = vadd.f32 %v3339_v18, %v9931_v15  ;;  %v10494_v8 = vadd.f32 %v3380_v59, %v10200_v25  ;;  %3729 = vmatpush1.bf16.msra.mxu0 %v13888_v55  ;;  %v3341_v0 = vpop.f32.mrb[22].mxu0  ;;  %v3382_v14 = vpop.f32.mrb[30].mxu1  ;;  %v13891_v61 = vld [vmem:[#allocation177_spill] sm:$0xff]  ;;  %v13896_v25 = vld [vmem:[#allocation152_spill] sm:$0xff]  ;;  %v13898_v18 = vld [vmem:[#allocation123_spill] sm:$0xff] }
 0x2aa   :  { %3770 = vmatpush1.bf16.msra.mxu1 %v13889_v6  ;;  %v3342_v50 = vpop.f32.mrb[23].mxu0  ;;  %v3383_v46 = vpop.f32.mrb[31].mxu1  ;;  %3730 = vmatprep.subr.bf16.mxu0 %v13890_v63  ;;  %v13894_v15 = vld [vmem:[#allocation149_spill] sm:$0xff]  ;;  %v7022_v0 = vld [vmem:[%s12398_s0 + $0x1] sm:$0x1]  ;;  %v13914_v63 = vld [vmem:[#allocation139_spill] sm:$0xff] }
 0x2ab   :  { %3771 = vmatprep.subr.bf16.mxu1 %v13891_v61  ;;  %v13895_v59 = vld [vmem:[#allocation181_spill] sm:$0xff]  ;;  %v13897_v50 = vld [vmem:[#allocation184_spill] sm:$0xff]  ;;  %v13900_v46 = vld [vmem:[#allocation126_spill] sm:$0xff] }
 0x2ac   :  { %v13899_v14 = vld [vmem:[#allocation185_spill] sm:$0xff]  ;;  %v13913_v61 = vld [vmem:[#allocation200_spill] sm:$0xff] }
 0x2ad   :  { %3731 = vmatpush1.bf16.msra.mxu0 %v13892_v57  ;;  %v13908_v57 = vld [vmem:[#allocation134_spill] sm:$0xff]  ;;  %v13947_v6 = vld [vmem:[#allocation228_spill] sm:$0xff] }
 0x2ae   :  { %3772 = vmatpush1.bf16.msra.mxu1 %v13893_v52  ;;  %3732 = vmatprep.subr.bf16.mxu0 %v13894_v15  ;;  %v13901_v52 = vld [vmem:[#allocation188_spill] sm:$0xff]  ;;  %v13902_v15 = vld [vmem:[#allocation127_spill] sm:$0xff] }
 0x2af   :  { %3773 = vmatprep.subr.bf16.mxu1 %v13895_v59  ;;  %v13903_v59 = vld [vmem:[#allocation189_spill] sm:$0xff] }
 0x2b1   :  { %3733 = vmatpush1.bf16.msra.mxu0 %v13896_v25  ;;  %v13904_v25 = vld [vmem:[#allocation130_spill] sm:$0xff] }
 0x2b2   :  { %3774 = vmatpush1.bf16.msra.mxu1 %v13897_v50  ;;  %3800 = vmatprep.subr.bf16.mxu0 %v13898_v18  ;;  %v13905_v50 = vld [vmem:[#allocation192_spill] sm:$0xff]  ;;  %v13906_v18 = vld [vmem:[#allocation131_spill] sm:$0xff] }
 0x2b3   :  { %3841 = vmatprep.subr.bf16.mxu1 %v13899_v14  ;;  %v13907_v14 = vld [vmem:[#allocation193_spill] sm:$0xff] }
 0x2b4   :  { %3751 = vmatmul.mubr.bf16.vlgmr.msra.gmra.mrb[36].mxu0 %v7022_v0 }
 0x2b5   :  { %3792 = vmatmul.mubr.bf16.vlgmr.msra.gmra.mrb[44].mxu1 %v7022_v0  ;;  %3801 = vmatpush1.bf16.msra.mxu0 %v13900_v46  ;;  %v13909_v46 = vld [vmem:[#allocation196_spill] sm:$0xff] }
 0x2b6   :  { %3842 = vmatpush1.bf16.msra.mxu1 %v13901_v52  ;;  %3802 = vmatprep.subr.bf16.mxu0 %v13902_v15  ;;  %v13910_v52 = vld [vmem:[#allocation135_spill] sm:$0xff]  ;;  %v13911_v15 = vld [vmem:[#allocation197_spill] sm:$0xff] }
 0x2b7   :  { %3843 = vmatprep.subr.bf16.mxu1 %v13903_v59  ;;  %3832 = vmatprep.mubr.bf16.mxu0 %v13871_v7  ;;  %v13912_v59 = vld [vmem:[#allocation138_spill] sm:$0xff] }
 0x2b8   :  { %3873 = vmatprep.mubr.bf16.mxu1 %v13871_v7 }
 0x2b9   :  { %3803 = vmatpush1.bf16.msra.mxu0 %v13904_v25  ;;  %v13915_v25 = vld [vmem:[#allocation201_spill] sm:$0xff] }
 0x2ba   :  { %3844 = vmatpush1.bf16.msra.mxu1 %v13905_v50  ;;  %3804 = vmatprep.subr.bf16.mxu0 %v13906_v18  ;;  %v13916_v50 = vld [vmem:[#allocation142_spill] sm:$0xff]  ;;  %v13917_v18 = vld [vmem:[#allocation204_spill] sm:$0xff] }
 0x2bb   :  { %3845 = vmatprep.subr.bf16.mxu1 %v13907_v14  ;;  %v13918_v14 = vld [vmem:[#allocation143_spill] sm:$0xff] }
 0x2bd   :  { %3805 = vmatpush1.bf16.msra.mxu0 %v13908_v57  ;;  %v13919_v57 = vld [vmem:[#allocation205_spill] sm:$0xff] }
 0x2be   :  { %3846 = vmatpush1.bf16.msra.mxu1 %v13909_v46  ;;  %3806 = vmatprep.subr.bf16.mxu0 %v13910_v52  ;;  %v13920_v46 = vld [vmem:[#allocation146_spill] sm:$0xff]  ;;  %v13921_v52 = vld [vmem:[#allocation208_spill] sm:$0xff] }
 0x2bf   :  { %3847 = vmatprep.subr.bf16.mxu1 %v13911_v15  ;;  %v13922_v15 = vld [vmem:[#allocation147_spill] sm:$0xff] }
 0x2c1   :  { %3807 = vmatpush1.bf16.msra.mxu0 %v13912_v59  ;;  %v13923_v59 = vld [vmem:[#allocation209_spill] sm:$0xff] }
 0x2c2   :  { %3848 = vmatpush1.bf16.msra.mxu1 %v13913_v61  ;;  %3808 = vmatprep.subr.bf16.mxu0 %v13914_v63  ;;  %v13924_v61 = vld [vmem:[#allocation150_spill] sm:$0xff]  ;;  %v13925_v63 = vld [vmem:[#allocation212_spill] sm:$0xff] }
 0x2c3   :  { %3849 = vmatprep.subr.bf16.mxu1 %v13915_v25  ;;  %v13926_v25 = vld [vmem:[#allocation151_spill] sm:$0xff] }
 0x2c5   :  { %3809 = vmatpush1.bf16.msra.mxu0 %v13916_v50  ;;  %v13927_v50 = vld [vmem:[#allocation213_spill] sm:$0xff] }
 0x2c6   :  { %3850 = vmatpush1.bf16.msra.mxu1 %v13917_v18  ;;  %3810 = vmatprep.subr.bf16.mxu0 %v13918_v14  ;;  %v13928_v18 = vld [vmem:[#allocation154_spill] sm:$0xff]  ;;  %v13929_v14 = vld [vmem:[#allocation216_spill] sm:$0xff] }
 0x2c7   :  { %3851 = vmatprep.subr.bf16.mxu1 %v13919_v57  ;;  %v13930_v57 = vld [vmem:[#allocation155_spill] sm:$0xff] }
 0x2c9   :  { %3811 = vmatpush1.bf16.msra.mxu0 %v13920_v46  ;;  %v13946_v46 = vld [vmem:[#allocation166_spill] sm:$0xff] }
 0x2ca   :  { %3852 = vmatpush1.bf16.msra.mxu1 %v13921_v52  ;;  %3812 = vmatprep.subr.bf16.mxu0 %v13922_v15  ;;  %v10547_v15 = vld [vmem:[%s12401_s6] sm:$0xff]  ;;  %v13944_v52 = vld [vmem:[#allocation163_spill] sm:$0xff] }
 0x2cb   :  { %3853 = vmatprep.subr.bf16.mxu1 %v13923_v59  ;;  %v13931_v59 = vld [vmem:[#allocation217_spill] sm:$0xff] }
 0x2cd   :  { %3813 = vmatpush1.bf16.msra.mxu0 %v13924_v61  ;;  %v13938_v61 = vld [vmem:[#allocation359_spill] sm:$0xff] }
 0x2ce   :  { %3854 = vmatpush1.bf16.msra.mxu1 %v13925_v63  ;;  %3814 = vmatprep.subr.bf16.mxu0 %v13926_v25  ;;  %v13932_v63 = vld [vmem:[#allocation158_spill] sm:$0xff]  ;;  %v13937_v25 = vld [vmem:[#allocation221_spill] sm:$0xff] }
 0x2cf   :  { %3855 = vmatprep.subr.bf16.mxu1 %v13927_v50  ;;  %v10553_v50 = vrot.slane %v10547_v15, %v9852_v62  ;;  %v13942_v62 = vld [vmem:[#allocation162_spill] sm:$0xff] }
 0x2d1   :  { %3815 = vmatpush1.bf16.msra.mxu0 %v13928_v18  ;;  %13933 = vst [vmem:[#allocation456_spill] sm:$0xff] %v10553_v50  ;;  %v13934_v18 = vld [vmem:[#allocation220_spill] sm:$0xff] }
 0x2d2   :  { %3856 = vmatpush1.bf16.msra.mxu1 %v13929_v14  ;;  %3930 = vmatprep.subr.bf16.mxu0 %v13930_v57  ;;  %v13935_v14 = vld [vmem:[#allocation159_spill] sm:$0xff]  ;;  %v10559_v57 = vrot.slane %v10547_v15, %v9858_v2 }
 0x2d3   :  { %3971 = vmatprep.subr.bf16.mxu1 %v13931_v59  ;;  %v10564_v59 = vrot.slane %v10547_v15, %v13938_v61 }
 0x2d4   :  { %3833 = vmatmul.mubr.bf16.vlgmr.msra.gmra.mrb[40].mxu0 %v7022_v0  ;;  %13936 = vst [vmem:[#allocation457_spill] sm:$0xff] %v10559_v57  ;;  %v3511_v2 = vadd.f32 %v10559_v57, %v10494_v8  ;;  %v13950_v57 = vld [vmem:[#allocation170_spill] sm:$0xff] }
 0x2d5   :  { %3874 = vmatmul.mubr.bf16.vlgmr.msra.gmra.mrb[48].mxu1 %v7022_v0  ;;  %3931 = vmatpush1.bf16.msra.mxu0 %v13932_v63  ;;  %13939 = vst [vmem:[#allocation458_spill] sm:$0xff] %v10564_v59  ;;  %v13940_v0 = vld [vmem:[#allocation361_spill] sm:$0xff]  ;;  %v3508_v61 = vadd.f32 %v10564_v59, %v10485_v41  ;;  %v13952_v41 = vld [vmem:[#allocation171_spill] sm:$0xff] }
 0x2d6   :  { %3972 = vmatpush1.bf16.msra.mxu1 %v13934_v18  ;;  %3932 = vmatprep.subr.bf16.mxu0 %v13935_v14  ;;  %v10568_v63 = vrot.slane %v10547_v15, %v13940_v0  ;;  %v3510_v18 = vadd.f32 %v10553_v50, %v10488_v54  ;;  %v13943_v14 = vld [vmem:[#allocation224_spill] sm:$0xff]  ;;  %v13948_v54 = vld [vmem:[#allocation167_spill] sm:$0xff] }
 0x2d7   :  { %3973 = vmatprep.subr.bf16.mxu1 %v13937_v25  ;;  %v13945_v25 = vld [vmem:[#allocation225_spill] sm:$0xff]  ;;  %v3516_v50 = vmul.f32 0.5, %v3508_v61 }
 0x2d8   :  { %13941 = vst [vmem:[#allocation459_spill] sm:$0xff] %v10568_v63  ;;  %v3509_v0 = vadd.f32 %v10568_v63, %v10491_v12  ;;  %v13953_v12 = vld [vmem:[#allocation233_spill] sm:$0xff] }
 0x2d9   :  { %3933 = vmatpush1.bf16.msra.mxu0 %v13942_v62  ;;  %v3524_v62 = vmul.f32 0.5, %v3510_v18  ;;  %v13954_v18 = vld [vmem:[#allocation174_spill] sm:$0xff] }
 0x2da   :  { %3974 = vmatpush1.bf16.msra.mxu1 %v13943_v14  ;;  %3934 = vmatprep.subr.bf16.mxu0 %v13944_v52  ;;  %v3525_v14 = vmul.f32 0.5, %v3511_v2  ;;  %v13949_v52 = vld [vmem:[#allocation229_spill] sm:$0xff]  ;;  %v3517_v8 = vmul.f32 0.5, %v3509_v0  ;;  %v13956_v2 = vld [vmem:[#allocation362_spill] sm:$0xff]  ;;  %v13958_v0 = vld [vmem:[#allocation175_spill] sm:$0xff] }
 0x2db   :  { %3975 = vmatprep.subr.bf16.mxu1 %v13945_v25  ;;  %7288 = vtanh.f32 %v3524_v62  ;;  %v13951_v25 = vld [vmem:[#allocation232_spill] sm:$0xff]  ;;  %v10594_v61 = vrot.slane %v10547_v15, %v13956_v2 }
 0x2dc   :  { %7290 = vtanh.f32 %v3525_v14  ;;  %v13960_v14 = vld [vmem:[#allocation237_spill] sm:$0xff] }
 0x2dd   :  { %3935 = vmatpush1.bf16.msra.mxu0 %v13946_v46  ;;  %7292 = vtanh.f32 %v3516_v50  ;;  %13957 = vst [vmem:[#allocation460_spill] sm:$0xff] %v10594_v61 }
 0x2de   :  { %3976 = vmatpush1.bf16.msra.mxu1 %v13947_v6  ;;  %3936 = vmatprep.subr.bf16.mxu0 %v13948_v54  ;;  %7294 = vtanh.f32 %v3517_v8  ;;  %v13955_v54 = vld [vmem:[#allocation236_spill] sm:$0xff]  ;;  %v13963_v6 = vld [vmem:[#allocation178_spill] sm:$0xff] }
 0x2df   :  { %3977 = vmatprep.subr.bf16.mxu1 %v13949_v52 }
 0x2e1   :  { %3937 = vmatpush1.bf16.msra.mxu0 %v13950_v57 }
 0x2e2   :  { %3978 = vmatpush1.bf16.msra.mxu1 %v13951_v25  ;;  %3938 = vmatprep.subr.bf16.mxu0 %v13952_v41  ;;  %v10599_v41 = vrot.slane %v10547_v15, %v9738_v19 }
 0x2e3   :  { %3979 = vmatprep.subr.bf16.mxu1 %v13953_v12  ;;  %v13961_v12 = vsub.s32 7, %v9700_v49 }
 0x2e4   :  { %13959 = vst [vmem:[#allocation461_spill] sm:$0xff] %v10599_v41 }
 0x2e5   :  { %3939 = vmatpush1.bf16.msra.mxu0 %v13954_v18  ;;  %v10607_v2 = vrot.slane %v10547_v15, %v13961_v12  ;;  %v13966_v12 = vld [vmem:[#allocation241_spill] sm:$0xff]  ;;  %v7289_v63 = vpop.eup %7288 }
 0x2e6   :  { %3980 = vmatpush1.bf16.msra.mxu1 %v13955_v54  ;;  %3940 = vmatprep.subr.bf16.mxu0 %v13958_v0 }
 0x2e7   :  { %v3419_v62 = vpop.f32.mrb[24].mxu0  ;;  %v3460_v57 = vpop.f32.mrb[32].mxu1  ;;  %3981 = vmatprep.subr.bf16.mxu1 %v13960_v14  ;;  %13962 = vst [vmem:[#allocation462_spill] sm:$0xff] %v10607_v2 }
 0x2e8   :  { %v3420_v50 = vadd.f32 %v3419_v62, %v10211_v3  ;;  %v3461_v8 = vadd.f32 %v3460_v57, %v10360_v1  ;;  %v3421_v18 = vpop.f32.mrb[25].mxu0  ;;  %v3462_v54 = vpop.f32.mrb[33].mxu1  ;;  %v13964_v3 = vld [vmem:[#allocation240_spill] sm:$0xff]  ;;  %v13965_v62 = vld [vmem:[#allocation179_spill] sm:$0xff] }
 0x2e9   :  { %v3422_v0 = vadd.f32 %v3421_v18, %v10222_v22  ;;  %v3463_v25 = vadd.f32 %v3462_v54, %v10363_v60  ;;  %v3423_v52 = vpop.f32.mrb[26].mxu0  ;;  %v3464_v19 = vpop.f32.mrb[34].mxu1  ;;  %3941 = vmatpush1.bf16.msra.mxu0 %v13963_v6  ;;  %v13968_v54 = vld [vmem:[#allocation244_spill] sm:$0xff]  ;;  %v13969_v18 = vld [vmem:[#allocation183_spill] sm:$0xff] }
 0x2ea   :  { %v3512_v14 = vadd.f32 %v10594_v61, %v3420_v50  ;;  %3982 = vmatpush1.bf16.msra.mxu1 %v13964_v3  ;;  %v3424_v1 = vpop.f32.mrb[27].mxu0  ;;  %v3465_v57 = vpop.f32.mrb[35].mxu1  ;;  %3942 = vmatprep.subr.bf16.mxu0 %v13965_v62  ;;  %v13967_v19 = vld [vmem:[#allocation182_spill] sm:$0xff]  ;;  %v13976_v62 = vld [vmem:[#allocation249_spill] sm:$0xff]  ;;  %v14128_v3 = vld [vmem:[#allocation340_spill] sm:$0xff] }
 0x2eb   :  { %v3513_v46 = vadd.f32 %v10599_v41, %v3422_v0  ;;  %3983 = vmatprep.subr.bf16.mxu1 %v13966_v12  ;;  %v3515_v60 = vadd.f32 %v10607_v2, %v3463_v25  ;;  %v7291_v52 = vpop.eup %7290  ;;  %v3528_v1 = vmul.f32 0.5, %v7289_v63  ;;  %v13970_v57 = vsub.s32 6, %v9700_v49  ;;  %v13972_v12 = vld [vmem:[#allocation245_spill] sm:$0xff]  ;;  %v13974_v41 = vld [vmem:[#allocation248_spill] sm:$0xff] }
 0x2ec   :  { %7296 = vtanh.f32 %v3512_v14  ;;  %v7293_v22 = vpop.eup %7292  ;;  %v3529_v14 = vmul.f32 0.5, %v7291_v52 }
 0x2ed   :  { %7298 = vtanh.f32 %v3513_v46  ;;  %3943 = vmatpush1.bf16.msra.mxu0 %v13967_v19  ;;  %v7295_v50 = vpop.eup %7294  ;;  %v10624_v0 = vrot.slane %v10547_v15, %v13970_v57  ;;  %v3535_v25 = vmul.f32 0.5, %v3515_v60  ;;  %v3520_v2 = vmul.f32 0.5, %v7293_v22  ;;  %v13973_v46 = vld [vmem:[#allocation186_spill] sm:$0xff]  ;;  %v13978_v22 = vld [vmem:[#allocation252_spill] sm:$0xff] }
 0x2ee   :  { %3984 = vmatpush1.bf16.msra.mxu1 %v13968_v54  ;;  %3944 = vmatprep.subr.bf16.mxu0 %v13969_v18  ;;  %v3521_v19 = vmul.f32 0.5, %v7295_v50  ;;  %v13975_v54 = vld [vmem:[#allocation187_spill] sm:$0xff]  ;;  %v3530_v18 = vadd.f32 0.5, %v3528_v1  ;;  %v3531_v49 = vadd.f32 0.5, %v3529_v14  ;;  %v13977_v57 = vld [vmem:[#allocation190_spill] sm:$0xff]  ;;  %v13980_v1 = vld [vmem:[#allocation253_spill] sm:$0xff] }
 0x2ef   :  { %13971 = vst [vmem:[#allocation463_spill] sm:$0xff] %v10624_v0  ;;  %3985 = vmatprep.subr.bf16.mxu1 %v13972_v12  ;;  %v3514_v63 = vadd.f32 %v10624_v0, %v3461_v8  ;;  %7300 = vtanh.f32 %v3535_v25  ;;  %v3522_v15 = vadd.f32 0.5, %v3520_v2  ;;  %v13982_v14 = vld [vmem:[#allocation194_spill] sm:$0xff]  ;;  %v13984_v25 = vld [vmem:[#allocation256_spill] sm:$0xff] }
 0x2f0   :  { %v3523_v60 = vadd.f32 0.5, %v3521_v19  ;;  %v3543_v8 = vmul.f32 0.0, %v3531_v49  ;;  %v13985_v19 = vld [vmem:[#allocation195_spill] sm:$0xff]  ;;  %v13988_v49 = vld [vmem:[#allocation260_spill] sm:$0xff] }
 0x2f1   :  { %3945 = vmatpush1.bf16.msra.mxu0 %v13973_v46  ;;  %v13979_v46 = vld [vmem:[#allocation191_spill] sm:$0xff] }
 0x2f2   :  { %3986 = vmatpush1.bf16.msra.mxu1 %v13974_v41  ;;  %3946 = vmatprep.subr.bf16.mxu0 %v13975_v54  ;;  %v3542_v41 = vmul.f32 0.0, %v3530_v18  ;;  %v3534_v54 = vmul.f32 0.5, %v3514_v63  ;;  %v13987_v18 = vld [vmem:[#allocation198_spill] sm:$0xff] }
 0x2f3   :  { %3987 = vmatprep.subr.bf16.mxu1 %v13976_v62 }
 0x2f4   :  { %7302 = vtanh.f32 %v3534_v54  ;;  %v13993_v54 = vld [vmem:[#allocation203_spill] sm:$0xff] }
 0x2f5   :  { %3947 = vmatpush1.bf16.msra.mxu0 %v13977_v57 }
 0x2f6   :  { %v7297_v52 = vpop.eup %7296  ;;  %3988 = vmatpush1.bf16.msra.mxu1 %v13978_v22  ;;  %3948 = vmatprep.subr.bf16.mxu0 %v13979_v46  ;;  %v13986_v46 = vld [vmem:[#allocation257_spill] sm:$0xff] }
 0x2f7   :  { %v7299_v50 = vpop.eup %7298  ;;  %v3544_v12 = vmul.f32 %v7297_v52, %v3522_v15  ;;  %3989 = vmatprep.subr.bf16.mxu1 %v13980_v1  ;;  %v13991_v15 = vld [vmem:[#allocation202_spill] sm:$0xff]  ;;  %v13992_v52 = vld [vmem:[#allocation264_spill] sm:$0xff]  ;;  %v14100_v1 = vld [vmem:[#allocation311_spill] sm:$0xff] }
 0x2f8   :  { %v3545_v0 = vmul.f32 %v7299_v50, %v3523_v60  ;;  %v13994_v60 = vld [vmem:[#allocation265_spill] sm:$0xff] }
 0x2f9   :  { %v10636_v62 = vadd.f32 %v3544_v12, %v3542_v41  ;;  %3949 = vmatpush1.bf16.msra.mxu0 %v13982_v14  ;;  %v7301_v63 = vpop.eup %7300  ;;  %v13989_v41 = vld [vmem:[#allocation199_spill] sm:$0xff]  ;;  %v13990_v12 = vld [vmem:[#allocation261_spill] sm:$0xff] }
 0x2fa   :  { %v10639_v2 = vadd.f32 %v3545_v0, %v3543_v8  ;;  %3990 = vmatpush1.bf16.msra.mxu1 %v13984_v25  ;;  %3950 = vmatprep.subr.bf16.mxu0 %v13985_v19  ;;  %v3539_v0 = vmul.f32 0.5, %v7301_v63  ;;  %v14000_v25 = vld [vmem:[#allocation272_spill] sm:$0xff]  ;;  %v14037_v14 = vld [vmem:[#allocation247_spill] sm:$0xff] }
 0x2fb   :  { %13981 = vst [vmem:[#allocation464_spill] sm:$0xff] %v10636_v62  ;;  %3991 = vmatprep.subr.bf16.mxu1 %v13986_v46  ;;  %v13996_v46 = vld [vmem:[#allocation268_spill] sm:$0xff] }
 0x2fc   :  { %13983 = vst [vmem:[#allocation465_spill] sm:$0xff] %v10639_v2  ;;  %7304 = vtanh.f32 %v10639_v2  ;;  %v3541_v8 = vadd.f32 0.5, %v3539_v0  ;;  %v14038_v2 = vld [vmem:[#allocation309_spill] sm:$0xff] }
 0x2fd   :  { %3951 = vmatpush1.bf16.msra.mxu0 %v13987_v18  ;;  %7306 = vtanh.f32 %v10636_v62  ;;  %v13995_v18 = vld [vmem:[#allocation206_spill] sm:$0xff]  ;;  %v14101_v62 = vld [vmem:[#allocation371_spill] sm:$0xff] }
 0x2fe   :  { %3992 = vmatpush1.bf16.msra.mxu1 %v13988_v49  ;;  %3952 = vmatprep.subr.bf16.mxu0 %v13989_v41  ;;  %v7303_v50 = vpop.eup %7302  ;;  %v13997_v41 = vld [vmem:[#allocation207_spill] sm:$0xff] }
 0x2ff   :  { %3993 = vmatprep.subr.bf16.mxu1 %v13990_v12  ;;  %v13998_v12 = vld [vmem:[#allocation269_spill] sm:$0xff]  ;;  %v3538_v19 = vmul.f32 0.5, %v7303_v50 }
 0x300   :  { %v14006_v50 = vld [vmem:[#allocation277_spill] sm:$0xff] }
 0x301   :  { %3953 = vmatpush1.bf16.msra.mxu0 %v13991_v15  ;;  %v13999_v15 = vld [vmem:[#allocation210_spill] sm:$0xff]  ;;  %v3540_v0 = vadd.f32 0.5, %v3538_v19  ;;  %v14010_v19 = vld [vmem:[#allocation281_spill] sm:$0xff] }
 0x302   :  { %3994 = vmatpush1.bf16.msra.mxu1 %v13992_v52  ;;  %3954 = vmatprep.subr.bf16.mxu0 %v13993_v54  ;;  %v14001_v54 = vld [vmem:[#allocation211_spill] sm:$0xff] }
 0x303   :  { %3995 = vmatprep.subr.bf16.mxu1 %v13994_v60 }
 0x305   :  { %3955 = vmatpush1.bf16.msra.mxu0 %v13995_v18  ;;  %v14002_v18 = vld [vmem:[#allocation273_spill] sm:$0xff] }
 0x306   :  { %v7305_v49 = vpop.eup %7304  ;;  %3996 = vmatpush1.bf16.msra.mxu1 %v13996_v46  ;;  %3956 = vmatprep.subr.bf16.mxu0 %v13997_v41  ;;  %v14003_v46 = vld [vmem:[#allocation214_spill] sm:$0xff]  ;;  %v14004_v41 = vld [vmem:[#allocation276_spill] sm:$0xff] }
 0x307   :  { %3997 = vmatprep.subr.bf16.mxu1 %v13998_v12  ;;  %v3551_v63 = vmul.f32 %v7305_v49, %v3541_v8  ;;  %v7307_v60 = vpop.eup %7306  ;;  %v14005_v12 = vld [vmem:[#allocation215_spill] sm:$0xff]  ;;  %v14007_v8 = vld [vmem:[#allocation218_spill] sm:$0xff] }
 0x308   :  { %v3550_v49 = vmul.f32 %v7307_v60, %v3540_v0  ;;  %v14012_v60 = vld [vmem:[#allocation284_spill] sm:$0xff]  ;;  %v14013_v0 = vld [vmem:[#allocation223_spill] sm:$0xff] }
 0x309   :  { %3957 = vmatpush1.bf16.msra.mxu0 %v13999_v15  ;;  %v3929_v52 = vpack.c.bf16 %v3551_v63, %v3551_v63  ;;  %v14008_v63 = vld [vmem:[#allocation280_spill] sm:$0xff]  ;;  %v14035_v15 = vld [vmem:[#allocation246_spill] sm:$0xff] }
 0x30a   :  { %3998 = vmatpush1.bf16.msra.mxu1 %v14000_v25  ;;  %3958 = vmatprep.subr.bf16.mxu0 %v14001_v54  ;;  %v10668_v54 = vpack.c.bf16 %v3550_v49, %v3550_v49  ;;  %v14009_v25 = vld [vmem:[#allocation219_spill] sm:$0xff]  ;;  %v14015_v49 = vld [vmem:[#allocation226_spill] sm:$0xff] }
 0x30b   :  { %3962 = vmatprep.mubr.bf16.mxu0 %v3929_v52  ;;  %4003 = vmatprep.mubr.bf16.mxu1 %v3929_v52 }
 0x30c   :  { %3999 = vmatprep.subr.bf16.mxu1 %v14002_v18  ;;  %v14034_v18 = vld [vmem:[#allocation305_spill] sm:$0xff] }
 0x30d   :  { %3959 = vmatpush1.bf16.msra.mxu0 %v14003_v46  ;;  %v14032_v46 = vld [vmem:[#allocation304_spill] sm:$0xff] }
 0x30e   :  { %4000 = vmatpush1.bf16.msra.mxu1 %v14004_v41  ;;  %3960 = vmatprep.subr.bf16.mxu0 %v14005_v12  ;;  %v14011_v41 = vld [vmem:[#allocation222_spill] sm:$0xff]  ;;  %v14020_v12 = vld [vmem:[#allocation292_spill] sm:$0xff] }
 0x30f   :  { %4001 = vmatprep.subr.bf16.mxu1 %v14006_v50  ;;  %v14019_v50 = vld [vmem:[#allocation230_spill] sm:$0xff] }
 0x311   :  { %3961 = vmatpush1.bf16.msra.mxu0 %v14007_v8  ;;  %v14014_v8 = vld [vmem:[#allocation285_spill] sm:$0xff] }
 0x312   :  { %4002 = vmatpush1.bf16.msra.mxu1 %v14008_v63  ;;  %4012 = vmatprep.subr.bf16.mxu0 %v14009_v25  ;;  %v14016_v63 = vld [vmem:[#allocation288_spill] sm:$0xff]  ;;  %v14017_v25 = vld [vmem:[#allocation227_spill] sm:$0xff] }
 0x313   :  { %4053 = vmatprep.subr.bf16.mxu1 %v14010_v19  ;;  %v14018_v19 = vld [vmem:[#allocation289_spill] sm:$0xff] }
 0x314   :  { %3963 = vmatmul.mubr.bf16.vlgmr.msra.gmra.mrb[44].mxu0 %v10668_v54 }
 0x315   :  { %4004 = vmatmul.mubr.bf16.vlgmr.msra.gmra.mrb[52].mxu1 %v10668_v54  ;;  %4013 = vmatpush1.bf16.msra.mxu0 %v14011_v41  ;;  %v14021_v41 = vld [vmem:[#allocation231_spill] sm:$0xff] }
 0x316   :  { %4044 = vmatprep.mubr.bf16.mxu0 %v3929_v52  ;;  %4054 = vmatpush1.bf16.msra.mxu1 %v14012_v60  ;;  %v14022_v60 = vld [vmem:[#allocation293_spill] sm:$0xff] }
 0x317   :  { %4085 = vmatprep.mubr.bf16.mxu1 %v3929_v52  ;;  %4014 = vmatprep.subr.bf16.mxu0 %v14013_v0  ;;  %v14023_v52 = vld [vmem:[#allocation234_spill] sm:$0xff]  ;;  %v14024_v0 = vld [vmem:[#allocation296_spill] sm:$0xff] }
 0x318   :  { %4055 = vmatprep.subr.bf16.mxu1 %v14014_v8  ;;  %v14025_v8 = vld [vmem:[#allocation235_spill] sm:$0xff] }
 0x319   :  { %4015 = vmatpush1.bf16.msra.mxu0 %v14015_v49  ;;  %v14026_v49 = vld [vmem:[#allocation297_spill] sm:$0xff] }
 0x31a   :  { %4056 = vmatpush1.bf16.msra.mxu1 %v14016_v63  ;;  %4016 = vmatprep.subr.bf16.mxu0 %v14017_v25  ;;  %v14027_v63 = vld [vmem:[#allocation238_spill] sm:$0xff]  ;;  %v14028_v25 = vld [vmem:[#allocation300_spill] sm:$0xff] }
 0x31b   :  { %4057 = vmatprep.subr.bf16.mxu1 %v14018_v19  ;;  %v14029_v19 = vld [vmem:[#allocation239_spill] sm:$0xff] }
 0x31d   :  { %4017 = vmatpush1.bf16.msra.mxu0 %v14019_v50 }
 0x31e   :  { %4058 = vmatpush1.bf16.msra.mxu1 %v14020_v12  ;;  %4018 = vmatprep.subr.bf16.mxu0 %v14021_v41  ;;  %v14030_v12 = vld [vmem:[#allocation301_spill] sm:$0xff] }
 0x31f   :  { %4059 = vmatprep.subr.bf16.mxu1 %v14022_v60 }
 0x321   :  { %4019 = vmatpush1.bf16.msra.mxu0 %v14023_v52 }
 0x322   :  { %4060 = vmatpush1.bf16.msra.mxu1 %v14024_v0  ;;  %4020 = vmatprep.subr.bf16.mxu0 %v14025_v8  ;;  %v14031_v8 = vld [vmem:[#allocation242_spill] sm:$0xff] }
 0x323   :  { %4061 = vmatprep.subr.bf16.mxu1 %v14026_v49 }
 0x325   :  { %4021 = vmatpush1.bf16.msra.mxu0 %v14027_v63 }
 0x326   :  { %4062 = vmatpush1.bf16.msra.mxu1 %v14028_v25  ;;  %4022 = vmatprep.subr.bf16.mxu0 %v14029_v19  ;;  %v14033_v25 = vld [vmem:[#allocation243_spill] sm:$0xff] }
 0x327   :  { %v10693_v50 = vpop.f32.mrb[28].mxu0  ;;  %4063 = vmatprep.subr.bf16.mxu1 %v14030_v12  ;;  %v14036_v12 = vld [vmem:[#allocation308_spill] sm:$0xff] }
 0x328   :  { %v10696_v41 = vpop.f32.mrb[36].mxu1  ;;  %v10698_v60 = vpop.f32.mrb[29].mxu0 }
 0x329   :  { %v10700_v52 = vpop.f32.mrb[37].mxu1  ;;  %v3592_v0 = vpop.f32.mrb[30].mxu0  ;;  %4023 = vmatpush1.bf16.msra.mxu0 %v14031_v8  ;;  %v14040_v8 = vld [vmem:[#allocation312_spill] sm:$0xff] }
 0x32a   :  { %v3633_v49 = vpop.f32.mrb[38].mxu1  ;;  %4064 = vmatpush1.bf16.msra.mxu1 %v14032_v46  ;;  %v3593_v63 = vpop.f32.mrb[31].mxu0  ;;  %4024 = vmatprep.subr.bf16.mxu0 %v14033_v25  ;;  %v14039_v0 = vld [vmem:[#allocation250_spill] sm:$0xff] }
 0x32b   :  { %v3634_v19 = vpop.f32.mrb[39].mxu1  ;;  %4065 = vmatprep.subr.bf16.mxu1 %v14034_v18  ;;  %v14041_v49 = vld [vmem:[#allocation251_spill] sm:$0xff]  ;;  %v14042_v63 = vld [vmem:[#allocation313_spill] sm:$0xff]  ;;  %v14043_v25 = vld [vmem:[#allocation254_spill] sm:$0xff] }
 0x32c   :  { %v14044_v19 = vld [vmem:[#allocation316_spill] sm:$0xff]  ;;  %v14045_v18 = vld [vmem:[#allocation255_spill] sm:$0xff]  ;;  %v14098_v46 = vld [vmem:[#allocation310_spill] sm:$0xff] }
 0x32d   :  { %4025 = vmatpush1.bf16.msra.mxu0 %v14035_v15  ;;  %v14046_v15 = vld [vmem:[#allocation317_spill] sm:$0xff] }
 0x32e   :  { %4066 = vmatpush1.bf16.msra.mxu1 %v14036_v12  ;;  %4026 = vmatprep.subr.bf16.mxu0 %v14037_v14  ;;  %v14047_v12 = vld [vmem:[#allocation258_spill] sm:$0xff]  ;;  %v14048_v14 = vld [vmem:[#allocation320_spill] sm:$0xff] }
 0x32f   :  { %4067 = vmatprep.subr.bf16.mxu1 %v14038_v2  ;;  %v14049_v2 = vld [vmem:[#allocation259_spill] sm:$0xff] }
 0x331   :  { %4027 = vmatpush1.bf16.msra.mxu0 %v14039_v0  ;;  %v14050_v0 = vld [vmem:[#allocation321_spill] sm:$0xff] }
 0x332   :  { %4068 = vmatpush1.bf16.msra.mxu1 %v14040_v8  ;;  %4028 = vmatprep.subr.bf16.mxu0 %v14041_v49  ;;  %v14051_v8 = vld [vmem:[#allocation262_spill] sm:$0xff]  ;;  %v14052_v49 = vld [vmem:[#allocation324_spill] sm:$0xff] }
 0x333   :  { %4069 = vmatprep.subr.bf16.mxu1 %v14042_v63  ;;  %v14053_v63 = vld [vmem:[#allocation263_spill] sm:$0xff] }
 0x335   :  { %4029 = vmatpush1.bf16.msra.mxu0 %v14043_v25  ;;  %v14054_v25 = vld [vmem:[#allocation325_spill] sm:$0xff] }
 0x336   :  { %4070 = vmatpush1.bf16.msra.mxu1 %v14044_v19  ;;  %4030 = vmatprep.subr.bf16.mxu0 %v14045_v18  ;;  %v14055_v19 = vld [vmem:[#allocation266_spill] sm:$0xff]  ;;  %v14056_v18 = vld [vmem:[#allocation328_spill] sm:$0xff] }
 0x337   :  { %4071 = vmatprep.subr.bf16.mxu1 %v14046_v15  ;;  %v14057_v15 = vld [vmem:[#allocation267_spill] sm:$0xff] }
 0x339   :  { %4031 = vmatpush1.bf16.msra.mxu0 %v14047_v12  ;;  %v14058_v12 = vld [vmem:[#allocation329_spill] sm:$0xff] }
 0x33a   :  { %4072 = vmatpush1.bf16.msra.mxu1 %v14048_v14  ;;  %4032 = vmatprep.subr.bf16.mxu0 %v14049_v2  ;;  %v14059_v14 = vld [vmem:[#allocation270_spill] sm:$0xff]  ;;  %v14060_v2 = vld [vmem:[#allocation332_spill] sm:$0xff] }
 0x33b   :  { %4073 = vmatprep.subr.bf16.mxu1 %v14050_v0  ;;  %v14061_v0 = vld [vmem:[#allocation271_spill] sm:$0xff] }
 0x33d   :  { %4033 = vmatpush1.bf16.msra.mxu0 %v14051_v8  ;;  %v14062_v8 = vld [vmem:[#allocation334_spill] sm:$0xff] }
 0x33e   :  { %4074 = vmatpush1.bf16.msra.mxu1 %v14052_v49  ;;  %4034 = vmatprep.subr.bf16.mxu0 %v14053_v63  ;;  %v14063_v49 = vld [vmem:[#allocation274_spill] sm:$0xff]  ;;  %v14064_v63 = vld [vmem:[#allocation337_spill] sm:$0xff] }
 0x33f   :  { %4075 = vmatprep.subr.bf16.mxu1 %v14054_v25  ;;  %v14065_v25 = vld [vmem:[#allocation275_spill] sm:$0xff] }
 0x341   :  { %4035 = vmatpush1.bf16.msra.mxu0 %v14055_v19  ;;  %v14066_v19 = vld [vmem:[#allocation338_spill] sm:$0xff] }
 0x342   :  { %4076 = vmatpush1.bf16.msra.mxu1 %v14056_v18  ;;  %4036 = vmatprep.subr.bf16.mxu0 %v14057_v15  ;;  %v14067_v18 = vld [vmem:[#allocation278_spill] sm:$0xff]  ;;  %v14068_v15 = vld [vmem:[#allocation341_spill] sm:$0xff] }
 0x343   :  { %4077 = vmatprep.subr.bf16.mxu1 %v14058_v12  ;;  %v14069_v12 = vld [vmem:[#allocation279_spill] sm:$0xff] }
 0x345   :  { %4037 = vmatpush1.bf16.msra.mxu0 %v14059_v14  ;;  %v14070_v14 = vld [vmem:[#allocation342_spill] sm:$0xff] }
 0x346   :  { %4078 = vmatpush1.bf16.msra.mxu1 %v14060_v2  ;;  %4038 = vmatprep.subr.bf16.mxu0 %v14061_v0  ;;  %v14071_v2 = vld [vmem:[#allocation282_spill] sm:$0xff]  ;;  %v14072_v0 = vld [vmem:[#allocation345_spill] sm:$0xff] }
 0x347   :  { %4079 = vmatprep.subr.bf16.mxu1 %v14062_v8  ;;  %v14073_v8 = vld [vmem:[#allocation283_spill] sm:$0xff] }
 0x349   :  { %4039 = vmatpush1.bf16.msra.mxu0 %v14063_v49  ;;  %v14074_v49 = vld [vmem:[#allocation346_spill] sm:$0xff] }
 0x34a   :  { %4080 = vmatpush1.bf16.msra.mxu1 %v14064_v63  ;;  %4040 = vmatprep.subr.bf16.mxu0 %v14065_v25  ;;  %v14084_v25 = vld [vmem:[#allocation353_spill] sm:$0xff] }
 0x34b   :  { %4081 = vmatprep.subr.bf16.mxu1 %v14066_v19  ;;  %v14075_v19 = vld [vmem:[#allocation286_spill] sm:$0xff] }
 0x34d   :  { %4041 = vmatpush1.bf16.msra.mxu0 %v14067_v18  ;;  %v14076_v18 = vld [vmem:[#allocation349_spill] sm:$0xff] }
 0x34e   :  { %4082 = vmatpush1.bf16.msra.mxu1 %v14068_v15  ;;  %4042 = vmatprep.subr.bf16.mxu0 %v14069_v12  ;;  %v14077_v15 = vld [vmem:[#allocation287_spill] sm:$0xff]  ;;  %v14078_v12 = vld [vmem:[#allocation350_spill] sm:$0xff] }
 0x34f   :  { %4083 = vmatprep.subr.bf16.mxu1 %v14070_v14  ;;  %v14079_v14 = vld [vmem:[#allocation290_spill] sm:$0xff] }
 0x351   :  { %4043 = vmatpush1.bf16.msra.mxu0 %v14071_v2  ;;  %v14080_v2 = vld [vmem:[#allocation351_spill] sm:$0xff] }
 0x352   :  { %4084 = vmatpush1.bf16.msra.mxu1 %v14072_v0  ;;  %4094 = vmatprep.subr.bf16.mxu0 %v14073_v8  ;;  %v14081_v0 = vld [vmem:[#allocation291_spill] sm:$0xff]  ;;  %v14082_v8 = vld [vmem:[#allocation352_spill] sm:$0xff] }
 0x353   :  { %4135 = vmatprep.subr.bf16.mxu1 %v14074_v49  ;;  %v14083_v49 = vld [vmem:[#allocation294_spill] sm:$0xff] }
 0x354   :  { %4045 = vmatmul.mubr.bf16.vlgmr.msra.gmra.mrb[48].mxu0 %v10668_v54 }
 0x355   :  { %4086 = vmatmul.mubr.bf16.vlgmr.msra.gmra.mrb[56].mxu1 %v10668_v54  ;;  %4095 = vmatpush1.bf16.msra.mxu0 %v14075_v19  ;;  %v14085_v54 = vld [vmem:[#allocation295_spill] sm:$0xff]  ;;  %v14086_v19 = vld [vmem:[#allocation354_spill] sm:$0xff] }
 0x356   :  { %4136 = vmatpush1.bf16.msra.mxu1 %v14076_v18  ;;  %4096 = vmatprep.subr.bf16.mxu0 %v14077_v15  ;;  %v14087_v18 = vld [vmem:[#allocation298_spill] sm:$0xff]  ;;  %v14088_v15 = vld [vmem:[#allocation355_spill] sm:$0xff] }
 0x357   :  { %4137 = vmatprep.subr.bf16.mxu1 %v14078_v12  ;;  %v14089_v12 = vld [vmem:[#allocation299_spill] sm:$0xff] }
 0x359   :  { %4097 = vmatpush1.bf16.msra.mxu0 %v14079_v14  ;;  %v14090_v14 = vld [vmem:[#allocation357_spill] sm:$0xff] }
 0x35a   :  { %4138 = vmatpush1.bf16.msra.mxu1 %v14080_v2  ;;  %4098 = vmatprep.subr.bf16.mxu0 %v14081_v0  ;;  %v14091_v2 = vld [vmem:[#allocation302_spill] sm:$0xff] }
 0x35b   :  { %4139 = vmatprep.subr.bf16.mxu1 %v14082_v8  ;;  %v14092_v0 = vld [vmem:[#allocation358_spill] sm:$0xff]  ;;  %v14093_v8 = vld [vmem:[#allocation303_spill] sm:$0xff] }
 0x35d   :  { %4099 = vmatpush1.bf16.msra.mxu0 %v14083_v49 }
 0x35e   :  { %4140 = vmatpush1.bf16.msra.mxu1 %v14084_v25  ;;  %4100 = vmatprep.subr.bf16.mxu0 %v14085_v54  ;;  %v14094_v25 = vld [vmem:[#allocation360_spill] sm:$0xff] }
 0x35f   :  { %4141 = vmatprep.subr.bf16.mxu1 %v14086_v19 }
 0x361   :  { %4101 = vmatpush1.bf16.msra.mxu0 %v14087_v18 }
 0x362   :  { %4142 = vmatpush1.bf16.msra.mxu1 %v14088_v15  ;;  %4102 = vmatprep.subr.bf16.mxu0 %v14089_v12  ;;  %v14095_v12 = vld [vmem:[#allocation306_spill] sm:$0xff] }
 0x363   :  { %4143 = vmatprep.subr.bf16.mxu1 %v14090_v14 }
 0x365   :  { %4103 = vmatpush1.bf16.msra.mxu0 %v14091_v2  ;;  %v14097_v2 = vld [vmem:[#allocation366_spill] sm:$0xff] }
 0x366   :  { %4144 = vmatpush1.bf16.msra.mxu1 %v14092_v0  ;;  %4104 = vmatprep.subr.bf16.mxu0 %v14093_v8  ;;  %v14096_v0 = vld [vmem:[#allocation307_spill] sm:$0xff] }
 0x367   :  { %v10767_v49 = vpop.f32.mrb[32].mxu0  ;;  %4145 = vmatprep.subr.bf16.mxu1 %v14094_v25  ;;  %v14099_v25 = vld [vmem:[#allocation370_spill] sm:$0xff] }
 0x368   :  { %v10770_v54 = vpop.f32.mrb[40].mxu1  ;;  %v10772_v19 = vpop.f32.mrb[33].mxu0 }
 0x369   :  { %v10774_v18 = vpop.f32.mrb[41].mxu1  ;;  %v3674_v15 = vpop.f32.mrb[34].mxu0  ;;  %4105 = vmatpush1.bf16.msra.mxu0 %v14095_v12  ;;  %v14103_v12 = vld [vmem:[#allocation372_spill] sm:$0xff] }
 0x36a   :  { %v3715_v14 = vpop.f32.mrb[42].mxu1  ;;  %v3675_v63 = vpop.f32.mrb[35].mxu0  ;;  %4146 = vmatpush1.bf16.msra.mxu1 %v9741_v47  ;;  %4106 = vmatprep.subr.bf16.mxu0 %v14096_v0  ;;  %v14102_v15 = vld [vmem:[#allocation314_spill] sm:$0xff] }
 0x36b   :  { %v3716_v8 = vpop.f32.mrb[43].mxu1  ;;  %4147 = vmatprep.subr.bf16.mxu1 %v14097_v2  ;;  %v14104_v14 = vld [vmem:[#allocation315_spill] sm:$0xff]  ;;  %v14105_v63 = vld [vmem:[#allocation373_spill] sm:$0xff]  ;;  %v14106_v0 = vld [vmem:[#allocation318_spill] sm:$0xff] }
 0x36c   :  { %v14107_v8 = vld [vmem:[#allocation374_spill] sm:$0xff]  ;;  %v14108_v2 = vld [vmem:[#allocation319_spill] sm:$0xff] }
 0x36d   :  { %4107 = vmatpush1.bf16.msra.mxu0 %v14098_v46  ;;  %v14109_v46 = vld [vmem:[#allocation375_spill] sm:$0xff] }
 0x36e   :  { %4148 = vmatpush1.bf16.msra.mxu1 %v14099_v25  ;;  %4108 = vmatprep.subr.bf16.mxu0 %v14100_v1  ;;  %v14110_v25 = vld [vmem:[#allocation322_spill] sm:$0xff]  ;;  %v14111_v1 = vld [vmem:[#allocation376_spill] sm:$0xff] }
 0x36f   :  { %4149 = vmatprep.subr.bf16.mxu1 %v14101_v62  ;;  %v14112_v62 = vld [vmem:[#allocation323_spill] sm:$0xff] }
 0x371   :  { %4109 = vmatpush1.bf16.msra.mxu0 %v14102_v15  ;;  %v14113_v15 = vld [vmem:[#allocation377_spill] sm:$0xff] }
 0x372   :  { %4150 = vmatpush1.bf16.msra.mxu1 %v14103_v12  ;;  %4110 = vmatprep.subr.bf16.mxu0 %v14104_v14  ;;  %v14114_v12 = vld [vmem:[#allocation326_spill] sm:$0xff] }
 0x373   :  { %4151 = vmatprep.subr.bf16.mxu1 %v14105_v63  ;;  %v14115_v14 = vld [vmem:[#allocation378_spill] sm:$0xff]  ;;  %v14116_v63 = vld [vmem:[#allocation327_spill] sm:$0xff] }
 0x375   :  { %4111 = vmatpush1.bf16.msra.mxu0 %v14106_v0  ;;  %v14117_v0 = vld [vmem:[#allocation379_spill] sm:$0xff] }
 0x376   :  { %4152 = vmatpush1.bf16.msra.mxu1 %v14107_v8  ;;  %4112 = vmatprep.subr.bf16.mxu0 %v14108_v2  ;;  %v14118_v8 = vld [vmem:[#allocation330_spill] sm:$0xff]  ;;  %v14119_v2 = vld [vmem:[#allocation380_spill] sm:$0xff] }
 0x377   :  { %4153 = vmatprep.subr.bf16.mxu1 %v14109_v46  ;;  %v14120_v46 = vld [vmem:[#allocation331_spill] sm:$0xff] }
 0x379   :  { %4113 = vmatpush1.bf16.msra.mxu0 %v14110_v25  ;;  %v14121_v25 = vld [vmem:[#allocation381_spill] sm:$0xff] }
 0x37a   :  { %4154 = vmatpush1.bf16.msra.mxu1 %v14111_v1  ;;  %4114 = vmatprep.subr.bf16.mxu0 %v14112_v62  ;;  %v14122_v1 = vld [vmem:[#allocation335_spill] sm:$0xff]  ;;  %v14123_v62 = vld [vmem:[#allocation382_spill] sm:$0xff] }
 0x37b   :  { %4155 = vmatprep.subr.bf16.mxu1 %v14113_v15  ;;  %v14124_v15 = vld [vmem:[#allocation336_spill] sm:$0xff] }
 0x37d   :  { %4115 = vmatpush1.bf16.msra.mxu0 %v14114_v12 }
 0x37e   :  { %4156 = vmatpush1.bf16.msra.mxu1 %v14115_v14  ;;  %4116 = vmatprep.subr.bf16.mxu0 %v14116_v63  ;;  %v14125_v14 = vld [vmem:[#allocation384_spill] sm:$0xff] }
 0x37f   :  { %4157 = vmatprep.subr.bf16.mxu1 %v14117_v0 }
 0x381   :  { %4117 = vmatpush1.bf16.msra.mxu0 %v14118_v8 }
 0x382   :  { %4158 = vmatpush1.bf16.msra.mxu1 %v14119_v2  ;;  %4118 = vmatprep.subr.bf16.mxu0 %v14120_v46 }
 0x383   :  { %4159 = vmatprep.subr.bf16.mxu1 %v14121_v25  ;;  %v14126_v25 = vld [vmem:[#allocation339_spill] sm:$0xff] }
 0x385   :  { %4119 = vmatpush1.bf16.msra.mxu0 %v14122_v1 }
 0x386   :  { %4160 = vmatpush1.bf16.msra.mxu1 %v14123_v62  ;;  %4120 = vmatprep.subr.bf16.mxu0 %v14124_v15  ;;  %v14127_v15 = vld [vmem:[#allocation386_spill] sm:$0xff] }
 0x387   :  { %v3752_v12 = vpop.f32.mrb[36].mxu0  ;;  %4161 = vmatprep.subr.bf16.mxu1 %v14125_v14 }
 0x388   :  { %v3753_v63 = vadd.f32 %v3752_v12, %v10693_v50  ;;  %v3793_v0 = vpop.f32.mrb[44].mxu1  ;;  %v3754_v47 = vpop.f32.mrb[37].mxu0  ;;  %v14129_v12 = vld [vmem:[#allocation388_spill] sm:$0xff]  ;;  %v14130_v50 = vld [vmem:[#allocation343_spill] sm:$0xff] }
 0x389   :  { %v3794_v8 = vadd.f32 %v3793_v0, %v10696_v41  ;;  %v3755_v2 = vadd.f32 %v3754_v47, %v10698_v60  ;;  %v3795_v46 = vpop.f32.mrb[45].mxu1  ;;  %v3756_v22 = vpop.f32.mrb[38].mxu0  ;;  %4121 = vmatpush1.bf16.msra.mxu0 %v14126_v25  ;;  %v14131_v41 = vld [vmem:[#allocation390_spill] sm:$0xff]  ;;  %v14132_v47 = vld [vmem:[#allocation344_spill] sm:$0xff]  ;;  %v14134_v60 = vld [vmem:[#allocation347_spill] sm:$0xff] }
 0x38a   :  { %v3796_v1 = vadd.f32 %v3795_v46, %v10700_v52  ;;  %v3757_v62 = vpop.f32.mrb[39].mxu0  ;;  %v3797_v57 = vpop.f32.mrb[46].mxu1  ;;  %4162 = vmatpush1.bf16.msra.mxu1 %v14127_v15  ;;  %4122 = vmatprep.subr.bf16.mxu0 %v14128_v3  ;;  %v14133_v22 = vld [vmem:[#allocation391_spill] sm:$0xff]  ;;  %v14135_v46 = vld [vmem:[#allocation392_spill] sm:$0xff]  ;;  %v14140_v3 = vld [vmem:[#allocation365_spill] sm:$0xff] }
 0x38b   :  { %v3798_v14 = vpop.f32.mrb[47].mxu1  ;;  %4163 = vmatprep.subr.bf16.mxu1 %v14129_v12  ;;  %v14136_v62 = vld [vmem:[#allocation348_spill] sm:$0xff]  ;;  %v14137_v57 = vld [vmem:[#allocation393_spill] sm:$0xff]  ;;  %v14138_v52 = vld [vmem:[#allocation387_spill] sm:$0xff] }
 0x38c   :  { %v3884_v0 = vadd.f32 %v3794_v8, %v14138_v52  ;;  %v14139_v14 = vld [vmem:[#allocation389_spill] sm:$0xff]  ;;  %v14141_v15 = vld [vmem:[#allocation367_spill] sm:$0xff] }
 0x38d   :  { %4123 = vmatpush1.bf16.msra.mxu0 %v14130_v50  ;;  %v3885_v12 = vadd.f32 %v3796_v1, %v14139_v14  ;;  %v3882_v50 = vadd.f32 %v3753_v63, %v14140_v3 }
 0x38e   :  { %4164 = vmatpush1.bf16.msra.mxu1 %v14131_v41  ;;  %4124 = vmatprep.subr.bf16.mxu0 %v14132_v47  ;;  %v3883_v41 = vadd.f32 %v3755_v2, %v14141_v15  ;;  %v3898_v25 = vmul.f32 0.5, %v3884_v0  ;;  %v14142_v2 = vld [vmem:[#allocation368_spill] sm:$0xff] }
 0x38f   :  { %4165 = vmatprep.subr.bf16.mxu1 %v14133_v22  ;;  %v3899_v47 = vmul.f32 0.5, %v3885_v12  ;;  %v3890_v61 = vmul.f32 0.5, %v3882_v50 }
 0x390   :  { %v3891_v22 = vmul.f32 0.5, %v3883_v41  ;;  %7308 = vtanh.f32 %v3898_v25  ;;  %v14143_v41 = vld [vmem:[#allocation396_spill] sm:$0xff] }
 0x391   :  { %4125 = vmatpush1.bf16.msra.mxu0 %v14134_v60  ;;  %7310 = vtanh.f32 %v3899_v47  ;;  %v14144_v47 = vld [vmem:[#allocation369_spill] sm:$0xff] }
 0x392   :  { %4166 = vmatpush1.bf16.msra.mxu1 %v14135_v46  ;;  %4176 = vmatprep.subr.bf16.mxu0 %v14136_v62  ;;  %7312 = vtanh.f32 %v3890_v61 }
 0x393   :  { %4217 = vmatprep.subr.bf16.mxu1 %v14137_v57  ;;  %7314 = vtanh.f32 %v3891_v22 }
 0x3a7   :  { %v3834_v46 = vpop.f32.mrb[40].mxu0 }
 0x3a8   :  { %v3835_v62 = vadd.f32 %v3834_v46, %v10767_v49  ;;  %v3875_v57 = vpop.f32.mrb[48].mxu1  ;;  %v3836_v60 = vpop.f32.mrb[41].mxu0  ;;  %v14145_v46 = vld [vmem:[#allocation397_spill] sm:$0xff] }
 0x3a9   :  { %v3876_v8 = vadd.f32 %v3875_v57, %v10770_v54  ;;  %v3837_v1 = vadd.f32 %v3836_v60, %v10772_v19  ;;  %v3877_v63 = vpop.f32.mrb[49].mxu1  ;;  %v3838_v3 = vpop.f32.mrb[42].mxu0 }
 0x3aa   :  { %v3886_v0 = vadd.f32 %v3835_v62, %v14142_v2  ;;  %v3878_v12 = vadd.f32 %v3877_v63, %v10774_v18  ;;  %v3839_v50 = vpop.f32.mrb[43].mxu0  ;;  %v3879_v25 = vpop.f32.mrb[50].mxu1 }
 0x3ab   :  { %v3888_v61 = vadd.f32 %v3876_v8, %v14143_v41  ;;  %v3887_v22 = vadd.f32 %v3837_v1, %v14144_v47  ;;  %v3880_v15 = vpop.f32.mrb[51].mxu1  ;;  %v7309_v49 = vpop.eup %7308  ;;  %v14146_v47 = vld [vmem:[#allocation394_spill] sm:$0xff] }
 0x3ac   :  { %7316 = vtanh.f32 %v3886_v0  ;;  %v3889_v14 = vadd.f32 %v3878_v12, %v14145_v46  ;;  %v7311_v54 = vpop.eup %7310  ;;  %v3902_v3 = vmul.f32 0.5, %v7309_v49 }
 0x3ad   :  { %7318 = vtanh.f32 %v3887_v22  ;;  %v7313_v19 = vpop.eup %7312  ;;  %v3908_v57 = vmul.f32 0.5, %v3888_v61  ;;  %v3903_v62 = vmul.f32 0.5, %v7311_v54  ;;  %v14147_v22 = vld [vmem:[#allocation395_spill] sm:$0xff] }
 0x3ae   :  { %v7315_v60 = vpop.eup %7314  ;;  %v3909_v2 = vmul.f32 0.5, %v3889_v14  ;;  %v3894_v18 = vmul.f32 0.5, %v7313_v19  ;;  %v3904_v50 = vadd.f32 0.5, %v3902_v3 }
 0x3af   :  { %v3895_v63 = vmul.f32 0.5, %v7315_v60  ;;  %7320 = vtanh.f32 %v3908_v57  ;;  %v3905_v8 = vadd.f32 0.5, %v3903_v62 }
 0x3b0   :  { %7322 = vtanh.f32 %v3909_v2  ;;  %v3896_v1 = vadd.f32 0.5, %v3894_v18  ;;  %v3916_v12 = vmul.f32 %v3904_v50, %v14146_v47  ;;  %v14150_v50 = vld [vmem:[#allocation399_spill] sm:$0xff] }
 0x3b1   :  { %v3897_v25 = vadd.f32 0.5, %v3895_v63  ;;  %v3917_v41 = vmul.f32 %v3905_v8, %v14147_v22  ;;  %v14151_v8 = vld [vmem:[#allocation400_spill] sm:$0xff]  ;;  %v14157_v22 = vld [vmem:[#allocation406_spill] sm:$0xff] }
 0x3b6   :  { %v7317_v15 = vpop.eup %7316 }
 0x3b7   :  { %v7319_v0 = vpop.eup %7318  ;;  %v3918_v46 = vmul.f32 %v7317_v15, %v3896_v1  ;;  %v14152_v1 = vld [vmem:[#allocation401_spill] sm:$0xff]  ;;  %v14153_v15 = vld [vmem:[#allocation402_spill] sm:$0xff] }
 0x3b8   :  { %v3919_v52 = vmul.f32 %v7319_v0, %v3897_v25  ;;  %v14154_v25 = vld [vmem:[#allocation403_spill] sm:$0xff]  ;;  %v14155_v0 = vld [vmem:[#allocation404_spill] sm:$0xff] }
 0x3b9   :  { %v10838_v49 = vadd.f32 %v3918_v46, %v3916_v12  ;;  %v7321_v14 = vpop.eup %7320  ;;  %v14156_v12 = vld [vmem:[#allocation405_spill] sm:$0xff] }
 0x3ba   :  { %v10840_v61 = vadd.f32 %v3919_v52, %v3917_v41  ;;  %v7323_v2 = vpop.eup %7322  ;;  %v3912_v54 = vmul.f32 0.5, %v7321_v14  ;;  %v14148_v52 = vld [vmem:[#allocation333_spill] sm:$0xff]  ;;  %v14149_v41 = vld [vmem:[#allocation398_spill] sm:$0xff]  ;;  %v14158_v14 = vld [vmem:[#allocation407_spill] sm:$0xff] }
 0x3bb   :  { %7324 = vtanh.f32 %v10838_v49  ;;  %v3913_v19 = vmul.f32 0.5, %v7323_v2  ;;  %v14159_v2 = vld [vmem:[#allocation408_spill] sm:$0xff] }
 0x3bc   :  { %7326 = vtanh.f32 %v10840_v61  ;;  %v3914_v60 = vadd.f32 0.5, %v3912_v54  ;;  %v14160_v54 = vld [vmem:[#allocation409_spill] sm:$0xff] }
 0x3bd   :  { %v3915_v57 = vadd.f32 0.5, %v3913_v19  ;;  %v14161_v19 = vld [vmem:[#allocation410_spill] sm:$0xff] }
 0x3c5   :  { %v7325_v3 = vpop.eup %7324 }
 0x3c6   :  { %v7327_v47 = vpop.eup %7326  ;;  %v3924_v62 = vmul.f32 %v7325_v3, %v3914_v60  ;;  %v14162_v60 = vld [vmem:[#allocation411_spill] sm:$0xff]  ;;  %v14163_v3 = vld [vmem:[#allocation412_spill] sm:$0xff] }
 0x3c7   :  { %v3925_v18 = vmul.f32 %v7327_v47, %v3915_v57  ;;  %v14164_v57 = vld [vmem:[#allocation413_spill] sm:$0xff]  ;;  %v14165_v47 = vld [vmem:[#allocation414_spill] sm:$0xff] }
 0x3c8   :  { %v10846_v46 = vpack.c.bf16 %v3924_v62, %v3924_v62  ;;  %v14166_v62 = vld [vmem:[#allocation415_spill] sm:$0xff] }
 0x3c9   :  { %v10844_v63 = vpack.c.bf16 %v3925_v18, %v3925_v18  ;;  %v14167_v18 = vld [vmem:[#allocation416_spill] sm:$0xff] }
 0x3cb   :  { %4126 = vmatprep.mubr.bf16.mxu0 %v10844_v63  ;;  %4167 = vmatprep.mubr.bf16.mxu1 %v10844_v63 }
 0x3cc   :  { %4127 = vmatmul.mubr.bf16.vlgmr.msra.gmra.mrb[52].mxu0 %v10846_v46  ;;  %4168 = vmatmul.mubr.bf16.vlgmr.msra.gmra.mrb[60].mxu1 %v10846_v46 }
 0x3cd   :  { %4177 = vmatpush1.bf16.msra.mxu0 %v14148_v52  ;;  %4218 = vmatpush1.bf16.msra.mxu1 %v14149_v41 }
 0x3ce   :  { %4208 = vmatprep.mubr.bf16.mxu0 %v10844_v63  ;;  %4249 = vmatprep.mubr.bf16.mxu1 %v10844_v63 }
 0x3cf   :  { %4178 = vmatprep.subr.bf16.mxu0 %v14150_v50  ;;  %4219 = vmatprep.subr.bf16.mxu1 %v14151_v8  ;;  %v14184_v8 = vld [vmem:[#allocation433_spill] sm:$0xff] }
 0x3d1   :  { %4179 = vmatpush1.bf16.msra.mxu0 %v14152_v1  ;;  %4220 = vmatpush1.bf16.msra.mxu1 %v14153_v15  ;;  %v14182_v15 = vld [vmem:[#allocation431_spill] sm:$0xff]  ;;  %v14183_v1 = vld [vmem:[#allocation432_spill] sm:$0xff] }
 0x3d2   :  { %4180 = vmatprep.subr.bf16.mxu0 %v14154_v25  ;;  %4221 = vmatprep.subr.bf16.mxu1 %v14155_v0  ;;  %v14180_v0 = vld [vmem:[#allocation429_spill] sm:$0xff]  ;;  %v14181_v25 = vld [vmem:[#allocation430_spill] sm:$0xff] }
 0x3d5   :  { %4181 = vmatpush1.bf16.msra.mxu0 %v14156_v12  ;;  %4222 = vmatpush1.bf16.msra.mxu1 %v14157_v22  ;;  %v14168_v22 = vld [vmem:[#allocation417_spill] sm:$0xff] }
 0x3d6   :  { %4182 = vmatprep.subr.bf16.mxu0 %v14158_v14  ;;  %4223 = vmatprep.subr.bf16.mxu1 %v14159_v2  ;;  %v14169_v14 = vld [vmem:[#allocation418_spill] sm:$0xff]  ;;  %v14170_v2 = vld [vmem:[#allocation419_spill] sm:$0xff] }
 0x3d9   :  { %4183 = vmatpush1.bf16.msra.mxu0 %v14160_v54  ;;  %4224 = vmatpush1.bf16.msra.mxu1 %v14161_v19  ;;  %v14171_v54 = vld [vmem:[#allocation420_spill] sm:$0xff]  ;;  %v14172_v19 = vld [vmem:[#allocation421_spill] sm:$0xff] }
 0x3da   :  { %4184 = vmatprep.subr.bf16.mxu0 %v14162_v60  ;;  %4225 = vmatprep.subr.bf16.mxu1 %v14163_v3  ;;  %v14173_v60 = vld [vmem:[#allocation422_spill] sm:$0xff]  ;;  %v14174_v3 = vld [vmem:[#allocation423_spill] sm:$0xff] }
 0x3dd   :  { %4185 = vmatpush1.bf16.msra.mxu0 %v14164_v57  ;;  %4226 = vmatpush1.bf16.msra.mxu1 %v14165_v47  ;;  %v14175_v57 = vld [vmem:[#allocation424_spill] sm:$0xff] }
 0x3de   :  { %4186 = vmatprep.subr.bf16.mxu0 %v14166_v62  ;;  %4227 = vmatprep.subr.bf16.mxu1 %v14167_v18 }
 0x3e1   :  { %4187 = vmatpush1.bf16.msra.mxu0 %v14168_v22  ;;  %4228 = vmatpush1.bf16.msra.mxu1 %v14169_v14  ;;  %v14176_v14 = vld [vmem:[#allocation425_spill] sm:$0xff] }
 0x3e2   :  { %4188 = vmatprep.subr.bf16.mxu0 %v14170_v2  ;;  %4229 = vmatprep.subr.bf16.mxu1 %v14171_v54  ;;  %v14177_v2 = vld [vmem:[#allocation426_spill] sm:$0xff] }
 0x3e5   :  { %4189 = vmatpush1.bf16.msra.mxu0 %v14172_v19  ;;  %4230 = vmatpush1.bf16.msra.mxu1 %v14173_v60  ;;  %v14178_v60 = vld [vmem:[#allocation427_spill] sm:$0xff] }
 0x3e6   :  { %4190 = vmatprep.subr.bf16.mxu0 %v14174_v3  ;;  %4231 = vmatprep.subr.bf16.mxu1 %v14175_v57  ;;  %v14179_v3 = vld [vmem:[#allocation428_spill] sm:$0xff] }
 0x3e7   :  { %v10882_v47 = vpop.f32.mrb[44].mxu0 }
 0x3e8   :  { %v10884_v62 = vpop.f32.mrb[52].mxu1  ;;  %v10886_v18 = vpop.f32.mrb[45].mxu0 }
 0x3e9   :  { %v10888_v22 = vpop.f32.mrb[53].mxu1  ;;  %4191 = vmatpush1.bf16.msra.mxu0 %v14176_v14  ;;  %4232 = vmatpush1.bf16.msra.mxu1 %v14177_v2  ;;  %v3968_v54 = vpop.f32.mrb[46].mxu0  ;;  %v14185_v14 = vld [vmem:[#allocation434_spill] sm:$0xff] }
 0x3ea   :  { %v4009_v19 = vpop.f32.mrb[54].mxu1  ;;  %v3969_v12 = vpop.f32.mrb[47].mxu0  ;;  %4192 = vmatprep.subr.bf16.mxu0 %v14178_v60  ;;  %4233 = vmatprep.subr.bf16.mxu1 %v14179_v3  ;;  %v14186_v54 = vld [vmem:[#allocation435_spill] sm:$0xff] }
 0x3eb   :  { %v4010_v57 = vpop.f32.mrb[55].mxu1  ;;  %v14187_v12 = vld [vmem:[#allocation436_spill] sm:$0xff]  ;;  %v14188_v19 = vld [vmem:[#allocation439_spill] sm:$0xff] }
 0x3ec   :  { %v14189_v57 = vld [vmem:[#allocation440_spill] sm:$0xff] }
 0x3ed   :  { %4193 = vmatpush1.bf16.msra.mxu0 %v14180_v0  ;;  %4234 = vmatpush1.bf16.msra.mxu1 %v14181_v25  ;;  %v14190_v25 = vld [vmem:[#allocation441_spill] sm:$0xff] }
 0x3ee   :  { %4194 = vmatprep.subr.bf16.mxu0 %v14182_v15  ;;  %4235 = vmatprep.subr.bf16.mxu1 %v14183_v1  ;;  %v14191_v15 = vld [vmem:[#allocation442_spill] sm:$0xff]  ;;  %v14192_v1 = vld [vmem:[#allocation443_spill] sm:$0xff] }
 0x3f1   :  { %4195 = vmatpush1.bf16.msra.mxu0 %v14184_v8  ;;  %4236 = vmatpush1.bf16.msra.mxu1 %v14185_v14  ;;  %v14193_v8 = vld [vmem:[#allocation444_spill] sm:$0xff]  ;;  %v14194_v14 = vld [vmem:[#allocation445_spill] sm:$0xff] }
 0x3f2   :  { %4196 = vmatprep.subr.bf16.mxu0 %v14186_v54  ;;  %4237 = vmatprep.subr.bf16.mxu1 %v14187_v12  ;;  %v14195_v54 = vld [vmem:[#allocation446_spill] sm:$0xff]  ;;  %v14196_v12 = vld [vmem:[#allocation447_spill] sm:$0xff] }
 0x3f5   :  { %4197 = vmatpush1.bf16.msra.mxu0 %v10196_v23  ;;  %4238 = vmatpush1.bf16.msra.mxu1 %v10198_v42  ;;  %v14197_v23 = vld [vmem:[#allocation448_spill] sm:$0xff]  ;;  %v14198_v42 = vld [vmem:[#allocation449_spill] sm:$0xff] }
 0x3f6   :  { %4198 = vmatprep.subr.bf16.mxu0 %v14188_v19  ;;  %4239 = vmatprep.subr.bf16.mxu1 %v14189_v57 }
 0x3f9   :  { %4199 = vmatpush1.bf16.msra.mxu0 %v14190_v25  ;;  %4240 = vmatpush1.bf16.msra.mxu1 %v14191_v15 }
 0x3fa   :  { %4200 = vmatprep.subr.bf16.mxu0 %v14192_v1  ;;  %4241 = vmatprep.subr.bf16.mxu1 %v14193_v8 }
 0x3fd   :  { %4201 = vmatpush1.bf16.msra.mxu0 %v14194_v14  ;;  %4242 = vmatpush1.bf16.msra.mxu1 %v14195_v54 }
 0x3fe   :  { %4202 = vmatprep.subr.bf16.mxu0 %v14196_v12  ;;  %4243 = vmatprep.subr.bf16.mxu1 %v14197_v23 }
 0x401   :  { %4203 = vmatpush1.bf16.msra.mxu0 %v14198_v42  ;;  %4244 = vmatpush1.bf16.msra.mxu1 %v10276_v33 }
 0x402   :  { %4204 = vmatprep.subr.bf16.mxu0 %v10280_v26  ;;  %4245 = vmatprep.subr.bf16.mxu1 %v10282_v38 }
 0x405   :  { %4205 = vmatpush1.bf16.msra.mxu0 %v10298_v34  ;;  %4246 = vmatpush1.bf16.msra.mxu1 %v10300_v39 }
 0x406   :  { %4206 = vmatprep.subr.bf16.mxu0 %v10304_v58  ;;  %4247 = vmatprep.subr.bf16.mxu1 %v10306_v13 }
 0x409   :  { %4207 = vmatpush1.bf16.msra.mxu0 %v10310_v31  ;;  %4248 = vmatpush1.bf16.msra.mxu1 %v10312_v30 }
 0x40a   :  { %4304 = vmatprep.subr.bf16.mxu0 %v7506_v10  ;;  %4345 = vmatprep.subr.bf16.mxu1 %v7491_v4 }
 0x40c   :  { %4209 = vmatmul.mubr.bf16.vlgmr.msra.gmra.mrb[56].mxu0 %v10846_v46  ;;  %4250 = vmatmul.mubr.bf16.vlgmr.msra.gmra.mrb[64].mxu1 %v10846_v46 }
 0x40d   :  { %4305 = vmatpush1.bf16.msra.mxu0 %v7508_v11  ;;  %4336 = vmatprep.mubr.bf16.mxu0 %v10844_v63 }
 0x40e   :  { %4346 = vmatpush1.bf16.msra.mxu1 %v7493_v5  ;;  %4377 = vmatprep.mubr.bf16.mxu1 %v10844_v63 }
 0x40f   :  { %4306 = vmatprep.subr.bf16.mxu0 %v7527_v17  ;;  %4347 = vmatprep.subr.bf16.mxu1 %v7504_v9 }
 0x411   :  { %4307 = vmatpush1.bf16.msra.mxu0 %v7539_v21 }
 0x412   :  { %4348 = vmatpush1.bf16.msra.mxu1 %v7524_v16  ;;  %4308 = vmatprep.subr.bf16.mxu0 %v7548_v24  ;;  %v14212_v24 = vld [vmem:[#allocation34_spill] sm:$0xff] }
 0x413   :  { %4349 = vmatprep.subr.bf16.mxu1 %v7537_v20  ;;  %v14211_v20 = vld [vmem:[#allocation29_spill] sm:$0xff] }
 0x415   :  { %4309 = vmatpush1.bf16.msra.mxu0 %v7563_v29  ;;  %v14210_v29 = vld [vmem:[#allocation31_spill] sm:$0xff] }
 0x416   :  { %4350 = vmatpush1.bf16.msra.mxu1 %v7557_v27  ;;  %4310 = vmatprep.subr.bf16.mxu0 %v7572_v32  ;;  %v14207_v32 = vld [vmem:[#allocation25_spill] sm:$0xff]  ;;  %v14208_v27 = vld [vmem:[#allocation30_spill] sm:$0xff] }
 0x417   :  { %4351 = vmatprep.subr.bf16.mxu1 %v7561_v28 }
 0x419   :  { %4311 = vmatpush1.bf16.msra.mxu0 %v7587_v37  ;;  %v14199_v37 = vld [vmem:[#allocation17_spill] sm:$0xff] }
 0x41a   :  { %4352 = vmatpush1.bf16.msra.mxu1 %v7581_v35  ;;  %4312 = vmatprep.subr.bf16.mxu0 %v7596_v40  ;;  %v14200_v35 = vld [vmem:[#allocation22_spill] sm:$0xff]  ;;  %v14201_v40 = vld [vmem:[#allocation20_spill] sm:$0xff] }
 0x41b   :  { %4353 = vmatprep.subr.bf16.mxu1 %v7585_v36  ;;  %v14202_v36 = vld [vmem:[#allocation23_spill] sm:$0xff] }
 0x41d   :  { %4313 = vmatpush1.bf16.msra.mxu0 %v7611_v45 }
 0x41e   :  { %4354 = vmatpush1.bf16.msra.mxu1 %v7605_v43  ;;  %4314 = vmatprep.subr.bf16.mxu0 %v7620_v48  ;;  %v14203_v43 = vld [vmem:[#allocation21_spill] sm:$0xff] }
 0x41f   :  { %4355 = vmatprep.subr.bf16.mxu1 %v7609_v44 }
 0x421   :  { %4315 = vmatpush1.bf16.msra.mxu0 %v7635_v53 }
 0x422   :  { %4356 = vmatpush1.bf16.msra.mxu1 %v7629_v51  ;;  %4316 = vmatprep.subr.bf16.mxu0 %v7644_v56  ;;  %v14204_v51 = vld [vmem:[#allocation26_spill] sm:$0xff] }
 0x423   :  { %4357 = vmatprep.subr.bf16.mxu1 %v14199_v37  ;;  %v14205_v37 = vld [vmem:[#allocation24_spill] sm:$0xff] }
 0x425   :  { %4317 = vmatpush1.bf16.msra.mxu0 %v14200_v35 }
 0x426   :  { %4358 = vmatpush1.bf16.msra.mxu1 %v14201_v40  ;;  %4318 = vmatprep.subr.bf16.mxu0 %v14202_v36  ;;  %v14206_v40 = vld [vmem:[#allocation27_spill] sm:$0xff] }
 0x427   :  { %v10957_v45 = vpop.f32.mrb[48].mxu0  ;;  %4359 = vmatprep.subr.bf16.mxu1 %v14203_v43  ;;  %v14209_v43 = vld [vmem:[#allocation28_spill] sm:$0xff] }
 0x428   :  { %v10960_v48 = vpop.f32.mrb[56].mxu1  ;;  %v10962_v44 = vpop.f32.mrb[49].mxu0 }
 0x429   :  { %v10964_v53 = vpop.f32.mrb[57].mxu1  ;;  %4319 = vmatpush1.bf16.msra.mxu0 %v14204_v51  ;;  %v4050_v56 = vpop.f32.mrb[50].mxu0 }
 0x42a   :  { %4360 = vmatpush1.bf16.msra.mxu1 %v14205_v37  ;;  %v4091_v35 = vpop.f32.mrb[58].mxu1  ;;  %v4051_v28 = vpop.f32.mrb[51].mxu0  ;;  %4320 = vmatprep.subr.bf16.mxu0 %v14206_v40  ;;  %v14213_v56 = vld [vmem:[#allocation32_spill] sm:$0xff]  ;;  %v14214_v37 = vld [vmem:[#allocation35_spill] sm:$0xff] }
 0x42b   :  { %v4092_v36 = vpop.f32.mrb[59].mxu1  ;;  %4361 = vmatprep.subr.bf16.mxu1 %v14207_v32  ;;  %v14215_v28 = vld [vmem:[#allocation33_spill] sm:$0xff]  ;;  %v14216_v35 = vld [vmem:[#allocation38_spill] sm:$0xff]  ;;  %v14218_v32 = vld [vmem:[#allocation39_spill] sm:$0xff] }
 0x42c   :  { %v14217_v36 = vld [vmem:[#allocation36_spill] sm:$0xff] }
 0x42d   :  { %4321 = vmatpush1.bf16.msra.mxu0 %v14208_v27  ;;  %v14219_v27 = vld [vmem:[#allocation37_spill] sm:$0xff] }
 0x42e   :  { %4362 = vmatpush1.bf16.msra.mxu1 %v14209_v43  ;;  %4322 = vmatprep.subr.bf16.mxu0 %v14210_v29  ;;  %v14220_v43 = vld [vmem:[#allocation42_spill] sm:$0xff]  ;;  %v14221_v29 = vld [vmem:[#allocation40_spill] sm:$0xff] }
 0x42f   :  { %4363 = vmatprep.subr.bf16.mxu1 %v14211_v20  ;;  %v14222_v20 = vld [vmem:[#allocation43_spill] sm:$0xff] }
 0x431   :  { %4323 = vmatpush1.bf16.msra.mxu0 %v14212_v24  ;;  %v14223_v24 = vld [vmem:[#allocation41_spill] sm:$0xff] }
 0x432   :  { %4364 = vmatpush1.bf16.msra.mxu1 %v14213_v56  ;;  %4324 = vmatprep.subr.bf16.mxu0 %v14214_v37  ;;  %v14224_v56 = vld [vmem:[#allocation46_spill] sm:$0xff]  ;;  %v14225_v37 = vld [vmem:[#allocation44_spill] sm:$0xff] }
 0x433   :  { %4365 = vmatprep.subr.bf16.mxu1 %v14215_v28  ;;  %v14226_v28 = vld [vmem:[#allocation47_spill] sm:$0xff] }
 0x435   :  { %4325 = vmatpush1.bf16.msra.mxu0 %v14216_v35  ;;  %v14227_v35 = vld [vmem:[#allocation45_spill] sm:$0xff] }
 0x436   :  { %4366 = vmatpush1.bf16.msra.mxu1 %v14217_v36  ;;  %4326 = vmatprep.subr.bf16.mxu0 %v14218_v32  ;;  %v14228_v36 = vld [vmem:[#allocation50_spill] sm:$0xff]  ;;  %v14229_v32 = vld [vmem:[#allocation48_spill] sm:$0xff] }
 0x437   :  { %4367 = vmatprep.subr.bf16.mxu1 %v14219_v27  ;;  %v14230_v27 = vld [vmem:[#allocation51_spill] sm:$0xff] }
 0x439   :  { %4327 = vmatpush1.bf16.msra.mxu0 %v14220_v43  ;;  %v14231_v43 = vld [vmem:[#allocation49_spill] sm:$0xff] }
 0x43a   :  { %4368 = vmatpush1.bf16.msra.mxu1 %v14221_v29  ;;  %4328 = vmatprep.subr.bf16.mxu0 %v14222_v20  ;;  %v14232_v29 = vld [vmem:[#allocation54_spill] sm:$0xff]  ;;  %v14233_v20 = vld [vmem:[#allocation52_spill] sm:$0xff] }
 0x43b   :  { %4369 = vmatprep.subr.bf16.mxu1 %v14223_v24  ;;  %v14234_v24 = vld [vmem:[#allocation55_spill] sm:$0xff] }
 0x43d   :  { %4329 = vmatpush1.bf16.msra.mxu0 %v14224_v56  ;;  %v14235_v56 = vld [vmem:[#allocation53_spill] sm:$0xff] }
 0x43e   :  { %4370 = vmatpush1.bf16.msra.mxu1 %v14225_v37  ;;  %4330 = vmatprep.subr.bf16.mxu0 %v14226_v28  ;;  %v14236_v37 = vld [vmem:[#allocation58_spill] sm:$0xff]  ;;  %v14237_v28 = vld [vmem:[#allocation56_spill] sm:$0xff] }
 0x43f   :  { %4371 = vmatprep.subr.bf16.mxu1 %v14227_v35  ;;  %v14238_v35 = vld [vmem:[#allocation59_spill] sm:$0xff] }
 0x441   :  { %4331 = vmatpush1.bf16.msra.mxu0 %v14228_v36  ;;  %v14239_v36 = vld [vmem:[#allocation57_spill] sm:$0xff] }
 0x442   :  { %4372 = vmatpush1.bf16.msra.mxu1 %v14229_v32  ;;  %4332 = vmatprep.subr.bf16.mxu0 %v14230_v27  ;;  %v14250_v27 = vld [vmem:[#allocation71_spill] sm:$0xff]  ;;  %v14328_v32 = vld [vmem:[#allocation180_spill] sm:$0xff] }
 0x443   :  { %4373 = vmatprep.subr.bf16.mxu1 %v14231_v43  ;;  %v14240_v43 = vld [vmem:[#allocation62_spill] sm:$0xff] }
 0x445   :  { %4333 = vmatpush1.bf16.msra.mxu0 %v14232_v29  ;;  %v14248_v29 = vld [vmem:[#allocation70_spill] sm:$0xff] }
 0x446   :  { %4374 = vmatpush1.bf16.msra.mxu1 %v14233_v20  ;;  %4334 = vmatprep.subr.bf16.mxu0 %v14234_v24  ;;  %v14241_v20 = vld [vmem:[#allocation60_spill] sm:$0xff]  ;;  %v14247_v24 = vld [vmem:[#allocation65_spill] sm:$0xff] }
 0x447   :  { %4375 = vmatprep.subr.bf16.mxu1 %v14235_v56  ;;  %v14242_v56 = vld [vmem:[#allocation63_spill] sm:$0xff] }
 0x449   :  { %4335 = vmatpush1.bf16.msra.mxu0 %v14236_v37  ;;  %v14243_v37 = vld [vmem:[#allocation61_spill] sm:$0xff] }
 0x44a   :  { %4376 = vmatpush1.bf16.msra.mxu1 %v14237_v28  ;;  %4386 = vmatprep.subr.bf16.mxu0 %v14238_v35  ;;  %v14244_v28 = vld [vmem:[#allocation66_spill] sm:$0xff]  ;;  %v14245_v35 = vld [vmem:[#allocation64_spill] sm:$0xff] }
 0x44b   :  { %4427 = vmatprep.subr.bf16.mxu1 %v14239_v36  ;;  %v14246_v36 = vld [vmem:[#allocation67_spill] sm:$0xff] }
 0x44c   :  { %4337 = vmatmul.mubr.bf16.vlgmr.msra.gmra.mrb[60].mxu0 %v10846_v46 }
 0x44d   :  { %4378 = vmatmul.mubr.bf16.vlgmr.msra.gmra.mrb[68].mxu1 %v10846_v46  ;;  %4387 = vmatpush1.bf16.msra.mxu0 %v14240_v43  ;;  %v14249_v43 = vld [vmem:[#allocation68_spill] sm:$0xff] }
 0x44e   :  { %4418 = vmatprep.mubr.bf16.mxu0 %v10844_v63  ;;  %4428 = vmatpush1.bf16.msra.mxu1 %v14241_v20  ;;  %v14251_v20 = vld [vmem:[#allocation69_spill] sm:$0xff] }
 0x44f   :  { %4459 = vmatprep.mubr.bf16.mxu1 %v10844_v63  ;;  %4388 = vmatprep.subr.bf16.mxu0 %v14242_v56  ;;  %v14252_v63 = vld [vmem:[#allocation74_spill] sm:$0xff]  ;;  %v14253_v56 = vld [vmem:[#allocation72_spill] sm:$0xff] }
 0x450   :  { %4429 = vmatprep.subr.bf16.mxu1 %v14243_v37  ;;  %v14254_v37 = vld [vmem:[#allocation75_spill] sm:$0xff] }
 0x451   :  { %4389 = vmatpush1.bf16.msra.mxu0 %v14244_v28  ;;  %v14255_v28 = vld [vmem:[#allocation73_spill] sm:$0xff] }
 0x452   :  { %4430 = vmatpush1.bf16.msra.mxu1 %v14245_v35  ;;  %4390 = vmatprep.subr.bf16.mxu0 %v14246_v36  ;;  %v14256_v35 = vld [vmem:[#allocation78_spill] sm:$0xff]  ;;  %v14257_v36 = vld [vmem:[#allocation76_spill] sm:$0xff] }
 0x453   :  { %4431 = vmatprep.subr.bf16.mxu1 %v14247_v24  ;;  %v14258_v24 = vld [vmem:[#allocation79_spill] sm:$0xff] }
 0x455   :  { %4391 = vmatpush1.bf16.msra.mxu0 %v14248_v29  ;;  %v14259_v29 = vld [vmem:[#allocation77_spill] sm:$0xff] }
 0x456   :  { %4432 = vmatpush1.bf16.msra.mxu1 %v14249_v43  ;;  %4392 = vmatprep.subr.bf16.mxu0 %v14250_v27  ;;  %v14260_v43 = vld [vmem:[#allocation82_spill] sm:$0xff]  ;;  %v14261_v27 = vld [vmem:[#allocation80_spill] sm:$0xff] }
 0x457   :  { %4433 = vmatprep.subr.bf16.mxu1 %v14251_v20  ;;  %v14262_v20 = vld [vmem:[#allocation83_spill] sm:$0xff] }
 0x459   :  { %4393 = vmatpush1.bf16.msra.mxu0 %v14252_v63  ;;  %v14263_v63 = vld [vmem:[#allocation81_spill] sm:$0xff] }
 0x45a   :  { %4434 = vmatpush1.bf16.msra.mxu1 %v14253_v56  ;;  %4394 = vmatprep.subr.bf16.mxu0 %v14254_v37  ;;  %v14264_v56 = vld [vmem:[#allocation86_spill] sm:$0xff]  ;;  %v14265_v37 = vld [vmem:[#allocation84_spill] sm:$0xff] }
 0x45b   :  { %4435 = vmatprep.subr.bf16.mxu1 %v14255_v28  ;;  %v14266_v28 = vld [vmem:[#allocation87_spill] sm:$0xff] }
 0x45d   :  { %4395 = vmatpush1.bf16.msra.mxu0 %v14256_v35  ;;  %v14267_v35 = vld [vmem:[#allocation85_spill] sm:$0xff] }
 0x45e   :  { %4436 = vmatpush1.bf16.msra.mxu1 %v14257_v36  ;;  %4396 = vmatprep.subr.bf16.mxu0 %v14258_v24  ;;  %v14268_v36 = vld [vmem:[#allocation90_spill] sm:$0xff]  ;;  %v14269_v24 = vld [vmem:[#allocation88_spill] sm:$0xff] }
 0x45f   :  { %4437 = vmatprep.subr.bf16.mxu1 %v14259_v29  ;;  %v14270_v29 = vld [vmem:[#allocation91_spill] sm:$0xff] }
 0x461   :  { %4397 = vmatpush1.bf16.msra.mxu0 %v14260_v43  ;;  %v14271_v43 = vld [vmem:[#allocation89_spill] sm:$0xff] }
 0x462   :  { %4438 = vmatpush1.bf16.msra.mxu1 %v14261_v27  ;;  %4398 = vmatprep.subr.bf16.mxu0 %v14262_v20  ;;  %v14272_v27 = vld [vmem:[#allocation94_spill] sm:$0xff]  ;;  %v14273_v20 = vld [vmem:[#allocation92_spill] sm:$0xff] }
 0x463   :  { %4439 = vmatprep.subr.bf16.mxu1 %v14263_v63  ;;  %v14274_v63 = vld [vmem:[#allocation95_spill] sm:$0xff] }
 0x465   :  { %4399 = vmatpush1.bf16.msra.mxu0 %v14264_v56  ;;  %v14275_v56 = vld [vmem:[#allocation93_spill] sm:$0xff] }
 0x466   :  { %4440 = vmatpush1.bf16.msra.mxu1 %v14265_v37  ;;  %4400 = vmatprep.subr.bf16.mxu0 %v14266_v28  ;;  %v14276_v37 = vld [vmem:[#allocation98_spill] sm:$0xff]  ;;  %v14277_v28 = vld [vmem:[#allocation96_spill] sm:$0xff] }
 0x467   :  { %4441 = vmatprep.subr.bf16.mxu1 %v14267_v35  ;;  %v14278_v35 = vld [vmem:[#allocation99_spill] sm:$0xff] }
 0x469   :  { %4401 = vmatpush1.bf16.msra.mxu0 %v14268_v36  ;;  %v14279_v36 = vld [vmem:[#allocation97_spill] sm:$0xff] }
 0x46a   :  { %4442 = vmatpush1.bf16.msra.mxu1 %v14269_v24  ;;  %4402 = vmatprep.subr.bf16.mxu0 %v14270_v29  ;;  %v14280_v24 = vld [vmem:[#allocation102_spill] sm:$0xff]  ;;  %v14281_v29 = vld [vmem:[#allocation100_spill] sm:$0xff] }
 0x46b   :  { %4443 = vmatprep.subr.bf16.mxu1 %v14271_v43  ;;  %v14282_v43 = vld [vmem:[#allocation103_spill] sm:$0xff] }
 0x46d   :  { %4403 = vmatpush1.bf16.msra.mxu0 %v14272_v27  ;;  %v14283_v27 = vld [vmem:[#allocation101_spill] sm:$0xff] }
 0x46e   :  { %4444 = vmatpush1.bf16.msra.mxu1 %v14273_v20  ;;  %4404 = vmatprep.subr.bf16.mxu0 %v14274_v63  ;;  %v14284_v20 = vld [vmem:[#allocation106_spill] sm:$0xff]  ;;  %v14285_v63 = vld [vmem:[#allocation104_spill] sm:$0xff] }
 0x46f   :  { %4445 = vmatprep.subr.bf16.mxu1 %v14275_v56  ;;  %v14286_v56 = vld [vmem:[#allocation107_spill] sm:$0xff] }
 0x471   :  { %4405 = vmatpush1.bf16.msra.mxu0 %v14276_v37  ;;  %v14287_v37 = vld [vmem:[#allocation105_spill] sm:$0xff] }
 0x472   :  { %4446 = vmatpush1.bf16.msra.mxu1 %v14277_v28  ;;  %4406 = vmatprep.subr.bf16.mxu0 %v14278_v35  ;;  %v14288_v28 = vld [vmem:[#allocation110_spill] sm:$0xff]  ;;  %v14289_v35 = vld [vmem:[#allocation108_spill] sm:$0xff] }
 0x473   :  { %4447 = vmatprep.subr.bf16.mxu1 %v14279_v36  ;;  %v14290_v36 = vld [vmem:[#allocation111_spill] sm:$0xff] }
 0x475   :  { %4407 = vmatpush1.bf16.msra.mxu0 %v14280_v24  ;;  %v14291_v24 = vld [vmem:[#allocation109_spill] sm:$0xff] }
 0x476   :  { %4448 = vmatpush1.bf16.msra.mxu1 %v14281_v29  ;;  %4408 = vmatprep.subr.bf16.mxu0 %v14282_v43  ;;  %v14292_v29 = vld [vmem:[#allocation114_spill] sm:$0xff]  ;;  %v14293_v43 = vld [vmem:[#allocation112_spill] sm:$0xff] }
 0x477   :  { %4449 = vmatprep.subr.bf16.mxu1 %v14283_v27  ;;  %v14294_v27 = vld [vmem:[#allocation115_spill] sm:$0xff] }
 0x479   :  { %4409 = vmatpush1.bf16.msra.mxu0 %v14284_v20  ;;  %v14295_v20 = vld [vmem:[#allocation113_spill] sm:$0xff] }
 0x47a   :  { %4450 = vmatpush1.bf16.msra.mxu1 %v14285_v63  ;;  %4410 = vmatprep.subr.bf16.mxu0 %v14286_v56  ;;  %v14296_v63 = vld [vmem:[#allocation118_spill] sm:$0xff]  ;;  %v14297_v56 = vld [vmem:[#allocation116_spill] sm:$0xff] }
 0x47b   :  { %4451 = vmatprep.subr.bf16.mxu1 %v14287_v37  ;;  %v14298_v37 = vld [vmem:[#allocation119_spill] sm:$0xff] }
 0x47d   :  { %4411 = vmatpush1.bf16.msra.mxu0 %v14288_v28  ;;  %v14299_v28 = vld [vmem:[#allocation117_spill] sm:$0xff] }
 0x47e   :  { %4452 = vmatpush1.bf16.msra.mxu1 %v14289_v35  ;;  %4412 = vmatprep.subr.bf16.mxu0 %v14290_v36  ;;  %v14300_v35 = vld [vmem:[#allocation122_spill] sm:$0xff]  ;;  %v14301_v36 = vld [vmem:[#allocation120_spill] sm:$0xff] }
 0x47f   :  { %4453 = vmatprep.subr.bf16.mxu1 %v14291_v24  ;;  %v14302_v24 = vld [vmem:[#allocation121_spill] sm:$0xff] }
 0x481   :  { %4413 = vmatpush1.bf16.msra.mxu0 %v14292_v29  ;;  %v14303_v29 = vld [vmem:[#allocation153_spill] sm:$0xff] }
 0x482   :  { %4454 = vmatpush1.bf16.msra.mxu1 %v14293_v43  ;;  %4414 = vmatprep.subr.bf16.mxu0 %v14294_v27  ;;  %v14318_v27 = vld [vmem:[#allocation137_spill] sm:$0xff] }
 0x483   :  { %4455 = vmatprep.subr.bf16.mxu1 %v14295_v20  ;;  %v14304_v20 = vld [vmem:[#allocation124_spill] sm:$0xff]  ;;  %v14323_v43 = vld [vmem:[#allocation173_spill] sm:$0xff] }
 0x485   :  { %4415 = vmatpush1.bf16.msra.mxu0 %v14296_v63  ;;  %v14305_v63 = vld [vmem:[#allocation156_spill] sm:$0xff] }
 0x486   :  { %4456 = vmatpush1.bf16.msra.mxu1 %v14297_v56  ;;  %4416 = vmatprep.subr.bf16.mxu0 %v14298_v37  ;;  %v14306_v56 = vld [vmem:[#allocation125_spill] sm:$0xff] }
 0x487   :  { %4457 = vmatprep.subr.bf16.mxu1 %v14299_v28  ;;  %v14307_v37 = vld [vmem:[#allocation157_spill] sm:$0xff]  ;;  %v14317_v28 = vld [vmem:[#allocation168_spill] sm:$0xff] }
 0x489   :  { %4417 = vmatpush1.bf16.msra.mxu0 %v14300_v35  ;;  %v14311_v35 = vld [vmem:[#allocation161_spill] sm:$0xff] }
 0x48a   :  { %4458 = vmatpush1.bf16.msra.mxu1 %v14301_v36  ;;  %4468 = vmatprep.subr.bf16.mxu0 %v14302_v24  ;;  %v14308_v36 = vld [vmem:[#allocation128_spill] sm:$0xff] }
 0x48b   :  { %4509 = vmatprep.subr.bf16.mxu1 %v14303_v29  ;;  %v14309_v24 = vld [vmem:[#allocation160_spill] sm:$0xff]  ;;  %v14310_v29 = vld [vmem:[#allocation129_spill] sm:$0xff] }
 0x48c   :  { %4419 = vmatmul.mubr.bf16.vlgmr.msra.gmra.mrb[64].mxu0 %v10846_v46 }
 0x48d   :  { %4460 = vmatmul.mubr.bf16.vlgmr.msra.gmra.mrb[72].mxu1 %v10846_v46  ;;  %4469 = vmatpush1.bf16.msra.mxu0 %v14304_v20  ;;  %v14312_v46 = vld [vmem:[#allocation132_spill] sm:$0xff] }
 0x48e   :  { %4510 = vmatpush1.bf16.msra.mxu1 %v14305_v63  ;;  %4470 = vmatprep.subr.bf16.mxu0 %v14306_v56  ;;  %v14313_v20 = vld [vmem:[#allocation164_spill] sm:$0xff]  ;;  %v14314_v63 = vld [vmem:[#allocation133_spill] sm:$0xff] }
 0x48f   :  { %4511 = vmatprep.subr.bf16.mxu1 %v14307_v37  ;;  %4500 = vmatprep.mubr.bf16.mxu0 %v13871_v7  ;;  %v14315_v56 = vld [vmem:[#allocation165_spill] sm:$0xff]  ;;  %v14316_v37 = vld [vmem:[#allocation136_spill] sm:$0xff] }
 0x490   :  { %4541 = vmatprep.mubr.bf16.mxu1 %v13871_v7 }
 0x491   :  { %4471 = vmatpush1.bf16.msra.mxu0 %v14308_v36  ;;  %v14319_v36 = vld [vmem:[#allocation169_spill] sm:$0xff] }
 0x492   :  { %4512 = vmatpush1.bf16.msra.mxu1 %v14309_v24  ;;  %4472 = vmatprep.subr.bf16.mxu0 %v14310_v29  ;;  %v14320_v24 = vld [vmem:[#allocation140_spill] sm:$0xff] }
 0x493   :  { %4513 = vmatprep.subr.bf16.mxu1 %v14311_v35  ;;  %v14321_v29 = vld [vmem:[#allocation172_spill] sm:$0xff]  ;;  %v14322_v35 = vld [vmem:[#allocation141_spill] sm:$0xff] }
 0x495   :  { %4473 = vmatpush1.bf16.msra.mxu0 %v14312_v46 }
 0x496   :  { %4514 = vmatpush1.bf16.msra.mxu1 %v14313_v20  ;;  %4474 = vmatprep.subr.bf16.mxu0 %v14314_v63  ;;  %v14324_v63 = vld [vmem:[#allocation176_spill] sm:$0xff] }
 0x497   :  { %4515 = vmatprep.subr.bf16.mxu1 %v14315_v56 }
 0x499   :  { %4475 = vmatpush1.bf16.msra.mxu0 %v14316_v37 }
 0x49a   :  { %4516 = vmatpush1.bf16.msra.mxu1 %v14317_v28  ;;  %4476 = vmatprep.subr.bf16.mxu0 %v14318_v27 }
 0x49b   :  { %4517 = vmatprep.subr.bf16.mxu1 %v14319_v36 }
 0x49d   :  { %4477 = vmatpush1.bf16.msra.mxu0 %v14320_v24 }
 0x49e   :  { %4518 = vmatpush1.bf16.msra.mxu1 %v14321_v29  ;;  %4478 = vmatprep.subr.bf16.mxu0 %v14322_v35 }
 0x49f   :  { %v4128_v46 = vpop.f32.mrb[52].mxu0  ;;  %v4169_v20 = vpop.f32.mrb[60].mxu1  ;;  %4519 = vmatprep.subr.bf16.mxu1 %v14323_v43 }
 0x4a0   :  { %v11095_v56 = vadd.f32 %v4128_v46, %v10882_v47  ;;  %v11098_v37 = vadd.f32 %v4169_v20, %v10884_v62  ;;  %v4130_v28 = vpop.f32.mrb[53].mxu0  ;;  %v4171_v27 = vpop.f32.mrb[61].mxu1  ;;  %v14325_v46 = vld [vmem:[#allocation145_spill] sm:$0xff]  ;;  %v14327_v62 = vld [vmem:[#allocation148_spill] sm:$0xff] }
 0x4a1   :  { %v11101_v36 = vadd.f32 %v4130_v28, %v10886_v18  ;;  %v11104_v24 = vadd.f32 %v4171_v27, %v10888_v22  ;;  %4479 = vmatpush1.bf16.msra.mxu0 %v13888_v55  ;;  %v4132_v35 = vpop.f32.mrb[54].mxu0  ;;  %v4173_v29 = vpop.f32.mrb[62].mxu1  ;;  %v14326_v20 = vld [vmem:[#allocation177_spill] sm:$0xff]  ;;  %v14331_v22 = vld [vmem:[#allocation152_spill] sm:$0xff]  ;;  %v14333_v28 = vld [vmem:[#allocation123_spill] sm:$0xff] }
 0x4a2   :  { %4520 = vmatpush1.bf16.msra.mxu1 %v14324_v63  ;;  %v4133_v43 = vpop.f32.mrb[55].mxu0  ;;  %v4174_v47 = vpop.f32.mrb[63].mxu1  ;;  %4480 = vmatprep.subr.bf16.mxu0 %v14325_v46  ;;  %v14329_v18 = vld [vmem:[#allocation149_spill] sm:$0xff]  ;;  %v7023_v29 = vld [vmem:[%s12398_s0 + $0x2] sm:$0x1]  ;;  %v14349_v46 = vld [vmem:[#allocation139_spill] sm:$0xff] }
 0x4a3   :  { %4521 = vmatprep.subr.bf16.mxu1 %v14326_v20  ;;  %v14330_v27 = vld [vmem:[#allocation181_spill] sm:$0xff]  ;;  %v14332_v43 = vld [vmem:[#allocation184_spill] sm:$0xff]  ;;  %v14335_v47 = vld [vmem:[#allocation126_spill] sm:$0xff] }
 0x4a4   :  { %v14334_v35 = vld [vmem:[#allocation185_spill] sm:$0xff]  ;;  %v14348_v20 = vld [vmem:[#allocation200_spill] sm:$0xff] }
 0x4a5   :  { %4481 = vmatpush1.bf16.msra.mxu0 %v14327_v62  ;;  %v14343_v62 = vld [vmem:[#allocation134_spill] sm:$0xff]  ;;  %v14379_v63 = vld [vmem:[#allocation228_spill] sm:$0xff] }
 0x4a6   :  { %4522 = vmatpush1.bf16.msra.mxu1 %v14328_v32  ;;  %4482 = vmatprep.subr.bf16.mxu0 %v14329_v18  ;;  %v14336_v32 = vld [vmem:[#allocation188_spill] sm:$0xff]  ;;  %v14337_v18 = vld [vmem:[#allocation127_spill] sm:$0xff] }
 0x4a7   :  { %4523 = vmatprep.subr.bf16.mxu1 %v14330_v27  ;;  %v14338_v27 = vld [vmem:[#allocation189_spill] sm:$0xff] }
 0x4a9   :  { %4483 = vmatpush1.bf16.msra.mxu0 %v14331_v22  ;;  %v14339_v22 = vld [vmem:[#allocation130_spill] sm:$0xff] }
 0x4aa   :  { %4524 = vmatpush1.bf16.msra.mxu1 %v14332_v43  ;;  %4550 = vmatprep.subr.bf16.mxu0 %v14333_v28  ;;  %v14340_v43 = vld [vmem:[#allocation192_spill] sm:$0xff]  ;;  %v14341_v28 = vld [vmem:[#allocation131_spill] sm:$0xff] }
 0x4ab   :  { %4591 = vmatprep.subr.bf16.mxu1 %v14334_v35  ;;  %v14342_v35 = vld [vmem:[#allocation193_spill] sm:$0xff] }
 0x4ac   :  { %4501 = vmatmul.mubr.bf16.vlgmr.msra.gmra.mrb[68].mxu0 %v7023_v29 }
 0x4ad   :  { %4542 = vmatmul.mubr.bf16.vlgmr.msra.gmra.mrb[76].mxu1 %v7023_v29  ;;  %4551 = vmatpush1.bf16.msra.mxu0 %v14335_v47  ;;  %v14344_v47 = vld [vmem:[#allocation196_spill] sm:$0xff] }
 0x4ae   :  { %4592 = vmatpush1.bf16.msra.mxu1 %v14336_v32  ;;  %4552 = vmatprep.subr.bf16.mxu0 %v14337_v18  ;;  %v14345_v32 = vld [vmem:[#allocation135_spill] sm:$0xff]  ;;  %v14346_v18 = vld [vmem:[#allocation197_spill] sm:$0xff] }
 0x4af   :  { %4593 = vmatprep.subr.bf16.mxu1 %v14338_v27  ;;  %4582 = vmatprep.mubr.bf16.mxu0 %v13871_v7  ;;  %v14347_v27 = vld [vmem:[#allocation138_spill] sm:$0xff] }
 0x4b0   :  { %4623 = vmatprep.mubr.bf16.mxu1 %v13871_v7 }
 0x4b1   :  { %4553 = vmatpush1.bf16.msra.mxu0 %v14339_v22  ;;  %v14350_v22 = vld [vmem:[#allocation201_spill] sm:$0xff] }
 0x4b2   :  { %4594 = vmatpush1.bf16.msra.mxu1 %v14340_v43  ;;  %4554 = vmatprep.subr.bf16.mxu0 %v14341_v28  ;;  %v14351_v43 = vld [vmem:[#allocation142_spill] sm:$0xff]  ;;  %v14352_v28 = vld [vmem:[#allocation204_spill] sm:$0xff] }
 0x4b3   :  { %4595 = vmatprep.subr.bf16.mxu1 %v14342_v35  ;;  %v14353_v35 = vld [vmem:[#allocation143_spill] sm:$0xff] }
 0x4b5   :  { %4555 = vmatpush1.bf16.msra.mxu0 %v14343_v62  ;;  %v14354_v62 = vld [vmem:[#allocation205_spill] sm:$0xff] }
 0x4b6   :  { %4596 = vmatpush1.bf16.msra.mxu1 %v14344_v47  ;;  %4556 = vmatprep.subr.bf16.mxu0 %v14345_v32  ;;  %v14355_v47 = vld [vmem:[#allocation146_spill] sm:$0xff]  ;;  %v14356_v32 = vld [vmem:[#allocation208_spill] sm:$0xff] }
 0x4b7   :  { %4597 = vmatprep.subr.bf16.mxu1 %v14346_v18  ;;  %v14357_v18 = vld [vmem:[#allocation147_spill] sm:$0xff] }
 0x4b9   :  { %4557 = vmatpush1.bf16.msra.mxu0 %v14347_v27  ;;  %v14358_v27 = vld [vmem:[#allocation209_spill] sm:$0xff] }
 0x4ba   :  { %4598 = vmatpush1.bf16.msra.mxu1 %v14348_v20  ;;  %4558 = vmatprep.subr.bf16.mxu0 %v14349_v46  ;;  %v14359_v20 = vld [vmem:[#allocation150_spill] sm:$0xff]  ;;  %v14360_v46 = vld [vmem:[#allocation212_spill] sm:$0xff] }
 0x4bb   :  { %4599 = vmatprep.subr.bf16.mxu1 %v14350_v22  ;;  %v14361_v22 = vld [vmem:[#allocation151_spill] sm:$0xff] }
 0x4bd   :  { %4559 = vmatpush1.bf16.msra.mxu0 %v14351_v43  ;;  %v14362_v43 = vld [vmem:[#allocation213_spill] sm:$0xff] }
 0x4be   :  { %4600 = vmatpush1.bf16.msra.mxu1 %v14352_v28  ;;  %4560 = vmatprep.subr.bf16.mxu0 %v14353_v35  ;;  %v14363_v28 = vld [vmem:[#allocation154_spill] sm:$0xff]  ;;  %v14364_v35 = vld [vmem:[#allocation216_spill] sm:$0xff] }
 0x4bf   :  { %4601 = vmatprep.subr.bf16.mxu1 %v14354_v62  ;;  %v14365_v62 = vld [vmem:[#allocation155_spill] sm:$0xff] }
 0x4c1   :  { %4561 = vmatpush1.bf16.msra.mxu0 %v14355_v47  ;;  %v14366_v47 = vld [vmem:[#allocation217_spill] sm:$0xff] }
 0x4c2   :  { %4602 = vmatpush1.bf16.msra.mxu1 %v14356_v32  ;;  %4562 = vmatprep.subr.bf16.mxu0 %v14357_v18  ;;  %v14367_v18 = vld [vmem:[#allocation158_spill] sm:$0xff]  ;;  %v14376_v32 = vld [vmem:[#allocation225_spill] sm:$0xff] }
 0x4c3   :  { %4603 = vmatprep.subr.bf16.mxu1 %v14358_v27  ;;  %v14368_v27 = vld [vmem:[#allocation220_spill] sm:$0xff] }
 0x4c5   :  { %4563 = vmatpush1.bf16.msra.mxu0 %v14359_v20  ;;  %v14369_v20 = vld [vmem:[#allocation159_spill] sm:$0xff] }
 0x4c6   :  { %4604 = vmatpush1.bf16.msra.mxu1 %v14360_v46  ;;  %4564 = vmatprep.subr.bf16.mxu0 %v14361_v22  ;;  %v14370_v46 = vld [vmem:[#allocation221_spill] sm:$0xff]  ;;  %v14371_v22 = vld [vmem:[#allocation162_spill] sm:$0xff] }
 0x4c7   :  { %4605 = vmatprep.subr.bf16.mxu1 %v14362_v43  ;;  %v14372_v43 = vld [vmem:[#allocation456_spill] sm:$0xff] }
 0x4c9   :  { %4565 = vmatpush1.bf16.msra.mxu0 %v14363_v28  ;;  %v4260_v28 = vadd.f32 %v11098_v37, %v14372_v43  ;;  %v14380_v37 = vld [vmem:[#allocation167_spill] sm:$0xff] }
 0x4ca   :  { %4606 = vmatpush1.bf16.msra.mxu1 %v14364_v35  ;;  %4680 = vmatprep.subr.bf16.mxu0 %v14365_v62  ;;  %v14373_v35 = vld [vmem:[#allocation224_spill] sm:$0xff]  ;;  %v14374_v62 = vld [vmem:[#allocation163_spill] sm:$0xff] }
 0x4cb   :  { %4721 = vmatprep.subr.bf16.mxu1 %v14366_v47  ;;  %v14375_v47 = vld [vmem:[#allocation457_spill] sm:$0xff] }
 0x4cc   :  { %4583 = vmatmul.mubr.bf16.vlgmr.msra.gmra.mrb[72].mxu0 %v7023_v29 }
 0x4cd   :  { %4624 = vmatmul.mubr.bf16.vlgmr.msra.gmra.mrb[80].mxu1 %v7023_v29  ;;  %4681 = vmatpush1.bf16.msra.mxu0 %v14367_v18  ;;  %v4261_v29 = vadd.f32 %v11104_v24, %v14375_v47  ;;  %v14378_v18 = vld [vmem:[#allocation166_spill] sm:$0xff] }
 0x4ce   :  { %4722 = vmatpush1.bf16.msra.mxu1 %v14368_v27  ;;  %4682 = vmatprep.subr.bf16.mxu0 %v14369_v20  ;;  %v4258_v27 = vadd.f32 %v11095_v56, %v10564_v59  ;;  %v14377_v20 = vld [vmem:[#allocation459_spill] sm:$0xff]  ;;  %v14382_v47 = vld [vmem:[#allocation170_spill] sm:$0xff]  ;;  %v14559_v59 = vld [vmem:[#allocation340_spill] sm:$0xff] }
 0x4cf   :  { %4723 = vmatprep.subr.bf16.mxu1 %v14370_v46  ;;  %v4259_v46 = vadd.f32 %v11101_v36, %v14377_v20  ;;  %v14384_v56 = vld [vmem:[#allocation171_spill] sm:$0xff]  ;;  %v14385_v36 = vld [vmem:[#allocation233_spill] sm:$0xff] }
 0x4d0   :  { %v4266_v43 = vmul.f32 0.5, %v4258_v27  ;;  %v14409_v20 = vld [vmem:[#allocation253_spill] sm:$0xff] }
 0x4d1   :  { %4683 = vmatpush1.bf16.msra.mxu0 %v14371_v22  ;;  %v4274_v22 = vmul.f32 0.5, %v4260_v28  ;;  %v4267_v24 = vmul.f32 0.5, %v4259_v46  ;;  %v14386_v28 = vld [vmem:[#allocation174_spill] sm:$0xff] }
 0x4d2   :  { %4724 = vmatpush1.bf16.msra.mxu1 %v14373_v35  ;;  %4684 = vmatprep.subr.bf16.mxu0 %v14374_v62  ;;  %v4275_v35 = vmul.f32 0.5, %v4261_v29  ;;  %v14381_v62 = vld [vmem:[#allocation229_spill] sm:$0xff]  ;;  %v14388_v29 = vld [vmem:[#allocation175_spill] sm:$0xff] }
 0x4d3   :  { %4725 = vmatprep.subr.bf16.mxu1 %v14376_v32  ;;  %7328 = vtanh.f32 %v4274_v22  ;;  %v14383_v32 = vld [vmem:[#allocation232_spill] sm:$0xff] }
 0x4d4   :  { %7330 = vtanh.f32 %v4275_v35 }
 0x4d5   :  { %4685 = vmatpush1.bf16.msra.mxu0 %v14378_v18  ;;  %7332 = vtanh.f32 %v4266_v43  ;;  %v14392_v18 = vld [vmem:[#allocation179_spill] sm:$0xff] }
 0x4d6   :  { %4726 = vmatpush1.bf16.msra.mxu1 %v14379_v63  ;;  %4686 = vmatprep.subr.bf16.mxu0 %v14380_v37  ;;  %7334 = vtanh.f32 %v4267_v24  ;;  %v14387_v37 = vld [vmem:[#allocation236_spill] sm:$0xff] }
 0x4d7   :  { %4727 = vmatprep.subr.bf16.mxu1 %v14381_v62  ;;  %v14389_v62 = vld [vmem:[#allocation237_spill] sm:$0xff] }
 0x4d9   :  { %4687 = vmatpush1.bf16.msra.mxu0 %v14382_v47  ;;  %v14391_v47 = vld [vmem:[#allocation240_spill] sm:$0xff] }
 0x4da   :  { %4728 = vmatpush1.bf16.msra.mxu1 %v14383_v32  ;;  %4688 = vmatprep.subr.bf16.mxu0 %v14384_v56 }
 0x4db   :  { %4729 = vmatprep.subr.bf16.mxu1 %v14385_v36 }
 0x4dd   :  { %4689 = vmatpush1.bf16.msra.mxu0 %v14386_v28 }
 0x4de   :  { %4730 = vmatpush1.bf16.msra.mxu1 %v14387_v37  ;;  %4690 = vmatprep.subr.bf16.mxu0 %v14388_v29  ;;  %v14390_v37 = vld [vmem:[#allocation460_spill] sm:$0xff] }
 0x4df   :  { %v4210_v27 = vpop.f32.mrb[56].mxu0  ;;  %v4251_v46 = vpop.f32.mrb[64].mxu1  ;;  %4731 = vmatprep.subr.bf16.mxu1 %v14389_v62 }
 0x4e0   :  { %v4211_v22 = vadd.f32 %v4210_v27, %v10957_v45  ;;  %v4252_v32 = vadd.f32 %v4251_v46, %v10960_v48  ;;  %v4212_v56 = vpop.f32.mrb[57].mxu0  ;;  %v4253_v35 = vpop.f32.mrb[65].mxu1  ;;  %v14393_v45 = vld [vmem:[#allocation461_spill] sm:$0xff] }
 0x4e1   :  { %v4213_v36 = vadd.f32 %v4212_v56, %v10962_v44  ;;  %v4254_v43 = vadd.f32 %v4253_v35, %v10964_v53  ;;  %v4214_v24 = vpop.f32.mrb[58].mxu0  ;;  %v4255_v28 = vpop.f32.mrb[66].mxu1  ;;  %4691 = vmatpush1.bf16.msra.mxu0 %v13963_v6  ;;  %v14394_v27 = vld [vmem:[#allocation241_spill] sm:$0xff]  ;;  %v14395_v44 = vld [vmem:[#allocation462_spill] sm:$0xff] }
 0x4e2   :  { %v4262_v29 = vadd.f32 %v4211_v22, %v14390_v37  ;;  %4732 = vmatpush1.bf16.msra.mxu1 %v14391_v47  ;;  %v4215_v63 = vpop.f32.mrb[59].mxu0  ;;  %v4256_v62 = vpop.f32.mrb[67].mxu1  ;;  %4692 = vmatprep.subr.bf16.mxu0 %v14392_v18  ;;  %v14396_v28 = vld [vmem:[#allocation182_spill] sm:$0xff]  ;;  %v14397_v22 = vld [vmem:[#allocation244_spill] sm:$0xff]  ;;  %v14398_v24 = vld [vmem:[#allocation183_spill] sm:$0xff] }
 0x4e3   :  { %v4263_v48 = vadd.f32 %v4213_v36, %v14393_v45  ;;  %4733 = vmatprep.subr.bf16.mxu1 %v14394_v27  ;;  %v7329_v46 = vpop.eup %7328  ;;  %v4265_v53 = vadd.f32 %v4254_v43, %v14395_v44  ;;  %v14399_v18 = vld [vmem:[#allocation245_spill] sm:$0xff]  ;;  %v14400_v47 = vld [vmem:[#allocation186_spill] sm:$0xff]  ;;  %v14401_v43 = vld [vmem:[#allocation248_spill] sm:$0xff] }
 0x4e4   :  { %7336 = vtanh.f32 %v4262_v29  ;;  %v7331_v56 = vpop.eup %7330  ;;  %v4278_v62 = vmul.f32 0.5, %v7329_v46  ;;  %v14403_v44 = vld [vmem:[#allocation463_spill] sm:$0xff]  ;;  %v14405_v6 = vld [vmem:[#allocation190_spill] sm:$0xff] }
 0x4e5   :  { %7338 = vtanh.f32 %v4263_v48  ;;  %4693 = vmatpush1.bf16.msra.mxu0 %v14396_v28  ;;  %v7333_v35 = vpop.eup %7332  ;;  %v4279_v36 = vmul.f32 0.5, %v7331_v56  ;;  %v4285_v45 = vmul.f32 0.5, %v4265_v53  ;;  %v14402_v48 = vld [vmem:[#allocation187_spill] sm:$0xff]  ;;  %v4264_v37 = vadd.f32 %v4252_v32, %v14403_v44  ;;  %v14410_v32 = vld [vmem:[#allocation465_spill] sm:$0xff] }
 0x4e6   :  { %4734 = vmatpush1.bf16.msra.mxu1 %v14397_v22  ;;  %4694 = vmatprep.subr.bf16.mxu0 %v14398_v24  ;;  %v7335_v63 = vpop.eup %7334  ;;  %v4270_v27 = vmul.f32 0.5, %v7333_v35  ;;  %v4280_v28 = vadd.f32 0.5, %v4278_v62  ;;  %v14404_v22 = vld [vmem:[#allocation249_spill] sm:$0xff]  ;;  %v14406_v35 = vld [vmem:[#allocation252_spill] sm:$0xff] }
 0x4e7   :  { %4735 = vmatprep.subr.bf16.mxu1 %v14399_v18  ;;  %v4271_v29 = vmul.f32 0.5, %v7335_v63  ;;  %v4281_v24 = vadd.f32 0.5, %v4279_v36  ;;  %7340 = vtanh.f32 %v4285_v45  ;;  %v4284_v62 = vmul.f32 0.5, %v4264_v37  ;;  %v14417_v37 = vld [vmem:[#allocation198_spill] sm:$0xff] }
 0x4e8   :  { %v4272_v46 = vadd.f32 0.5, %v4270_v27  ;;  %v14412_v27 = vld [vmem:[#allocation194_spill] sm:$0xff] }
 0x4e9   :  { %4695 = vmatpush1.bf16.msra.mxu0 %v14400_v47  ;;  %v4273_v53 = vadd.f32 0.5, %v4271_v29  ;;  %v14407_v47 = vld [vmem:[#allocation191_spill] sm:$0xff]  ;;  %v14414_v29 = vld [vmem:[#allocation256_spill] sm:$0xff]  ;;  %7342 = vtanh.f32 %v4284_v62 }
 0x4ea   :  { %4736 = vmatpush1.bf16.msra.mxu1 %v14401_v43  ;;  %4696 = vmatprep.subr.bf16.mxu0 %v14402_v48  ;;  %v14408_v43 = vld [vmem:[#allocation464_spill] sm:$0xff] }
 0x4eb   :  { %4737 = vmatprep.subr.bf16.mxu1 %v14404_v22  ;;  %v4292_v18 = vmul.f32 %v4280_v28, %v14408_v43  ;;  %v4293_v22 = vmul.f32 %v4281_v24, %v14410_v32  ;;  %v14418_v24 = vld [vmem:[#allocation260_spill] sm:$0xff]  ;;  %v14420_v43 = vld [vmem:[#allocation261_spill] sm:$0xff]  ;;  %v14425_v32 = vld [vmem:[#allocation206_spill] sm:$0xff] }
 0x4ed   :  { %4697 = vmatpush1.bf16.msra.mxu0 %v14405_v6 }
 0x4ee   :  { %v7337_v56 = vpop.eup %7336  ;;  %4738 = vmatpush1.bf16.msra.mxu1 %v14406_v35  ;;  %4698 = vmatprep.subr.bf16.mxu0 %v14407_v47  ;;  %v14415_v35 = vld [vmem:[#allocation195_spill] sm:$0xff]  ;;  %v14416_v47 = vld [vmem:[#allocation257_spill] sm:$0xff] }
 0x4ef   :  { %v7339_v63 = vpop.eup %7338  ;;  %v4294_v48 = vmul.f32 %v7337_v56, %v4272_v46  ;;  %4739 = vmatprep.subr.bf16.mxu1 %v14409_v20  ;;  %v14422_v46 = vld [vmem:[#allocation264_spill] sm:$0xff]  ;;  %v14423_v56 = vld [vmem:[#allocation203_spill] sm:$0xff] }
 0x4f0   :  { %v4295_v36 = vmul.f32 %v7339_v63, %v4273_v53  ;;  %v14424_v53 = vld [vmem:[#allocation265_spill] sm:$0xff]  ;;  %v14532_v20 = vld [vmem:[#allocation371_spill] sm:$0xff] }
 0x4f1   :  { %v11209_v45 = vadd.f32 %v4294_v48, %v4292_v18  ;;  %4699 = vmatpush1.bf16.msra.mxu0 %v14412_v27  ;;  %v7341_v28 = vpop.eup %7340  ;;  %v14419_v18 = vld [vmem:[#allocation199_spill] sm:$0xff]  ;;  %v14421_v48 = vld [vmem:[#allocation202_spill] sm:$0xff] }
 0x4f2   :  { %v11212_v6 = vadd.f32 %v4295_v36, %v4293_v22  ;;  %4740 = vmatpush1.bf16.msra.mxu1 %v14414_v29  ;;  %4700 = vmatprep.subr.bf16.mxu0 %v14415_v35  ;;  %v4289_v22 = vmul.f32 0.5, %v7341_v28  ;;  %v14467_v35 = vld [vmem:[#allocation247_spill] sm:$0xff]  ;;  %v14468_v29 = vld [vmem:[#allocation309_spill] sm:$0xff]  ;;  %v14529_v27 = vld [vmem:[#allocation310_spill] sm:$0xff] }
 0x4f3   :  { %14411 = vst [vmem:[#allocation394_spill] sm:$0xff] %v11209_v45  ;;  %4741 = vmatprep.subr.bf16.mxu1 %v14416_v47  ;;  %v7343_v63 = vpop.eup %7342  ;;  %v14430_v47 = vld [vmem:[#allocation272_spill] sm:$0xff] }
 0x4f4   :  { %14413 = vst [vmem:[#allocation395_spill] sm:$0xff] %v11212_v6  ;;  %7344 = vtanh.f32 %v11212_v6  ;;  %v4291_v62 = vadd.f32 0.5, %v4289_v22  ;;  %v14531_v6 = vld [vmem:[#allocation311_spill] sm:$0xff] }
 0x4f5   :  { %4701 = vmatpush1.bf16.msra.mxu0 %v14417_v37  ;;  %7346 = vtanh.f32 %v11209_v45  ;;  %v4288_v37 = vmul.f32 0.5, %v7343_v63 }
 0x4f6   :  { %4742 = vmatpush1.bf16.msra.mxu1 %v14418_v24  ;;  %4702 = vmatprep.subr.bf16.mxu0 %v14419_v18  ;;  %v14426_v24 = vld [vmem:[#allocation268_spill] sm:$0xff]  ;;  %v14427_v18 = vld [vmem:[#allocation207_spill] sm:$0xff] }
 0x4f7   :  { %4743 = vmatprep.subr.bf16.mxu1 %v14420_v43  ;;  %v14428_v43 = vld [vmem:[#allocation269_spill] sm:$0xff]  ;;  %v4290_v22 = vadd.f32 0.5, %v4288_v37 }
 0x4f8   :  { %v14440_v37 = vld [vmem:[#allocation281_spill] sm:$0xff] }
 0x4f9   :  { %4703 = vmatpush1.bf16.msra.mxu0 %v14421_v48  ;;  %v14429_v48 = vld [vmem:[#allocation210_spill] sm:$0xff] }
 0x4fa   :  { %4744 = vmatpush1.bf16.msra.mxu1 %v14422_v46  ;;  %4704 = vmatprep.subr.bf16.mxu0 %v14423_v56  ;;  %v14431_v56 = vld [vmem:[#allocation211_spill] sm:$0xff] }
 0x4fb   :  { %4745 = vmatprep.subr.bf16.mxu1 %v14424_v53 }
 0x4fd   :  { %4705 = vmatpush1.bf16.msra.mxu0 %v14425_v32  ;;  %v14432_v32 = vld [vmem:[#allocation273_spill] sm:$0xff] }
 0x4fe   :  { %v7345_v36 = vpop.eup %7344  ;;  %4746 = vmatpush1.bf16.msra.mxu1 %v14426_v24  ;;  %4706 = vmatprep.subr.bf16.mxu0 %v14427_v18  ;;  %v14433_v24 = vld [vmem:[#allocation214_spill] sm:$0xff]  ;;  %v14434_v18 = vld [vmem:[#allocation276_spill] sm:$0xff] }
 0x4ff   :  { %4747 = vmatprep.subr.bf16.mxu1 %v14428_v43  ;;  %v4301_v28 = vmul.f32 %v7345_v36, %v4291_v62  ;;  %v7347_v53 = vpop.eup %7346  ;;  %v14435_v43 = vld [vmem:[#allocation215_spill] sm:$0xff]  ;;  %v14436_v62 = vld [vmem:[#allocation277_spill] sm:$0xff]  ;;  %v14437_v36 = vld [vmem:[#allocation218_spill] sm:$0xff] }
 0x500   :  { %v4300_v63 = vmul.f32 %v7347_v53, %v4290_v22  ;;  %v14442_v53 = vld [vmem:[#allocation284_spill] sm:$0xff]  ;;  %v14443_v22 = vld [vmem:[#allocation223_spill] sm:$0xff] }
 0x501   :  { %4707 = vmatpush1.bf16.msra.mxu0 %v14429_v48  ;;  %v4679_v46 = vpack.c.bf16 %v4301_v28, %v4301_v28  ;;  %v14438_v28 = vld [vmem:[#allocation280_spill] sm:$0xff]  ;;  %v14465_v48 = vld [vmem:[#allocation246_spill] sm:$0xff] }
 0x502   :  { %4748 = vmatpush1.bf16.msra.mxu1 %v14430_v47  ;;  %4708 = vmatprep.subr.bf16.mxu0 %v14431_v56  ;;  %v11241_v56 = vpack.c.bf16 %v4300_v63, %v4300_v63  ;;  %v14439_v47 = vld [vmem:[#allocation219_spill] sm:$0xff]  ;;  %v14445_v63 = vld [vmem:[#allocation226_spill] sm:$0xff] }
 0x503   :  { %4712 = vmatprep.mubr.bf16.mxu0 %v4679_v46  ;;  %4753 = vmatprep.mubr.bf16.mxu1 %v4679_v46 }
 0x504   :  { %4749 = vmatprep.subr.bf16.mxu1 %v14432_v32  ;;  %v14464_v32 = vld [vmem:[#allocation305_spill] sm:$0xff] }
 0x505   :  { %4709 = vmatpush1.bf16.msra.mxu0 %v14433_v24  ;;  %v14462_v24 = vld [vmem:[#allocation304_spill] sm:$0xff] }
 0x506   :  { %4750 = vmatpush1.bf16.msra.mxu1 %v14434_v18  ;;  %4710 = vmatprep.subr.bf16.mxu0 %v14435_v43  ;;  %v14441_v18 = vld [vmem:[#allocation222_spill] sm:$0xff]  ;;  %v14450_v43 = vld [vmem:[#allocation292_spill] sm:$0xff] }
 0x507   :  { %4751 = vmatprep.subr.bf16.mxu1 %v14436_v62  ;;  %v14449_v62 = vld [vmem:[#allocation230_spill] sm:$0xff] }
 0x509   :  { %4711 = vmatpush1.bf16.msra.mxu0 %v14437_v36  ;;  %v14444_v36 = vld [vmem:[#allocation285_spill] sm:$0xff] }
 0x50a   :  { %4752 = vmatpush1.bf16.msra.mxu1 %v14438_v28  ;;  %4762 = vmatprep.subr.bf16.mxu0 %v14439_v47  ;;  %v14446_v28 = vld [vmem:[#allocation288_spill] sm:$0xff]  ;;  %v14447_v47 = vld [vmem:[#allocation227_spill] sm:$0xff] }
 0x50b   :  { %4803 = vmatprep.subr.bf16.mxu1 %v14440_v37  ;;  %v14448_v37 = vld [vmem:[#allocation289_spill] sm:$0xff] }
 0x50c   :  { %4713 = vmatmul.mubr.bf16.vlgmr.msra.gmra.mrb[76].mxu0 %v11241_v56 }
 0x50d   :  { %4754 = vmatmul.mubr.bf16.vlgmr.msra.gmra.mrb[84].mxu1 %v11241_v56  ;;  %4763 = vmatpush1.bf16.msra.mxu0 %v14441_v18  ;;  %v14451_v18 = vld [vmem:[#allocation231_spill] sm:$0xff] }
 0x50e   :  { %4794 = vmatprep.mubr.bf16.mxu0 %v4679_v46  ;;  %4804 = vmatpush1.bf16.msra.mxu1 %v14442_v53  ;;  %v14452_v53 = vld [vmem:[#allocation293_spill] sm:$0xff] }
 0x50f   :  { %4835 = vmatprep.mubr.bf16.mxu1 %v4679_v46  ;;  %4764 = vmatprep.subr.bf16.mxu0 %v14443_v22  ;;  %v14453_v46 = vld [vmem:[#allocation234_spill] sm:$0xff]  ;;  %v14454_v22 = vld [vmem:[#allocation296_spill] sm:$0xff] }
 0x510   :  { %4805 = vmatprep.subr.bf16.mxu1 %v14444_v36  ;;  %v14455_v36 = vld [vmem:[#allocation235_spill] sm:$0xff] }
 0x511   :  { %4765 = vmatpush1.bf16.msra.mxu0 %v14445_v63  ;;  %v14456_v63 = vld [vmem:[#allocation297_spill] sm:$0xff] }
 0x512   :  { %4806 = vmatpush1.bf16.msra.mxu1 %v14446_v28  ;;  %4766 = vmatprep.subr.bf16.mxu0 %v14447_v47  ;;  %v14457_v28 = vld [vmem:[#allocation238_spill] sm:$0xff]  ;;  %v14458_v47 = vld [vmem:[#allocation300_spill] sm:$0xff] }
 0x513   :  { %4807 = vmatprep.subr.bf16.mxu1 %v14448_v37  ;;  %v14459_v37 = vld [vmem:[#allocation239_spill] sm:$0xff] }
 0x515   :  { %4767 = vmatpush1.bf16.msra.mxu0 %v14449_v62 }
 0x516   :  { %4808 = vmatpush1.bf16.msra.mxu1 %v14450_v43  ;;  %4768 = vmatprep.subr.bf16.mxu0 %v14451_v18  ;;  %v14460_v43 = vld [vmem:[#allocation301_spill] sm:$0xff] }
 0x517   :  { %4809 = vmatprep.subr.bf16.mxu1 %v14452_v53 }
 0x519   :  { %4769 = vmatpush1.bf16.msra.mxu0 %v14453_v46 }
 0x51a   :  { %4810 = vmatpush1.bf16.msra.mxu1 %v14454_v22  ;;  %4770 = vmatprep.subr.bf16.mxu0 %v14455_v36  ;;  %v14461_v36 = vld [vmem:[#allocation242_spill] sm:$0xff] }
 0x51b   :  { %4811 = vmatprep.subr.bf16.mxu1 %v14456_v63 }
 0x51d   :  { %4771 = vmatpush1.bf16.msra.mxu0 %v14457_v28 }
 0x51e   :  { %4812 = vmatpush1.bf16.msra.mxu1 %v14458_v47  ;;  %4772 = vmatprep.subr.bf16.mxu0 %v14459_v37  ;;  %v14463_v47 = vld [vmem:[#allocation243_spill] sm:$0xff] }
 0x51f   :  { %v11266_v62 = vpop.f32.mrb[60].mxu0  ;;  %4813 = vmatprep.subr.bf16.mxu1 %v14460_v43  ;;  %v14466_v43 = vld [vmem:[#allocation308_spill] sm:$0xff] }
 0x520   :  { %v11269_v18 = vpop.f32.mrb[68].mxu1  ;;  %v11271_v53 = vpop.f32.mrb[61].mxu0 }
 0x521   :  { %v11273_v46 = vpop.f32.mrb[69].mxu1  ;;  %v4342_v22 = vpop.f32.mrb[62].mxu0  ;;  %4773 = vmatpush1.bf16.msra.mxu0 %v14461_v36  ;;  %v14470_v36 = vld [vmem:[#allocation312_spill] sm:$0xff] }
 0x522   :  { %v4383_v63 = vpop.f32.mrb[70].mxu1  ;;  %4814 = vmatpush1.bf16.msra.mxu1 %v14462_v24  ;;  %v4343_v28 = vpop.f32.mrb[63].mxu0  ;;  %4774 = vmatprep.subr.bf16.mxu0 %v14463_v47  ;;  %v14469_v22 = vld [vmem:[#allocation250_spill] sm:$0xff] }
 0x523   :  { %v4384_v37 = vpop.f32.mrb[71].mxu1  ;;  %4815 = vmatprep.subr.bf16.mxu1 %v14464_v32  ;;  %v14471_v63 = vld [vmem:[#allocation251_spill] sm:$0xff]  ;;  %v14472_v28 = vld [vmem:[#allocation313_spill] sm:$0xff]  ;;  %v14473_v47 = vld [vmem:[#allocation254_spill] sm:$0xff] }
 0x524   :  { %v14474_v37 = vld [vmem:[#allocation316_spill] sm:$0xff]  ;;  %v14475_v32 = vld [vmem:[#allocation255_spill] sm:$0xff]  ;;  %v14528_v24 = vld [vmem:[#allocation366_spill] sm:$0xff] }
 0x525   :  { %4775 = vmatpush1.bf16.msra.mxu0 %v14465_v48  ;;  %v14476_v48 = vld [vmem:[#allocation317_spill] sm:$0xff] }
 0x526   :  { %4816 = vmatpush1.bf16.msra.mxu1 %v14466_v43  ;;  %4776 = vmatprep.subr.bf16.mxu0 %v14467_v35  ;;  %v14477_v43 = vld [vmem:[#allocation258_spill] sm:$0xff]  ;;  %v14478_v35 = vld [vmem:[#allocation320_spill] sm:$0xff] }
 0x527   :  { %4817 = vmatprep.subr.bf16.mxu1 %v14468_v29  ;;  %v14479_v29 = vld [vmem:[#allocation259_spill] sm:$0xff] }
 0x529   :  { %4777 = vmatpush1.bf16.msra.mxu0 %v14469_v22  ;;  %v14480_v22 = vld [vmem:[#allocation321_spill] sm:$0xff] }
 0x52a   :  { %4818 = vmatpush1.bf16.msra.mxu1 %v14470_v36  ;;  %4778 = vmatprep.subr.bf16.mxu0 %v14471_v63  ;;  %v14481_v36 = vld [vmem:[#allocation262_spill] sm:$0xff]  ;;  %v14482_v63 = vld [vmem:[#allocation324_spill] sm:$0xff] }
 0x52b   :  { %4819 = vmatprep.subr.bf16.mxu1 %v14472_v28  ;;  %v14483_v28 = vld [vmem:[#allocation263_spill] sm:$0xff] }
 0x52d   :  { %4779 = vmatpush1.bf16.msra.mxu0 %v14473_v47  ;;  %v14484_v47 = vld [vmem:[#allocation325_spill] sm:$0xff] }
 0x52e   :  { %4820 = vmatpush1.bf16.msra.mxu1 %v14474_v37  ;;  %4780 = vmatprep.subr.bf16.mxu0 %v14475_v32  ;;  %v14485_v37 = vld [vmem:[#allocation266_spill] sm:$0xff]  ;;  %v14486_v32 = vld [vmem:[#allocation328_spill] sm:$0xff] }
 0x52f   :  { %4821 = vmatprep.subr.bf16.mxu1 %v14476_v48  ;;  %v14487_v48 = vld [vmem:[#allocation267_spill] sm:$0xff] }
 0x531   :  { %4781 = vmatpush1.bf16.msra.mxu0 %v14477_v43  ;;  %v14488_v43 = vld [vmem:[#allocation329_spill] sm:$0xff] }
 0x532   :  { %4822 = vmatpush1.bf16.msra.mxu1 %v14478_v35  ;;  %4782 = vmatprep.subr.bf16.mxu0 %v14479_v29  ;;  %v14489_v35 = vld [vmem:[#allocation270_spill] sm:$0xff]  ;;  %v14490_v29 = vld [vmem:[#allocation332_spill] sm:$0xff] }
 0x533   :  { %4823 = vmatprep.subr.bf16.mxu1 %v14480_v22  ;;  %v14491_v22 = vld [vmem:[#allocation271_spill] sm:$0xff] }
 0x535   :  { %4783 = vmatpush1.bf16.msra.mxu0 %v14481_v36  ;;  %v14492_v36 = vld [vmem:[#allocation334_spill] sm:$0xff] }
 0x536   :  { %4824 = vmatpush1.bf16.msra.mxu1 %v14482_v63  ;;  %4784 = vmatprep.subr.bf16.mxu0 %v14483_v28  ;;  %v14493_v63 = vld [vmem:[#allocation274_spill] sm:$0xff]  ;;  %v14494_v28 = vld [vmem:[#allocation337_spill] sm:$0xff] }
 0x537   :  { %4825 = vmatprep.subr.bf16.mxu1 %v14484_v47  ;;  %v14495_v47 = vld [vmem:[#allocation275_spill] sm:$0xff] }
 0x539   :  { %4785 = vmatpush1.bf16.msra.mxu0 %v14485_v37  ;;  %v14496_v37 = vld [vmem:[#allocation338_spill] sm:$0xff] }
 0x53a   :  { %4826 = vmatpush1.bf16.msra.mxu1 %v14486_v32  ;;  %4786 = vmatprep.subr.bf16.mxu0 %v14487_v48  ;;  %v14497_v32 = vld [vmem:[#allocation278_spill] sm:$0xff]  ;;  %v14498_v48 = vld [vmem:[#allocation341_spill] sm:$0xff] }
 0x53b   :  { %4827 = vmatprep.subr.bf16.mxu1 %v14488_v43  ;;  %v14499_v43 = vld [vmem:[#allocation279_spill] sm:$0xff] }
 0x53d   :  { %4787 = vmatpush1.bf16.msra.mxu0 %v14489_v35  ;;  %v14500_v35 = vld [vmem:[#allocation342_spill] sm:$0xff] }
 0x53e   :  { %4828 = vmatpush1.bf16.msra.mxu1 %v14490_v29  ;;  %4788 = vmatprep.subr.bf16.mxu0 %v14491_v22  ;;  %v14501_v29 = vld [vmem:[#allocation282_spill] sm:$0xff]  ;;  %v14502_v22 = vld [vmem:[#allocation345_spill] sm:$0xff] }
 0x53f   :  { %4829 = vmatprep.subr.bf16.mxu1 %v14492_v36  ;;  %v14503_v36 = vld [vmem:[#allocation283_spill] sm:$0xff] }
 0x541   :  { %4789 = vmatpush1.bf16.msra.mxu0 %v14493_v63  ;;  %v14504_v63 = vld [vmem:[#allocation346_spill] sm:$0xff] }
 0x542   :  { %4830 = vmatpush1.bf16.msra.mxu1 %v14494_v28  ;;  %4790 = vmatprep.subr.bf16.mxu0 %v14495_v47  ;;  %v14514_v47 = vld [vmem:[#allocation353_spill] sm:$0xff] }
 0x543   :  { %4831 = vmatprep.subr.bf16.mxu1 %v14496_v37  ;;  %v14505_v37 = vld [vmem:[#allocation286_spill] sm:$0xff] }
 0x545   :  { %4791 = vmatpush1.bf16.msra.mxu0 %v14497_v32  ;;  %v14506_v32 = vld [vmem:[#allocation349_spill] sm:$0xff] }
 0x546   :  { %4832 = vmatpush1.bf16.msra.mxu1 %v14498_v48  ;;  %4792 = vmatprep.subr.bf16.mxu0 %v14499_v43  ;;  %v14507_v48 = vld [vmem:[#allocation287_spill] sm:$0xff]  ;;  %v14508_v43 = vld [vmem:[#allocation350_spill] sm:$0xff] }
 0x547   :  { %4833 = vmatprep.subr.bf16.mxu1 %v14500_v35  ;;  %v14509_v35 = vld [vmem:[#allocation290_spill] sm:$0xff] }
 0x549   :  { %4793 = vmatpush1.bf16.msra.mxu0 %v14501_v29  ;;  %v14510_v29 = vld [vmem:[#allocation351_spill] sm:$0xff] }
 0x54a   :  { %4834 = vmatpush1.bf16.msra.mxu1 %v14502_v22  ;;  %4844 = vmatprep.subr.bf16.mxu0 %v14503_v36  ;;  %v14511_v22 = vld [vmem:[#allocation291_spill] sm:$0xff]  ;;  %v14512_v36 = vld [vmem:[#allocation352_spill] sm:$0xff] }
 0x54b   :  { %4885 = vmatprep.subr.bf16.mxu1 %v14504_v63  ;;  %v14513_v63 = vld [vmem:[#allocation294_spill] sm:$0xff] }
 0x54c   :  { %4795 = vmatmul.mubr.bf16.vlgmr.msra.gmra.mrb[80].mxu0 %v11241_v56 }
 0x54d   :  { %4836 = vmatmul.mubr.bf16.vlgmr.msra.gmra.mrb[88].mxu1 %v11241_v56  ;;  %4845 = vmatpush1.bf16.msra.mxu0 %v14505_v37  ;;  %v14515_v56 = vld [vmem:[#allocation295_spill] sm:$0xff]  ;;  %v14516_v37 = vld [vmem:[#allocation354_spill] sm:$0xff] }
 0x54e   :  { %4886 = vmatpush1.bf16.msra.mxu1 %v14506_v32  ;;  %4846 = vmatprep.subr.bf16.mxu0 %v14507_v48  ;;  %v14517_v32 = vld [vmem:[#allocation298_spill] sm:$0xff]  ;;  %v14518_v48 = vld [vmem:[#allocation355_spill] sm:$0xff] }
 0x54f   :  { %4887 = vmatprep.subr.bf16.mxu1 %v14508_v43  ;;  %v14519_v43 = vld [vmem:[#allocation299_spill] sm:$0xff] }
 0x551   :  { %4847 = vmatpush1.bf16.msra.mxu0 %v14509_v35  ;;  %v14520_v35 = vld [vmem:[#allocation357_spill] sm:$0xff] }
 0x552   :  { %4888 = vmatpush1.bf16.msra.mxu1 %v14510_v29  ;;  %4848 = vmatprep.subr.bf16.mxu0 %v14511_v22  ;;  %v14521_v29 = vld [vmem:[#allocation302_spill] sm:$0xff] }
 0x553   :  { %4889 = vmatprep.subr.bf16.mxu1 %v14512_v36  ;;  %v14522_v22 = vld [vmem:[#allocation358_spill] sm:$0xff]  ;;  %v14523_v36 = vld [vmem:[#allocation303_spill] sm:$0xff] }
 0x555   :  { %4849 = vmatpush1.bf16.msra.mxu0 %v14513_v63 }
 0x556   :  { %4890 = vmatpush1.bf16.msra.mxu1 %v14514_v47  ;;  %4850 = vmatprep.subr.bf16.mxu0 %v14515_v56  ;;  %v14524_v47 = vld [vmem:[#allocation360_spill] sm:$0xff] }
 0x557   :  { %4891 = vmatprep.subr.bf16.mxu1 %v14516_v37 }
 0x559   :  { %4851 = vmatpush1.bf16.msra.mxu0 %v14517_v32 }
 0x55a   :  { %4892 = vmatpush1.bf16.msra.mxu1 %v14518_v48  ;;  %4852 = vmatprep.subr.bf16.mxu0 %v14519_v43  ;;  %v14525_v43 = vld [vmem:[#allocation306_spill] sm:$0xff] }
 0x55b   :  { %4893 = vmatprep.subr.bf16.mxu1 %v14520_v35 }
 0x55d   :  { %4853 = vmatpush1.bf16.msra.mxu0 %v14521_v29  ;;  %v14526_v29 = vld [vmem:[#allocation364_spill] sm:$0xff] }
 0x55e   :  { %4894 = vmatpush1.bf16.msra.mxu1 %v14522_v22  ;;  %4854 = vmatprep.subr.bf16.mxu0 %v14523_v36  ;;  %v14527_v22 = vld [vmem:[#allocation307_spill] sm:$0xff] }
 0x55f   :  { %v11340_v63 = vpop.f32.mrb[64].mxu0  ;;  %4895 = vmatprep.subr.bf16.mxu1 %v14524_v47  ;;  %v14530_v47 = vld [vmem:[#allocation370_spill] sm:$0xff] }
 0x560   :  { %v11343_v56 = vpop.f32.mrb[72].mxu1  ;;  %v11345_v37 = vpop.f32.mrb[65].mxu0 }
 0x561   :  { %v11347_v32 = vpop.f32.mrb[73].mxu1  ;;  %v4424_v48 = vpop.f32.mrb[66].mxu0  ;;  %4855 = vmatpush1.bf16.msra.mxu0 %v14525_v43  ;;  %v14534_v43 = vld [vmem:[#allocation372_spill] sm:$0xff] }
 0x562   :  { %v4465_v35 = vpop.f32.mrb[74].mxu1  ;;  %v4425_v28 = vpop.f32.mrb[67].mxu0  ;;  %4896 = vmatpush1.bf16.msra.mxu1 %v14526_v29  ;;  %4856 = vmatprep.subr.bf16.mxu0 %v14527_v22  ;;  %v14533_v48 = vld [vmem:[#allocation314_spill] sm:$0xff] }
 0x563   :  { %v4466_v36 = vpop.f32.mrb[75].mxu1  ;;  %4897 = vmatprep.subr.bf16.mxu1 %v14528_v24  ;;  %v14535_v35 = vld [vmem:[#allocation315_spill] sm:$0xff]  ;;  %v14536_v28 = vld [vmem:[#allocation373_spill] sm:$0xff]  ;;  %v14537_v22 = vld [vmem:[#allocation318_spill] sm:$0xff] }
 0x564   :  { %v14538_v36 = vld [vmem:[#allocation374_spill] sm:$0xff]  ;;  %v14539_v24 = vld [vmem:[#allocation319_spill] sm:$0xff] }
 0x565   :  { %4857 = vmatpush1.bf16.msra.mxu0 %v14529_v27  ;;  %v14540_v27 = vld [vmem:[#allocation375_spill] sm:$0xff] }
 0x566   :  { %4898 = vmatpush1.bf16.msra.mxu1 %v14530_v47  ;;  %4858 = vmatprep.subr.bf16.mxu0 %v14531_v6  ;;  %v14541_v47 = vld [vmem:[#allocation322_spill] sm:$0xff]  ;;  %v14542_v6 = vld [vmem:[#allocation376_spill] sm:$0xff] }
 0x567   :  { %4899 = vmatprep.subr.bf16.mxu1 %v14532_v20  ;;  %v14543_v20 = vld [vmem:[#allocation323_spill] sm:$0xff] }
 0x569   :  { %4859 = vmatpush1.bf16.msra.mxu0 %v14533_v48  ;;  %v14544_v48 = vld [vmem:[#allocation377_spill] sm:$0xff] }
 0x56a   :  { %4900 = vmatpush1.bf16.msra.mxu1 %v14534_v43  ;;  %4860 = vmatprep.subr.bf16.mxu0 %v14535_v35  ;;  %v14545_v43 = vld [vmem:[#allocation326_spill] sm:$0xff] }
 0x56b   :  { %4901 = vmatprep.subr.bf16.mxu1 %v14536_v28  ;;  %v14546_v35 = vld [vmem:[#allocation378_spill] sm:$0xff]  ;;  %v14547_v28 = vld [vmem:[#allocation327_spill] sm:$0xff] }
 0x56d   :  { %4861 = vmatpush1.bf16.msra.mxu0 %v14537_v22  ;;  %v14548_v22 = vld [vmem:[#allocation379_spill] sm:$0xff] }
 0x56e   :  { %4902 = vmatpush1.bf16.msra.mxu1 %v14538_v36  ;;  %4862 = vmatprep.subr.bf16.mxu0 %v14539_v24  ;;  %v14549_v36 = vld [vmem:[#allocation330_spill] sm:$0xff]  ;;  %v14550_v24 = vld [vmem:[#allocation380_spill] sm:$0xff] }
 0x56f   :  { %4903 = vmatprep.subr.bf16.mxu1 %v14540_v27  ;;  %v14551_v27 = vld [vmem:[#allocation331_spill] sm:$0xff] }
 0x571   :  { %4863 = vmatpush1.bf16.msra.mxu0 %v14541_v47  ;;  %v14552_v47 = vld [vmem:[#allocation381_spill] sm:$0xff] }
 0x572   :  { %4904 = vmatpush1.bf16.msra.mxu1 %v14542_v6  ;;  %4864 = vmatprep.subr.bf16.mxu0 %v14543_v20  ;;  %v14553_v6 = vld [vmem:[#allocation335_spill] sm:$0xff]  ;;  %v14554_v20 = vld [vmem:[#allocation382_spill] sm:$0xff] }
 0x573   :  { %4905 = vmatprep.subr.bf16.mxu1 %v14544_v48  ;;  %v14555_v48 = vld [vmem:[#allocation336_spill] sm:$0xff] }
 0x575   :  { %4865 = vmatpush1.bf16.msra.mxu0 %v14545_v43 }
 0x576   :  { %4906 = vmatpush1.bf16.msra.mxu1 %v14546_v35  ;;  %4866 = vmatprep.subr.bf16.mxu0 %v14547_v28  ;;  %v14556_v35 = vld [vmem:[#allocation384_spill] sm:$0xff] }
 0x577   :  { %4907 = vmatprep.subr.bf16.mxu1 %v14548_v22 }
 0x579   :  { %4867 = vmatpush1.bf16.msra.mxu0 %v14549_v36 }
 0x57a   :  { %4908 = vmatpush1.bf16.msra.mxu1 %v14550_v24  ;;  %4868 = vmatprep.subr.bf16.mxu0 %v14551_v27 }
 0x57b   :  { %4909 = vmatprep.subr.bf16.mxu1 %v14552_v47  ;;  %v14557_v47 = vld [vmem:[#allocation339_spill] sm:$0xff] }
 0x57d   :  { %4869 = vmatpush1.bf16.msra.mxu0 %v14553_v6 }
 0x57e   :  { %4910 = vmatpush1.bf16.msra.mxu1 %v14554_v20  ;;  %4870 = vmatprep.subr.bf16.mxu0 %v14555_v48  ;;  %v14558_v48 = vld [vmem:[#allocation386_spill] sm:$0xff] }
 0x57f   :  { %v4502_v43 = vpop.f32.mrb[68].mxu0  ;;  %4911 = vmatprep.subr.bf16.mxu1 %v14556_v35 }
 0x580   :  { %v4503_v28 = vadd.f32 %v4502_v43, %v11266_v62  ;;  %v4543_v22 = vpop.f32.mrb[76].mxu1  ;;  %v4504_v29 = vpop.f32.mrb[69].mxu0  ;;  %v14560_v43 = vld [vmem:[#allocation388_spill] sm:$0xff]  ;;  %v14561_v62 = vld [vmem:[#allocation343_spill] sm:$0xff] }
 0x581   :  { %v4544_v36 = vadd.f32 %v4543_v22, %v11269_v18  ;;  %v4505_v24 = vadd.f32 %v4504_v29, %v11271_v53  ;;  %v4545_v27 = vpop.f32.mrb[77].mxu1  ;;  %v4506_v45 = vpop.f32.mrb[70].mxu0  ;;  %4871 = vmatpush1.bf16.msra.mxu0 %v14557_v47  ;;  %v14562_v18 = vld [vmem:[#allocation390_spill] sm:$0xff]  ;;  %v14563_v29 = vld [vmem:[#allocation344_spill] sm:$0xff]  ;;  %v14565_v53 = vld [vmem:[#allocation347_spill] sm:$0xff] }
 0x582   :  { %v4546_v6 = vadd.f32 %v4545_v27, %v11273_v46  ;;  %v4507_v20 = vpop.f32.mrb[71].mxu0  ;;  %v4547_v44 = vpop.f32.mrb[78].mxu1  ;;  %4912 = vmatpush1.bf16.msra.mxu1 %v14558_v48  ;;  %4872 = vmatprep.subr.bf16.mxu0 %v14559_v59  ;;  %v14564_v45 = vld [vmem:[#allocation391_spill] sm:$0xff]  ;;  %v14566_v27 = vld [vmem:[#allocation392_spill] sm:$0xff]  ;;  %v14571_v59 = vld [vmem:[#allocation365_spill] sm:$0xff] }
 0x583   :  { %v4548_v35 = vpop.f32.mrb[79].mxu1  ;;  %4913 = vmatprep.subr.bf16.mxu1 %v14560_v43  ;;  %v14567_v20 = vld [vmem:[#allocation348_spill] sm:$0xff]  ;;  %v14568_v44 = vld [vmem:[#allocation393_spill] sm:$0xff]  ;;  %v14569_v46 = vld [vmem:[#allocation387_spill] sm:$0xff] }
 0x584   :  { %v4634_v22 = vadd.f32 %v4544_v36, %v14569_v46  ;;  %v14570_v35 = vld [vmem:[#allocation389_spill] sm:$0xff]  ;;  %v14572_v48 = vld [vmem:[#allocation367_spill] sm:$0xff] }
 0x585   :  { %4873 = vmatpush1.bf16.msra.mxu0 %v14561_v62  ;;  %v4635_v43 = vadd.f32 %v4546_v6, %v14570_v35  ;;  %v4632_v62 = vadd.f32 %v4503_v28, %v14571_v59 }
 0x586   :  { %4914 = vmatpush1.bf16.msra.mxu1 %v14562_v18  ;;  %4874 = vmatprep.subr.bf16.mxu0 %v14563_v29  ;;  %v4633_v18 = vadd.f32 %v4505_v24, %v14572_v48  ;;  %v4648_v47 = vmul.f32 0.5, %v4634_v22  ;;  %v14573_v24 = vld [vmem:[#allocation368_spill] sm:$0xff] }
 0x587   :  { %4915 = vmatprep.subr.bf16.mxu1 %v14564_v45  ;;  %v4649_v29 = vmul.f32 0.5, %v4635_v43  ;;  %v4640_v55 = vmul.f32 0.5, %v4632_v62 }
 0x588   :  { %v4641_v45 = vmul.f32 0.5, %v4633_v18  ;;  %7348 = vtanh.f32 %v4648_v47  ;;  %v14574_v18 = vld [vmem:[#allocation396_spill] sm:$0xff] }
 0x589   :  { %4875 = vmatpush1.bf16.msra.mxu0 %v14565_v53  ;;  %7350 = vtanh.f32 %v4649_v29  ;;  %v14575_v29 = vld [vmem:[#allocation369_spill] sm:$0xff] }
 0x58a   :  { %4916 = vmatpush1.bf16.msra.mxu1 %v14566_v27  ;;  %4926 = vmatprep.subr.bf16.mxu0 %v14567_v20  ;;  %7352 = vtanh.f32 %v4640_v55 }
 0x58b   :  { %4967 = vmatprep.subr.bf16.mxu1 %v14568_v44  ;;  %7354 = vtanh.f32 %v4641_v45 }
 0x59f   :  { %v4584_v27 = vpop.f32.mrb[72].mxu0 }
 0x5a0   :  { %v4585_v20 = vadd.f32 %v4584_v27, %v11340_v63  ;;  %v4625_v44 = vpop.f32.mrb[80].mxu1  ;;  %v4586_v53 = vpop.f32.mrb[73].mxu0  ;;  %v14576_v27 = vld [vmem:[#allocation397_spill] sm:$0xff] }
 0x5a1   :  { %v4626_v36 = vadd.f32 %v4625_v44, %v11343_v56  ;;  %v4587_v6 = vadd.f32 %v4586_v53, %v11345_v37  ;;  %v4627_v28 = vpop.f32.mrb[81].mxu1  ;;  %v4588_v59 = vpop.f32.mrb[74].mxu0 }
 0x5a2   :  { %v4636_v22 = vadd.f32 %v4585_v20, %v14573_v24  ;;  %v4628_v43 = vadd.f32 %v4627_v28, %v11347_v32  ;;  %v4589_v62 = vpop.f32.mrb[75].mxu0  ;;  %v4629_v47 = vpop.f32.mrb[82].mxu1 }
 0x5a3   :  { %v4638_v55 = vadd.f32 %v4626_v36, %v14574_v18  ;;  %v4637_v45 = vadd.f32 %v4587_v6, %v14575_v29  ;;  %v4630_v48 = vpop.f32.mrb[83].mxu1  ;;  %v7349_v63 = vpop.eup %7348 }
 0x5a4   :  { %7356 = vtanh.f32 %v4636_v22  ;;  %v4639_v35 = vadd.f32 %v4628_v43, %v14576_v27  ;;  %v7351_v56 = vpop.eup %7350  ;;  %v4652_v59 = vmul.f32 0.5, %v7349_v63 }
 0x5a5   :  { %7358 = vtanh.f32 %v4637_v45  ;;  %v7353_v37 = vpop.eup %7352  ;;  %v4658_v44 = vmul.f32 0.5, %v4638_v55  ;;  %v4653_v20 = vmul.f32 0.5, %v7351_v56 }
 0x5a6   :  { %v7355_v53 = vpop.eup %7354  ;;  %v4659_v24 = vmul.f32 0.5, %v4639_v35  ;;  %v4644_v32 = vmul.f32 0.5, %v7353_v37  ;;  %v4654_v62 = vadd.f32 0.5, %v4652_v59 }
 0x5a7   :  { %v4645_v28 = vmul.f32 0.5, %v7355_v53  ;;  %7360 = vtanh.f32 %v4658_v44  ;;  %v4655_v36 = vadd.f32 0.5, %v4653_v20 }
 0x5a8   :  { %7362 = vtanh.f32 %v4659_v24  ;;  %v4646_v6 = vadd.f32 0.5, %v4644_v32  ;;  %v4666_v43 = vmul.f32 %v4654_v62, %v10838_v49  ;;  %v14579_v62 = vld [vmem:[#allocation402_spill] sm:$0xff] }
 0x5a9   :  { %v4647_v47 = vadd.f32 0.5, %v4645_v28  ;;  %v4667_v45 = vmul.f32 %v4655_v36, %v10840_v61  ;;  %v14578_v28 = vld [vmem:[#allocation401_spill] sm:$0xff]  ;;  %v14580_v36 = vld [vmem:[#allocation403_spill] sm:$0xff] }
 0x5ae   :  { %v7357_v48 = vpop.eup %7356 }
 0x5af   :  { %v7359_v22 = vpop.eup %7358  ;;  %v4668_v27 = vmul.f32 %v7357_v48, %v4646_v6  ;;  %v14581_v6 = vld [vmem:[#allocation404_spill] sm:$0xff]  ;;  %v14582_v48 = vld [vmem:[#allocation405_spill] sm:$0xff] }
 0x5b0   :  { %v4669_v29 = vmul.f32 %v7359_v22, %v4647_v47  ;;  %v14583_v47 = vld [vmem:[#allocation406_spill] sm:$0xff]  ;;  %v14584_v22 = vld [vmem:[#allocation407_spill] sm:$0xff] }
 0x5b1   :  { %v11411_v63 = vadd.f32 %v4668_v27, %v4666_v43  ;;  %v7361_v35 = vpop.eup %7360  ;;  %v14585_v43 = vld [vmem:[#allocation408_spill] sm:$0xff] }
 0x5b2   :  { %v11413_v55 = vadd.f32 %v4669_v29, %v4667_v45  ;;  %v7363_v24 = vpop.eup %7362  ;;  %v4662_v56 = vmul.f32 0.5, %v7361_v35  ;;  %v14577_v29 = vld [vmem:[#allocation400_spill] sm:$0xff]  ;;  %v14586_v45 = vld [vmem:[#allocation409_spill] sm:$0xff]  ;;  %v14587_v35 = vld [vmem:[#allocation410_spill] sm:$0xff] }
 0x5b3   :  { %7364 = vtanh.f32 %v11411_v63  ;;  %v4663_v37 = vmul.f32 0.5, %v7363_v24  ;;  %v14588_v24 = vld [vmem:[#allocation411_spill] sm:$0xff] }
 0x5b4   :  { %7366 = vtanh.f32 %v11413_v55  ;;  %v4664_v53 = vadd.f32 0.5, %v4662_v56  ;;  %v14589_v56 = vld [vmem:[#allocation412_spill] sm:$0xff] }
 0x5b5   :  { %v4665_v44 = vadd.f32 0.5, %v4663_v37  ;;  %v14590_v37 = vld [vmem:[#allocation413_spill] sm:$0xff] }
 0x5bd   :  { %v7365_v59 = vpop.eup %7364 }
 0x5be   :  { %v7367_v49 = vpop.eup %7366  ;;  %v4674_v20 = vmul.f32 %v7365_v59, %v4664_v53  ;;  %v14591_v53 = vld [vmem:[#allocation414_spill] sm:$0xff]  ;;  %v14592_v59 = vld [vmem:[#allocation415_spill] sm:$0xff] }
 0x5bf   :  { %v4675_v32 = vmul.f32 %v7367_v49, %v4665_v44  ;;  %v14593_v44 = vld [vmem:[#allocation416_spill] sm:$0xff]  ;;  %v14594_v49 = vld [vmem:[#allocation417_spill] sm:$0xff] }
 0x5c0   :  { %v11419_v27 = vpack.c.bf16 %v4674_v20, %v4674_v20  ;;  %v14595_v20 = vld [vmem:[#allocation418_spill] sm:$0xff] }
 0x5c1   :  { %v11417_v61 = vpack.c.bf16 %v4675_v32, %v4675_v32  ;;  %v14596_v32 = vld [vmem:[#allocation419_spill] sm:$0xff] }
 0x5c3   :  { %4876 = vmatprep.mubr.bf16.mxu0 %v11417_v61  ;;  %4917 = vmatprep.mubr.bf16.mxu1 %v11417_v61 }
 0x5c4   :  { %4877 = vmatmul.mubr.bf16.vlgmr.msra.gmra.mrb[84].mxu0 %v11419_v27  ;;  %4918 = vmatmul.mubr.bf16.vlgmr.msra.gmra.mrb[92].mxu1 %v11419_v27 }
 0x5c5   :  { %4927 = vmatpush1.bf16.msra.mxu0 %v14148_v52  ;;  %4968 = vmatpush1.bf16.msra.mxu1 %v14149_v41 }
 0x5c6   :  { %4958 = vmatprep.mubr.bf16.mxu0 %v11417_v61  ;;  %4999 = vmatprep.mubr.bf16.mxu1 %v11417_v61 }
 0x5c7   :  { %4928 = vmatprep.subr.bf16.mxu0 %v14150_v50  ;;  %4969 = vmatprep.subr.bf16.mxu1 %v14577_v29 }
 0x5c9   :  { %4929 = vmatpush1.bf16.msra.mxu0 %v14578_v28  ;;  %4970 = vmatpush1.bf16.msra.mxu1 %v14579_v62 }
 0x5ca   :  { %4930 = vmatprep.subr.bf16.mxu0 %v14580_v36  ;;  %4971 = vmatprep.subr.bf16.mxu1 %v14581_v6 }
 0x5cd   :  { %4931 = vmatpush1.bf16.msra.mxu0 %v14582_v48  ;;  %4972 = vmatpush1.bf16.msra.mxu1 %v14583_v47 }
 0x5ce   :  { %4932 = vmatprep.subr.bf16.mxu0 %v14584_v22  ;;  %4973 = vmatprep.subr.bf16.mxu1 %v14585_v43  ;;  %v14605_v43 = vld [vmem:[#allocation432_spill] sm:$0xff]  ;;  %v14606_v22 = vld [vmem:[#allocation433_spill] sm:$0xff] }
 0x5d1   :  { %4933 = vmatpush1.bf16.msra.mxu0 %v14586_v45  ;;  %4974 = vmatpush1.bf16.msra.mxu1 %v14587_v35  ;;  %v14597_v45 = vld [vmem:[#allocation420_spill] sm:$0xff]  ;;  %v14598_v35 = vld [vmem:[#allocation421_spill] sm:$0xff] }
 0x5d2   :  { %4934 = vmatprep.subr.bf16.mxu0 %v14588_v24  ;;  %4975 = vmatprep.subr.bf16.mxu1 %v14589_v56  ;;  %v14599_v24 = vld [vmem:[#allocation422_spill] sm:$0xff]  ;;  %v14600_v56 = vld [vmem:[#allocation423_spill] sm:$0xff] }
 0x5d5   :  { %4935 = vmatpush1.bf16.msra.mxu0 %v14590_v37  ;;  %4976 = vmatpush1.bf16.msra.mxu1 %v14591_v53  ;;  %v14601_v37 = vld [vmem:[#allocation424_spill] sm:$0xff] }
 0x5d6   :  { %4936 = vmatprep.subr.bf16.mxu0 %v14592_v59  ;;  %4977 = vmatprep.subr.bf16.mxu1 %v14593_v44 }
 0x5d9   :  { %4937 = vmatpush1.bf16.msra.mxu0 %v14594_v49  ;;  %4978 = vmatpush1.bf16.msra.mxu1 %v14595_v20  ;;  %v14602_v20 = vld [vmem:[#allocation425_spill] sm:$0xff] }
 0x5da   :  { %4938 = vmatprep.subr.bf16.mxu0 %v14596_v32  ;;  %4979 = vmatprep.subr.bf16.mxu1 %v14597_v45 }
 0x5dd   :  { %4939 = vmatpush1.bf16.msra.mxu0 %v14598_v35  ;;  %4980 = vmatpush1.bf16.msra.mxu1 %v14599_v24  ;;  %v14604_v24 = vld [vmem:[#allocation431_spill] sm:$0xff] }
 0x5de   :  { %4940 = vmatprep.subr.bf16.mxu0 %v14600_v56  ;;  %4981 = vmatprep.subr.bf16.mxu1 %v14601_v37  ;;  %v14603_v56 = vld [vmem:[#allocation430_spill] sm:$0xff] }
 0x5df   :  { %v11455_v53 = vpop.f32.mrb[76].mxu0 }
 0x5e0   :  { %v11457_v59 = vpop.f32.mrb[84].mxu1  ;;  %v11459_v44 = vpop.f32.mrb[77].mxu0 }
 0x5e1   :  { %v11461_v49 = vpop.f32.mrb[85].mxu1  ;;  %4941 = vmatpush1.bf16.msra.mxu0 %v14602_v20  ;;  %4982 = vmatpush1.bf16.msra.mxu1 %v14177_v2  ;;  %v4718_v45 = vpop.f32.mrb[78].mxu0  ;;  %v14607_v20 = vld [vmem:[#allocation434_spill] sm:$0xff] }
 0x5e2   :  { %v4759_v35 = vpop.f32.mrb[86].mxu1  ;;  %v4719_v32 = vpop.f32.mrb[79].mxu0  ;;  %4942 = vmatprep.subr.bf16.mxu0 %v14178_v60  ;;  %4983 = vmatprep.subr.bf16.mxu1 %v14179_v3  ;;  %v14608_v45 = vld [vmem:[#allocation435_spill] sm:$0xff]  ;;  %v14611_v3 = vld [vmem:[#allocation438_spill] sm:$0xff] }
 0x5e3   :  { %v4760_v37 = vpop.f32.mrb[87].mxu1  ;;  %v14609_v35 = vld [vmem:[#allocation436_spill] sm:$0xff]  ;;  %v14610_v32 = vld [vmem:[#allocation437_spill] sm:$0xff] }
 0x5e4   :  { %v14614_v37 = vld [vmem:[#allocation6_spill] sm:$0xff] }
 0x5e5   :  { %4943 = vmatpush1.bf16.msra.mxu0 %v14180_v0  ;;  %4984 = vmatpush1.bf16.msra.mxu1 %v14603_v56 }
 0x5e6   :  { %4944 = vmatprep.subr.bf16.mxu0 %v14604_v24  ;;  %4985 = vmatprep.subr.bf16.mxu1 %v14605_v43 }
 0x5e9   :  { %4945 = vmatpush1.bf16.msra.mxu0 %v14606_v22  ;;  %4986 = vmatpush1.bf16.msra.mxu1 %v14607_v20 }
 0x5ea   :  { %4946 = vmatprep.subr.bf16.mxu0 %v14608_v45  ;;  %4987 = vmatprep.subr.bf16.mxu1 %v14609_v35 }
 0x5ed   :  { %4947 = vmatpush1.bf16.msra.mxu0 %v14610_v32  ;;  %4988 = vmatpush1.bf16.msra.mxu1 %v14611_v3 }
 0x5ee   :  { %4948 = vmatprep.subr.bf16.mxu0 %v14188_v19  ;;  %4989 = vmatprep.subr.bf16.mxu1 %v14189_v57 }
 0x5f1   :  { %4949 = vmatpush1.bf16.msra.mxu0 %v14190_v25  ;;  %4990 = vmatpush1.bf16.msra.mxu1 %v14191_v15 }
 0x5f2   :  { %4950 = vmatprep.subr.bf16.mxu0 %v14192_v1  ;;  %4991 = vmatprep.subr.bf16.mxu1 %v14193_v8 }
 0x5f5   :  { %4951 = vmatpush1.bf16.msra.mxu0 %v14194_v14  ;;  %4992 = vmatpush1.bf16.msra.mxu1 %v14195_v54 }
 0x5f6   :  { %4952 = vmatprep.subr.bf16.mxu0 %v14196_v12  ;;  %4993 = vmatprep.subr.bf16.mxu1 %v14197_v23 }
 0x5f9   :  { %4953 = vmatpush1.bf16.msra.mxu0 %v14198_v42  ;;  %4994 = vmatpush1.bf16.msra.mxu1 %v10276_v33 }
 0x5fa   :  { %4954 = vmatprep.subr.bf16.mxu0 %v10280_v26  ;;  %4995 = vmatprep.subr.bf16.mxu1 %v10282_v38 }
 0x5fd   :  { %4955 = vmatpush1.bf16.msra.mxu0 %v10298_v34  ;;  %4996 = vmatpush1.bf16.msra.mxu1 %v10300_v39  ;;  %v14639_v39 = vld [vmem:[#allocation29_spill] sm:$0xff]  ;;  %v14640_v34 = vld [vmem:[#allocation34_spill] sm:$0xff] }
 0x5fe   :  { %4956 = vmatprep.subr.bf16.mxu0 %v10304_v58  ;;  %4997 = vmatprep.subr.bf16.mxu1 %v10306_v13  ;;  %v14636_v13 = vld [vmem:[#allocation30_spill] sm:$0xff]  ;;  %v14638_v58 = vld [vmem:[#allocation31_spill] sm:$0xff] }
 0x601   :  { %4957 = vmatpush1.bf16.msra.mxu0 %v10310_v31  ;;  %4998 = vmatpush1.bf16.msra.mxu1 %v10312_v30  ;;  %v14616_v30 = vld [vmem:[#allocation7_spill] sm:$0xff]  ;;  %v14618_v31 = vld [vmem:[#allocation10_spill] sm:$0xff] }
 0x602   :  { %5054 = vmatprep.subr.bf16.mxu0 %v7506_v10  ;;  %5095 = vmatprep.subr.bf16.mxu1 %v7491_v4  ;;  %v14612_v4 = vld [vmem:[#allocation3_spill] sm:$0xff]  ;;  %v14613_v10 = vld [vmem:[#allocation2_spill] sm:$0xff] }
 0x604   :  { %4959 = vmatmul.mubr.bf16.vlgmr.msra.gmra.mrb[88].mxu0 %v11419_v27  ;;  %5000 = vmatmul.mubr.bf16.vlgmr.msra.gmra.mrb[96].mxu1 %v11419_v27 }
 0x605   :  { %5055 = vmatpush1.bf16.msra.mxu0 %v7508_v11  ;;  %5086 = vmatprep.mubr.bf16.mxu0 %v11417_v61  ;;  %v14615_v11 = vld [vmem:[#allocation4_spill] sm:$0xff] }
 0x606   :  { %5096 = vmatpush1.bf16.msra.mxu1 %v7493_v5  ;;  %5127 = vmatprep.mubr.bf16.mxu1 %v11417_v61  ;;  %v14617_v5 = vld [vmem:[#allocation5_spill] sm:$0xff] }
 0x607   :  { %5056 = vmatprep.subr.bf16.mxu0 %v7527_v17  ;;  %5097 = vmatprep.subr.bf16.mxu1 %v7504_v9  ;;  %v14619_v17 = vld [vmem:[#allocation8_spill] sm:$0xff]  ;;  %v14620_v9 = vld [vmem:[#allocation11_spill] sm:$0xff] }
 0x609   :  { %5057 = vmatpush1.bf16.msra.mxu0 %v7539_v21  ;;  %v14621_v21 = vld [vmem:[#allocation9_spill] sm:$0xff] }
 0x60a   :  { %5098 = vmatpush1.bf16.msra.mxu1 %v7524_v16  ;;  %5058 = vmatprep.subr.bf16.mxu0 %v14612_v4  ;;  %v14622_v16 = vld [vmem:[#allocation14_spill] sm:$0xff]  ;;  %v14623_v4 = vld [vmem:[#allocation12_spill] sm:$0xff] }
 0x60b   :  { %5099 = vmatprep.subr.bf16.mxu1 %v14613_v10  ;;  %v14624_v10 = vld [vmem:[#allocation15_spill] sm:$0xff] }
 0x60d   :  { %5059 = vmatpush1.bf16.msra.mxu0 %v14614_v37  ;;  %v14625_v37 = vld [vmem:[#allocation13_spill] sm:$0xff] }
 0x60e   :  { %5100 = vmatpush1.bf16.msra.mxu1 %v14615_v11  ;;  %5060 = vmatprep.subr.bf16.mxu0 %v14616_v30  ;;  %v14626_v11 = vld [vmem:[#allocation18_spill] sm:$0xff]  ;;  %v14627_v30 = vld [vmem:[#allocation16_spill] sm:$0xff] }
 0x60f   :  { %5101 = vmatprep.subr.bf16.mxu1 %v14617_v5  ;;  %v14628_v5 = vld [vmem:[#allocation19_spill] sm:$0xff] }
 0x611   :  { %5061 = vmatpush1.bf16.msra.mxu0 %v14618_v31  ;;  %v14629_v31 = vld [vmem:[#allocation17_spill] sm:$0xff] }
 0x612   :  { %5102 = vmatpush1.bf16.msra.mxu1 %v14619_v17  ;;  %5062 = vmatprep.subr.bf16.mxu0 %v14620_v9  ;;  %v14630_v17 = vld [vmem:[#allocation22_spill] sm:$0xff]  ;;  %v14631_v9 = vld [vmem:[#allocation20_spill] sm:$0xff] }
 0x613   :  { %5103 = vmatprep.subr.bf16.mxu1 %v14621_v21  ;;  %v14632_v21 = vld [vmem:[#allocation23_spill] sm:$0xff] }
 0x615   :  { %5063 = vmatpush1.bf16.msra.mxu0 %v14622_v16 }
 0x616   :  { %5104 = vmatpush1.bf16.msra.mxu1 %v14623_v4  ;;  %5064 = vmatprep.subr.bf16.mxu0 %v14624_v10  ;;  %v14633_v4 = vld [vmem:[#allocation21_spill] sm:$0xff] }
 0x617   :  { %5105 = vmatprep.subr.bf16.mxu1 %v14625_v37 }
 0x619   :  { %5065 = vmatpush1.bf16.msra.mxu0 %v14626_v11 }
 0x61a   :  { %5106 = vmatpush1.bf16.msra.mxu1 %v14627_v30  ;;  %5066 = vmatprep.subr.bf16.mxu0 %v14628_v5  ;;  %v14634_v5 = vld [vmem:[#allocation24_spill] sm:$0xff] }
 0x61b   :  { %5107 = vmatprep.subr.bf16.mxu1 %v14629_v31 }
 0x61d   :  { %5067 = vmatpush1.bf16.msra.mxu0 %v14630_v17 }
 0x61e   :  { %5108 = vmatpush1.bf16.msra.mxu1 %v14631_v9  ;;  %5068 = vmatprep.subr.bf16.mxu0 %v14632_v21  ;;  %v14635_v21 = vld [vmem:[#allocation25_spill] sm:$0xff] }
 0x61f   :  { %v11530_v16 = vpop.f32.mrb[80].mxu0  ;;  %5109 = vmatprep.subr.bf16.mxu1 %v14633_v4  ;;  %v14637_v4 = vld [vmem:[#allocation28_spill] sm:$0xff] }
 0x620   :  { %v11533_v10 = vpop.f32.mrb[88].mxu1  ;;  %v11535_v37 = vpop.f32.mrb[81].mxu0 }
 0x621   :  { %v11537_v11 = vpop.f32.mrb[89].mxu1  ;;  %5069 = vmatpush1.bf16.msra.mxu0 %v14204_v51  ;;  %v4800_v30 = vpop.f32.mrb[82].mxu0  ;;  %v14641_v51 = vld [vmem:[#allocation32_spill] sm:$0xff] }
 0x622   :  { %5110 = vmatpush1.bf16.msra.mxu1 %v14634_v5  ;;  %v4841_v31 = vpop.f32.mrb[90].mxu1  ;;  %v4801_v17 = vpop.f32.mrb[83].mxu0  ;;  %5070 = vmatprep.subr.bf16.mxu0 %v14206_v40  ;;  %v14642_v30 = vld [vmem:[#allocation35_spill] sm:$0xff]  ;;  %v14643_v5 = vld [vmem:[#allocation33_spill] sm:$0xff]  ;;  %v14644_v40 = vld [vmem:[#allocation38_spill] sm:$0xff] }
 0x623   :  { %v4842_v9 = vpop.f32.mrb[91].mxu1  ;;  %5111 = vmatprep.subr.bf16.mxu1 %v14635_v21  ;;  %v14645_v31 = vld [vmem:[#allocation36_spill] sm:$0xff]  ;;  %v14646_v17 = vld [vmem:[#allocation39_spill] sm:$0xff]  ;;  %v14652_v21 = vld [vmem:[#allocation46_spill] sm:$0xff] }
 0x624   :  { %v14648_v9 = vld [vmem:[#allocation42_spill] sm:$0xff] }
 0x625   :  { %5071 = vmatpush1.bf16.msra.mxu0 %v14636_v13  ;;  %v14647_v13 = vld [vmem:[#allocation37_spill] sm:$0xff] }
 0x626   :  { %5112 = vmatpush1.bf16.msra.mxu1 %v14637_v4  ;;  %5072 = vmatprep.subr.bf16.mxu0 %v14638_v58  ;;  %v14649_v58 = vld [vmem:[#allocation40_spill] sm:$0xff] }
 0x627   :  { %5113 = vmatprep.subr.bf16.mxu1 %v14639_v39  ;;  %v14650_v39 = vld [vmem:[#allocation43_spill] sm:$0xff]  ;;  %v14653_v4 = vld [vmem:[#allocation44_spill] sm:$0xff] }
 0x629   :  { %5073 = vmatpush1.bf16.msra.mxu0 %v14640_v34  ;;  %v14651_v34 = vld [vmem:[#allocation41_spill] sm:$0xff] }
 0x62a   :  { %5114 = vmatpush1.bf16.msra.mxu1 %v14641_v51  ;;  %5074 = vmatprep.subr.bf16.mxu0 %v14642_v30  ;;  %v14654_v51 = vld [vmem:[#allocation47_spill] sm:$0xff]  ;;  %v14655_v30 = vld [vmem:[#allocation45_spill] sm:$0xff] }
 0x62b   :  { %5115 = vmatprep.subr.bf16.mxu1 %v14643_v5  ;;  %v14656_v5 = vld [vmem:[#allocation50_spill] sm:$0xff] }
 0x62d   :  { %5075 = vmatpush1.bf16.msra.mxu0 %v14644_v40  ;;  %v14657_v40 = vld [vmem:[#allocation48_spill] sm:$0xff] }
 0x62e   :  { %5116 = vmatpush1.bf16.msra.mxu1 %v14645_v31  ;;  %5076 = vmatprep.subr.bf16.mxu0 %v14646_v17  ;;  %v14658_v31 = vld [vmem:[#allocation51_spill] sm:$0xff]  ;;  %v14659_v17 = vld [vmem:[#allocation49_spill] sm:$0xff] }
 0x62f   :  { %5117 = vmatprep.subr.bf16.mxu1 %v14647_v13  ;;  %v14660_v13 = vld [vmem:[#allocation54_spill] sm:$0xff] }
 0x631   :  { %5077 = vmatpush1.bf16.msra.mxu0 %v14648_v9  ;;  %v14661_v9 = vld [vmem:[#allocation52_spill] sm:$0xff] }
 0x632   :  { %5118 = vmatpush1.bf16.msra.mxu1 %v14649_v58  ;;  %5078 = vmatprep.subr.bf16.mxu0 %v14650_v39  ;;  %v14662_v58 = vld [vmem:[#allocation55_spill] sm:$0xff]  ;;  %v14663_v39 = vld [vmem:[#allocation53_spill] sm:$0xff] }
 0x633   :  { %5119 = vmatprep.subr.bf16.mxu1 %v14651_v34  ;;  %v14664_v34 = vld [vmem:[#allocation58_spill] sm:$0xff] }
 0x635   :  { %5079 = vmatpush1.bf16.msra.mxu0 %v14652_v21  ;;  %v14665_v21 = vld [vmem:[#allocation56_spill] sm:$0xff] }
 0x636   :  { %5120 = vmatpush1.bf16.msra.mxu1 %v14653_v4  ;;  %5080 = vmatprep.subr.bf16.mxu0 %v14654_v51  ;;  %v14666_v4 = vld [vmem:[#allocation59_spill] sm:$0xff]  ;;  %v14667_v51 = vld [vmem:[#allocation57_spill] sm:$0xff] }
 0x637   :  { %5121 = vmatprep.subr.bf16.mxu1 %v14655_v30  ;;  %v14668_v30 = vld [vmem:[#allocation62_spill] sm:$0xff] }
 0x639   :  { %5081 = vmatpush1.bf16.msra.mxu0 %v14656_v5  ;;  %v14669_v5 = vld [vmem:[#allocation60_spill] sm:$0xff] }
 0x63a   :  { %5122 = vmatpush1.bf16.msra.mxu1 %v14657_v40  ;;  %5082 = vmatprep.subr.bf16.mxu0 %v14658_v31  ;;  %v14670_v40 = vld [vmem:[#allocation63_spill] sm:$0xff]  ;;  %v14671_v31 = vld [vmem:[#allocation61_spill] sm:$0xff] }
 0x63b   :  { %5123 = vmatprep.subr.bf16.mxu1 %v14659_v17  ;;  %v14672_v17 = vld [vmem:[#allocation66_spill] sm:$0xff] }
 0x63d   :  { %5083 = vmatpush1.bf16.msra.mxu0 %v14660_v13  ;;  %v14673_v13 = vld [vmem:[#allocation64_spill] sm:$0xff] }
 0x63e   :  { %5124 = vmatpush1.bf16.msra.mxu1 %v14661_v9  ;;  %5084 = vmatprep.subr.bf16.mxu0 %v14662_v58  ;;  %v14674_v9 = vld [vmem:[#allocation67_spill] sm:$0xff]  ;;  %v14675_v58 = vld [vmem:[#allocation65_spill] sm:$0xff] }
 0x63f   :  { %5125 = vmatprep.subr.bf16.mxu1 %v14663_v39  ;;  %v14676_v39 = vld [vmem:[#allocation70_spill] sm:$0xff] }
 0x641   :  { %5085 = vmatpush1.bf16.msra.mxu0 %v14664_v34  ;;  %v14677_v34 = vld [vmem:[#allocation68_spill] sm:$0xff] }
 0x642   :  { %5126 = vmatpush1.bf16.msra.mxu1 %v14665_v21  ;;  %5136 = vmatprep.subr.bf16.mxu0 %v14666_v4  ;;  %v14678_v21 = vld [vmem:[#allocation71_spill] sm:$0xff]  ;;  %v14679_v4 = vld [vmem:[#allocation69_spill] sm:$0xff] }
 0x643   :  { %5177 = vmatprep.subr.bf16.mxu1 %v14667_v51  ;;  %v14681_v51 = vld [vmem:[#allocation72_spill] sm:$0xff] }
 0x644   :  { %5087 = vmatmul.mubr.bf16.vlgmr.msra.gmra.mrb[92].mxu0 %v11419_v27 }
 0x645   :  { %5128 = vmatmul.mubr.bf16.vlgmr.msra.gmra.mrb[100].mxu1 %v11419_v27  ;;  %5137 = vmatpush1.bf16.msra.mxu0 %v14668_v30  ;;  %v14682_v30 = vld [vmem:[#allocation75_spill] sm:$0xff] }
 0x646   :  { %5168 = vmatprep.mubr.bf16.mxu0 %v11417_v61  ;;  %5178 = vmatpush1.bf16.msra.mxu1 %v14669_v5  ;;  %v14683_v5 = vld [vmem:[#allocation73_spill] sm:$0xff] }
 0x647   :  { %5209 = vmatprep.mubr.bf16.mxu1 %v11417_v61  ;;  %5138 = vmatprep.subr.bf16.mxu0 %v14670_v40  ;;  %v14680_v61 = vld [vmem:[#allocation74_spill] sm:$0xff] }
 0x648   :  { %5179 = vmatprep.subr.bf16.mxu1 %v14671_v31  ;;  %v14684_v40 = vld [vmem:[#allocation78_spill] sm:$0xff]  ;;  %v14685_v31 = vld [vmem:[#allocation76_spill] sm:$0xff] }
 0x649   :  { %5139 = vmatpush1.bf16.msra.mxu0 %v14672_v17  ;;  %v14686_v17 = vld [vmem:[#allocation79_spill] sm:$0xff] }
 0x64a   :  { %5180 = vmatpush1.bf16.msra.mxu1 %v14673_v13  ;;  %5140 = vmatprep.subr.bf16.mxu0 %v14674_v9  ;;  %v14687_v13 = vld [vmem:[#allocation77_spill] sm:$0xff]  ;;  %v14688_v9 = vld [vmem:[#allocation82_spill] sm:$0xff] }
 0x64b   :  { %5181 = vmatprep.subr.bf16.mxu1 %v14675_v58  ;;  %v14689_v58 = vld [vmem:[#allocation80_spill] sm:$0xff] }
 0x64d   :  { %5141 = vmatpush1.bf16.msra.mxu0 %v14676_v39  ;;  %v14690_v39 = vld [vmem:[#allocation83_spill] sm:$0xff] }
 0x64e   :  { %5182 = vmatpush1.bf16.msra.mxu1 %v14677_v34  ;;  %5142 = vmatprep.subr.bf16.mxu0 %v14678_v21  ;;  %v14691_v34 = vld [vmem:[#allocation81_spill] sm:$0xff]  ;;  %v14692_v21 = vld [vmem:[#allocation86_spill] sm:$0xff] }
 0x64f   :  { %5183 = vmatprep.subr.bf16.mxu1 %v14679_v4  ;;  %v14693_v4 = vld [vmem:[#allocation84_spill] sm:$0xff] }
 0x651   :  { %5143 = vmatpush1.bf16.msra.mxu0 %v14680_v61  ;;  %v14694_v61 = vld [vmem:[#allocation87_spill] sm:$0xff] }
 0x652   :  { %5184 = vmatpush1.bf16.msra.mxu1 %v14681_v51  ;;  %5144 = vmatprep.subr.bf16.mxu0 %v14682_v30  ;;  %v14695_v51 = vld [vmem:[#allocation85_spill] sm:$0xff]  ;;  %v14696_v30 = vld [vmem:[#allocation90_spill] sm:$0xff] }
 0x653   :  { %5185 = vmatprep.subr.bf16.mxu1 %v14683_v5  ;;  %v14697_v5 = vld [vmem:[#allocation88_spill] sm:$0xff] }
 0x655   :  { %5145 = vmatpush1.bf16.msra.mxu0 %v14684_v40  ;;  %v14698_v40 = vld [vmem:[#allocation91_spill] sm:$0xff] }
 0x656   :  { %5186 = vmatpush1.bf16.msra.mxu1 %v14685_v31  ;;  %5146 = vmatprep.subr.bf16.mxu0 %v14686_v17  ;;  %v14699_v31 = vld [vmem:[#allocation89_spill] sm:$0xff]  ;;  %v14700_v17 = vld [vmem:[#allocation94_spill] sm:$0xff] }
 0x657   :  { %5187 = vmatprep.subr.bf16.mxu1 %v14687_v13  ;;  %v14701_v13 = vld [vmem:[#allocation92_spill] sm:$0xff] }
 0x659   :  { %5147 = vmatpush1.bf16.msra.mxu0 %v14688_v9  ;;  %v14702_v9 = vld [vmem:[#allocation95_spill] sm:$0xff] }
 0x65a   :  { %5188 = vmatpush1.bf16.msra.mxu1 %v14689_v58  ;;  %5148 = vmatprep.subr.bf16.mxu0 %v14690_v39  ;;  %v14703_v58 = vld [vmem:[#allocation93_spill] sm:$0xff]  ;;  %v14704_v39 = vld [vmem:[#allocation98_spill] sm:$0xff] }
 0x65b   :  { %5189 = vmatprep.subr.bf16.mxu1 %v14691_v34  ;;  %v14705_v34 = vld [vmem:[#allocation96_spill] sm:$0xff] }
 0x65d   :  { %5149 = vmatpush1.bf16.msra.mxu0 %v14692_v21  ;;  %v14706_v21 = vld [vmem:[#allocation99_spill] sm:$0xff] }
 0x65e   :  { %5190 = vmatpush1.bf16.msra.mxu1 %v14693_v4  ;;  %5150 = vmatprep.subr.bf16.mxu0 %v14694_v61  ;;  %v14707_v4 = vld [vmem:[#allocation97_spill] sm:$0xff]  ;;  %v14708_v61 = vld [vmem:[#allocation102_spill] sm:$0xff] }
 0x65f   :  { %5191 = vmatprep.subr.bf16.mxu1 %v14695_v51  ;;  %v14709_v51 = vld [vmem:[#allocation100_spill] sm:$0xff] }
 0x661   :  { %5151 = vmatpush1.bf16.msra.mxu0 %v14696_v30  ;;  %v14710_v30 = vld [vmem:[#allocation103_spill] sm:$0xff] }
 0x662   :  { %5192 = vmatpush1.bf16.msra.mxu1 %v14697_v5  ;;  %5152 = vmatprep.subr.bf16.mxu0 %v14698_v40  ;;  %v14711_v5 = vld [vmem:[#allocation101_spill] sm:$0xff]  ;;  %v14712_v40 = vld [vmem:[#allocation106_spill] sm:$0xff] }
 0x663   :  { %5193 = vmatprep.subr.bf16.mxu1 %v14699_v31  ;;  %v14713_v31 = vld [vmem:[#allocation104_spill] sm:$0xff] }
 0x665   :  { %5153 = vmatpush1.bf16.msra.mxu0 %v14700_v17  ;;  %v14714_v17 = vld [vmem:[#allocation107_spill] sm:$0xff] }
 0x666   :  { %5194 = vmatpush1.bf16.msra.mxu1 %v14701_v13  ;;  %5154 = vmatprep.subr.bf16.mxu0 %v14702_v9  ;;  %v14715_v13 = vld [vmem:[#allocation105_spill] sm:$0xff]  ;;  %v14716_v9 = vld [vmem:[#allocation110_spill] sm:$0xff] }
 0x667   :  { %5195 = vmatprep.subr.bf16.mxu1 %v14703_v58  ;;  %v14717_v58 = vld [vmem:[#allocation108_spill] sm:$0xff] }
 0x669   :  { %5155 = vmatpush1.bf16.msra.mxu0 %v14704_v39  ;;  %v14718_v39 = vld [vmem:[#allocation111_spill] sm:$0xff] }
 0x66a   :  { %5196 = vmatpush1.bf16.msra.mxu1 %v14705_v34  ;;  %5156 = vmatprep.subr.bf16.mxu0 %v14706_v21  ;;  %v14719_v34 = vld [vmem:[#allocation109_spill] sm:$0xff]  ;;  %v14720_v21 = vld [vmem:[#allocation114_spill] sm:$0xff] }
 0x66b   :  { %5197 = vmatprep.subr.bf16.mxu1 %v14707_v4  ;;  %v14721_v4 = vld [vmem:[#allocation112_spill] sm:$0xff] }
 0x66d   :  { %5157 = vmatpush1.bf16.msra.mxu0 %v14708_v61  ;;  %v14722_v61 = vld [vmem:[#allocation115_spill] sm:$0xff] }
 0x66e   :  { %5198 = vmatpush1.bf16.msra.mxu1 %v14709_v51  ;;  %5158 = vmatprep.subr.bf16.mxu0 %v14710_v30  ;;  %v14723_v51 = vld [vmem:[#allocation113_spill] sm:$0xff]  ;;  %v14724_v30 = vld [vmem:[#allocation118_spill] sm:$0xff] }
 0x66f   :  { %5199 = vmatprep.subr.bf16.mxu1 %v14711_v5  ;;  %v14725_v5 = vld [vmem:[#allocation116_spill] sm:$0xff] }
 0x671   :  { %5159 = vmatpush1.bf16.msra.mxu0 %v14712_v40  ;;  %v14726_v40 = vld [vmem:[#allocation119_spill] sm:$0xff] }
 0x672   :  { %5200 = vmatpush1.bf16.msra.mxu1 %v14713_v31  ;;  %5160 = vmatprep.subr.bf16.mxu0 %v14714_v17  ;;  %v14727_v31 = vld [vmem:[#allocation117_spill] sm:$0xff]  ;;  %v14728_v17 = vld [vmem:[#allocation122_spill] sm:$0xff] }
 0x673   :  { %5201 = vmatprep.subr.bf16.mxu1 %v14715_v13  ;;  %v14729_v13 = vld [vmem:[#allocation120_spill] sm:$0xff] }
 0x675   :  { %5161 = vmatpush1.bf16.msra.mxu0 %v14716_v9  ;;  %v14730_v9 = vld [vmem:[#allocation121_spill] sm:$0xff] }
 0x676   :  { %5202 = vmatpush1.bf16.msra.mxu1 %v14717_v58  ;;  %5162 = vmatprep.subr.bf16.mxu0 %v14718_v39  ;;  %v14731_v58 = vld [vmem:[#allocation153_spill] sm:$0xff]  ;;  %v14732_v39 = vld [vmem:[#allocation124_spill] sm:$0xff] }
 0x677   :  { %5203 = vmatprep.subr.bf16.mxu1 %v14719_v34  ;;  %v14733_v34 = vld [vmem:[#allocation156_spill] sm:$0xff] }
 0x679   :  { %5163 = vmatpush1.bf16.msra.mxu0 %v14720_v21  ;;  %v14734_v21 = vld [vmem:[#allocation125_spill] sm:$0xff] }
 0x67a   :  { %5204 = vmatpush1.bf16.msra.mxu1 %v14721_v4  ;;  %5164 = vmatprep.subr.bf16.mxu0 %v14722_v61  ;;  %v14735_v4 = vld [vmem:[#allocation157_spill] sm:$0xff]  ;;  %v14736_v61 = vld [vmem:[#allocation128_spill] sm:$0xff] }
 0x67b   :  { %5205 = vmatprep.subr.bf16.mxu1 %v14723_v51  ;;  %v14737_v51 = vld [vmem:[#allocation160_spill] sm:$0xff] }
 0x67d   :  { %5165 = vmatpush1.bf16.msra.mxu0 %v14724_v30  ;;  %v14738_v30 = vld [vmem:[#allocation129_spill] sm:$0xff] }
 0x67e   :  { %5206 = vmatpush1.bf16.msra.mxu1 %v14725_v5  ;;  %5166 = vmatprep.subr.bf16.mxu0 %v14726_v40  ;;  %v14739_v5 = vld [vmem:[#allocation161_spill] sm:$0xff]  ;;  %v14741_v40 = vld [vmem:[#allocation164_spill] sm:$0xff] }
 0x67f   :  { %5207 = vmatprep.subr.bf16.mxu1 %v14727_v31  ;;  %v14742_v31 = vld [vmem:[#allocation133_spill] sm:$0xff] }
 0x681   :  { %5167 = vmatpush1.bf16.msra.mxu0 %v14728_v17  ;;  %v14743_v17 = vld [vmem:[#allocation165_spill] sm:$0xff] }
 0x682   :  { %5208 = vmatpush1.bf16.msra.mxu1 %v14729_v13  ;;  %5218 = vmatprep.subr.bf16.mxu0 %v14730_v9  ;;  %v14744_v13 = vld [vmem:[#allocation136_spill] sm:$0xff] }
 0x683   :  { %5259 = vmatprep.subr.bf16.mxu1 %v14731_v58  ;;  %v14745_v9 = vld [vmem:[#allocation168_spill] sm:$0xff]  ;;  %v14746_v58 = vld [vmem:[#allocation137_spill] sm:$0xff] }
 0x684   :  { %5169 = vmatmul.mubr.bf16.vlgmr.msra.gmra.mrb[96].mxu0 %v11419_v27 }
 0x685   :  { %5210 = vmatmul.mubr.bf16.vlgmr.msra.gmra.mrb[104].mxu1 %v11419_v27  ;;  %5219 = vmatpush1.bf16.msra.mxu0 %v14732_v39  ;;  %v14740_v27 = vld [vmem:[#allocation132_spill] sm:$0xff]  ;;  %v14747_v39 = vld [vmem:[#allocation169_spill] sm:$0xff] }
 0x686   :  { %5260 = vmatpush1.bf16.msra.mxu1 %v14733_v34  ;;  %5220 = vmatprep.subr.bf16.mxu0 %v14734_v21  ;;  %v14748_v34 = vld [vmem:[#allocation140_spill] sm:$0xff] }
 0x687   :  { %5261 = vmatprep.subr.bf16.mxu1 %v14735_v4  ;;  %5250 = vmatprep.mubr.bf16.mxu0 %v13871_v7  ;;  %v14749_v21 = vld [vmem:[#allocation172_spill] sm:$0xff]  ;;  %v14750_v4 = vld [vmem:[#allocation141_spill] sm:$0xff] }
 0x688   :  { %5291 = vmatprep.mubr.bf16.mxu1 %v13871_v7 }
 0x689   :  { %5221 = vmatpush1.bf16.msra.mxu0 %v14736_v61 }
 0x68a   :  { %5262 = vmatpush1.bf16.msra.mxu1 %v14737_v51  ;;  %5222 = vmatprep.subr.bf16.mxu0 %v14738_v30  ;;  %v14751_v30 = vld [vmem:[#allocation173_spill] sm:$0xff] }
 0x68b   :  { %5263 = vmatprep.subr.bf16.mxu1 %v14739_v5 }
 0x68d   :  { %5223 = vmatpush1.bf16.msra.mxu0 %v14740_v27 }
 0x68e   :  { %5264 = vmatpush1.bf16.msra.mxu1 %v14741_v40  ;;  %5224 = vmatprep.subr.bf16.mxu0 %v14742_v31 }
 0x68f   :  { %5265 = vmatprep.subr.bf16.mxu1 %v14743_v17 }
 0x691   :  { %5225 = vmatpush1.bf16.msra.mxu0 %v14744_v13 }
 0x692   :  { %5266 = vmatpush1.bf16.msra.mxu1 %v14745_v9  ;;  %5226 = vmatprep.subr.bf16.mxu0 %v14746_v58  ;;  %v14752_v9 = vld [vmem:[#allocation144_spill] sm:$0xff] }
 0x693   :  { %5267 = vmatprep.subr.bf16.mxu1 %v14747_v39 }
 0x695   :  { %5227 = vmatpush1.bf16.msra.mxu0 %v14748_v34  ;;  %v14753_v34 = vld [vmem:[#allocation176_spill] sm:$0xff] }
 0x696   :  { %5268 = vmatpush1.bf16.msra.mxu1 %v14749_v21  ;;  %5228 = vmatprep.subr.bf16.mxu0 %v14750_v4  ;;  %v14754_v4 = vld [vmem:[#allocation145_spill] sm:$0xff] }
 0x697   :  { %v4878_v61 = vpop.f32.mrb[84].mxu0  ;;  %v4919_v51 = vpop.f32.mrb[92].mxu1  ;;  %5269 = vmatprep.subr.bf16.mxu1 %v14751_v30  ;;  %v14760_v30 = vld [vmem:[#allocation152_spill] sm:$0xff] }
 0x698   :  { %v11668_v5 = vadd.f32 %v4878_v61, %v11455_v53  ;;  %v11671_v27 = vadd.f32 %v4919_v51, %v11457_v59  ;;  %v4880_v40 = vpop.f32.mrb[85].mxu0  ;;  %v4921_v31 = vpop.f32.mrb[93].mxu1  ;;  %v14755_v59 = vld [vmem:[#allocation177_spill] sm:$0xff]  ;;  %v14756_v61 = vld [vmem:[#allocation148_spill] sm:$0xff] }
 0x699   :  { %v11674_v17 = vadd.f32 %v4880_v40, %v11459_v44  ;;  %v11677_v13 = vadd.f32 %v4921_v31, %v11461_v49  ;;  %5229 = vmatpush1.bf16.msra.mxu0 %v14752_v9  ;;  %v4882_v58 = vpop.f32.mrb[86].mxu0  ;;  %v4923_v39 = vpop.f32.mrb[94].mxu1  ;;  %v14757_v51 = vld [vmem:[#allocation180_spill] sm:$0xff]  ;;  %v14758_v44 = vld [vmem:[#allocation149_spill] sm:$0xff]  ;;  %v7024_v40 = vld [vmem:[%s12398_s0 + $0x3] sm:$0x1] }
 0x69a   :  { %5270 = vmatpush1.bf16.msra.mxu1 %v14753_v34  ;;  %v4883_v21 = vpop.f32.mrb[87].mxu0  ;;  %v4924_v53 = vpop.f32.mrb[95].mxu1  ;;  %5230 = vmatprep.subr.bf16.mxu0 %v14754_v4  ;;  %v14759_v49 = vld [vmem:[#allocation181_spill] sm:$0xff]  ;;  %v14761_v31 = vld [vmem:[#allocation184_spill] sm:$0xff]  ;;  %v14762_v9 = vld [vmem:[#allocation123_spill] sm:$0xff] }
 0x69b   :  { %5271 = vmatprep.subr.bf16.mxu1 %v14755_v59  ;;  %v14763_v58 = vld [vmem:[#allocation185_spill] sm:$0xff]  ;;  %v14764_v39 = vld [vmem:[#allocation126_spill] sm:$0xff]  ;;  %v14765_v34 = vld [vmem:[#allocation188_spill] sm:$0xff] }
 0x69c   :  { %v14766_v21 = vld [vmem:[#allocation127_spill] sm:$0xff]  ;;  %v14767_v53 = vld [vmem:[#allocation189_spill] sm:$0xff]  ;;  %v14768_v4 = vld [vmem:[#allocation130_spill] sm:$0xff] }
 0x69d   :  { %5231 = vmatpush1.bf16.msra.mxu0 %v14756_v61  ;;  %v14769_v59 = vld [vmem:[#allocation192_spill] sm:$0xff]  ;;  %v14770_v61 = vld [vmem:[#allocation131_spill] sm:$0xff] }
 0x69e   :  { %5272 = vmatpush1.bf16.msra.mxu1 %v14757_v51  ;;  %5232 = vmatprep.subr.bf16.mxu0 %v14758_v44  ;;  %v14771_v51 = vld [vmem:[#allocation193_spill] sm:$0xff]  ;;  %v14772_v44 = vld [vmem:[#allocation134_spill] sm:$0xff] }
 0x69f   :  { %5273 = vmatprep.subr.bf16.mxu1 %v14759_v49  ;;  %v14773_v49 = vld [vmem:[#allocation196_spill] sm:$0xff] }
 0x6a1   :  { %5233 = vmatpush1.bf16.msra.mxu0 %v14760_v30  ;;  %v14774_v30 = vld [vmem:[#allocation135_spill] sm:$0xff] }
 0x6a2   :  { %5274 = vmatpush1.bf16.msra.mxu1 %v14761_v31  ;;  %5300 = vmatprep.subr.bf16.mxu0 %v14762_v9  ;;  %v14775_v31 = vld [vmem:[#allocation197_spill] sm:$0xff]  ;;  %v14776_v9 = vld [vmem:[#allocation138_spill] sm:$0xff] }
 0x6a3   :  { %5341 = vmatprep.subr.bf16.mxu1 %v14763_v58  ;;  %v14777_v58 = vld [vmem:[#allocation200_spill] sm:$0xff] }
 0x6a4   :  { %5251 = vmatmul.mubr.bf16.vlgmr.msra.gmra.mrb[100].mxu0 %v7024_v40 }
 0x6a5   :  { %5292 = vmatmul.mubr.bf16.vlgmr.msra.gmra.mrb[108].mxu1 %v7024_v40  ;;  %5301 = vmatpush1.bf16.msra.mxu0 %v14764_v39  ;;  %v14779_v39 = vld [vmem:[#allocation201_spill] sm:$0xff] }
 0x6a6   :  { %5342 = vmatpush1.bf16.msra.mxu1 %v14765_v34  ;;  %5302 = vmatprep.subr.bf16.mxu0 %v14766_v21  ;;  %v14780_v34 = vld [vmem:[#allocation142_spill] sm:$0xff]  ;;  %v14781_v21 = vld [vmem:[#allocation204_spill] sm:$0xff] }
 0x6a7   :  { %5343 = vmatprep.subr.bf16.mxu1 %v14767_v53  ;;  %5332 = vmatprep.mubr.bf16.mxu0 %v13871_v7  ;;  %v14782_v53 = vld [vmem:[#allocation143_spill] sm:$0xff] }
 0x6a8   :  { %5373 = vmatprep.mubr.bf16.mxu1 %v13871_v7  ;;  %v14778_v7 = vld [vmem:[#allocation139_spill] sm:$0xff] }
 0x6a9   :  { %5303 = vmatpush1.bf16.msra.mxu0 %v14768_v4  ;;  %v14783_v4 = vld [vmem:[#allocation205_spill] sm:$0xff] }
 0x6aa   :  { %5344 = vmatpush1.bf16.msra.mxu1 %v14769_v59  ;;  %5304 = vmatprep.subr.bf16.mxu0 %v14770_v61  ;;  %v14784_v59 = vld [vmem:[#allocation146_spill] sm:$0xff]  ;;  %v14785_v61 = vld [vmem:[#allocation208_spill] sm:$0xff] }
 0x6ab   :  { %5345 = vmatprep.subr.bf16.mxu1 %v14771_v51  ;;  %v14786_v51 = vld [vmem:[#allocation147_spill] sm:$0xff] }
 0x6ad   :  { %5305 = vmatpush1.bf16.msra.mxu0 %v14772_v44  ;;  %v14787_v44 = vld [vmem:[#allocation209_spill] sm:$0xff] }
 0x6ae   :  { %5346 = vmatpush1.bf16.msra.mxu1 %v14773_v49  ;;  %5306 = vmatprep.subr.bf16.mxu0 %v14774_v30  ;;  %v14788_v49 = vld [vmem:[#allocation150_spill] sm:$0xff]  ;;  %v14789_v30 = vld [vmem:[#allocation212_spill] sm:$0xff] }
 0x6af   :  { %5347 = vmatprep.subr.bf16.mxu1 %v14775_v31  ;;  %v14790_v31 = vld [vmem:[#allocation151_spill] sm:$0xff] }
 0x6b1   :  { %5307 = vmatpush1.bf16.msra.mxu0 %v14776_v9  ;;  %v14791_v9 = vld [vmem:[#allocation213_spill] sm:$0xff] }
 0x6b2   :  { %5348 = vmatpush1.bf16.msra.mxu1 %v14777_v58  ;;  %5308 = vmatprep.subr.bf16.mxu0 %v14778_v7  ;;  %v14792_v58 = vld [vmem:[#allocation154_spill] sm:$0xff]  ;;  %v14793_v7 = vld [vmem:[#allocation216_spill] sm:$0xff] }
 0x6b3   :  { %5349 = vmatprep.subr.bf16.mxu1 %v14779_v39  ;;  %v14794_v39 = vld [vmem:[#allocation155_spill] sm:$0xff] }
 0x6b5   :  { %5309 = vmatpush1.bf16.msra.mxu0 %v14780_v34  ;;  %v14795_v34 = vld [vmem:[#allocation217_spill] sm:$0xff] }
 0x6b6   :  { %5350 = vmatpush1.bf16.msra.mxu1 %v14781_v21  ;;  %5310 = vmatprep.subr.bf16.mxu0 %v14782_v53  ;;  %v14796_v21 = vld [vmem:[#allocation158_spill] sm:$0xff]  ;;  %v14797_v53 = vld [vmem:[#allocation220_spill] sm:$0xff] }
 0x6b7   :  { %5351 = vmatprep.subr.bf16.mxu1 %v14783_v4  ;;  %v14798_v4 = vld [vmem:[#allocation159_spill] sm:$0xff] }
 0x6b9   :  { %5311 = vmatpush1.bf16.msra.mxu0 %v14784_v59  ;;  %v14799_v59 = vld [vmem:[#allocation221_spill] sm:$0xff] }
 0x6ba   :  { %5352 = vmatpush1.bf16.msra.mxu1 %v14785_v61  ;;  %5312 = vmatprep.subr.bf16.mxu0 %v14786_v51  ;;  %v14800_v61 = vld [vmem:[#allocation162_spill] sm:$0xff]  ;;  %v14801_v51 = vld [vmem:[#allocation456_spill] sm:$0xff] }
 0x6bb   :  { %5353 = vmatprep.subr.bf16.mxu1 %v14787_v44  ;;  %v5010_v44 = vadd.f32 %v11671_v27, %v14801_v51  ;;  %v14810_v27 = vld [vmem:[#allocation167_spill] sm:$0xff] }
 0x6bd   :  { %5313 = vmatpush1.bf16.msra.mxu0 %v14788_v49  ;;  %v14802_v49 = vld [vmem:[#allocation224_spill] sm:$0xff] }
 0x6be   :  { %5354 = vmatpush1.bf16.msra.mxu1 %v14789_v30  ;;  %5314 = vmatprep.subr.bf16.mxu0 %v14790_v31  ;;  %v14803_v30 = vld [vmem:[#allocation163_spill] sm:$0xff]  ;;  %v14804_v31 = vld [vmem:[#allocation457_spill] sm:$0xff] }
 0x6bf   :  { %5355 = vmatprep.subr.bf16.mxu1 %v14791_v9  ;;  %v14805_v9 = vld [vmem:[#allocation225_spill] sm:$0xff] }
 0x6c1   :  { %5315 = vmatpush1.bf16.msra.mxu0 %v14792_v58  ;;  %v14806_v58 = vld [vmem:[#allocation458_spill] sm:$0xff] }
 0x6c2   :  { %5356 = vmatpush1.bf16.msra.mxu1 %v14793_v7  ;;  %5430 = vmatprep.subr.bf16.mxu0 %v14794_v39  ;;  %v5008_v7 = vadd.f32 %v11668_v5, %v14806_v58  ;;  %v14807_v39 = vld [vmem:[#allocation459_spill] sm:$0xff]  ;;  %v14840_v58 = vld [vmem:[#allocation253_spill] sm:$0xff] }
 0x6c3   :  { %5471 = vmatprep.subr.bf16.mxu1 %v14795_v34  ;;  %v5009_v34 = vadd.f32 %v11674_v17, %v14807_v39  ;;  %v14814_v5 = vld [vmem:[#allocation171_spill] sm:$0xff]  ;;  %v14815_v17 = vld [vmem:[#allocation233_spill] sm:$0xff] }
 0x6c4   :  { %5333 = vmatmul.mubr.bf16.vlgmr.msra.gmra.mrb[104].mxu0 %v7024_v40  ;;  %v14823_v39 = vld [vmem:[#allocation179_spill] sm:$0xff] }
 0x6c5   :  { %5374 = vmatmul.mubr.bf16.vlgmr.msra.gmra.mrb[112].mxu1 %v7024_v40  ;;  %5431 = vmatpush1.bf16.msra.mxu0 %v14796_v21  ;;  %v5011_v40 = vadd.f32 %v11677_v13, %v14804_v31  ;;  %v14808_v21 = vld [vmem:[#allocation166_spill] sm:$0xff]  ;;  %v5017_v13 = vmul.f32 0.5, %v5009_v34  ;;  %v14990_v31 = vld [vmem:[#allocation340_spill] sm:$0xff] }
 0x6c6   :  { %5472 = vmatpush1.bf16.msra.mxu1 %v14797_v53  ;;  %5432 = vmatprep.subr.bf16.mxu0 %v14798_v4  ;;  %v5024_v53 = vmul.f32 0.5, %v5010_v44  ;;  %v14809_v4 = vld [vmem:[#allocation228_spill] sm:$0xff]  ;;  %v14816_v44 = vld [vmem:[#allocation174_spill] sm:$0xff] }
 0x6c7   :  { %5473 = vmatprep.subr.bf16.mxu1 %v14799_v59  ;;  %v5025_v59 = vmul.f32 0.5, %v5011_v40  ;;  %v14818_v40 = vld [vmem:[#allocation175_spill] sm:$0xff] }
 0x6c8   :  { %7368 = vtanh.f32 %v5024_v53 }
 0x6c9   :  { %5433 = vmatpush1.bf16.msra.mxu0 %v14800_v61  ;;  %v14811_v61 = vld [vmem:[#allocation229_spill] sm:$0xff]  ;;  %7370 = vtanh.f32 %v5025_v59 }
 0x6ca   :  { %5474 = vmatpush1.bf16.msra.mxu1 %v14802_v49  ;;  %5434 = vmatprep.subr.bf16.mxu0 %v14803_v30  ;;  %v5016_v49 = vmul.f32 0.5, %v5008_v7  ;;  %v14812_v30 = vld [vmem:[#allocation170_spill] sm:$0xff] }
 0x6cb   :  { %5475 = vmatprep.subr.bf16.mxu1 %v14805_v9  ;;  %v14813_v9 = vld [vmem:[#allocation232_spill] sm:$0xff] }
 0x6cc   :  { %7372 = vtanh.f32 %v5016_v49 }
 0x6cd   :  { %5435 = vmatpush1.bf16.msra.mxu0 %v14808_v21  ;;  %7374 = vtanh.f32 %v5017_v13  ;;  %v14817_v21 = vld [vmem:[#allocation236_spill] sm:$0xff] }
 0x6ce   :  { %5476 = vmatpush1.bf16.msra.mxu1 %v14809_v4  ;;  %5436 = vmatprep.subr.bf16.mxu0 %v14810_v27  ;;  %v14819_v4 = vld [vmem:[#allocation237_spill] sm:$0xff] }
 0x6cf   :  { %5477 = vmatprep.subr.bf16.mxu1 %v14811_v61 }
 0x6d1   :  { %5437 = vmatpush1.bf16.msra.mxu0 %v14812_v30 }
 0x6d2   :  { %5478 = vmatpush1.bf16.msra.mxu1 %v14813_v9  ;;  %5438 = vmatprep.subr.bf16.mxu0 %v14814_v5  ;;  %v14820_v5 = vld [vmem:[#allocation178_spill] sm:$0xff] }
 0x6d3   :  { %5479 = vmatprep.subr.bf16.mxu1 %v14815_v17  ;;  %v14821_v17 = vld [vmem:[#allocation460_spill] sm:$0xff] }
 0x6d5   :  { %5439 = vmatpush1.bf16.msra.mxu0 %v14816_v44 }
 0x6d6   :  { %5480 = vmatpush1.bf16.msra.mxu1 %v14817_v21  ;;  %5440 = vmatprep.subr.bf16.mxu0 %v14818_v40  ;;  %v14822_v21 = vld [vmem:[#allocation240_spill] sm:$0xff] }
 0x6d7   :  { %v4960_v7 = vpop.f32.mrb[88].mxu0  ;;  %v5001_v34 = vpop.f32.mrb[96].mxu1  ;;  %5481 = vmatprep.subr.bf16.mxu1 %v14819_v4 }
 0x6d8   :  { %v4961_v53 = vadd.f32 %v4960_v7, %v11530_v16  ;;  %v5002_v27 = vadd.f32 %v5001_v34, %v11533_v10  ;;  %v4962_v61 = vpop.f32.mrb[89].mxu0  ;;  %v5003_v59 = vpop.f32.mrb[97].mxu1  ;;  %v14824_v16 = vld [vmem:[#allocation461_spill] sm:$0xff] }
 0x6d9   :  { %v4963_v30 = vadd.f32 %v4962_v61, %v11535_v37  ;;  %v5004_v49 = vadd.f32 %v5003_v59, %v11537_v11  ;;  %v4964_v13 = vpop.f32.mrb[90].mxu0  ;;  %v5005_v9 = vpop.f32.mrb[98].mxu1  ;;  %5441 = vmatpush1.bf16.msra.mxu0 %v14820_v5  ;;  %v14825_v7 = vld [vmem:[#allocation241_spill] sm:$0xff]  ;;  %v14826_v37 = vld [vmem:[#allocation462_spill] sm:$0xff] }
 0x6da   :  { %v5012_v44 = vadd.f32 %v4961_v53, %v14821_v17  ;;  %5482 = vmatpush1.bf16.msra.mxu1 %v14822_v21  ;;  %v4965_v40 = vpop.f32.mrb[91].mxu0  ;;  %v5006_v4 = vpop.f32.mrb[99].mxu1  ;;  %5442 = vmatprep.subr.bf16.mxu0 %v14823_v39  ;;  %v14827_v59 = vld [vmem:[#allocation182_spill] sm:$0xff]  ;;  %v14828_v53 = vld [vmem:[#allocation244_spill] sm:$0xff]  ;;  %v14829_v9 = vld [vmem:[#allocation183_spill] sm:$0xff] }
 0x6db   :  { %v5013_v10 = vadd.f32 %v4963_v30, %v14824_v16  ;;  %5483 = vmatprep.subr.bf16.mxu1 %v14825_v7  ;;  %v7369_v34 = vpop.eup %7368  ;;  %v5015_v11 = vadd.f32 %v5004_v49, %v14826_v37  ;;  %v14830_v39 = vld [vmem:[#allocation245_spill] sm:$0xff]  ;;  %v14831_v7 = vld [vmem:[#allocation186_spill] sm:$0xff]  ;;  %v14832_v49 = vld [vmem:[#allocation248_spill] sm:$0xff] }
 0x6dc   :  { %7376 = vtanh.f32 %v5012_v44  ;;  %v7371_v61 = vpop.eup %7370  ;;  %v5028_v21 = vmul.f32 0.5, %v7369_v34  ;;  %v14834_v37 = vld [vmem:[#allocation463_spill] sm:$0xff]  ;;  %v14836_v17 = vld [vmem:[#allocation190_spill] sm:$0xff] }
 0x6dd   :  { %7378 = vtanh.f32 %v5013_v10  ;;  %5443 = vmatpush1.bf16.msra.mxu0 %v14827_v59  ;;  %v7373_v13 = vpop.eup %7372  ;;  %v5029_v30 = vmul.f32 0.5, %v7371_v61  ;;  %v5035_v40 = vmul.f32 0.5, %v5015_v11  ;;  %v14833_v10 = vld [vmem:[#allocation187_spill] sm:$0xff]  ;;  %v5014_v16 = vadd.f32 %v5002_v27, %v14834_v37 }
 0x6de   :  { %5484 = vmatpush1.bf16.msra.mxu1 %v14828_v53  ;;  %5444 = vmatprep.subr.bf16.mxu0 %v14829_v9  ;;  %v7375_v5 = vpop.eup %7374  ;;  %v5020_v4 = vmul.f32 0.5, %v7373_v13  ;;  %v5030_v59 = vadd.f32 0.5, %v5028_v21  ;;  %v14835_v53 = vld [vmem:[#allocation249_spill] sm:$0xff]  ;;  %v14837_v13 = vld [vmem:[#allocation252_spill] sm:$0xff]  ;;  %v14841_v27 = vld [vmem:[#allocation395_spill] sm:$0xff] }
 0x6df   :  { %5485 = vmatprep.subr.bf16.mxu1 %v14830_v39  ;;  %v5021_v44 = vmul.f32 0.5, %v7375_v5  ;;  %v5031_v9 = vadd.f32 0.5, %v5029_v30  ;;  %7380 = vtanh.f32 %v5035_v40  ;;  %v14838_v39 = vld [vmem:[#allocation191_spill] sm:$0xff]  ;;  %v5034_v21 = vmul.f32 0.5, %v5014_v16  ;;  %v14848_v16 = vld [vmem:[#allocation198_spill] sm:$0xff] }
 0x6e0   :  { %v5022_v34 = vadd.f32 0.5, %v5020_v4  ;;  %v14843_v4 = vld [vmem:[#allocation194_spill] sm:$0xff] }
 0x6e1   :  { %5445 = vmatpush1.bf16.msra.mxu0 %v14831_v7  ;;  %v5023_v11 = vadd.f32 0.5, %v5021_v44  ;;  %v14839_v7 = vld [vmem:[#allocation394_spill] sm:$0xff]  ;;  %v14845_v44 = vld [vmem:[#allocation256_spill] sm:$0xff]  ;;  %7382 = vtanh.f32 %v5034_v21 }
 0x6e2   :  { %5486 = vmatpush1.bf16.msra.mxu1 %v14832_v49  ;;  %5446 = vmatprep.subr.bf16.mxu0 %v14833_v10  ;;  %v5042_v49 = vmul.f32 %v5030_v59, %v14839_v7  ;;  %v14849_v59 = vld [vmem:[#allocation260_spill] sm:$0xff]  ;;  %v14854_v7 = vld [vmem:[#allocation203_spill] sm:$0xff] }
 0x6e3   :  { %5487 = vmatprep.subr.bf16.mxu1 %v14835_v53  ;;  %v5043_v53 = vmul.f32 %v5031_v9, %v14841_v27  ;;  %v14850_v9 = vld [vmem:[#allocation199_spill] sm:$0xff]  ;;  %v14856_v27 = vld [vmem:[#allocation206_spill] sm:$0xff] }
 0x6e5   :  { %5447 = vmatpush1.bf16.msra.mxu0 %v14836_v17 }
 0x6e6   :  { %v7377_v61 = vpop.eup %7376  ;;  %5488 = vmatpush1.bf16.msra.mxu1 %v14837_v13  ;;  %5448 = vmatprep.subr.bf16.mxu0 %v14838_v39  ;;  %v14846_v13 = vld [vmem:[#allocation195_spill] sm:$0xff]  ;;  %v14847_v39 = vld [vmem:[#allocation257_spill] sm:$0xff] }
 0x6e7   :  { %v7379_v5 = vpop.eup %7378  ;;  %v5044_v10 = vmul.f32 %v7377_v61, %v5022_v34  ;;  %5489 = vmatprep.subr.bf16.mxu1 %v14840_v58  ;;  %v14851_v34 = vld [vmem:[#allocation261_spill] sm:$0xff] }
 0x6e8   :  { %v5045_v30 = vmul.f32 %v7379_v5, %v5023_v11  ;;  %v14852_v11 = vld [vmem:[#allocation202_spill] sm:$0xff]  ;;  %v14853_v5 = vld [vmem:[#allocation264_spill] sm:$0xff] }
 0x6e9   :  { %v11782_v40 = vadd.f32 %v5044_v10, %v5042_v49  ;;  %5449 = vmatpush1.bf16.msra.mxu0 %v14843_v4  ;;  %v7381_v58 = vpop.eup %7380  ;;  %v14855_v49 = vld [vmem:[#allocation265_spill] sm:$0xff]  ;;  %v14858_v4 = vld [vmem:[#allocation207_spill] sm:$0xff] }
 0x6ea   :  { %v11785_v17 = vadd.f32 %v5045_v30, %v5043_v53  ;;  %5490 = vmatpush1.bf16.msra.mxu1 %v14845_v44  ;;  %5450 = vmatprep.subr.bf16.mxu0 %v14846_v13  ;;  %v5039_v61 = vmul.f32 0.5, %v7381_v58  ;;  %v14857_v30 = vld [vmem:[#allocation268_spill] sm:$0xff]  ;;  %v14859_v44 = vld [vmem:[#allocation269_spill] sm:$0xff] }
 0x6eb   :  { %14842 = vst [vmem:[#allocation333_spill] sm:$0xff] %v11782_v40  ;;  %5491 = vmatprep.subr.bf16.mxu1 %v14847_v39  ;;  %v7383_v10 = vpop.eup %7382 }
 0x6ec   :  { %14844 = vst [vmem:[#allocation398_spill] sm:$0xff] %v11785_v17  ;;  %7384 = vtanh.f32 %v11785_v17  ;;  %v5041_v21 = vadd.f32 0.5, %v5039_v61  ;;  %v5038_v39 = vmul.f32 0.5, %v7383_v10  ;;  %v14963_v17 = vld [vmem:[#allocation371_spill] sm:$0xff] }
 0x6ed   :  { %5451 = vmatpush1.bf16.msra.mxu0 %v14848_v16  ;;  %7386 = vtanh.f32 %v11782_v40  ;;  %v14860_v16 = vld [vmem:[#allocation210_spill] sm:$0xff] }
 0x6ee   :  { %5492 = vmatpush1.bf16.msra.mxu1 %v14849_v59  ;;  %5452 = vmatprep.subr.bf16.mxu0 %v14850_v9  ;;  %v14861_v59 = vld [vmem:[#allocation272_spill] sm:$0xff]  ;;  %v14862_v9 = vld [vmem:[#allocation211_spill] sm:$0xff]  ;;  %v5040_v61 = vadd.f32 0.5, %v5038_v39 }
 0x6ef   :  { %5493 = vmatprep.subr.bf16.mxu1 %v14851_v34  ;;  %v14873_v39 = vld [vmem:[#allocation284_spill] sm:$0xff] }
 0x6f1   :  { %5453 = vmatpush1.bf16.msra.mxu0 %v14852_v11  ;;  %v14863_v11 = vld [vmem:[#allocation273_spill] sm:$0xff] }
 0x6f2   :  { %5494 = vmatpush1.bf16.msra.mxu1 %v14853_v5  ;;  %5454 = vmatprep.subr.bf16.mxu0 %v14854_v7  ;;  %v14864_v5 = vld [vmem:[#allocation214_spill] sm:$0xff]  ;;  %v14865_v7 = vld [vmem:[#allocation276_spill] sm:$0xff] }
 0x6f3   :  { %5495 = vmatprep.subr.bf16.mxu1 %v14855_v49  ;;  %v14866_v49 = vld [vmem:[#allocation215_spill] sm:$0xff] }
 0x6f5   :  { %5455 = vmatpush1.bf16.msra.mxu0 %v14856_v27  ;;  %v14868_v27 = vld [vmem:[#allocation218_spill] sm:$0xff] }
 0x6f6   :  { %v7385_v53 = vpop.eup %7384  ;;  %5496 = vmatpush1.bf16.msra.mxu1 %v14857_v30  ;;  %5456 = vmatprep.subr.bf16.mxu0 %v14858_v4  ;;  %v14870_v4 = vld [vmem:[#allocation219_spill] sm:$0xff] }
 0x6f7   :  { %5497 = vmatprep.subr.bf16.mxu1 %v14859_v44  ;;  %v5051_v13 = vmul.f32 %v7385_v53, %v5041_v21  ;;  %v7387_v34 = vpop.eup %7386  ;;  %v14867_v21 = vld [vmem:[#allocation277_spill] sm:$0xff]  ;;  %v14869_v53 = vld [vmem:[#allocation280_spill] sm:$0xff] }
 0x6f8   :  { %v5050_v10 = vmul.f32 %v7387_v34, %v5040_v61  ;;  %v14871_v44 = vld [vmem:[#allocation281_spill] sm:$0xff]  ;;  %v14877_v34 = vld [vmem:[#allocation288_spill] sm:$0xff]  ;;  %v14878_v61 = vld [vmem:[#allocation227_spill] sm:$0xff] }
 0x6f9   :  { %5457 = vmatpush1.bf16.msra.mxu0 %v14860_v16  ;;  %v5429_v58 = vpack.c.bf16 %v5051_v13, %v5051_v13  ;;  %v14872_v13 = vld [vmem:[#allocation222_spill] sm:$0xff]  ;;  %v14874_v16 = vld [vmem:[#allocation223_spill] sm:$0xff] }
 0x6fa   :  { %5498 = vmatpush1.bf16.msra.mxu1 %v14861_v59  ;;  %5458 = vmatprep.subr.bf16.mxu0 %v14862_v9  ;;  %v11814_v30 = vpack.c.bf16 %v5050_v10, %v5050_v10  ;;  %v14875_v59 = vld [vmem:[#allocation285_spill] sm:$0xff]  ;;  %v14876_v9 = vld [vmem:[#allocation226_spill] sm:$0xff] }
 0x6fb   :  { %5462 = vmatprep.mubr.bf16.mxu0 %v5429_v58  ;;  %5503 = vmatprep.mubr.bf16.mxu1 %v5429_v58  ;;  %v14883_v10 = vld [vmem:[#allocation293_spill] sm:$0xff] }
 0x6fc   :  { %5499 = vmatprep.subr.bf16.mxu1 %v14863_v11  ;;  %v14879_v11 = vld [vmem:[#allocation289_spill] sm:$0xff] }
 0x6fd   :  { %5459 = vmatpush1.bf16.msra.mxu0 %v14864_v5  ;;  %v14880_v5 = vld [vmem:[#allocation230_spill] sm:$0xff] }
 0x6fe   :  { %5500 = vmatpush1.bf16.msra.mxu1 %v14865_v7  ;;  %5460 = vmatprep.subr.bf16.mxu0 %v14866_v49  ;;  %v14881_v7 = vld [vmem:[#allocation292_spill] sm:$0xff]  ;;  %v14882_v49 = vld [vmem:[#allocation231_spill] sm:$0xff] }
 0x6ff   :  { %5501 = vmatprep.subr.bf16.mxu1 %v14867_v21  ;;  %v14885_v21 = vld [vmem:[#allocation296_spill] sm:$0xff] }
 0x701   :  { %5461 = vmatpush1.bf16.msra.mxu0 %v14868_v27  ;;  %v14886_v27 = vld [vmem:[#allocation235_spill] sm:$0xff] }
 0x702   :  { %5502 = vmatpush1.bf16.msra.mxu1 %v14869_v53  ;;  %5512 = vmatprep.subr.bf16.mxu0 %v14870_v4  ;;  %v14887_v53 = vld [vmem:[#allocation297_spill] sm:$0xff]  ;;  %v14888_v4 = vld [vmem:[#allocation238_spill] sm:$0xff] }
 0x703   :  { %5553 = vmatprep.subr.bf16.mxu1 %v14871_v44  ;;  %v14889_v44 = vld [vmem:[#allocation300_spill] sm:$0xff] }
 0x704   :  { %5463 = vmatmul.mubr.bf16.vlgmr.msra.gmra.mrb[108].mxu0 %v11814_v30 }
 0x705   :  { %5504 = vmatmul.mubr.bf16.vlgmr.msra.gmra.mrb[116].mxu1 %v11814_v30  ;;  %5513 = vmatpush1.bf16.msra.mxu0 %v14872_v13  ;;  %v14890_v13 = vld [vmem:[#allocation239_spill] sm:$0xff] }
 0x706   :  { %5544 = vmatprep.mubr.bf16.mxu0 %v5429_v58  ;;  %5554 = vmatpush1.bf16.msra.mxu1 %v14873_v39 }
 0x707   :  { %5585 = vmatprep.mubr.bf16.mxu1 %v5429_v58  ;;  %5514 = vmatprep.subr.bf16.mxu0 %v14874_v16  ;;  %v14884_v58 = vld [vmem:[#allocation234_spill] sm:$0xff]  ;;  %v14891_v16 = vld [vmem:[#allocation301_spill] sm:$0xff] }
 0x708   :  { %5555 = vmatprep.subr.bf16.mxu1 %v14875_v59 }
 0x709   :  { %5515 = vmatpush1.bf16.msra.mxu0 %v14876_v9 }
 0x70a   :  { %5556 = vmatpush1.bf16.msra.mxu1 %v14877_v34  ;;  %5516 = vmatprep.subr.bf16.mxu0 %v14878_v61 }
 0x70b   :  { %5557 = vmatprep.subr.bf16.mxu1 %v14879_v11  ;;  %v14892_v11 = vld [vmem:[#allocation242_spill] sm:$0xff] }
 0x70d   :  { %5517 = vmatpush1.bf16.msra.mxu0 %v14880_v5 }
 0x70e   :  { %5558 = vmatpush1.bf16.msra.mxu1 %v14881_v7  ;;  %5518 = vmatprep.subr.bf16.mxu0 %v14882_v49  ;;  %v14893_v7 = vld [vmem:[#allocation304_spill] sm:$0xff] }
 0x70f   :  { %5559 = vmatprep.subr.bf16.mxu1 %v14883_v10  ;;  %v14894_v10 = vld [vmem:[#allocation243_spill] sm:$0xff] }
 0x711   :  { %5519 = vmatpush1.bf16.msra.mxu0 %v14884_v58 }
 0x712   :  { %5560 = vmatpush1.bf16.msra.mxu1 %v14885_v21  ;;  %5520 = vmatprep.subr.bf16.mxu0 %v14886_v27  ;;  %v14895_v21 = vld [vmem:[#allocation305_spill] sm:$0xff]  ;;  %v14896_v27 = vld [vmem:[#allocation246_spill] sm:$0xff] }
 0x713   :  { %5561 = vmatprep.subr.bf16.mxu1 %v14887_v53  ;;  %v14897_v53 = vld [vmem:[#allocation308_spill] sm:$0xff] }
 0x715   :  { %5521 = vmatpush1.bf16.msra.mxu0 %v14888_v4  ;;  %v14898_v4 = vld [vmem:[#allocation247_spill] sm:$0xff] }
 0x716   :  { %5562 = vmatpush1.bf16.msra.mxu1 %v14889_v44  ;;  %5522 = vmatprep.subr.bf16.mxu0 %v14890_v13  ;;  %v14899_v44 = vld [vmem:[#allocation309_spill] sm:$0xff]  ;;  %v14900_v13 = vld [vmem:[#allocation250_spill] sm:$0xff] }
 0x717   :  { %v11839_v39 = vpop.f32.mrb[92].mxu0  ;;  %5563 = vmatprep.subr.bf16.mxu1 %v14891_v16  ;;  %v14901_v16 = vld [vmem:[#allocation312_spill] sm:$0xff] }
 0x718   :  { %v11842_v59 = vpop.f32.mrb[100].mxu1  ;;  %v11844_v9 = vpop.f32.mrb[93].mxu0 }
 0x719   :  { %v11846_v34 = vpop.f32.mrb[101].mxu1  ;;  %v5092_v61 = vpop.f32.mrb[94].mxu0  ;;  %5523 = vmatpush1.bf16.msra.mxu0 %v14892_v11  ;;  %v14903_v11 = vld [vmem:[#allocation313_spill] sm:$0xff] }
 0x71a   :  { %v5133_v5 = vpop.f32.mrb[102].mxu1  ;;  %5564 = vmatpush1.bf16.msra.mxu1 %v14893_v7  ;;  %v5093_v49 = vpop.f32.mrb[95].mxu0  ;;  %5524 = vmatprep.subr.bf16.mxu0 %v14894_v10  ;;  %v14902_v61 = vld [vmem:[#allocation251_spill] sm:$0xff]  ;;  %v14905_v7 = vld [vmem:[#allocation316_spill] sm:$0xff]  ;;  %v14907_v10 = vld [vmem:[#allocation317_spill] sm:$0xff] }
 0x71b   :  { %v5134_v58 = vpop.f32.mrb[103].mxu1  ;;  %5565 = vmatprep.subr.bf16.mxu1 %v14895_v21  ;;  %v14904_v5 = vld [vmem:[#allocation254_spill] sm:$0xff]  ;;  %v14906_v49 = vld [vmem:[#allocation255_spill] sm:$0xff]  ;;  %v14909_v21 = vld [vmem:[#allocation320_spill] sm:$0xff] }
 0x71c   :  { %v14908_v58 = vld [vmem:[#allocation258_spill] sm:$0xff] }
 0x71d   :  { %5525 = vmatpush1.bf16.msra.mxu0 %v14896_v27  ;;  %v14910_v27 = vld [vmem:[#allocation259_spill] sm:$0xff] }
 0x71e   :  { %5566 = vmatpush1.bf16.msra.mxu1 %v14897_v53  ;;  %5526 = vmatprep.subr.bf16.mxu0 %v14898_v4  ;;  %v14911_v53 = vld [vmem:[#allocation321_spill] sm:$0xff]  ;;  %v14912_v4 = vld [vmem:[#allocation262_spill] sm:$0xff] }
 0x71f   :  { %5567 = vmatprep.subr.bf16.mxu1 %v14899_v44  ;;  %v14913_v44 = vld [vmem:[#allocation324_spill] sm:$0xff] }
 0x721   :  { %5527 = vmatpush1.bf16.msra.mxu0 %v14900_v13  ;;  %v14914_v13 = vld [vmem:[#allocation263_spill] sm:$0xff] }
 0x722   :  { %5568 = vmatpush1.bf16.msra.mxu1 %v14901_v16  ;;  %5528 = vmatprep.subr.bf16.mxu0 %v14902_v61  ;;  %v14915_v16 = vld [vmem:[#allocation325_spill] sm:$0xff]  ;;  %v14916_v61 = vld [vmem:[#allocation266_spill] sm:$0xff] }
 0x723   :  { %5569 = vmatprep.subr.bf16.mxu1 %v14903_v11  ;;  %v14917_v11 = vld [vmem:[#allocation328_spill] sm:$0xff] }
 0x725   :  { %5529 = vmatpush1.bf16.msra.mxu0 %v14904_v5  ;;  %v14918_v5 = vld [vmem:[#allocation267_spill] sm:$0xff] }
 0x726   :  { %5570 = vmatpush1.bf16.msra.mxu1 %v14905_v7  ;;  %5530 = vmatprep.subr.bf16.mxu0 %v14906_v49  ;;  %v14919_v7 = vld [vmem:[#allocation329_spill] sm:$0xff]  ;;  %v14920_v49 = vld [vmem:[#allocation270_spill] sm:$0xff] }
 0x727   :  { %5571 = vmatprep.subr.bf16.mxu1 %v14907_v10  ;;  %v14921_v10 = vld [vmem:[#allocation332_spill] sm:$0xff] }
 0x729   :  { %5531 = vmatpush1.bf16.msra.mxu0 %v14908_v58  ;;  %v14922_v58 = vld [vmem:[#allocation271_spill] sm:$0xff] }
 0x72a   :  { %5572 = vmatpush1.bf16.msra.mxu1 %v14909_v21  ;;  %5532 = vmatprep.subr.bf16.mxu0 %v14910_v27  ;;  %v14923_v21 = vld [vmem:[#allocation334_spill] sm:$0xff] }
 0x72b   :  { %5573 = vmatprep.subr.bf16.mxu1 %v14911_v53  ;;  %v14924_v27 = vld [vmem:[#allocation274_spill] sm:$0xff]  ;;  %v14925_v53 = vld [vmem:[#allocation337_spill] sm:$0xff] }
 0x72d   :  { %5533 = vmatpush1.bf16.msra.mxu0 %v14912_v4  ;;  %v14926_v4 = vld [vmem:[#allocation275_spill] sm:$0xff] }
 0x72e   :  { %5574 = vmatpush1.bf16.msra.mxu1 %v14913_v44  ;;  %5534 = vmatprep.subr.bf16.mxu0 %v14914_v13  ;;  %v14927_v44 = vld [vmem:[#allocation338_spill] sm:$0xff] }
 0x72f   :  { %5575 = vmatprep.subr.bf16.mxu1 %v14915_v16  ;;  %v14928_v13 = vld [vmem:[#allocation278_spill] sm:$0xff]  ;;  %v14929_v16 = vld [vmem:[#allocation341_spill] sm:$0xff] }
 0x731   :  { %5535 = vmatpush1.bf16.msra.mxu0 %v14916_v61  ;;  %v14930_v61 = vld [vmem:[#allocation279_spill] sm:$0xff] }
 0x732   :  { %5576 = vmatpush1.bf16.msra.mxu1 %v14917_v11  ;;  %5536 = vmatprep.subr.bf16.mxu0 %v14918_v5  ;;  %v14931_v11 = vld [vmem:[#allocation342_spill] sm:$0xff] }
 0x733   :  { %5577 = vmatprep.subr.bf16.mxu1 %v14919_v7  ;;  %v14932_v5 = vld [vmem:[#allocation282_spill] sm:$0xff]  ;;  %v14933_v7 = vld [vmem:[#allocation345_spill] sm:$0xff] }
 0x735   :  { %5537 = vmatpush1.bf16.msra.mxu0 %v14920_v49  ;;  %v14934_v49 = vld [vmem:[#allocation283_spill] sm:$0xff] }
 0x736   :  { %5578 = vmatpush1.bf16.msra.mxu1 %v14921_v10  ;;  %5538 = vmatprep.subr.bf16.mxu0 %v14922_v58  ;;  %v14935_v10 = vld [vmem:[#allocation346_spill] sm:$0xff] }
 0x737   :  { %5579 = vmatprep.subr.bf16.mxu1 %v14923_v21  ;;  %v14936_v58 = vld [vmem:[#allocation286_spill] sm:$0xff]  ;;  %v14937_v21 = vld [vmem:[#allocation349_spill] sm:$0xff] }
 0x739   :  { %5539 = vmatpush1.bf16.msra.mxu0 %v14924_v27  ;;  %v14938_v27 = vld [vmem:[#allocation287_spill] sm:$0xff] }
 0x73a   :  { %5580 = vmatpush1.bf16.msra.mxu1 %v14925_v53  ;;  %5540 = vmatprep.subr.bf16.mxu0 %v14926_v4  ;;  %v14939_v53 = vld [vmem:[#allocation350_spill] sm:$0xff] }
 0x73b   :  { %5581 = vmatprep.subr.bf16.mxu1 %v14927_v44  ;;  %v14940_v4 = vld [vmem:[#allocation290_spill] sm:$0xff]  ;;  %v14941_v44 = vld [vmem:[#allocation351_spill] sm:$0xff] }
 0x73d   :  { %5541 = vmatpush1.bf16.msra.mxu0 %v14928_v13  ;;  %v14942_v13 = vld [vmem:[#allocation291_spill] sm:$0xff] }
 0x73e   :  { %5582 = vmatpush1.bf16.msra.mxu1 %v14929_v16  ;;  %5542 = vmatprep.subr.bf16.mxu0 %v14930_v61  ;;  %v14943_v16 = vld [vmem:[#allocation352_spill] sm:$0xff]  ;;  %v14944_v61 = vld [vmem:[#allocation294_spill] sm:$0xff] }
 0x73f   :  { %5583 = vmatprep.subr.bf16.mxu1 %v14931_v11  ;;  %v14945_v11 = vld [vmem:[#allocation353_spill] sm:$0xff] }
 0x741   :  { %5543 = vmatpush1.bf16.msra.mxu0 %v14932_v5  ;;  %v14947_v5 = vld [vmem:[#allocation354_spill] sm:$0xff] }
 0x742   :  { %5584 = vmatpush1.bf16.msra.mxu1 %v14933_v7  ;;  %5594 = vmatprep.subr.bf16.mxu0 %v14934_v49  ;;  %v14948_v7 = vld [vmem:[#allocation298_spill] sm:$0xff]  ;;  %v14949_v49 = vld [vmem:[#allocation355_spill] sm:$0xff] }
 0x743   :  { %5635 = vmatprep.subr.bf16.mxu1 %v14935_v10  ;;  %v14950_v10 = vld [vmem:[#allocation299_spill] sm:$0xff] }
 0x744   :  { %5545 = vmatmul.mubr.bf16.vlgmr.msra.gmra.mrb[112].mxu0 %v11814_v30 }
 0x745   :  { %5586 = vmatmul.mubr.bf16.vlgmr.msra.gmra.mrb[120].mxu1 %v11814_v30  ;;  %5595 = vmatpush1.bf16.msra.mxu0 %v14936_v58  ;;  %v14946_v30 = vld [vmem:[#allocation295_spill] sm:$0xff]  ;;  %v14951_v58 = vld [vmem:[#allocation357_spill] sm:$0xff] }
 0x746   :  { %5636 = vmatpush1.bf16.msra.mxu1 %v14937_v21  ;;  %5596 = vmatprep.subr.bf16.mxu0 %v14938_v27  ;;  %v14952_v21 = vld [vmem:[#allocation302_spill] sm:$0xff] }
 0x747   :  { %5637 = vmatprep.subr.bf16.mxu1 %v14939_v53  ;;  %v14953_v27 = vld [vmem:[#allocation358_spill] sm:$0xff]  ;;  %v14954_v53 = vld [vmem:[#allocation303_spill] sm:$0xff] }
 0x749   :  { %5597 = vmatpush1.bf16.msra.mxu0 %v14940_v4 }
 0x74a   :  { %5638 = vmatpush1.bf16.msra.mxu1 %v14941_v44  ;;  %5598 = vmatprep.subr.bf16.mxu0 %v14942_v13  ;;  %v14955_v44 = vld [vmem:[#allocation360_spill] sm:$0xff] }
 0x74b   :  { %5639 = vmatprep.subr.bf16.mxu1 %v14943_v16 }
 0x74d   :  { %5599 = vmatpush1.bf16.msra.mxu0 %v14944_v61 }
 0x74e   :  { %5640 = vmatpush1.bf16.msra.mxu1 %v14945_v11  ;;  %5600 = vmatprep.subr.bf16.mxu0 %v14946_v30  ;;  %v14956_v30 = vld [vmem:[#allocation306_spill] sm:$0xff] }
 0x74f   :  { %5641 = vmatprep.subr.bf16.mxu1 %v14947_v5 }
 0x751   :  { %5601 = vmatpush1.bf16.msra.mxu0 %v14948_v7 }
 0x752   :  { %5642 = vmatpush1.bf16.msra.mxu1 %v14949_v49  ;;  %5602 = vmatprep.subr.bf16.mxu0 %v14950_v10  ;;  %v14957_v49 = vld [vmem:[#allocation364_spill] sm:$0xff]  ;;  %v14958_v10 = vld [vmem:[#allocation307_spill] sm:$0xff] }
 0x753   :  { %5643 = vmatprep.subr.bf16.mxu1 %v14951_v58 }
 0x755   :  { %5603 = vmatpush1.bf16.msra.mxu0 %v14952_v21  ;;  %v14959_v21 = vld [vmem:[#allocation366_spill] sm:$0xff] }
 0x756   :  { %5644 = vmatpush1.bf16.msra.mxu1 %v14953_v27  ;;  %5604 = vmatprep.subr.bf16.mxu0 %v14954_v53  ;;  %v14960_v27 = vld [vmem:[#allocation310_spill] sm:$0xff] }
 0x757   :  { %v11913_v4 = vpop.f32.mrb[96].mxu0  ;;  %5645 = vmatprep.subr.bf16.mxu1 %v14955_v44  ;;  %v14961_v53 = vld [vmem:[#allocation370_spill] sm:$0xff]  ;;  %v14962_v44 = vld [vmem:[#allocation311_spill] sm:$0xff] }
 0x758   :  { %v11916_v13 = vpop.f32.mrb[104].mxu1  ;;  %v11918_v16 = vpop.f32.mrb[97].mxu0 }
 0x759   :  { %v11920_v61 = vpop.f32.mrb[105].mxu1  ;;  %v5174_v11 = vpop.f32.mrb[98].mxu0  ;;  %5605 = vmatpush1.bf16.msra.mxu0 %v14956_v30  ;;  %v14965_v30 = vld [vmem:[#allocation372_spill] sm:$0xff] }
 0x75a   :  { %v5215_v5 = vpop.f32.mrb[106].mxu1  ;;  %v5175_v7 = vpop.f32.mrb[99].mxu0  ;;  %5646 = vmatpush1.bf16.msra.mxu1 %v14957_v49  ;;  %5606 = vmatprep.subr.bf16.mxu0 %v14958_v10  ;;  %v14964_v11 = vld [vmem:[#allocation314_spill] sm:$0xff] }
 0x75b   :  { %v5216_v58 = vpop.f32.mrb[107].mxu1  ;;  %5647 = vmatprep.subr.bf16.mxu1 %v14959_v21  ;;  %v14966_v5 = vld [vmem:[#allocation315_spill] sm:$0xff]  ;;  %v14967_v7 = vld [vmem:[#allocation373_spill] sm:$0xff]  ;;  %v14968_v49 = vld [vmem:[#allocation318_spill] sm:$0xff] }
 0x75c   :  { %v14969_v10 = vld [vmem:[#allocation374_spill] sm:$0xff]  ;;  %v14970_v58 = vld [vmem:[#allocation319_spill] sm:$0xff] }
 0x75d   :  { %5607 = vmatpush1.bf16.msra.mxu0 %v14960_v27  ;;  %v14971_v21 = vld [vmem:[#allocation375_spill] sm:$0xff]  ;;  %v14972_v27 = vld [vmem:[#allocation322_spill] sm:$0xff] }
 0x75e   :  { %5648 = vmatpush1.bf16.msra.mxu1 %v14961_v53  ;;  %5608 = vmatprep.subr.bf16.mxu0 %v14962_v44  ;;  %v14973_v53 = vld [vmem:[#allocation376_spill] sm:$0xff]  ;;  %v14975_v44 = vld [vmem:[#allocation377_spill] sm:$0xff] }
 0x75f   :  { %5649 = vmatprep.subr.bf16.mxu1 %v14963_v17  ;;  %v14974_v17 = vld [vmem:[#allocation323_spill] sm:$0xff] }
 0x761   :  { %5609 = vmatpush1.bf16.msra.mxu0 %v14964_v11  ;;  %v14976_v11 = vld [vmem:[#allocation326_spill] sm:$0xff] }
 0x762   :  { %5650 = vmatpush1.bf16.msra.mxu1 %v14965_v30  ;;  %5610 = vmatprep.subr.bf16.mxu0 %v14966_v5  ;;  %v14977_v30 = vld [vmem:[#allocation378_spill] sm:$0xff]  ;;  %v14978_v5 = vld [vmem:[#allocation327_spill] sm:$0xff] }
 0x763   :  { %5651 = vmatprep.subr.bf16.mxu1 %v14967_v7  ;;  %v14979_v7 = vld [vmem:[#allocation379_spill] sm:$0xff] }
 0x765   :  { %5611 = vmatpush1.bf16.msra.mxu0 %v14968_v49  ;;  %v14980_v49 = vld [vmem:[#allocation330_spill] sm:$0xff] }
 0x766   :  { %5652 = vmatpush1.bf16.msra.mxu1 %v14969_v10  ;;  %5612 = vmatprep.subr.bf16.mxu0 %v14970_v58  ;;  %v14981_v10 = vld [vmem:[#allocation380_spill] sm:$0xff]  ;;  %v14982_v58 = vld [vmem:[#allocation331_spill] sm:$0xff] }
 0x767   :  { %5653 = vmatprep.subr.bf16.mxu1 %v14971_v21  ;;  %v14983_v21 = vld [vmem:[#allocation381_spill] sm:$0xff] }
 0x769   :  { %5613 = vmatpush1.bf16.msra.mxu0 %v14972_v27  ;;  %v14984_v27 = vld [vmem:[#allocation335_spill] sm:$0xff] }
 0x76a   :  { %5654 = vmatpush1.bf16.msra.mxu1 %v14973_v53  ;;  %5614 = vmatprep.subr.bf16.mxu0 %v14974_v17  ;;  %v14985_v53 = vld [vmem:[#allocation382_spill] sm:$0xff]  ;;  %v14986_v17 = vld [vmem:[#allocation336_spill] sm:$0xff] }
 0x76b   :  { %5655 = vmatprep.subr.bf16.mxu1 %v14975_v44 }
 0x76d   :  { %5615 = vmatpush1.bf16.msra.mxu0 %v14976_v11  ;;  %v14987_v11 = vld [vmem:[#allocation384_spill] sm:$0xff] }
 0x76e   :  { %5656 = vmatpush1.bf16.msra.mxu1 %v14977_v30  ;;  %5616 = vmatprep.subr.bf16.mxu0 %v14978_v5 }
 0x76f   :  { %5657 = vmatprep.subr.bf16.mxu1 %v14979_v7 }
 0x771   :  { %5617 = vmatpush1.bf16.msra.mxu0 %v14980_v49 }
 0x772   :  { %5658 = vmatpush1.bf16.msra.mxu1 %v14981_v10  ;;  %5618 = vmatprep.subr.bf16.mxu0 %v14982_v58 }
 0x773   :  { %5659 = vmatprep.subr.bf16.mxu1 %v14983_v21  ;;  %v14988_v21 = vld [vmem:[#allocation339_spill] sm:$0xff] }
 0x775   :  { %5619 = vmatpush1.bf16.msra.mxu0 %v14984_v27 }
 0x776   :  { %5660 = vmatpush1.bf16.msra.mxu1 %v14985_v53  ;;  %5620 = vmatprep.subr.bf16.mxu0 %v14986_v17  ;;  %v14989_v17 = vld [vmem:[#allocation386_spill] sm:$0xff] }
 0x777   :  { %v5252_v44 = vpop.f32.mrb[100].mxu0  ;;  %5661 = vmatprep.subr.bf16.mxu1 %v14987_v11 }
 0x778   :  { %v5253_v30 = vadd.f32 %v5252_v44, %v11839_v39  ;;  %v5293_v5 = vpop.f32.mrb[108].mxu1  ;;  %v5254_v7 = vpop.f32.mrb[101].mxu0  ;;  %v14991_v39 = vld [vmem:[#allocation388_spill] sm:$0xff]  ;;  %v14992_v44 = vld [vmem:[#allocation343_spill] sm:$0xff] }
 0x779   :  { %v5294_v49 = vadd.f32 %v5293_v5, %v11842_v59  ;;  %v5255_v10 = vadd.f32 %v5254_v7, %v11844_v9  ;;  %v5295_v58 = vpop.f32.mrb[109].mxu1  ;;  %v5256_v40 = vpop.f32.mrb[102].mxu0  ;;  %5621 = vmatpush1.bf16.msra.mxu0 %v14988_v21  ;;  %v14993_v59 = vld [vmem:[#allocation390_spill] sm:$0xff]  ;;  %v14994_v9 = vld [vmem:[#allocation344_spill] sm:$0xff]  ;;  %v14996_v5 = vld [vmem:[#allocation347_spill] sm:$0xff] }
 0x77a   :  { %v5296_v27 = vadd.f32 %v5295_v58, %v11846_v34  ;;  %v5257_v53 = vpop.f32.mrb[103].mxu0  ;;  %v5297_v37 = vpop.f32.mrb[110].mxu1  ;;  %5662 = vmatpush1.bf16.msra.mxu1 %v14989_v17  ;;  %5622 = vmatprep.subr.bf16.mxu0 %v14990_v31  ;;  %v14995_v40 = vld [vmem:[#allocation391_spill] sm:$0xff]  ;;  %v14997_v34 = vld [vmem:[#allocation392_spill] sm:$0xff]  ;;  %v14999_v7 = vld [vmem:[#allocation393_spill] sm:$0xff] }
 0x77b   :  { %v5298_v11 = vpop.f32.mrb[111].mxu1  ;;  %5663 = vmatprep.subr.bf16.mxu1 %v14991_v39  ;;  %v14998_v37 = vld [vmem:[#allocation348_spill] sm:$0xff]  ;;  %v5384_v31 = vadd.f32 %v5294_v49, %v14569_v46  ;;  %v15000_v58 = vld [vmem:[#allocation389_spill] sm:$0xff] }
 0x77c   :  { %v5385_v21 = vadd.f32 %v5296_v27, %v15000_v58  ;;  %v15001_v53 = vld [vmem:[#allocation365_spill] sm:$0xff]  ;;  %v15002_v11 = vld [vmem:[#allocation367_spill] sm:$0xff] }
 0x77d   :  { %5623 = vmatpush1.bf16.msra.mxu0 %v14992_v44  ;;  %v5382_v17 = vadd.f32 %v5253_v30, %v15001_v53  ;;  %v5383_v39 = vadd.f32 %v5255_v10, %v15002_v11  ;;  %v5398_v44 = vmul.f32 0.5, %v5384_v31  ;;  %v15003_v10 = vld [vmem:[#allocation368_spill] sm:$0xff]  ;;  %v15004_v11 = vld [vmem:[#allocation369_spill] sm:$0xff] }
 0x77e   :  { %5664 = vmatpush1.bf16.msra.mxu1 %v14993_v59  ;;  %5624 = vmatprep.subr.bf16.mxu0 %v14994_v9  ;;  %v5399_v59 = vmul.f32 0.5, %v5385_v21 }
 0x77f   :  { %5665 = vmatprep.subr.bf16.mxu1 %v14995_v40  ;;  %v5390_v9 = vmul.f32 0.5, %v5382_v17  ;;  %v5391_v40 = vmul.f32 0.5, %v5383_v39  ;;  %7388 = vtanh.f32 %v5398_v44 }
 0x780   :  { %7390 = vtanh.f32 %v5399_v59  ;;  %v15005_v59 = vld [vmem:[#allocation397_spill] sm:$0xff] }
 0x781   :  { %5625 = vmatpush1.bf16.msra.mxu0 %v14996_v5  ;;  %7392 = vtanh.f32 %v5390_v9 }
 0x782   :  { %5666 = vmatpush1.bf16.msra.mxu1 %v14997_v34  ;;  %5676 = vmatprep.subr.bf16.mxu0 %v14998_v37  ;;  %7394 = vtanh.f32 %v5391_v40 }
 0x783   :  { %5717 = vmatprep.subr.bf16.mxu1 %v14999_v7 }
 0x797   :  { %v5334_v5 = vpop.f32.mrb[104].mxu0 }
 0x798   :  { %v5335_v34 = vadd.f32 %v5334_v5, %v11913_v4  ;;  %v5375_v37 = vpop.f32.mrb[112].mxu1  ;;  %v5336_v7 = vpop.f32.mrb[105].mxu0 }
 0x799   :  { %v5376_v46 = vadd.f32 %v5375_v37, %v11916_v13  ;;  %v5337_v49 = vadd.f32 %v5336_v7, %v11918_v16  ;;  %v5377_v30 = vpop.f32.mrb[113].mxu1  ;;  %v5338_v27 = vpop.f32.mrb[106].mxu0 }
 0x79a   :  { %v5386_v31 = vadd.f32 %v5335_v34, %v15003_v10  ;;  %v5378_v58 = vadd.f32 %v5377_v30, %v11920_v61  ;;  %v5339_v21 = vpop.f32.mrb[107].mxu0  ;;  %v5379_v53 = vpop.f32.mrb[114].mxu1 }
 0x79b   :  { %v5388_v17 = vadd.f32 %v5376_v46, %v14574_v18  ;;  %v5387_v39 = vadd.f32 %v5337_v49, %v15004_v11  ;;  %v5380_v44 = vpop.f32.mrb[115].mxu1  ;;  %v7389_v4 = vpop.eup %7388 }
 0x79c   :  { %7396 = vtanh.f32 %v5386_v31  ;;  %v5389_v9 = vadd.f32 %v5378_v58, %v15005_v59  ;;  %v7391_v13 = vpop.eup %7390  ;;  %v5402_v5 = vmul.f32 0.5, %v7389_v4 }
 0x79d   :  { %7398 = vtanh.f32 %v5387_v39  ;;  %v7393_v16 = vpop.eup %7392  ;;  %v5408_v37 = vmul.f32 0.5, %v5388_v17  ;;  %v5403_v34 = vmul.f32 0.5, %v7391_v13 }
 0x79e   :  { %v7395_v40 = vpop.eup %7394  ;;  %v5409_v7 = vmul.f32 0.5, %v5389_v9  ;;  %v5394_v61 = vmul.f32 0.5, %v7393_v16  ;;  %v5404_v27 = vadd.f32 0.5, %v5402_v5 }
 0x79f   :  { %v5395_v30 = vmul.f32 0.5, %v7395_v40  ;;  %7400 = vtanh.f32 %v5408_v37  ;;  %v5405_v18 = vadd.f32 0.5, %v5403_v34 }
 0x7a0   :  { %7402 = vtanh.f32 %v5409_v7  ;;  %v5396_v46 = vadd.f32 0.5, %v5394_v61  ;;  %v5416_v58 = vmul.f32 %v5404_v27, %v11411_v63  ;;  %v15017_v61 = vld [vmem:[#allocation418_spill] sm:$0xff]  ;;  %v15019_v27 = vld [vmem:[#allocation420_spill] sm:$0xff] }
 0x7a1   :  { %v5397_v10 = vadd.f32 0.5, %v5395_v30  ;;  %v5417_v53 = vmul.f32 %v5405_v18, %v11413_v55  ;;  %v15008_v55 = vld [vmem:[#allocation409_spill] sm:$0xff]  ;;  %v15018_v30 = vld [vmem:[#allocation419_spill] sm:$0xff] }
 0x7a2   :  { %v15020_v18 = vld [vmem:[#allocation421_spill] sm:$0xff] }
 0x7a6   :  { %v7397_v49 = vpop.eup %7396 }
 0x7a7   :  { %v7399_v31 = vpop.eup %7398  ;;  %v5418_v21 = vmul.f32 %v7397_v49, %v5396_v46  ;;  %v15021_v46 = vld [vmem:[#allocation422_spill] sm:$0xff]  ;;  %v15022_v49 = vld [vmem:[#allocation423_spill] sm:$0xff] }
 0x7a8   :  { %v5419_v11 = vmul.f32 %v7399_v31, %v5397_v10  ;;  %v15023_v10 = vld [vmem:[#allocation424_spill] sm:$0xff] }
 0x7a9   :  { %v5420_v39 = vadd.f32 %v5418_v21, %v5416_v58  ;;  %v7401_v44 = vpop.eup %7400 }
 0x7aa   :  { %v5421_v17 = vadd.f32 %v5419_v11, %v5417_v53  ;;  %v7403_v4 = vpop.eup %7402  ;;  %v5412_v59 = vmul.f32 0.5, %v7401_v44  ;;  %v15024_v11 = vld [vmem:[#allocation425_spill] sm:$0xff] }
 0x7ab   :  { %7404 = vtanh.f32 %v5420_v39  ;;  %v5413_v9 = vmul.f32 0.5, %v7403_v4  ;;  %v15025_v4 = vld [vmem:[#allocation428_spill] sm:$0xff] }
 0x7ac   :  { %7406 = vtanh.f32 %v5421_v17  ;;  %v5414_v13 = vadd.f32 0.5, %v5412_v59 }
 0x7ad   :  { %v5415_v40 = vadd.f32 0.5, %v5413_v9  ;;  %v7144_v9 = vld [vmem:[%s12402_s7 + $0x94] ss:$24 sps:$4 sm:$0xff]  }
 0x7b5   :  { %v7405_v16 = vpop.eup %7404 }
 0x7b6   :  { %v7407_v5 = vpop.eup %7406  ;;  %v5424_v37 = vmul.f32 %v7405_v16, %v5414_v13  ;;  %v7147_v13 = vld [vmem:[%s12402_s7 + $0x9c] ss:$24 sps:$4 sm:$0xff]   ;;  %v7142_v16 = vld [vmem:[%s12402_s7 + $0x90] ss:$24 sps:$4 sm:$0xff]  }
 0x7b7   :  { %v5425_v34 = vmul.f32 %v7407_v5, %v5415_v40  ;;  %v7145_v40 = vld [vmem:[%s12402_s7 + $0x98] ss:$24 sps:$4 sm:$0xff]   ;;  %v7150_v5 = vld [vmem:[%s12402_s7 + $0xc4] ss:$24 sps:$4 sm:$0xff]  }
 0x7b8   :  { %v11984_v63 = vpack.c.bf16 %v5424_v37, %v5424_v37  ;;  %v7153_v37 = vld [vmem:[%s12402_s7 + $0xcc] ss:$24 sps:$4 sm:$0xff]  }
 0x7b9   :  { %v5427_v7 = vpack.c.bf16 %v5425_v34, %v5425_v34  ;;  %v7148_v34 = vld [vmem:[%s12402_s7 + $0xc0] ss:$24 sps:$4 sm:$0xff]  }
 0x7bb   :  { %5626 = vmatprep.mubr.bf16.mxu0 %v5427_v7  ;;  %5667 = vmatprep.mubr.bf16.mxu1 %v5427_v7 }
 0x7bc   :  { %5627 = vmatmul.mubr.bf16.vlgmr.msra.gmra.mrb[116].mxu0 %v11984_v63  ;;  %5668 = vmatmul.mubr.bf16.vlgmr.msra.gmra.mrb[124].mxu1 %v11984_v63 }
 0x7bd   :  { %5677 = vmatpush1.bf16.msra.mxu0 %v14148_v52  ;;  %5718 = vmatpush1.bf16.msra.mxu1 %v14149_v41  ;;  %v15006_v52 = vld [vmem:[#allocation407_spill] sm:$0xff]  ;;  %v15007_v41 = vld [vmem:[#allocation408_spill] sm:$0xff] }
 0x7be   :  { %5708 = vmatprep.mubr.bf16.mxu0 %v5427_v7  ;;  %5749 = vmatprep.mubr.bf16.mxu1 %v5427_v7  ;;  %v7151_v7 = vld [vmem:[%s12402_s7 + $0xc8] ss:$24 sps:$4 sm:$0xff]  }
 0x7bf   :  { %5678 = vmatprep.subr.bf16.mxu0 %v14150_v50  ;;  %5719 = vmatprep.subr.bf16.mxu1 %v14577_v29  ;;  %v15009_v50 = vld [vmem:[#allocation410_spill] sm:$0xff]  ;;  %v15010_v29 = vld [vmem:[#allocation411_spill] sm:$0xff] }
 0x7c1   :  { %5679 = vmatpush1.bf16.msra.mxu0 %v14578_v28  ;;  %5720 = vmatpush1.bf16.msra.mxu1 %v14579_v62  ;;  %v15011_v28 = vld [vmem:[#allocation412_spill] sm:$0xff]  ;;  %v15012_v62 = vld [vmem:[#allocation413_spill] sm:$0xff] }
 0x7c2   :  { %5680 = vmatprep.subr.bf16.mxu0 %v14580_v36  ;;  %5721 = vmatprep.subr.bf16.mxu1 %v14581_v6  ;;  %v15013_v36 = vld [vmem:[#allocation414_spill] sm:$0xff]  ;;  %v15014_v6 = vld [vmem:[#allocation415_spill] sm:$0xff] }
 0x7c5   :  { %5681 = vmatpush1.bf16.msra.mxu0 %v14582_v48  ;;  %5722 = vmatpush1.bf16.msra.mxu1 %v14583_v47  ;;  %v15015_v48 = vld [vmem:[#allocation416_spill] sm:$0xff]  ;;  %v15016_v47 = vld [vmem:[#allocation417_spill] sm:$0xff] }
 0x7c6   :  { %5682 = vmatprep.subr.bf16.mxu0 %v15006_v52  ;;  %5723 = vmatprep.subr.bf16.mxu1 %v15007_v41  ;;  %v7154_v52 = vld [vmem:[%s12402_s7 + $0xf0] ss:$24 sps:$4 sm:$0xff]   ;;  %v7159_v41 = vld [vmem:[%s12402_s7 + $0xfc] ss:$24 sps:$4 sm:$0xff]  }
 0x7c9   :  { %5683 = vmatpush1.bf16.msra.mxu0 %v15008_v55  ;;  %5724 = vmatpush1.bf16.msra.mxu1 %v15009_v50  ;;  %v7157_v55 = vld [vmem:[%s12402_s7 + $0xf8] ss:$24 sps:$4 sm:$0xff]   ;;  %v7162_v50 = vld [vmem:[%s12402_s7 + $0x124] ss:$24 sps:$4 sm:$0xff]  }
 0x7ca   :  { %5684 = vmatprep.subr.bf16.mxu0 %v15010_v29  ;;  %5725 = vmatprep.subr.bf16.mxu1 %v15011_v28  ;;  %v7165_v29 = vld [vmem:[%s12402_s7 + $0x12c] ss:$24 sps:$4 sm:$0xff]   ;;  %v7160_v28 = vld [vmem:[%s12402_s7 + $0x120] ss:$24 sps:$4 sm:$0xff]  }
 0x7cd   :  { %5685 = vmatpush1.bf16.msra.mxu0 %v15012_v62  ;;  %5726 = vmatpush1.bf16.msra.mxu1 %v15013_v36  ;;  %v7163_v62 = vld [vmem:[%s12402_s7 + $0x128] ss:$24 sps:$4 sm:$0xff]   ;;  %v7168_v36 = vld [vmem:[%s12402_s7 + $0x154] ss:$24 sps:$4 sm:$0xff]  }
 0x7ce   :  { %5686 = vmatprep.subr.bf16.mxu0 %v15014_v6  ;;  %5727 = vmatprep.subr.bf16.mxu1 %v15015_v48  ;;  %v7166_v6 = vld [vmem:[%s12402_s7 + $0x150] ss:$24 sps:$4 sm:$0xff]   ;;  %v7171_v48 = vld [vmem:[%s12402_s7 + $0x15c] ss:$24 sps:$4 sm:$0xff]  }
 0x7d1   :  { %5687 = vmatpush1.bf16.msra.mxu0 %v15016_v47  ;;  %5728 = vmatpush1.bf16.msra.mxu1 %v15017_v61  ;;  %v7169_v47 = vld [vmem:[%s12402_s7 + $0x158] ss:$24 sps:$4 sm:$0xff]   ;;  %v7174_v61 = vld [vmem:[%s12402_s7 + $0x184] ss:$24 sps:$4 sm:$0xff]  }
 0x7d2   :  { %5688 = vmatprep.subr.bf16.mxu0 %v15018_v30  ;;  %5729 = vmatprep.subr.bf16.mxu1 %v15019_v27  ;;  %v7172_v30 = vld [vmem:[%s12402_s7 + $0x180] ss:$24 sps:$4 sm:$0xff]   ;;  %v7177_v27 = vld [vmem:[%s12402_s7 + $0x18c] ss:$24 sps:$4 sm:$0xff]  }
 0x7d5   :  { %5689 = vmatpush1.bf16.msra.mxu0 %v15020_v18  ;;  %5730 = vmatpush1.bf16.msra.mxu1 %v15021_v46  ;;  %v7175_v18 = vld [vmem:[%s12402_s7 + $0x188] ss:$24 sps:$4 sm:$0xff]   ;;  %v7180_v46 = vld [vmem:[%s12402_s7 + $0x1b4] ss:$24 sps:$4 sm:$0xff]  }
 0x7d6   :  { %5690 = vmatprep.subr.bf16.mxu0 %v15022_v49  ;;  %5731 = vmatprep.subr.bf16.mxu1 %v15023_v10  ;;  %v7178_v49 = vld [vmem:[%s12402_s7 + $0x1b0] ss:$24 sps:$4 sm:$0xff]   ;;  %v7183_v10 = vld [vmem:[%s12402_s7 + $0x1bc] ss:$24 sps:$4 sm:$0xff]  }
 0x7d7   :  { %v12016_v31 = vpop.f32.mrb[108].mxu0 }
 0x7d8   :  { %v12018_v58 = vpop.f32.mrb[116].mxu1  ;;  %v12020_v21 = vpop.f32.mrb[109].mxu0 }
 0x7d9   :  { %v12022_v53 = vpop.f32.mrb[117].mxu1  ;;  %5691 = vmatpush1.bf16.msra.mxu0 %v15024_v11  ;;  %5732 = vmatpush1.bf16.msra.mxu1 %v14177_v2  ;;  %v5468_v39 = vpop.f32.mrb[110].mxu0  ;;  %v7181_v11 = vld [vmem:[%s12402_s7 + $0x1b8] ss:$24 sps:$4 sm:$0xff]  }
 0x7da   :  { %v5509_v17 = vpop.f32.mrb[118].mxu1  ;;  %v5469_v44 = vpop.f32.mrb[111].mxu0  ;;  %5692 = vmatprep.subr.bf16.mxu0 %v14178_v60  ;;  %5733 = vmatprep.subr.bf16.mxu1 %v15025_v4  ;;  %v7186_v39 = vld [vmem:[%s12402_s7 + $0x1e4] ss:$24 sps:$4 sm:$0xff]   ;;  %v7187_v4 = vld [vmem:[%s12402_s7 + $0x1e8] ss:$24 sps:$4 sm:$0xff]  }
 0x7db   :  { %v5510_v59 = vpop.f32.mrb[119].mxu1  ;;  %v7184_v17 = vld [vmem:[%s12402_s7 + $0x1e0] ss:$24 sps:$4 sm:$0xff]   ;;  %v7189_v44 = vld [vmem:[%s12402_s7 + $0x1ec] ss:$24 sps:$4 sm:$0xff]  }
 0x7dc   :  { %v7192_v59 = vld [vmem:[%s12402_s7 + $0x214] ss:$24 sps:$4 sm:$0xff]  }
 0x7dd   :  { %5693 = vmatpush1.bf16.msra.mxu0 %v14180_v0  ;;  %5734 = vmatpush1.bf16.msra.mxu1 %v14603_v56  ;;  %v15030_v0 = vld [vmem:[#allocation454_spill] sm:$0xff]  ;;  %v7135_v56 = vld [vmem:[%s12402_s7 + $0x3c] ss:$24 sps:$4 sm:$0xff]  }
 0x7de   :  { %5694 = vmatprep.subr.bf16.mxu0 %v14604_v24  ;;  %5735 = vmatprep.subr.bf16.mxu1 %v14605_v43  ;;  %v7132_v43 = vld [vmem:[%s12402_s7 + $0x34] ss:$24 sps:$4 sm:$0xff]   ;;  %v7133_v24 = vld [vmem:[%s12402_s7 + $0x38] ss:$24 sps:$4 sm:$0xff]  }
 0x7e1   :  { %5695 = vmatpush1.bf16.msra.mxu0 %v14606_v22  ;;  %5736 = vmatpush1.bf16.msra.mxu1 %v14607_v20  ;;  %v7130_v22 = vld [vmem:[%s12402_s7 + $0x30] ss:$24 sps:$4 sm:$0xff]   ;;  %v7138_v20 = vld [vmem:[%s12402_s7 + $0x64] ss:$24 sps:$4 sm:$0xff]  }
 0x7e2   :  { %5696 = vmatprep.subr.bf16.mxu0 %v14608_v45  ;;  %5737 = vmatprep.subr.bf16.mxu1 %v14609_v35  ;;  %v7136_v45 = vld [vmem:[%s12402_s7 + $0x60] ss:$24 sps:$4 sm:$0xff]   ;;  %v7141_v35 = vld [vmem:[%s12402_s7 + $0x6c] ss:$24 sps:$4 sm:$0xff]  }
 0x7e5   :  { %5697 = vmatpush1.bf16.msra.mxu0 %v14610_v32  ;;  %5738 = vmatpush1.bf16.msra.mxu1 %v14611_v3  ;;  %v7139_v32 = vld [vmem:[%s12402_s7 + $0x68] ss:$24 sps:$4 sm:$0xff]  }
 0x7e6   :  { %5698 = vmatprep.subr.bf16.mxu0 %v14188_v19  ;;  %5739 = vmatprep.subr.bf16.mxu1 %v14189_v57  ;;  %v7127_v19 = vld [vmem:[%s12402_s7 + $0x8] ss:$24 sps:$4 sm:$0xff]   ;;  %v7129_v57 = vld [vmem:[%s12402_s7 + $0xc] ss:$24 sps:$4 sm:$0xff]  }
 0x7e9   :  { %5699 = vmatpush1.bf16.msra.mxu0 %v14190_v25  ;;  %5740 = vmatpush1.bf16.msra.mxu1 %v14191_v15  ;;  %v15026_v15 = vld [vmem:[#allocation450_spill] sm:$0xff]  ;;  %v15029_v25 = vld [vmem:[#allocation453_spill] sm:$0xff] }
 0x7ea   :  { %5700 = vmatprep.subr.bf16.mxu0 %v14192_v1  ;;  %5741 = vmatprep.subr.bf16.mxu1 %v14193_v8  ;;  %v15027_v1 = vld [vmem:[#allocation451_spill] sm:$0xff]  ;;  %v15028_v8 = vld [vmem:[#allocation452_spill] sm:$0xff] }
 0x7ed   :  { %5701 = vmatpush1.bf16.msra.mxu0 %v14194_v14  ;;  %5742 = vmatpush1.bf16.msra.mxu1 %v14195_v54  ;;  %v15031_v14 = vld [vmem:[#allocation455_spill] sm:$0xff]  ;;  %v7124_v54 = vld [vmem:[%s12402_s7] ss:$24 sps:$4 sm:$0xff]  }
 0x7ee   :  { %5702 = vmatprep.subr.bf16.mxu0 %v14196_v12  ;;  %5743 = vmatprep.subr.bf16.mxu1 %v14197_v23  ;;  %v7126_v12 = vld [vmem:[%s12402_s7 + $0x4] ss:$24 sps:$4 sm:$0xff]  }
 0x7f1   :  { %5703 = vmatpush1.bf16.msra.mxu0 %v14198_v42  ;;  %5744 = vmatpush1.bf16.msra.mxu1 %v10276_v33 }
 0x7f2   :  { %5704 = vmatprep.subr.bf16.mxu0 %v10280_v26  ;;  %5745 = vmatprep.subr.bf16.mxu1 %v10282_v38 }
 0x7f5   :  { %5705 = vmatpush1.bf16.msra.mxu0 %v15026_v15  ;;  %5746 = vmatpush1.bf16.msra.mxu1 %v15027_v1  ;;  %v7190_v15 = vld [vmem:[%s12402_s7 + $0x210] ss:$24 sps:$4 sm:$0xff]   ;;  %v7195_v1 = vld [vmem:[%s12402_s7 + $0x21c] ss:$24 sps:$4 sm:$0xff]  }
 0x7f6   :  { %5706 = vmatprep.subr.bf16.mxu0 %v15028_v8  ;;  %5747 = vmatprep.subr.bf16.mxu1 %v15029_v25  ;;  %v7193_v8 = vld [vmem:[%s12402_s7 + $0x218] ss:$24 sps:$4 sm:$0xff]   ;;  %v7198_v25 = vld [vmem:[%s12402_s7 + $0x244] ss:$24 sps:$4 sm:$0xff]  }
 0x7f9   :  { %5707 = vmatpush1.bf16.msra.mxu0 %v15030_v0  ;;  %5748 = vmatpush1.bf16.msra.mxu1 %v15031_v14  ;;  %v7196_v0 = vld [vmem:[%s12402_s7 + $0x240] ss:$24 sps:$4 sm:$0xff]  }
 0x7fa   :  { %6412 = vmatprep.subr.bf16.mxu0 %v7126_v12  ;;  %6453 = vmatprep.subr.bf16.mxu1 %v7129_v57  ;;  %v7199_v14 = vld [vmem:[%s12402_s7 + $0x248] ss:$24 sps:$4 sm:$0xff]   ;;  %v7210_v12 = vld [vmem:[%s12402_s7 + $0x2a4] ss:$24 sps:$4 sm:$0xff]  }
 0x7fb   :  { %v7208_v57 = vld [vmem:[%s12402_s7 + $0x2a0] ss:$24 sps:$4 sm:$0xff]  }
 0x7fc   :  { %5709 = vmatmul.mubr.bf16.vlgmr.msra.gmra.mrb[120].mxu0 %v11984_v63  ;;  %5750 = vmatmul.mubr.bf16.vlgmr.msra.gmra.mrb[128].mxu1 %v11984_v63  ;;  %v7156_v63 = vld [vmem:[%s12402_s7 + $0xf4] ss:$24 sps:$4 sm:$0xff]  }
 0x7fd   :  { %6413 = vmatpush1.bf16.msra.mxu0 %v7124_v54  ;;  %6454 = vmatpush1.bf16.msra.mxu1 %v7127_v19  ;;  %v7205_v54 = vld [vmem:[%s12402_s7 + $0x278] ss:$24 sps:$4 sm:$0xff]   ;;  %v7213_v19 = vld [vmem:[%s12402_s7 + $0x2ac] ss:$24 sps:$4 sm:$0xff]  }
 0x7fe   :  { %6414 = vmatprep.subr.bf16.mxu0 %v7132_v43  ;;  %6455 = vmatprep.subr.bf16.mxu1 %v7135_v56  ;;  %v7216_v43 = vld [vmem:[%s12402_s7 + $0x2d4] ss:$24 sps:$4 sm:$0xff]   ;;  %v7214_v56 = vld [vmem:[%s12402_s7 + $0x2d0] ss:$24 sps:$4 sm:$0xff]  }
 0x801   :  { %6415 = vmatpush1.bf16.msra.mxu0 %v7130_v22  ;;  %6456 = vmatpush1.bf16.msra.mxu1 %v7133_v24  ;;  %v7211_v22 = vld [vmem:[%s12402_s7 + $0x2a8] ss:$24 sps:$4 sm:$0xff]   ;;  %v7219_v24 = vld [vmem:[%s12402_s7 + $0x2dc] ss:$24 sps:$4 sm:$0xff]  }
 0x802   :  { %6416 = vmatprep.subr.bf16.mxu0 %v7138_v20  ;;  %6457 = vmatprep.subr.bf16.mxu1 %v7141_v35  ;;  %v7217_v20 = vld [vmem:[%s12402_s7 + $0x2d8] ss:$24 sps:$4 sm:$0xff]  }
 0x805   :  { %6417 = vmatpush1.bf16.msra.mxu0 %v7136_v45  ;;  %6458 = vmatpush1.bf16.msra.mxu1 %v7139_v32  ;;  %v7222_v45 = vld [vmem:[%s12402_s7 + $0x14] ss:$24 sps:$4 sm:$0xff]  }
 0x806   :  { %6418 = vmatprep.subr.bf16.mxu0 %v7144_v9  ;;  %6459 = vmatprep.subr.bf16.mxu1 %v7147_v13 }
 0x809   :  { %6419 = vmatpush1.bf16.msra.mxu0 %v7142_v16  ;;  %6460 = vmatpush1.bf16.msra.mxu1 %v7145_v40 }
 0x80a   :  { %6420 = vmatprep.subr.bf16.mxu0 %v7150_v5  ;;  %6461 = vmatprep.subr.bf16.mxu1 %v7153_v37 }
 0x80d   :  { %6421 = vmatpush1.bf16.msra.mxu0 %v7148_v34  ;;  %6462 = vmatpush1.bf16.msra.mxu1 %v7151_v7 }
 0x80e   :  { %6422 = vmatprep.subr.bf16.mxu0 %v7156_v63  ;;  %6463 = vmatprep.subr.bf16.mxu1 %v7159_v41 }
 0x811   :  { %6423 = vmatpush1.bf16.msra.mxu0 %v7154_v52  ;;  %6464 = vmatpush1.bf16.msra.mxu1 %v7157_v55  ;;  %v15032_v55 = vld [vmem:[#allocation457_spill] sm:$0xff] }
 0x812   :  { %6424 = vmatprep.subr.bf16.mxu0 %v7162_v50  ;;  %6465 = vmatprep.subr.bf16.mxu1 %v7165_v29  ;;  %v15033_v29 = vld [vmem:[#allocation458_spill] sm:$0xff] }
 0x815   :  { %6425 = vmatpush1.bf16.msra.mxu0 %v7160_v28  ;;  %6466 = vmatpush1.bf16.msra.mxu1 %v7163_v62  ;;  %v15034_v62 = vld [vmem:[#allocation459_spill] sm:$0xff] }
 0x816   :  { %6426 = vmatprep.subr.bf16.mxu0 %v7168_v36  ;;  %6467 = vmatprep.subr.bf16.mxu1 %v7171_v48 }
 0x817   :  { %v12060_v42 = vpop.f32.mrb[112].mxu0 }
 0x818   :  { %v12062_v26 = vpop.f32.mrb[120].mxu1  ;;  %v12064_v38 = vpop.f32.mrb[113].mxu0 }
 0x819   :  { %v12066_v23 = vpop.f32.mrb[121].mxu1  ;;  %v5550_v33 = vpop.f32.mrb[114].mxu0  ;;  %6427 = vmatpush1.bf16.msra.mxu0 %v7166_v6  ;;  %6468 = vmatpush1.bf16.msra.mxu1 %v7169_v47 }
 0x81a   :  { %v5591_v2 = vpop.f32.mrb[122].mxu1  ;;  %v5551_v60 = vpop.f32.mrb[115].mxu0  ;;  %6428 = vmatprep.subr.bf16.mxu0 %v7174_v61  ;;  %6469 = vmatprep.subr.bf16.mxu1 %v7177_v27  ;;  %v7201_v33 = vld [vmem:[%s12402_s7 + $0x24c] ss:$24 sps:$4 sm:$0xff]  }
 0x81b   :  { %v5592_v3 = vpop.f32.mrb[123].mxu1  ;;  %v7204_v2 = vld [vmem:[%s12402_s7 + $0x274] ss:$24 sps:$4 sm:$0xff]   ;;  %v7202_v60 = vld [vmem:[%s12402_s7 + $0x270] ss:$24 sps:$4 sm:$0xff]  }
 0x81c   :  { %v7207_v3 = vld [vmem:[%s12402_s7 + $0x27c] ss:$24 sps:$4 sm:$0xff]  }
 0x81d   :  { %6429 = vmatpush1.bf16.msra.mxu0 %v7172_v30  ;;  %6470 = vmatpush1.bf16.msra.mxu1 %v7175_v18 }
 0x81e   :  { %6430 = vmatprep.subr.bf16.mxu0 %v7180_v46  ;;  %6471 = vmatprep.subr.bf16.mxu1 %v7183_v10  ;;  %v15035_v10 = vld [vmem:[#allocation460_spill] sm:$0xff] }
 0x821   :  { %6431 = vmatpush1.bf16.msra.mxu0 %v7178_v49  ;;  %6472 = vmatpush1.bf16.msra.mxu1 %v7181_v11 }
 0x822   :  { %6432 = vmatprep.subr.bf16.mxu0 %v7186_v39  ;;  %6473 = vmatprep.subr.bf16.mxu1 %v7189_v44  ;;  %v15036_v44 = vld [vmem:[#allocation463_spill] sm:$0xff] }
 0x825   :  { %6433 = vmatpush1.bf16.msra.mxu0 %v7184_v17  ;;  %6474 = vmatpush1.bf16.msra.mxu1 %v7187_v4 }
 0x826   :  { %6434 = vmatprep.subr.bf16.mxu0 %v7192_v59  ;;  %6475 = vmatprep.subr.bf16.mxu1 %v7195_v1  ;;  %v15037_v59 = vld [vmem:[#allocation461_spill] sm:$0xff] }
 0x829   :  { %6435 = vmatpush1.bf16.msra.mxu0 %v7190_v15  ;;  %6476 = vmatpush1.bf16.msra.mxu1 %v7193_v8 }
 0x82a   :  { %6436 = vmatprep.subr.bf16.mxu0 %v7198_v25  ;;  %6477 = vmatprep.subr.bf16.mxu1 %v7201_v33 }
 0x82d   :  { %6437 = vmatpush1.bf16.msra.mxu0 %v7196_v0  ;;  %6478 = vmatpush1.bf16.msra.mxu1 %v7199_v14 }
 0x82e   :  { %6438 = vmatprep.subr.bf16.mxu0 %v7204_v2  ;;  %6479 = vmatprep.subr.bf16.mxu1 %v7207_v3 }
 0x831   :  { %6439 = vmatpush1.bf16.msra.mxu0 %v7202_v60  ;;  %6480 = vmatpush1.bf16.msra.mxu1 %v7205_v54 }
 0x832   :  { %6440 = vmatprep.subr.bf16.mxu0 %v7210_v12  ;;  %6481 = vmatprep.subr.bf16.mxu1 %v7213_v19 }
 0x835   :  { %6441 = vmatpush1.bf16.msra.mxu0 %v7208_v57  ;;  %6482 = vmatpush1.bf16.msra.mxu1 %v7211_v22 }
 0x836   :  { %6442 = vmatprep.subr.bf16.mxu0 %v7216_v43  ;;  %6483 = vmatprep.subr.bf16.mxu1 %v7219_v24  ;;  %v15039_v43 = vld [vmem:[#allocation333_spill] sm:$0xff] }
 0x839   :  { %6443 = vmatpush1.bf16.msra.mxu0 %v7214_v56  ;;  %6484 = vmatpush1.bf16.msra.mxu1 %v7217_v20  ;;  %v15040_v20 = vld [vmem:[#allocation398_spill] sm:$0xff] }
 0x83a   :  { %6494 = vmatprep.subr.bf16.mxu0 %v7222_v45 }
 0x88f   :  { %v5628_v35 = vpop.f32.mrb[116].mxu0  ;;  %v5669_v32 = vpop.f32.mrb[124].mxu1 }
 0x890   :  { %v5629_v9 = vadd.f32 %v5628_v35, %v12016_v31  ;;  %v5670_v13 = vadd.f32 %v5669_v32, %v12018_v58  ;;  %v5630_v16 = vpop.f32.mrb[117].mxu0  ;;  %v5671_v40 = vpop.f32.mrb[125].mxu1 }
 0x891   :  { %v5631_v5 = vadd.f32 %v5630_v16, %v12020_v21  ;;  %v5672_v37 = vadd.f32 %v5671_v40, %v12022_v53  ;;  %v5632_v34 = vpop.f32.mrb[118].mxu0  ;;  %v5673_v7 = vpop.f32.mrb[126].mxu1 }
 0x892   :  { %v5633_v63 = vpop.f32.mrb[119].mxu0  ;;  %v5674_v52 = vpop.f32.mrb[127].mxu1  ;;  %v5760_v41 = vadd.f32 %v5670_v13, %v14801_v51  ;;  %v5758_v28 = vadd.f32 %v5629_v9, %v15033_v29 }
 0x893   :  { %v5761_v50 = vadd.f32 %v5672_v37, %v15032_v55  ;;  %v5759_v31 = vadd.f32 %v5631_v5, %v15034_v62  ;;  %v7223_v62 = vld [vmem:[%s12402_s7 + $0x40] ss:$24 sps:$4 sm:$0xff]  }
 0x894   :  { %v5774_v36 = vmul.f32 0.5, %v5760_v41  ;;  %v5766_v6 = vmul.f32 0.5, %v5758_v28  ;;  %v7225_v28 = vld [vmem:[%s12402_s7 + $0x44] ss:$24 sps:$4 sm:$0xff]  }
 0x895   :  { %v5775_v58 = vmul.f32 0.5, %v5761_v50  ;;  %v5767_v48 = vmul.f32 0.5, %v5759_v31  ;;  %v7220_v50 = vld [vmem:[%s12402_s7 + $0x10] ss:$24 sps:$4 sm:$0xff]   ;;  %v7228_v31 = vld [vmem:[%s12402_s7 + $0x74] ss:$24 sps:$4 sm:$0xff]  }
 0x896   :  { %7408 = vtanh.f32 %v5774_v36  ;;  %v7226_v36 = vld [vmem:[%s12402_s7 + $0x70] ss:$24 sps:$4 sm:$0xff]  }
 0x897   :  { %7410 = vtanh.f32 %v5775_v58  ;;  %v7231_v58 = vld [vmem:[%s12402_s7 + $0xa4] ss:$24 sps:$4 sm:$0xff]  }
 0x898   :  { %7412 = vtanh.f32 %v5766_v6  ;;  %v7229_v6 = vld [vmem:[%s12402_s7 + $0xa0] ss:$24 sps:$4 sm:$0xff]  }
 0x899   :  { %7414 = vtanh.f32 %v5767_v48  ;;  %v7234_v48 = vld [vmem:[%s12402_s7 + $0xd4] ss:$24 sps:$4 sm:$0xff]  }
 0x8a0   :  { %v7409_v1 = vpop.eup %7408 }
 0x8a1   :  { %v7411_v8 = vpop.eup %7410  ;;  %v5778_v0 = vmul.f32 0.5, %v7409_v1  ;;  %v7259_v1 = vld [vmem:[%s12402_s7 + $0x280] ss:$24 sps:$4 sm:$0xff]  }
 0x8a2   :  { %v7413_v25 = vpop.eup %7412  ;;  %v5779_v14 = vmul.f32 0.5, %v7411_v8  ;;  %v7267_v8 = vld [vmem:[%s12402_s7 + $0x2e4] ss:$24 sps:$4 sm:$0xff]  }
 0x8a3   :  { %v5770_v2 = vmul.f32 0.5, %v7413_v25  ;;  %v5780_v3 = vadd.f32 0.5, %v5778_v0  ;;  %v7265_v25 = vld [vmem:[%s12402_s7 + $0x2e0] ss:$24 sps:$4 sm:$0xff]   ;;  %v7429_v0 = vmov 1983009808  }
 0x8a4   :  { %v5781_v54 = vadd.f32 0.5, %v5779_v14  ;;  %v15041_v14 = vld [vmem:[#allocation359_spill] sm:$0xff] }
 0x8a5   :  { %v5772_v12 = vadd.f32 0.5, %v5770_v2  ;;  %v5792_v24 = vmul.f32 %v5780_v3, %v15039_v43  ;;  %v15042_v2 = vld [vmem:[#allocation383_spill] sm:$0xff]  ;;  %v15043_v3 = vld [vmem:[#allocation361_spill] sm:$0xff] }
 0x8a6   :  { %v5793_v45 = vmul.f32 %v5781_v54, %v15040_v20 }
 0x8cf   :  { %v5710_v21 = vpop.f32.mrb[120].mxu0  ;;  %v5751_v53 = vpop.f32.mrb[128].mxu1 }
 0x8d0   :  { %v5711_v47 = vadd.f32 %v5710_v21, %v12060_v42  ;;  %v5752_v51 = vadd.f32 %v5751_v53, %v12062_v26  ;;  %v5712_v61 = vpop.f32.mrb[121].mxu0  ;;  %v5753_v30 = vpop.f32.mrb[129].mxu1  ;;  %v15038_v42 = vld [vmem:[#allocation462_spill] sm:$0xff]  ;;  %v7232_v21 = vld [vmem:[%s12402_s7 + $0xd0] ss:$24 sps:$4 sm:$0xff]  }
 0x8d1   :  { %v5713_v27 = vadd.f32 %v5712_v61, %v12064_v38  ;;  %v5754_v18 = vadd.f32 %v5753_v30, %v12066_v23  ;;  %v5714_v46 = vpop.f32.mrb[122].mxu0  ;;  %v5755_v49 = vpop.f32.mrb[130].mxu1  ;;  %v7237_v53 = vld [vmem:[%s12402_s7 + $0x104] ss:$24 sps:$4 sm:$0xff]   ;;  %v7238_v61 = vld [vmem:[%s12402_s7 + $0x130] ss:$24 sps:$4 sm:$0xff]  }
 0x8d2   :  { %v5762_v11 = vadd.f32 %v5711_v47, %v15035_v10  ;;  %v5715_v39 = vpop.f32.mrb[123].mxu0  ;;  %v5756_v17 = vpop.f32.mrb[131].mxu1  ;;  %v5764_v4 = vadd.f32 %v5752_v51, %v15036_v44  ;;  %v7235_v47 = vld [vmem:[%s12402_s7 + $0x100] ss:$24 sps:$4 sm:$0xff]   ;;  %v7240_v51 = vld [vmem:[%s12402_s7 + $0x134] ss:$24 sps:$4 sm:$0xff]  }
 0x8d3   :  { %v5763_v15 = vadd.f32 %v5713_v27, %v15037_v59  ;;  %v5765_v26 = vadd.f32 %v5754_v18, %v15038_v42  ;;  %v7415_v38 = vpop.eup %7414  ;;  %v7243_v30 = vld [vmem:[%s12402_s7 + $0x164] ss:$24 sps:$4 sm:$0xff]   ;;  %v7241_v27 = vld [vmem:[%s12402_s7 + $0x160] ss:$24 sps:$4 sm:$0xff]   ;;  %v7246_v18 = vld [vmem:[%s12402_s7 + $0x194] ss:$24 sps:$4 sm:$0xff]  }
 0x8d4   :  { %7416 = vtanh.f32 %v5762_v11  ;;  %v5784_v23 = vmul.f32 0.5, %v5764_v4  ;;  %v5771_v60 = vmul.f32 0.5, %v7415_v38  ;;  %v7244_v46 = vld [vmem:[%s12402_s7 + $0x190] ss:$24 sps:$4 sm:$0xff]   ;;  %v7249_v49 = vld [vmem:[%s12402_s7 + $0x1c4] ss:$24 sps:$4 sm:$0xff]  }
 0x8d5   :  { %7418 = vtanh.f32 %v5763_v15  ;;  %v5785_v33 = vmul.f32 0.5, %v5765_v26  ;;  %v7247_v10 = vld [vmem:[%s12402_s7 + $0x1c0] ss:$24 sps:$4 sm:$0xff]   ;;  %v7252_v11 = vld [vmem:[%s12402_s7 + $0x1f4] ss:$24 sps:$4 sm:$0xff]  }
 0x8d6   :  { %7420 = vtanh.f32 %v5784_v23  ;;  %v5773_v57 = vadd.f32 0.5, %v5771_v60  ;;  %v7250_v39 = vld [vmem:[%s12402_s7 + $0x1f0] ss:$24 sps:$4 sm:$0xff]   ;;  %v7255_v17 = vld [vmem:[%s12402_s7 + $0x224] ss:$24 sps:$4 sm:$0xff]   ;;  %v6544_v23 = vunpack.c.l.s4 %v7429_v0 }
 0x8d7   :  { %7422 = vtanh.f32 %v5785_v33  ;;  %v7253_v44 = vld [vmem:[%s12402_s7 + $0x220] ss:$24 sps:$4 sm:$0xff]   ;;  %v7258_v4 = vld [vmem:[%s12402_s7 + $0x254] ss:$24 sps:$4 sm:$0xff]   ;;  %v7256_v59 = vld [vmem:[%s12402_s7 + $0x250] ss:$24 sps:$4 sm:$0xff]  }
 0x8d8   :  { %v7261_v15 = vld [vmem:[%s12402_s7 + $0x284] ss:$24 sps:$4 sm:$0xff]   ;;  %v7264_v42 = vld [vmem:[%s12402_s7 + $0x2b4] ss:$24 sps:$4 sm:$0xff]   ;;  %v7262_v26 = vld [vmem:[%s12402_s7 + $0x2b0] ss:$24 sps:$4 sm:$0xff]  }
 0x8d9   :  { %v5900_v38 = vld [vmem:[%s12403_s8] sm:$0x3f] }
 0x8da   :  { %v5905_v33 = vrot.slane %v5900_v38, %v15041_v14  ;;  %v5913_v60 = vrot.slane %v5900_v38, %v15042_v2  ;;  %v5909_v54 = vrot.slane %v5900_v38, %v15043_v3 }
 0x8de   :  { %v7417_v19 = vpop.eup %7416 }
 0x8df   :  { %v7419_v22 = vpop.eup %7418  ;;  %v5794_v56 = vmul.f32 %v7417_v19, %v5772_v12  ;;  %v6545_v12 = vunpack.c.0.s8 %v6544_v23  ;;  %v15044_v19 = vld [vmem:[#allocation385_spill] sm:$0xff] }
 0x8e0   :  { %v5795_v35 = vmul.f32 %v7419_v22, %v5773_v57  ;;  %v7421_v13 = vpop.eup %7420  ;;  %v5917_v57 = vrot.slane %v5900_v38, %v15044_v19 }
 0x8e1   :  { %v5796_v32 = vadd.f32 %v5794_v56, %v5792_v24  ;;  %v7423_v16 = vpop.eup %7422  ;;  %v5788_v40 = vmul.f32 0.5, %v7421_v13 }
 0x8e2   :  { %v5797_v9 = vadd.f32 %v5795_v35, %v5793_v45  ;;  %v5789_v5 = vmul.f32 0.5, %v7423_v16 }
 0x8e3   :  { %7424 = vtanh.f32 %v5796_v32  ;;  %v5790_v37 = vadd.f32 0.5, %v5788_v40  ;;  %v15045_v32 = vld [vmem:[#allocation356_spill] sm:$0xff] }
 0x8e4   :  { %7426 = vtanh.f32 %v5797_v9  ;;  %v5791_v7 = vadd.f32 0.5, %v5789_v5  ;;  %v6548_v9 = vsub.s32 %v6545_v12, %v15045_v32 }
 0x8ed   :  { %v7425_v34 = vpop.eup %7424 }
 0x8ee   :  { %v7427_v63 = vpop.eup %7426  ;;  %v5800_v52 = vmul.f32 %v7425_v34, %v5790_v37 }
 0x8ef   :  { %v5801_v41 = vmul.f32 %v7427_v63, %v5791_v7 }
 0x8f0   :  { %v12284_v29 = vpack.c.bf16 %v5800_v52, %v5800_v52 }
 0x8f1   :  { %v5803_v55 = vpack.c.bf16 %v5801_v41, %v5801_v41 }
 0x8f3   :  { %6444 = vmatprep.mubr.bf16.mxu0 %v5803_v55  ;;  %6485 = vmatprep.mubr.bf16.mxu1 %v5803_v55 }
 0x8f4   :  { %6445 = vmatmul.mubr.bf16.vlgmr.msra.gmra.mrb[124].mxu0 %v12284_v29  ;;  %6486 = vmatmul.mubr.bf16.vlgmr.msra.gmra.mrb[132].mxu1 %v12284_v29 }
 0x8f5   :  { %6495 = vmatpush1.bf16.msra.mxu0 %v7220_v50  ;;  %6526 = vmatprep.mubr.bf16.mxu0 %v5803_v55  ;;  %v15046_v55 = vld [vmem:[#allocation362_spill] sm:$0xff] }
 0x8f6   :  { %6496 = vmatprep.subr.bf16.mxu0 %v7225_v28  ;;  %v5921_v50 = vrot.slane %v5900_v38, %v15046_v55 }
 0x8f9   :  { %6497 = vmatpush1.bf16.msra.mxu0 %v7223_v62 }
 0x8fa   :  { %6498 = vmatprep.subr.bf16.mxu0 %v7228_v31 }
 0x8fd   :  { %6499 = vmatpush1.bf16.msra.mxu0 %v7226_v36 }
 0x8fe   :  { %6500 = vmatprep.subr.bf16.mxu0 %v7231_v58 }
 0x901   :  { %6501 = vmatpush1.bf16.msra.mxu0 %v7229_v6 }
 0x902   :  { %6502 = vmatprep.subr.bf16.mxu0 %v7234_v48 }
 0x905   :  { %6503 = vmatpush1.bf16.msra.mxu0 %v7232_v21 }
 0x906   :  { %6504 = vmatprep.subr.bf16.mxu0 %v7237_v53 }
 0x909   :  { %6505 = vmatpush1.bf16.msra.mxu0 %v7235_v47 }
 0x90a   :  { %6506 = vmatprep.subr.bf16.mxu0 %v7240_v51 }
 0x90d   :  { %6507 = vmatpush1.bf16.msra.mxu0 %v7238_v61 }
 0x90e   :  { %6508 = vmatprep.subr.bf16.mxu0 %v7243_v30 }
 0x911   :  { %6509 = vmatpush1.bf16.msra.mxu0 %v7241_v27 }
 0x912   :  { %6510 = vmatprep.subr.bf16.mxu0 %v7246_v18 }
 0x915   :  { %6511 = vmatpush1.bf16.msra.mxu0 %v7244_v46 }
 0x916   :  { %6512 = vmatprep.subr.bf16.mxu0 %v7249_v49 }
 0x919   :  { %6513 = vmatpush1.bf16.msra.mxu0 %v7247_v10 }
 0x91a   :  { %6514 = vmatprep.subr.bf16.mxu0 %v7252_v11 }
 0x91d   :  { %6515 = vmatpush1.bf16.msra.mxu0 %v7250_v39 }
 0x91e   :  { %6516 = vmatprep.subr.bf16.mxu0 %v7255_v17 }
 0x921   :  { %6517 = vmatpush1.bf16.msra.mxu0 %v7253_v44 }
 0x922   :  { %6518 = vmatprep.subr.bf16.mxu0 %v7258_v4 }
 0x925   :  { %6519 = vmatpush1.bf16.msra.mxu0 %v7256_v59 }
 0x926   :  { %6520 = vmatprep.subr.bf16.mxu0 %v7261_v15 }
 0x929   :  { %6521 = vmatpush1.bf16.msra.mxu0 %v7259_v1 }
 0x92a   :  { %6522 = vmatprep.subr.bf16.mxu0 %v7264_v42 }
 0x92d   :  { %6523 = vmatpush1.bf16.msra.mxu0 %v7262_v26 }
 0x92e   :  { %6524 = vmatprep.subr.bf16.mxu0 %v7267_v8 }
 0x931   :  { %6525 = vmatpush1.bf16.msra.mxu0 %v7265_v25 }
 0x934   :  { %6527 = vmatmul.mubr.bf16.vlgmr.msra.gmra.mrb[128].mxu0 %v12284_v29  ;;  %v15047_v29 = vld [vmem:[#allocation363_spill] sm:$0xff] }
 0x935   :  { %v5925_v28 = vrot.slane %v5900_v38, %v15047_v29 }
 0x9c7   :  { %v6446_v22 = vpop.f32.mrb[124].mxu0  ;;  %v6487_v43 = vpop.f32.mrb[132].mxu1 }
 0x9c8   :  { %v6447_v24 = vadd.f32 %v6446_v22, %v5905_v33  ;;  %v6488_v56 = vadd.f32 %v6487_v43, %v5913_v60  ;;  %v6448_v20 = vpop.f32.mrb[125].mxu0  ;;  %v6489_v45 = vpop.f32.mrb[133].mxu1 }
 0x9c9   :  { %v6449_v35 = vadd.f32 %v6448_v20, %v5909_v54  ;;  %v6490_v13 = vadd.f32 %v6489_v45, %v5917_v57  ;;  %v6450_v16 = vpop.f32.mrb[126].mxu0  ;;  %v6491_v40 = vpop.f32.mrb[134].mxu1 }
 0x9ca   :  { %v6451_v5 = vpop.f32.mrb[127].mxu0  ;;  %v6492_v37 = vpop.f32.mrb[135].mxu1 }
 0x9cb   :  { %v6541_v34 = vcombine.low %v6447_v24, %v6449_v35  ;;  %v6542_v7 = vcombine.low %v6488_v56, %v6490_v13 }
 0x9cd   :  { %v6549_v63 = vrot.slane %v6541_v34, %v6548_v9  ;;  %v6556_v52 = vrot.slane %v6542_v7, %v6548_v9 }
 0x9cf   :  { %v6557_v41 = vcombine.low %v6549_v63, %v6556_v52 }
 0x9d1   :  { %6568 = vst [vmem:[%s12404_s9] sm:$0xff] %v6557_v41 }
 0xa07   :  { %v6528_v62 = vpop.f32.mrb[128].mxu0 }
 0xa08   :  { %v6529_v31 = vadd.f32 %v6528_v62, %v5921_v50  ;;  %v6530_v36 = vpop.f32.mrb[129].mxu0 }
 0xa09   :  { %v6531_v58 = vadd.f32 %v6530_v36, %v5925_v28  ;;  %v6532_v6 = vpop.f32.mrb[130].mxu0 }
 0xa0a   :  { %v6533_v48 = vpop.f32.mrb[131].mxu0 }
 0xa0b   :  { %v6558_v21 = vcombine.low %v6529_v31, %v6531_v58 }
 0xa0d   :  { %7121 = vst.sshfl [vmem:[%s12404_s9 + $0x8] sm:$0x33 pattern:$0x76325410] %v6558_v21 }

</bundles_post_ra>
